<compile_context>
chip_gen: v5e
topology: v5e:2x2
jax: 0.10.0
libtpu: 0.0.40
codegen_flags: <defaults>
</compile_context>

<pallas_src>
import functools

import jax
import jax.numpy as jnp
from jax.experimental import pallas as pl
from jax.experimental.pallas import tpu as pltpu

F32 = jnp.float32
_ROW_TILE = 512                      # row tile cap for the dense GEMM kernels
_VMEM_LIMIT = 48 * 1024 * 1024       # safe on v5e/v6e (128MiB) and v7x (64MiB)
# TODO(synk): re-derive row/col tiles per generation (v7x has half the VMEM).


def _round_up(x, m):
    return ((x + m - 1) // m) * m


def _pick_col_tile(np_):
    for t in (512, 256, 128):
        if np_ >= t and np_ % t == 0:
            return t
    return np_


def _gelu(x):
    # TODO(synk): PyTorch F.gelu default is the exact erf form; the tanh
    # approximation is used here (numerically ~1e-3 close).
    c = 0.7978845608028654
    return 0.5 * x * (1.0 + jnp.tanh(c * (x + 0.044715 * x * x * x)))


# --------------------------- dense GEMM kernels -------------------------------

def _matmul_kernel(x_ref, w_ref, b_ref, o_ref):
    o_ref[...] = (jnp.dot(x_ref[...], w_ref[...],
                          preferred_element_type=jnp.float32) + b_ref[...])


def _ln_gelu_matmul_kernel(x_ref, g_ref, b_ref, w_ref, bias_ref, o_ref):
    # LayerNorm over the last dim + GELU fused as the matmul prologue.
    x = x_ref[...]
    mu = jnp.mean(x, axis=-1, keepdims=True)
    var = jnp.mean((x - mu) * (x - mu), axis=-1, keepdims=True)
    xn = (x - mu) * jax.lax.rsqrt(var + 1e-5)
    y = _gelu(xn * g_ref[...] + b_ref[...])
    o_ref[...] = (jnp.dot(y, w_ref[...],
                          preferred_element_type=jnp.float32) + bias_ref[...])


def _classifier_kernel(x_ref, w1_ref, b1_ref, w2_ref, b2_ref, o_ref):
    # Linear -> GELU -> Linear, intermediate stays in VMEM/registers.
    h = _gelu(jnp.dot(x_ref[...], w1_ref[...],
                      preferred_element_type=jnp.float32) + b1_ref[...])
    o_ref[...] = (jnp.dot(h, w2_ref[...],
                          preferred_element_type=jnp.float32) + b2_ref[...])


def _gemm_dims(R, Dout):
    Np = _round_up(Dout, 128)                 # lane-dense output
    TM = min(_ROW_TILE, _round_up(R, 8))
    gm = pl.cdiv(R, TM)
    Rp = gm * TM
    TN = _pick_col_tile(Np)
    gn = Np // TN
    return Np, TM, gm, Rp, TN, gn


def pallas_linear(x2d, w, b):
    """x2d: (R, K), w: (K, Dout), b: (Dout,) -> (R, Dout)."""
    R, K = x2d.shape
    Dout = w.shape[1]
    Np, TM, gm, Rp, TN, gn = _gemm_dims(R, Dout)
    if Np != Dout:
        w = jnp.pad(w, ((0, 0), (0, Np - Dout)))
        b = jnp.pad(b, (0, Np - Dout))
    if Rp != R:
        x2d = jnp.pad(x2d, ((0, Rp - R), (0, 0)))
    out = pl.pallas_call(
        _matmul_kernel,
        out_shape=jax.ShapeDtypeStruct((Rp, Np), F32),
        grid_spec=pltpu.PrefetchScalarGridSpec(
            num_scalar_prefetch=0,
            grid=(gm, gn),
            in_specs=[
                pl.BlockSpec((TM, K), lambda i, j: (i, 0)),
                pl.BlockSpec((K, TN), lambda i, j: (0, j)),
                pl.BlockSpec((1, TN), lambda i, j: (0, j)),
            ],
            out_specs=pl.BlockSpec((TM, TN), lambda i, j: (i, j)),
        ),
        compiler_params=pltpu.CompilerParams(
            dimension_semantics=("parallel", "parallel"),
            vmem_limit_bytes=_VMEM_LIMIT),
    )(x2d, w, b.reshape(1, Np))
    return out[:R, :Dout]


def pallas_ln_gelu_linear(x2d, gamma, beta, w, b):
    """gelu(LayerNorm(x)) @ w + b, LN fused into the matmul prologue."""
    R, K = x2d.shape
    Dout = w.shape[1]
    Np, TM, gm, Rp, TN, gn = _gemm_dims(R, Dout)
    if Np != Dout:
        w = jnp.pad(w, ((0, 0), (0, Np - Dout)))
        b = jnp.pad(b, (0, Np - Dout))
    if Rp != R:
        x2d = jnp.pad(x2d, ((0, Rp - R), (0, 0)))
    out = pl.pallas_call(
        _ln_gelu_matmul_kernel,
        out_shape=jax.ShapeDtypeStruct((Rp, Np), F32),
        grid_spec=pltpu.PrefetchScalarGridSpec(
            num_scalar_prefetch=0,
            grid=(gm, gn),
            in_specs=[
                pl.BlockSpec((TM, K), lambda i, j: (i, 0)),
                pl.BlockSpec((1, K), lambda i, j: (0, 0)),
                pl.BlockSpec((1, K), lambda i, j: (0, 0)),
                pl.BlockSpec((K, TN), lambda i, j: (0, j)),
                pl.BlockSpec((1, TN), lambda i, j: (0, j)),
            ],
            out_specs=pl.BlockSpec((TM, TN), lambda i, j: (i, j)),
        ),
        compiler_params=pltpu.CompilerParams(
            dimension_semantics=("parallel", "parallel"),
            vmem_limit_bytes=_VMEM_LIMIT),
    )(x2d, gamma.reshape(1, K), beta.reshape(1, K), w, b.reshape(1, Np))
    return out[:R, :Dout]


def pallas_classifier(x2d, w1, b1, w2, b2):
    """(x @ w1 + b1) -> gelu -> @ w2 + b2, fused."""
    R, K1 = x2d.shape
    Hd = w1.shape[1]
    C = w2.shape[1]
    Cp = _round_up(C, 128)
    if Cp != C:
        w2 = jnp.pad(w2, ((0, 0), (0, Cp - C)))
        b2 = jnp.pad(b2, (0, Cp - C))
    TM = min(_ROW_TILE, _round_up(R, 8))
    gm = pl.cdiv(R, TM)
    Rp = gm * TM
    if Rp != R:
        x2d = jnp.pad(x2d, ((0, Rp - R), (0, 0)))
    out = pl.pallas_call(
        _classifier_kernel,
        out_shape=jax.ShapeDtypeStruct((Rp, Cp), F32),
        grid_spec=pltpu.PrefetchScalarGridSpec(
            num_scalar_prefetch=0,
            grid=(gm,),
            in_specs=[
                pl.BlockSpec((TM, K1), lambda i: (i, 0)),
                pl.BlockSpec((K1, Hd), lambda i: (0, 0)),
                pl.BlockSpec((1, Hd), lambda i: (0, 0)),
                pl.BlockSpec((Hd, Cp), lambda i: (0, 0)),
                pl.BlockSpec((1, Cp), lambda i: (0, 0)),
            ],
            out_specs=pl.BlockSpec((TM, Cp), lambda i: (i, 0)),
        ),
        compiler_params=pltpu.CompilerParams(
            dimension_semantics=("parallel",),
            vmem_limit_bytes=_VMEM_LIMIT),
    )(x2d, w1, b1.reshape(1, Hd), w2, b2.reshape(1, Cp))
    return out[:R, :C]


# --------------------------- fused residual CNN block -------------------------

def _ln_gelu_axis0(v, g, bt):
    """LayerNorm over axis 0 (the feature axis) then GELU.  v: (F, T, C)."""
    F = v.shape[0]
    inv = 1.0 / F
    s = v[0]
    for f in range(1, F):
        s = s + v[f]
    mu = s * inv                                          # (T, C)
    d0 = v[0] - mu
    s2 = d0 * d0
    for f in range(1, F):
        df = v[f] - mu
        s2 = s2 + df * df
    var = s2 * inv                                        # (T, C)
    xn = (v - mu) * jax.lax.rsqrt(var + 1e-5)             # (F, T, C)
    return _gelu(xn * g + bt)                             # g, bt: (F, 1, 1)


def _residual_block_kernel(x_ref, g1_ref, bt1_ref, w1_ref, b1_ref,
                           g2_ref, bt2_ref, w2_ref, b2_ref,
                           o_ref, pad_scr, y1_scr):
    # x_ref / o_ref: (F, T, C) channels-last plane for one batch element.
    F, T, C = x_ref.shape

    def conv3x3(w, b, write_row):
        # Implicit GEMM: zero-padded plane sits in pad_scr; per output feature
        # row accumulate nine shifted (T, C) @ (C, O) MXU dots.
        O = w.shape[-1]

        def body(f, carry):
            acc = jnp.zeros((T, O), jnp.float32) + b
            for i in range(3):
                row = pad_scr[f + i]                      # (T + 2, C)
                for j in range(3):
                    acc = acc + jnp.dot(row[j:j + T, :], w[i, j],
                                        preferred_element_type=jnp.float32)
            write_row(f, acc)
            return carry

        jax.lax.fori_loop(0, F, body, 0)

    x = x_ref[...]

    # ---- LayerNorm(F) + GELU + conv1 ----
    pad_scr[...] = jnp.zeros_like(pad_scr)
    pad_scr[1:F + 1, 1:T + 1, :] = _ln_gelu_axis0(x, g1_ref[...], bt1_ref[...])

    def write_y1(f, acc):
        y1_scr[f] = acc

    conv3x3(w1_ref[...], b1_ref[...], write_y1)

    # ---- LayerNorm(F) + GELU + conv2 + residual add ----
    pad_scr[...] = jnp.zeros_like(pad_scr)
    pad_scr[1:F + 1, 1:T + 1, :] = _ln_gelu_axis0(y1_scr[...], g2_ref[...],
                                                  bt2_ref[...])

    def write_out(f, acc):
        o_ref[f] = acc + x_ref[f]

    conv3x3(w2_ref[...], b2_ref[...], write_out)


def residual_block(y, p):
    """y: (N, F, T, C) channels-last activations."""
    N, Fd, Td, C = y.shape
    g1 = p['ln1_g'].reshape(Fd, 1, 1)
    bt1 = p['ln1_b'].reshape(Fd, 1, 1)
    g2 = p['ln2_g'].reshape(Fd, 1, 1)
    bt2 = p['ln2_b'].reshape(Fd, 1, 1)
    w1 = jnp.transpose(p['w1'], (2, 3, 1, 0))             # (3, 3, C, O)
    w2 = jnp.transpose(p['w2'], (2, 3, 1, 0))
    b1 = p['b1'].reshape(1, -1)
    b2 = p['b2'].reshape(1, -1)
    return pl.pallas_call(
        _residual_block_kernel,
        out_shape=jax.ShapeDtypeStruct((N, Fd, Td, C), F32),
        grid_spec=pltpu.PrefetchScalarGridSpec(
            num_scalar_prefetch=0,
            grid=(N,),
            in_specs=[
                pl.BlockSpec((None, Fd, Td, C), lambda n: (n, 0, 0, 0)),
                pl.BlockSpec((Fd, 1, 1), lambda n: (0, 0, 0)),
                pl.BlockSpec((Fd, 1, 1), lambda n: (0, 0, 0)),
                pl.BlockSpec((3, 3, C, C), lambda n: (0, 0, 0, 0)),
                pl.BlockSpec((1, C), lambda n: (0, 0)),
                pl.BlockSpec((Fd, 1, 1), lambda n: (0, 0, 0)),
                pl.BlockSpec((Fd, 1, 1), lambda n: (0, 0, 0)),
                pl.BlockSpec((3, 3, C, C), lambda n: (0, 0, 0, 0)),
                pl.BlockSpec((1, C), lambda n: (0, 0)),
            ],
            out_specs=pl.BlockSpec((None, Fd, Td, C), lambda n: (n, 0, 0, 0)),
            scratch_shapes=[pltpu.VMEM((Fd + 2, Td + 2, C), F32),
                            pltpu.VMEM((Fd, Td, C), F32)],
        ),
        compiler_params=pltpu.CompilerParams(
            dimension_semantics=("parallel",),
            vmem_limit_bytes=_VMEM_LIMIT),
    )(y, g1, bt1, w1, b1, g2, bt2, w2, b2)


# --------------------------- bidirectional GRU --------------------------------

def _bigru_kernel(xp_ref, whh_ref, bhh_ref, o_ref, h_scr, *, seq_len):
    # xp_ref: (TC, Bp, 3, H) gate pre-activations for this direction/chunk.
    # whh_ref: (3, H, H), bhh_ref: (3, 1, H), o_ref: (TC, Bp, H).
    # Grid = (direction, time-chunk); hidden state carried in h_scr.
    TC = xp_ref.shape[0]
    d = pl.program_id(0)
    c = pl.program_id(1)
    nc = pl.num_programs(1)

    @pl.when(c == 0)
    def _():
        h_scr[...] = jnp.zeros_like(h_scr)

    w_r = whh_ref[0]
    w_z = whh_ref[1]
    w_n = whh_ref[2]
    b_r = bhh_ref[0]
    b_z = bhh_ref[1]
    b_n = bhh_ref[2]
    data_chunk = d * (nc - 1 - 2 * c) + c        # c (fwd) or nc-1-c (bwd)

    def step(t, carry):
        tt = t + d * (TC - 1 - 2 * t)            # t (fwd) or TC-1-t (bwd)
        g = data_chunk * TC + tt                 # global (padded) time index
        xpt = xp_ref[tt]                         # (Bp, 3, H)
        h = h_scr[...]
        hr = jnp.dot(h, w_r, preferred_element_type=jnp.float32) + b_r
        hz = jnp.dot(h, w_z, preferred_element_type=jnp.float32) + b_z
        hn = jnp.dot(h, w_n, preferred_element_type=jnp.float32) + b_n
        r = jax.nn.sigmoid(xpt[:, 0, :] + hr)
        z = jax.nn.sigmoid(xpt[:, 1, :] + hz)
        n = jnp.tanh(xpt[:, 2, :] + r * hn)
        h_new = (1.0 - z) * n + z * h
        h_new = jnp.where(g < seq_len, h_new, h)  # padded steps keep state
        h_scr[...] = h_new
        o_ref[tt] = h_new
        return carry

    jax.lax.fori_loop(0, TC, step, 0)


def pallas_bigru(xp, whh, bhh, *, seq_len, chunk):
    """xp: (Sp, Bp, 2, 3, H), whh: (2, 3, H, H), bhh: (2, 3, 1, H)."""
    Sp, Bp, _, _, H = xp.shape
    nc = Sp // chunk

    def _chunk_idx(d, c):
        return d * (nc - 1 - 2 * c) + c

    return pl.pallas_call(
        functools.partial(_bigru_kernel, seq_len=seq_len),
        out_shape=jax.ShapeDtypeStruct((2, Sp, Bp, H), F32),
        grid_spec=pltpu.PrefetchScalarGridSpec(
            num_scalar_prefetch=0,
            grid=(2, nc),
            in_specs=[
                pl.BlockSpec((chunk, Bp, None, 3, H),
                             lambda d, c: (_chunk_idx(d, c), 0, d, 0, 0)),
                pl.BlockSpec((None, 3, H, H), lambda d, c: (d, 0, 0, 0)),
                pl.BlockSpec((None, 3, 1, H), lambda d, c: (d, 0, 0, 0)),
            ],
            out_specs=pl.BlockSpec((None, chunk, Bp, H),
                                   lambda d, c: (d, _chunk_idx(d, c), 0, 0)),
            scratch_shapes=[pltpu.VMEM((Bp, H), F32)],
        ),
        compiler_params=pltpu.CompilerParams(
            dimension_semantics=("parallel", "arbitrary"),
            vmem_limit_bytes=_VMEM_LIMIT),
    )(xp, whh, bhh)


def bigru_layer(x, p, batch_first):
    # Reproduces the module's batch_first=(i==0) semantics: when batch_first is
    # False the physical leading axis is treated as the sequence axis.
    d0, d1, D = x.shape
    H = p['whh_f'].shape[1]
    xs = jnp.transpose(x, (1, 0, 2)) if batch_first else x   # (S, B, D)
    S, B, _ = xs.shape
    Bp = _round_up(B, 8)
    TC = min(S, 128)
    nc = pl.cdiv(S, TC)
    Sp = nc * TC
    if (Sp, Bp) != (S, B):
        xs = jnp.pad(xs, ((0, Sp - S), (0, Bp - B), (0, 0)))

    # one wide LN+GELU+matmul covering both directions' gate pre-activations
    w_cat = jnp.concatenate([p['wih_f'].T, p['wih_b'].T], axis=1)   # (D, 6H)
    b_cat = jnp.concatenate([p['bih_f'], p['bih_b']], axis=0)       # (6H,)
    xp = pallas_ln_gelu_linear(xs.reshape(Sp * Bp, D),
                               p['ln_g'], p['ln_b'], w_cat, b_cat)
    xp = xp.reshape(Sp, Bp, 2, 3, H)

    def per_gate(w):                              # (3H, H) -> (3, H, H)
        return jnp.stack([w[g * H:(g + 1) * H, :].T for g in range(3)], axis=0)

    whh = jnp.stack([per_gate(p['whh_f']), per_gate(p['whh_b'])], axis=0)
    bhh = jnp.stack([p['bhh_f'].reshape(3, 1, H),
                     p['bhh_b'].reshape(3, 1, H)], axis=0)

    out = pallas_bigru(xp, whh, bhh, seq_len=S, chunk=TC)    # (2, Sp, Bp, H)
    y = jnp.concatenate([out[0, :S, :B, :], out[1, :S, :B, :]], axis=-1)
    return jnp.transpose(y, (1, 0, 2)) if batch_first else y


# --------------------------- stem conv ----------------------------------------

def _im2col_stem(x):
    # TODO(synk): stem conv (C=1, stride 2) still uses a tiny single-channel
    # im2col in XLA glue; fold into an implicit-GEMM kernel like the residual
    # convs if it ever shows up on profiles.
    N, _, H, W = x.shape
    xp = jnp.pad(x, ((0, 0), (0, 0), (1, 1), (1, 1)))
    Ho = (H - 1) // 2 + 1
    Wo = (W - 1) // 2 + 1
    cols = [xp[:, 0, i:i + 2 * Ho:2, j:j + 2 * Wo:2]
            for i in range(3) for j in range(3)]
    col = jnp.stack(cols, axis=-1)                # (N, Ho, Wo, 9)
    return col.reshape(N * Ho * Wo, 9), Ho, Wo


# --------------------------- full model ----------------------------------------

def tamil_asr_forward(x, params):
    # x: (N, 1, n_feats, time) -- NCHW like PyTorch.
    N = x.shape[0]

    # stem Conv2d(1, 32, 3, stride=2, pad=1) as im2col + tiled GEMM
    col, Ho, Wo = _im2col_stem(x)
    w0 = params['cnn_w'].reshape(32, 9).T                       # (9, 32)
    y = pallas_linear(col, w0, params['cnn_b'])                 # (N*Ho*Wo, 32)
    y = y.reshape(N, Ho, Wo, 32)                                # (N, F', T', C)

    # residual CNN stack (one fused kernel per block)
    for rp in params['rescnn']:
        y = residual_block(y, rp)

    # x.view(N, C*F', T').transpose(1, 2)  ==  (N, T', C*F') with c-major order
    Fd, Td, C = y.shape[1], y.shape[2], y.shape[3]
    z = jnp.transpose(y, (0, 2, 3, 1)).reshape(N, Td, C * Fd)

    # fully_connected (no activation)
    rnn_dim = params['fc_w'].shape[0]
    z = pallas_linear(z.reshape(N * Td, C * Fd),
                      params['fc_w'].T, params['fc_b']).reshape(N, Td, rnn_dim)

    # BiGRU stack
    for i, gp in enumerate(params['bigru']):
        z = bigru_layer(z, gp, batch_first=(i == 0))

    # classifier: Linear -> GELU -> Linear fused
    d0, d1, D = z.shape
    out = pallas_classifier(z.reshape(d0 * d1, D),
                            params['cls_w1'].T, params['cls_b1'],
                            params['cls_w2'].T, params['cls_b2'])
    return out.reshape(d0, d1, -1)


# --------------------------- deterministic params -----------------------------

def init_params(key, n_cnn_layers, n_rnn_layers, rnn_dim, n_class, n_feats):
    nf = n_feats // 2
    keys = iter(jax.random.split(key, 512))

    def nrm(shape, scale=0.1):
        return (scale * jax.random.normal(next(keys), shape)).astype(F32)

    p = {}
    p['cnn_w'] = nrm((32, 1, 3, 3))
    p['cnn_b'] = nrm((32,))
    p['rescnn'] = []
    for _ in range(n_cnn_layers):
        p['rescnn'].append(dict(
            ln1_g=jnp.ones((nf,), F32), ln1_b=jnp.zeros((nf,), F32),
            w1=nrm((32, 32, 3, 3)), b1=nrm((32,)),
            ln2_g=jnp.ones((nf,), F32), ln2_b=jnp.zeros((nf,), F32),
            w2=nrm((32, 32, 3, 3)), b2=nrm((32,)),
        ))
    p['fc_w'] = nrm((rnn_dim, nf * 32))
    p['fc_b'] = nrm((rnn_dim,))
    p['bigru'] = []
    H = rnn_dim
    for i in range(n_rnn_layers):
        din = rnn_dim if i == 0 else rnn_dim * 2
        p['bigru'].append(dict(
            ln_g=jnp.ones((din,), F32), ln_b=jnp.zeros((din,), F32),
            wih_f=nrm((3 * H, din)), whh_f=nrm((3 * H, H)),
            bih_f=nrm((3 * H,)), bhh_f=nrm((3 * H,)),
            wih_b=nrm((3 * H, din)), whh_b=nrm((3 * H, H)),
            bih_b=nrm((3 * H,)), bhh_b=nrm((3 * H,)),
        ))
    p['cls_w1'] = nrm((rnn_dim, rnn_dim * 2))
    p['cls_b1'] = nrm((rnn_dim,))
    p['cls_w2'] = nrm((n_class, rnn_dim))
    p['cls_b2'] = nrm((n_class,))
    return p


if __name__ == "__main__":
    key = jax.random.PRNGKey(0)
    kx, kp = jax.random.split(key)

    # Small shapes consistent with the module.
    B, n_feats, time = 2, 16, 16
    n_cnn_layers, n_rnn_layers, rnn_dim, n_class = 1, 2, 32, 10

    x = jax.random.normal(kx, (B, 1, n_feats, time), dtype=F32)
    params = init_params(kp, n_cnn_layers, n_rnn_layers, rnn_dim, n_class,
                         n_feats)

    out = jax.jit(lambda xx: tamil_asr_forward(xx, params))(x)
    out = jax.block_until_ready(out)

    assert out.shape == (B, time // 2, n_class), out.shape
    assert bool(jnp.all(jnp.isfinite(out)))
    print("KERNEL_OK")
</pallas_src>

<mosaic_0001>
module attributes {stable_mosaic.version = 11 : i64} {
  func.func @_matmul_kernel(%arg0: i32, %arg1: i32, %arg2: memref<128x9xf32, #tpu.memory_space<vmem>>, %arg3: memref<9x128xf32, #tpu.memory_space<vmem>>, %arg4: memref<1x128xf32, #tpu.memory_space<vmem>>, %arg5: memref<128x128xf32, #tpu.memory_space<vmem>>) attributes {dimension_semantics = [#tpu.dimension_semantics<parallel>, #tpu.dimension_semantics<parallel>], iteration_bounds = array<i64: 1, 1>, scalar_prefetch = 0 : i64, scratch_operands = 0 : i64, tpu.core_type = #tpu.core_type<tc>, window_params = [{transform_indices = @transform_0, window_bounds = array<i64: 128, 9>}, {transform_indices = @transform_1, window_bounds = array<i64: 9, 128>}, {transform_indices = @transform_2, window_bounds = array<i64: 1, 128>}, {transform_indices = @transform_3, window_bounds = array<i64: 128, 128>}]} {
    %c0 = arith.constant 0 : index
    %c0_0 = arith.constant 0 : index
    %0 = vector.load %arg2[%c0, %c0_0] : memref<128x9xf32, #tpu.memory_space<vmem>>, vector<128x9xf32>
    %c0_1 = arith.constant 0 : index
    %c0_2 = arith.constant 0 : index
    %1 = vector.load %arg3[%c0_1, %c0_2] : memref<9x128xf32, #tpu.memory_space<vmem>>, vector<9x128xf32>
    %cst = arith.constant dense<0.000000e+00> : vector<128x128xf32>
    %2 = tpu.matmul %0, %1, %cst {dimension_numbers = #tpu.dot_dimension_numbers<[1], [0], [0], [1], [0, 0, 1, 1], [], []>} : vector<128x9xf32>, vector<9x128xf32>, vector<128x128xf32> -> vector<128x128xf32>
    %c0_3 = arith.constant 0 : index
    %c0_4 = arith.constant 0 : index
    %3 = vector.load %arg4[%c0_3, %c0_4] : memref<1x128xf32, #tpu.memory_space<vmem>>, vector<1x128xf32>
    %4 = vector.broadcast %3 : vector<1x128xf32> to vector<128x128xf32>
    %5 = arith.addf %2, %4 : vector<128x128xf32>
    %c0_5 = arith.constant 0 : index
    %c0_6 = arith.constant 0 : index
    %6 = vector.load %arg5[%c0_5, %c0_6] : memref<128x128xf32, #tpu.memory_space<vmem>>, vector<128x128xf32>
    tpu.vector_store %arg5[%c0_5, %c0_6], %5 {strides = array<i32>} : memref<128x128xf32, #tpu.memory_space<vmem>>, vector<128x128xf32>,
    return
  }
  func.func @transform_0(%arg0: i32, %arg1: i32) -> (i32, i32) {
    %c0_i32 = arith.constant 0 : i32
    %c0_i32_0 = arith.constant 0 : i32
    return %arg0, %c0_i32 : i32, i32
  }
  func.func @transform_1(%arg0: i32, %arg1: i32) -> (i32, i32) {
    %c0_i32 = arith.constant 0 : i32
    %c0_i32_0 = arith.constant 0 : i32
    return %c0_i32, %arg1 : i32, i32
  }
  func.func @transform_2(%arg0: i32, %arg1: i32) -> (i32, i32) {
    %c0_i32 = arith.constant 0 : i32
    %c0_i32_0 = arith.constant 0 : i32
    return %c0_i32, %arg1 : i32, i32
  }
  func.func @transform_3(%arg0: i32, %arg1: i32) -> (i32, i32) {
    %c0_i32 = arith.constant 0 : i32
    return %arg0, %arg1 : i32, i32
  }
}

module attributes {stable_mosaic.version = 11 : i64} {
  func.func @_residual_block_kernel(%arg0: i32, %arg1: memref<1x8x8x32xf32, #tpu.memory_space<vmem>>, %arg2: memref<8x1x1xf32, #tpu.memory_space<vmem>>, %arg3: memref<8x1x1xf32, #tpu.memory_space<vmem>>, %arg4: memref<3x3x32x32xf32, #tpu.memory_space<vmem>>, %arg5: memref<1x32xf32, #tpu.memory_space<vmem>>, %arg6: memref<8x1x1xf32, #tpu.memory_space<vmem>>, %arg7: memref<8x1x1xf32, #tpu.memory_space<vmem>>, %arg8: memref<3x3x32x32xf32, #tpu.memory_space<vmem>>, %arg9: memref<1x32xf32, #tpu.memory_space<vmem>>, %arg10: memref<1x8x8x32xf32, #tpu.memory_space<vmem>>, %arg11: memref<10x10x32xf32, #tpu.memory_space<vmem>>, %arg12: memref<8x8x32xf32, #tpu.memory_space<vmem>>) attributes {dimension_semantics = [#tpu.dimension_semantics<parallel>], iteration_bounds = array<i64: 2>, scalar_prefetch = 0 : i64, scratch_operands = 2 : i64, tpu.core_type = #tpu.core_type<tc>, window_params = [{transform_indices = @transform_0, window_bounds = array<i64: 1, 8, 8, 32>}, {pipeline_mode = #tpu.pipeline_mode<synchronous>, transform_indices = @transform_1, window_bounds = array<i64: 8, 1, 1>}, {pipeline_mode = #tpu.pipeline_mode<synchronous>, transform_indices = @transform_2, window_bounds = array<i64: 8, 1, 1>}, {pipeline_mode = #tpu.pipeline_mode<synchronous>, transform_indices = @transform_3, window_bounds = array<i64: 3, 3, 32, 32>}, {pipeline_mode = #tpu.pipeline_mode<synchronous>, transform_indices = @transform_4, window_bounds = array<i64: 1, 32>}, {pipeline_mode = #tpu.pipeline_mode<synchronous>, transform_indices = @transform_5, window_bounds = array<i64: 8, 1, 1>}, {pipeline_mode = #tpu.pipeline_mode<synchronous>, transform_indices = @transform_6, window_bounds = array<i64: 8, 1, 1>}, {pipeline_mode = #tpu.pipeline_mode<synchronous>, transform_indices = @transform_7, window_bounds = array<i64: 3, 3, 32, 32>}, {pipeline_mode = #tpu.pipeline_mode<synchronous>, transform_indices = @transform_8, window_bounds = array<i64: 1, 32>}, {transform_indices = @transform_9, window_bounds = array<i64: 1, 8, 8, 32>}]} {
    %c0 = arith.constant 0 : index
    %c0_0 = arith.constant 0 : index
    %c0_1 = arith.constant 0 : index
    %c0_2 = arith.constant 0 : index
    %0 = vector.load %arg1[%c0, %c0_0, %c0_1, %c0_2] : memref<1x8x8x32xf32, #tpu.memory_space<vmem>>, vector<1x8x8x32xf32>
    %1 = vector.shape_cast %0 : vector<1x8x8x32xf32> to vector<8x8x32xf32>
    %cst = arith.constant 0.000000e+00 : f32
    %2 = vector.broadcast %cst : f32 to vector<10x10x32xf32>
    %c0_3 = arith.constant 0 : index
    %c0_4 = arith.constant 0 : index
    %c0_5 = arith.constant 0 : index
    %3 = vector.load %arg11[%c0_3, %c0_4, %c0_5] : memref<10x10x32xf32, #tpu.memory_space<vmem>>, vector<10x10x32xf32>
    tpu.vector_store %arg11[%c0_3, %c0_4, %c0_5], %2 {strides = array<i32>} : memref<10x10x32xf32, #tpu.memory_space<vmem>>, vector<10x10x32xf32>,
    %c0_6 = arith.constant 0 : index
    %c0_7 = arith.constant 0 : index
    %c0_8 = arith.constant 0 : index
    %4 = vector.load %arg2[%c0_6, %c0_7, %c0_8] : memref<8x1x1xf32, #tpu.memory_space<vmem>>, vector<8x1x1xf32>
    %c0_9 = arith.constant 0 : index
    %c0_10 = arith.constant 0 : index
    %c0_11 = arith.constant 0 : index
    %5 = vector.load %arg3[%c0_9, %c0_10, %c0_11] : memref<8x1x1xf32, #tpu.memory_space<vmem>>, vector<8x1x1xf32>
    %6 = vector.extract_strided_slice %1 {offsets = [0, 0, 0], sizes = [1, 8, 32], strides = [1, 1, 1]} : vector<8x8x32xf32> to vector<1x8x32xf32>
    %7 = vector.shape_cast %6 : vector<1x8x32xf32> to vector<8x32xf32>
    %8 = vector.extract_strided_slice %1 {offsets = [1, 0, 0], sizes = [1, 8, 32], strides = [1, 1, 1]} : vector<8x8x32xf32> to vector<1x8x32xf32>
    %9 = vector.shape_cast %8 : vector<1x8x32xf32> to vector<8x32xf32>
    %10 = arith.addf %7, %9 : vector<8x32xf32>
    %11 = vector.extract_strided_slice %1 {offsets = [2, 0, 0], sizes = [1, 8, 32], strides = [1, 1, 1]} : vector<8x8x32xf32> to vector<1x8x32xf32>
    %12 = vector.shape_cast %11 : vector<1x8x32xf32> to vector<8x32xf32>
    %13 = arith.addf %10, %12 : vector<8x32xf32>
    %14 = vector.extract_strided_slice %1 {offsets = [3, 0, 0], sizes = [1, 8, 32], strides = [1, 1, 1]} : vector<8x8x32xf32> to vector<1x8x32xf32>
    %15 = vector.shape_cast %14 : vector<1x8x32xf32> to vector<8x32xf32>
    %16 = arith.addf %13, %15 : vector<8x32xf32>
    %17 = vector.extract_strided_slice %1 {offsets = [4, 0, 0], sizes = [1, 8, 32], strides = [1, 1, 1]} : vector<8x8x32xf32> to vector<1x8x32xf32>
    %18 = vector.shape_cast %17 : vector<1x8x32xf32> to vector<8x32xf32>
    %19 = arith.addf %16, %18 : vector<8x32xf32>
    %20 = vector.extract_strided_slice %1 {offsets = [5, 0, 0], sizes = [1, 8, 32], strides = [1, 1, 1]} : vector<8x8x32xf32> to vector<1x8x32xf32>
    %21 = vector.shape_cast %20 : vector<1x8x32xf32> to vector<8x32xf32>
    %22 = arith.addf %19, %21 : vector<8x32xf32>
    %23 = vector.extract_strided_slice %1 {offsets = [6, 0, 0], sizes = [1, 8, 32], strides = [1, 1, 1]} : vector<8x8x32xf32> to vector<1x8x32xf32>
    %24 = vector.shape_cast %23 : vector<1x8x32xf32> to vector<8x32xf32>
    %25 = arith.addf %22, %24 : vector<8x32xf32>
    %26 = vector.extract_strided_slice %1 {offsets = [7, 0, 0], sizes = [1, 8, 32], strides = [1, 1, 1]} : vector<8x8x32xf32> to vector<1x8x32xf32>
    %27 = vector.shape_cast %26 : vector<1x8x32xf32> to vector<8x32xf32>
    %28 = arith.addf %25, %27 : vector<8x32xf32>
    %cst_12 = arith.constant 1.250000e-01 : f32
    %29 = vector.broadcast %cst_12 : f32 to vector<8x32xf32>
    %30 = arith.mulf %28, %29 : vector<8x32xf32>
    %31 = vector.extract_strided_slice %1 {offsets = [0, 0, 0], sizes = [1, 8, 32], strides = [1, 1, 1]} : vector<8x8x32xf32> to vector<1x8x32xf32>
    %32 = vector.shape_cast %31 : vector<1x8x32xf32> to vector<8x32xf32>
    %33 = arith.subf %32, %30 : vector<8x32xf32>
    %34 = arith.mulf %33, %33 : vector<8x32xf32>
    %35 = vector.extract_strided_slice %1 {offsets = [1, 0, 0], sizes = [1, 8, 32], strides = [1, 1, 1]} : vector<8x8x32xf32> to vector<1x8x32xf32>
    %36 = vector.shape_cast %35 : vector<1x8x32xf32> to vector<8x32xf32>
    %37 = arith.subf %36, %30 : vector<8x32xf32>
    %38 = arith.mulf %37, %37 : vector<8x32xf32>
    %39 = arith.addf %34, %38 : vector<8x32xf32>
    %40 = vector.extract_strided_slice %1 {offsets = [2, 0, 0], sizes = [1, 8, 32], strides = [1, 1, 1]} : vector<8x8x32xf32> to vector<1x8x32xf32>
    %41 = vector.shape_cast %40 : vector<1x8x32xf32> to vector<8x32xf32>
    %42 = arith.subf %41, %30 : vector<8x32xf32>
    %43 = arith.mulf %42, %42 : vector<8x32xf32>
    %44 = arith.addf %39, %43 : vector<8x32xf32>
    %45 = vector.extract_strided_slice %1 {offsets = [3, 0, 0], sizes = [1, 8, 32], strides = [1, 1, 1]} : vector<8x8x32xf32> to vector<1x8x32xf32>
    %46 = vector.shape_cast %45 : vector<1x8x32xf32> to vector<8x32xf32>
    %47 = arith.subf %46, %30 : vector<8x32xf32>
    %48 = arith.mulf %47, %47 : vector<8x32xf32>
    %49 = arith.addf %44, %48 : vector<8x32xf32>
    %50 = vector.extract_strided_slice %1 {offsets = [4, 0, 0], sizes = [1, 8, 32], strides = [1, 1, 1]} : vector<8x8x32xf32> to vector<1x8x32xf32>
    %51 = vector.shape_cast %50 : vector<1x8x32xf32> to vector<8x32xf32>
    %52 = arith.subf %51, %30 : vector<8x32xf32>
    %53 = arith.mulf %52, %52 : vector<8x32xf32>
    %54 = arith.addf %49, %53 : vector<8x32xf32>
    %55 = vector.extract_strided_slice %1 {offsets = [5, 0, 0], sizes = [1, 8, 32], strides = [1, 1, 1]} : vector<8x8x32xf32> to vector<1x8x32xf32>
    %56 = vector.shape_cast %55 : vector<1x8x32xf32> to vector<8x32xf32>
    %57 = arith.subf %56, %30 : vector<8x32xf32>
    %58 = arith.mulf %57, %57 : vector<8x32xf32>
    %59 = arith.addf %54, %58 : vector<8x32xf32>
    %60 = vector.extract_strided_slice %1 {offsets = [6, 0, 0], sizes = [1, 8, 32], strides = [1, 1, 1]} : vector<8x8x32xf32> to vector<1x8x32xf32>
    %61 = vector.shape_cast %60 : vector<1x8x32xf32> to vector<8x32xf32>
    %62 = arith.subf %61, %30 : vector<8x32xf32>
    %63 = arith.mulf %62, %62 : vector<8x32xf32>
    %64 = arith.addf %59, %63 : vector<8x32xf32>
    %65 = vector.extract_strided_slice %1 {offsets = [7, 0, 0], sizes = [1, 8, 32], strides = [1, 1, 1]} : vector<8x8x32xf32> to vector<1x8x32xf32>
    %66 = vector.shape_cast %65 : vector<1x8x32xf32> to vector<8x32xf32>
    %67 = arith.subf %66, %30 : vector<8x32xf32>
    %68 = arith.mulf %67, %67 : vector<8x32xf32>
    %69 = arith.addf %64, %68 : vector<8x32xf32>
    %cst_13 = arith.constant 1.250000e-01 : f32
    %70 = vector.broadcast %cst_13 : f32 to vector<8x32xf32>
    %71 = arith.mulf %69, %70 : vector<8x32xf32>
    %72 = vector.shape_cast %30 : vector<8x32xf32> to vector<1x8x32xf32>
    %73 = vector.broadcast %72 : vector<1x8x32xf32> to vector<8x8x32xf32>
    %74 = arith.subf %1, %73 : vector<8x8x32xf32>
    %cst_14 = arith.constant 9.99999974E-6 : f32
    %75 = vector.broadcast %cst_14 : f32 to vector<8x32xf32>
    %76 = arith.addf %71, %75 : vector<8x32xf32>
    %77 = math.rsqrt %76 : vector<8x32xf32>
    %78 = vector.shape_cast %77 : vector<8x32xf32> to vector<1x8x32xf32>
    %79 = vector.broadcast %78 : vector<1x8x32xf32> to vector<8x8x32xf32>
    %80 = arith.mulf %74, %79 : vector<8x8x32xf32>
    %81 = vector.broadcast %4 : vector<8x1x1xf32> to vector<8x8x32xf32>
    %82 = arith.mulf %80, %81 : vector<8x8x32xf32>
    %83 = vector.broadcast %5 : vector<8x1x1xf32> to vector<8x8x32xf32>
    %84 = arith.addf %82, %83 : vector<8x8x32xf32>
    %cst_15 = arith.constant 5.000000e-01 : f32
    %85 = vector.broadcast %cst_15 : f32 to vector<8x8x32xf32>
    %86 = arith.mulf %85, %84 : vector<8x8x32xf32>
    %cst_16 = arith.constant 4.471500e-02 : f32
    %87 = vector.broadcast %cst_16 : f32 to vector<8x8x32xf32>
    %88 = arith.mulf %87, %84 : vector<8x8x32xf32>
    %89 = arith.mulf %88, %84 : vector<8x8x32xf32>
    %90 = arith.mulf %89, %84 : vector<8x8x32xf32>
    %91 = arith.addf %84, %90 : vector<8x8x32xf32>
    %cst_17 = arith.constant 0.797884583 : f32
    %92 = vector.broadcast %cst_17 : f32 to vector<8x8x32xf32>
    %93 = arith.mulf %92, %91 : vector<8x8x32xf32>
    %94 = math.tanh %93 : vector<8x8x32xf32>
    %cst_18 = arith.constant 1.000000e+00 : f32
    %95 = vector.broadcast %cst_18 : f32 to vector<8x8x32xf32>
    %96 = arith.addf %95, %94 : vector<8x8x32xf32>
    %97 = arith.mulf %86, %96 : vector<8x8x32xf32>
    %c1 = arith.constant 1 : index
    %c1_19 = arith.constant 1 : index
    %c0_20 = arith.constant 0 : index
    %98 = vector.load %arg11[%c1, %c1_19, %c0_20] : memref<10x10x32xf32, #tpu.memory_space<vmem>>, vector<8x8x32xf32>
    tpu.vector_store %arg11[%c1, %c1_19, %c0_20], %97 {strides = array<i32>} : memref<10x10x32xf32, #tpu.memory_space<vmem>>, vector<8x8x32xf32>,
    %c0_21 = arith.constant 0 : index
    %c0_22 = arith.constant 0 : index
    %c0_23 = arith.constant 0 : index
    %c0_24 = arith.constant 0 : index
    %99 = vector.load %arg4[%c0_21, %c0_22, %c0_23, %c0_24] : memref<3x3x32x32xf32, #tpu.memory_space<vmem>>, vector<3x3x32x32xf32>
    %c0_25 = arith.constant 0 : index
    %c0_26 = arith.constant 0 : index
    %100 = vector.load %arg5[%c0_25, %c0_26] : memref<1x32xf32, #tpu.memory_space<vmem>>, vector<1x32xf32>
    %c0_i32 = arith.constant 0 : i32
    %c8_i32 = arith.constant 8 : i32
    %101 = arith.addi %c0_i32, %c8_i32 : i32
    %c1_i32 = arith.constant 1 : i32
    scf.for %arg13 = %c0_i32 to %101 step %c1_i32  : i32 {
      %cst_61 = arith.constant 0.000000e+00 : f32
      %203 = vector.broadcast %cst_61 : f32 to vector<8x32xf32>
      %204 = vector.broadcast %100 : vector<1x32xf32> to vector<8x32xf32>
      %205 = arith.addf %203, %204 : vector<8x32xf32>
      %c0_i32_62 = arith.constant 0 : i32
      %206 = arith.addi %arg13, %c0_i32_62 : i32
      %207 = arith.index_cast %206 : i32 to index
      %c0_63 = arith.constant 0 : index
      %c0_64 = arith.constant 0 : index
      %208 = vector.load %arg11[%207, %c0_63, %c0_64] : memref<10x10x32xf32, #tpu.memory_space<vmem>>, vector<1x10x32xf32>
      %209 = vector.shape_cast %208 : vector<1x10x32xf32> to vector<10x32xf32>
      %210 = vector.extract_strided_slice %209 {offsets = [0, 0], sizes = [8, 32], strides = [1, 1]} : vector<10x32xf32> to vector<8x32xf32>
      %211 = vector.extract_strided_slice %99 {offsets = [0, 0, 0, 0], sizes = [1, 1, 32, 32], strides = [1, 1, 1, 1]} : vector<3x3x32x32xf32> to vector<1x1x32x32xf32>
      %212 = vector.shape_cast %211 : vector<1x1x32x32xf32> to vector<32x32xf32>
      %cst_65 = arith.constant dense<0.000000e+00> : vector<8x32xf32>
      %213 = tpu.matmul %210, %212, %cst_65 {dimension_numbers = #tpu.dot_dimension_numbers<[1], [0], [0], [1], [0, 0, 1, 1], [], []>} : vector<8x32xf32>, vector<32x32xf32>, vector<8x32xf32> -> vector<8x32xf32>
      %214 = arith.addf %205, %213 : vector<8x32xf32>
      %215 = vector.extract_strided_slice %209 {offsets = [1, 0], sizes = [8, 32], strides = [1, 1]} : vector<10x32xf32> to vector<8x32xf32>
      %216 = vector.extract_strided_slice %99 {offsets = [0, 1, 0, 0], sizes = [1, 1, 32, 32], strides = [1, 1, 1, 1]} : vector<3x3x32x32xf32> to vector<1x1x32x32xf32>
      %217 = vector.shape_cast %216 : vector<1x1x32x32xf32> to vector<32x32xf32>
      %cst_66 = arith.constant dense<0.000000e+00> : vector<8x32xf32>
      %218 = tpu.matmul %215, %217, %cst_66 {dimension_numbers = #tpu.dot_dimension_numbers<[1], [0], [0], [1], [0, 0, 1, 1], [], []>} : vector<8x32xf32>, vector<32x32xf32>, vector<8x32xf32> -> vector<8x32xf32>
      %219 = arith.addf %214, %218 : vector<8x32xf32>
      %220 = vector.extract_strided_slice %209 {offsets = [2, 0], sizes = [8, 32], strides = [1, 1]} : vector<10x32xf32> to vector<8x32xf32>
      %221 = vector.extract_strided_slice %99 {offsets = [0, 2, 0, 0], sizes = [1, 1, 32, 32], strides = [1, 1, 1, 1]} : vector<3x3x32x32xf32> to vector<1x1x32x32xf32>
      %222 = vector.shape_cast %221 : vector<1x1x32x32xf32> to vector<32x32xf32>
      %cst_67 = arith.constant dense<0.000000e+00> : vector<8x32xf32>
      %223 = tpu.matmul %220, %222, %cst_67 {dimension_numbers = #tpu.dot_dimension_numbers<[1], [0], [0], [1], [0, 0, 1, 1], [], []>} : vector<8x32xf32>, vector<32x32xf32>, vector<8x32xf32> -> vector<8x32xf32>
      %224 = arith.addf %219, %223 : vector<8x32xf32>
      %c1_i32_68 = arith.constant 1 : i32
      %225 = arith.addi %arg13, %c1_i32_68 : i32
      %226 = arith.index_cast %225 : i32 to index
      %c0_69 = arith.constant 0 : index
      %c0_70 = arith.constant 0 : index
      %227 = vector.load %arg11[%226, %c0_69, %c0_70] : memref<10x10x32xf32, #tpu.memory_space<vmem>>, vector<1x10x32xf32>
      %228 = vector.shape_cast %227 : vector<1x10x32xf32> to vector<10x32xf32>
      %229 = vector.extract_strided_slice %228 {offsets = [0, 0], sizes = [8, 32], strides = [1, 1]} : vector<10x32xf32> to vector<8x32xf32>
      %230 = vector.extract_strided_slice %99 {offsets = [1, 0, 0, 0], sizes = [1, 1, 32, 32], strides = [1, 1, 1, 1]} : vector<3x3x32x32xf32> to vector<1x1x32x32xf32>
      %231 = vector.shape_cast %230 : vector<1x1x32x32xf32> to vector<32x32xf32>
      %cst_71 = arith.constant dense<0.000000e+00> : vector<8x32xf32>
      %232 = tpu.matmul %229, %231, %cst_71 {dimension_numbers = #tpu.dot_dimension_numbers<[1], [0], [0], [1], [0, 0, 1, 1], [], []>} : vector<8x32xf32>, vector<32x32xf32>, vector<8x32xf32> -> vector<8x32xf32>
      %233 = arith.addf %224, %232 : vector<8x32xf32>
      %234 = vector.extract_strided_slice %228 {offsets = [1, 0], sizes = [8, 32], strides = [1, 1]} : vector<10x32xf32> to vector<8x32xf32>
      %235 = vector.extract_strided_slice %99 {offsets = [1, 1, 0, 0], sizes = [1, 1, 32, 32], strides = [1, 1, 1, 1]} : vector<3x3x32x32xf32> to vector<1x1x32x32xf32>
      %236 = vector.shape_cast %235 : vector<1x1x32x32xf32> to vector<32x32xf32>
      %cst_72 = arith.constant dense<0.000000e+00> : vector<8x32xf32>
      %237 = tpu.matmul %234, %236, %cst_72 {dimension_numbers = #tpu.dot_dimension_numbers<[1], [0], [0], [1], [0, 0, 1, 1], [], []>} : vector<8x32xf32>, vector<32x32xf32>, vector<8x32xf32> -> vector<8x32xf32>
      %238 = arith.addf %233, %237 : vector<8x32xf32>
      %239 = vector.extract_strided_slice %228 {offsets = [2, 0], sizes = [8, 32], strides = [1, 1]} : vector<10x32xf32> to vector<8x32xf32>
      %240 = vector.extract_strided_slice %99 {offsets = [1, 2, 0, 0], sizes = [1, 1, 32, 32], strides = [1, 1, 1, 1]} : vector<3x3x32x32xf32> to vector<1x1x32x32xf32>
      %241 = vector.shape_cast %240 : vector<1x1x32x32xf32> to vector<32x32xf32>
      %cst_73 = arith.constant dense<0.000000e+00> : vector<8x32xf32>
      %242 = tpu.matmul %239, %241, %cst_73 {dimension_numbers = #tpu.dot_dimension_numbers<[1], [0], [0], [1], [0, 0, 1, 1], [], []>} : vector<8x32xf32>, vector<32x32xf32>, vector<8x32xf32> -> vector<8x32xf32>
      %243 = arith.addf %238, %242 : vector<8x32xf32>
      %c2_i32 = arith.constant 2 : i32
      %244 = arith.addi %arg13, %c2_i32 : i32
      %245 = arith.index_cast %244 : i32 to index
      %c0_74 = arith.constant 0 : index
      %c0_75 = arith.constant 0 : index
      %246 = vector.load %arg11[%245, %c0_74, %c0_75] : memref<10x10x32xf32, #tpu.memory_space<vmem>>, vector<1x10x32xf32>
      %247 = vector.shape_cast %246 : vector<1x10x32xf32> to vector<10x32xf32>
      %248 = vector.extract_strided_slice %247 {offsets = [0, 0], sizes = [8, 32], strides = [1, 1]} : vector<10x32xf32> to vector<8x32xf32>
      %249 = vector.extract_strided_slice %99 {offsets = [2, 0, 0, 0], sizes = [1, 1, 32, 32], strides = [1, 1, 1, 1]} : vector<3x3x32x32xf32> to vector<1x1x32x32xf32>
      %250 = vector.shape_cast %249 : vector<1x1x32x32xf32> to vector<32x32xf32>
      %cst_76 = arith.constant dense<0.000000e+00> : vector<8x32xf32>
      %251 = tpu.matmul %248, %250, %cst_76 {dimension_numbers = #tpu.dot_dimension_numbers<[1], [0], [0], [1], [0, 0, 1, 1], [], []>} : vector<8x32xf32>, vector<32x32xf32>, vector<8x32xf32> -> vector<8x32xf32>
      %252 = arith.addf %243, %251 : vector<8x32xf32>
      %253 = vector.extract_strided_slice %247 {offsets = [1, 0], sizes = [8, 32], strides = [1, 1]} : vector<10x32xf32> to vector<8x32xf32>
      %254 = vector.extract_strided_slice %99 {offsets = [2, 1, 0, 0], sizes = [1, 1, 32, 32], strides = [1, 1, 1, 1]} : vector<3x3x32x32xf32> to vector<1x1x32x32xf32>
      %255 = vector.shape_cast %254 : vector<1x1x32x32xf32> to vector<32x32xf32>
      %cst_77 = arith.constant dense<0.000000e+00> : vector<8x32xf32>
      %256 = tpu.matmul %253, %255, %cst_77 {dimension_numbers = #tpu.dot_dimension_numbers<[1], [0], [0], [1], [0, 0, 1, 1], [], []>} : vector<8x32xf32>, vector<32x32xf32>, vector<8x32xf32> -> vector<8x32xf32>
      %257 = arith.addf %252, %256 : vector<8x32xf32>
      %258 = vector.extract_strided_slice %247 {offsets = [2, 0], sizes = [8, 32], strides = [1, 1]} : vector<10x32xf32> to vector<8x32xf32>
      %259 = vector.extract_strided_slice %99 {offsets = [2, 2, 0, 0], sizes = [1, 1, 32, 32], strides = [1, 1, 1, 1]} : vector<3x3x32x32xf32> to vector<1x1x32x32xf32>
      %260 = vector.shape_cast %259 : vector<1x1x32x32xf32> to vector<32x32xf32>
      %cst_78 = arith.constant dense<0.000000e+00> : vector<8x32xf32>
      %261 = tpu.matmul %258, %260, %cst_78 {dimension_numbers = #tpu.dot_dimension_numbers<[1], [0], [0], [1], [0, 0, 1, 1], [], []>} : vector<8x32xf32>, vector<32x32xf32>, vector<8x32xf32> -> vector<8x32xf32>
      %262 = arith.addf %257, %261 : vector<8x32xf32>
      %263 = arith.index_cast %arg13 : i32 to index
      %c0_79 = arith.constant 0 : index
      %c0_80 = arith.constant 0 : index
      %264 = vector.load %arg12[%263, %c0_79, %c0_80] : memref<8x8x32xf32, #tpu.memory_space<vmem>>, vector<1x8x32xf32>
      %265 = vector.shape_cast %264 : vector<1x8x32xf32> to vector<8x32xf32>
      %266 = vector.shape_cast %262 : vector<8x32xf32> to vector<1x8x32xf32>
      tpu.vector_store %arg12[%263, %c0_79, %c0_80], %266 {strides = array<i32>} : memref<8x8x32xf32, #tpu.memory_space<vmem>>, vector<1x8x32xf32>,
    }
    %c8_i32_27 = arith.constant 8 : i32
    %cst_28 = arith.constant 0.000000e+00 : f32
    %102 = vector.broadcast %cst_28 : f32 to vector<10x10x32xf32>
    %c0_29 = arith.constant 0 : index
    %c0_30 = arith.constant 0 : index
    %c0_31 = arith.constant 0 : index
    %103 = vector.load %arg11[%c0_29, %c0_30, %c0_31] : memref<10x10x32xf32, #tpu.memory_space<vmem>>, vector<10x10x32xf32>
    tpu.vector_store %arg11[%c0_29, %c0_30, %c0_31], %102 {strides = array<i32>} : memref<10x10x32xf32, #tpu.memory_space<vmem>>, vector<10x10x32xf32>,
    %c0_32 = arith.constant 0 : index
    %c0_33 = arith.constant 0 : index
    %c0_34 = arith.constant 0 : index
    %104 = vector.load %arg12[%c0_32, %c0_33, %c0_34] : memref<8x8x32xf32, #tpu.memory_space<vmem>>, vector<8x8x32xf32>
    %c0_35 = arith.constant 0 : index
    %c0_36 = arith.constant 0 : index
    %c0_37 = arith.constant 0 : index
    %105 = vector.load %arg6[%c0_35, %c0_36, %c0_37] : memref<8x1x1xf32, #tpu.memory_space<vmem>>, vector<8x1x1xf32>
    %c0_38 = arith.constant 0 : index
    %c0_39 = arith.constant 0 : index
    %c0_40 = arith.constant 0 : index
    %106 = vector.load %arg7[%c0_38, %c0_39, %c0_40] : memref<8x1x1xf32, #tpu.memory_space<vmem>>, vector<8x1x1xf32>
    %107 = vector.extract_strided_slice %104 {offsets = [0, 0, 0], sizes = [1, 8, 32], strides = [1, 1, 1]} : vector<8x8x32xf32> to vector<1x8x32xf32>
    %108 = vector.shape_cast %107 : vector<1x8x32xf32> to vector<8x32xf32>
    %109 = vector.extract_strided_slice %104 {offsets = [1, 0, 0], sizes = [1, 8, 32], strides = [1, 1, 1]} : vector<8x8x32xf32> to vector<1x8x32xf32>
    %110 = vector.shape_cast %109 : vector<1x8x32xf32> to vector<8x32xf32>
    %111 = arith.addf %108, %110 : vector<8x32xf32>
    %112 = vector.extract_strided_slice %104 {offsets = [2, 0, 0], sizes = [1, 8, 32], strides = [1, 1, 1]} : vector<8x8x32xf32> to vector<1x8x32xf32>
    %113 = vector.shape_cast %112 : vector<1x8x32xf32> to vector<8x32xf32>
    %114 = arith.addf %111, %113 : vector<8x32xf32>
    %115 = vector.extract_strided_slice %104 {offsets = [3, 0, 0], sizes = [1, 8, 32], strides = [1, 1, 1]} : vector<8x8x32xf32> to vector<1x8x32xf32>
    %116 = vector.shape_cast %115 : vector<1x8x32xf32> to vector<8x32xf32>
    %117 = arith.addf %114, %116 : vector<8x32xf32>
    %118 = vector.extract_strided_slice %104 {offsets = [4, 0, 0], sizes = [1, 8, 32], strides = [1, 1, 1]} : vector<8x8x32xf32> to vector<1x8x32xf32>
    %119 = vector.shape_cast %118 : vector<1x8x32xf32> to vector<8x32xf32>
    %120 = arith.addf %117, %119 : vector<8x32xf32>
    %121 = vector.extract_strided_slice %104 {offsets = [5, 0, 0], sizes = [1, 8, 32], strides = [1, 1, 1]} : vector<8x8x32xf32> to vector<1x8x32xf32>
    %122 = vector.shape_cast %121 : vector<1x8x32xf32> to vector<8x32xf32>
    %123 = arith.addf %120, %122 : vector<8x32xf32>
    %124 = vector.extract_strided_slice %104 {offsets = [6, 0, 0], sizes = [1, 8, 32], strides = [1, 1, 1]} : vector<8x8x32xf32> to vector<1x8x32xf32>
    %125 = vector.shape_cast %124 : vector<1x8x32xf32> to vector<8x32xf32>
    %126 = arith.addf %123, %125 : vector<8x32xf32>
    %127 = vector.extract_strided_slice %104 {offsets = [7, 0, 0], sizes = [1, 8, 32], strides = [1, 1, 1]} : vector<8x8x32xf32> to vector<1x8x32xf32>
    %128 = vector.shape_cast %127 : vector<1x8x32xf32> to vector<8x32xf32>
    %129 = arith.addf %126, %128 : vector<8x32xf32>
    %cst_41 = arith.constant 1.250000e-01 : f32
    %130 = vector.broadcast %cst_41 : f32 to vector<8x32xf32>
    %131 = arith.mulf %129, %130 : vector<8x32xf32>
    %132 = vector.extract_strided_slice %104 {offsets = [0, 0, 0], sizes = [1, 8, 32], strides = [1, 1, 1]} : vector<8x8x32xf32> to vector<1x8x32xf32>
    %133 = vector.shape_cast %132 : vector<1x8x32xf32> to vector<8x32xf32>
    %134 = arith.subf %133, %131 : vector<8x32xf32>
    %135 = arith.mulf %134, %134 : vector<8x32xf32>
    %136 = vector.extract_strided_slice %104 {offsets = [1, 0, 0], sizes = [1, 8, 32], strides = [1, 1, 1]} : vector<8x8x32xf32> to vector<1x8x32xf32>
    %137 = vector.shape_cast %136 : vector<1x8x32xf32> to vector<8x32xf32>
    %138 = arith.subf %137, %131 : vector<8x32xf32>
    %139 = arith.mulf %138, %138 : vector<8x32xf32>
    %140 = arith.addf %135, %139 : vector<8x32xf32>
    %141 = vector.extract_strided_slice %104 {offsets = [2, 0, 0], sizes = [1, 8, 32], strides = [1, 1, 1]} : vector<8x8x32xf32> to vector<1x8x32xf32>
    %142 = vector.shape_cast %141 : vector<1x8x32xf32> to vector<8x32xf32>
    %143 = arith.subf %142, %131 : vector<8x32xf32>
    %144 = arith.mulf %143, %143 : vector<8x32xf32>
    %145 = arith.addf %140, %144 : vector<8x32xf32>
    %146 = vector.extract_strided_slice %104 {offsets = [3, 0, 0], sizes = [1, 8, 32], strides = [1, 1, 1]} : vector<8x8x32xf32> to vector<1x8x32xf32>
    %147 = vector.shape_cast %146 : vector<1x8x32xf32> to vector<8x32xf32>
    %148 = arith.subf %147, %131 : vector<8x32xf32>
    %149 = arith.mulf %148, %148 : vector<8x32xf32>
    %150 = arith.addf %145, %149 : vector<8x32xf32>
    %151 = vector.extract_strided_slice %104 {offsets = [4, 0, 0], sizes = [1, 8, 32], strides = [1, 1, 1]} : vector<8x8x32xf32> to vector<1x8x32xf32>
    %152 = vector.shape_cast %151 : vector<1x8x32xf32> to vector<8x32xf32>
    %153 = arith.subf %152, %131 : vector<8x32xf32>
    %154 = arith.mulf %153, %153 : vector<8x32xf32>
    %155 = arith.addf %150, %154 : vector<8x32xf32>
    %156 = vector.extract_strided_slice %104 {offsets = [5, 0, 0], sizes = [1, 8, 32], strides = [1, 1, 1]} : vector<8x8x32xf32> to vector<1x8x32xf32>
    %157 = vector.shape_cast %156 : vector<1x8x32xf32> to vector<8x32xf32>
    %158 = arith.subf %157, %131 : vector<8x32xf32>
    %159 = arith.mulf %158, %158 : vector<8x32xf32>
    %160 = arith.addf %155, %159 : vector<8x32xf32>
    %161 = vector.extract_strided_slice %104 {offsets = [6, 0, 0], sizes = [1, 8, 32], strides = [1, 1, 1]} : vector<8x8x32xf32> to vector<1x8x32xf32>
    %162 = vector.shape_cast %161 : vector<1x8x32xf32> to vector<8x32xf32>
    %163 = arith.subf %162, %131 : vector<8x32xf32>
    %164 = arith.mulf %163, %163 : vector<8x32xf32>
    %165 = arith.addf %160, %164 : vector<8x32xf32>
    %166 = vector.extract_strided_slice %104 {offsets = [7, 0, 0], sizes = [1, 8, 32], strides = [1, 1, 1]} : vector<8x8x32xf32> to vector<1x8x32xf32>
    %167 = vector.shape_cast %166 : vector<1x8x32xf32> to vector<8x32xf32>
    %168 = arith.subf %167, %131 : vector<8x32xf32>
    %169 = arith.mulf %168, %168 : vector<8x32xf32>
    %170 = arith.addf %165, %169 : vector<8x32xf32>
    %cst_42 = arith.constant 1.250000e-01 : f32
    %171 = vector.broadcast %cst_42 : f32 to vector<8x32xf32>
    %172 = arith.mulf %170, %171 : vector<8x32xf32>
    %173 = vector.shape_cast %131 : vector<8x32xf32> to vector<1x8x32xf32>
    %174 = vector.broadcast %173 : vector<1x8x32xf32> to vector<8x8x32xf32>
    %175 = arith.subf %104, %174 : vector<8x8x32xf32>
    %cst_43 = arith.constant 9.99999974E-6 : f32
    %176 = vector.broadcast %cst_43 : f32 to vector<8x32xf32>
    %177 = arith.addf %172, %176 : vector<8x32xf32>
    %178 = math.rsqrt %177 : vector<8x32xf32>
    %179 = vector.shape_cast %178 : vector<8x32xf32> to vector<1x8x32xf32>
    %180 = vector.broadcast %179 : vector<1x8x32xf32> to vector<8x8x32xf32>
    %181 = arith.mulf %175, %180 : vector<8x8x32xf32>
    %182 = vector.broadcast %105 : vector<8x1x1xf32> to vector<8x8x32xf32>
    %183 = arith.mulf %181, %182 : vector<8x8x32xf32>
    %184 = vector.broadcast %106 : vector<8x1x1xf32> to vector<8x8x32xf32>
    %185 = arith.addf %183, %184 : vector<8x8x32xf32>
    %cst_44 = arith.constant 5.000000e-01 : f32
    %186 = vector.broadcast %cst_44 : f32 to vector<8x8x32xf32>
    %187 = arith.mulf %186, %185 : vector<8x8x32xf32>
    %cst_45 = arith.constant 4.471500e-02 : f32
    %188 = vector.broadcast %cst_45 : f32 to vector<8x8x32xf32>
    %189 = arith.mulf %188, %185 : vector<8x8x32xf32>
    %190 = arith.mulf %189, %185 : vector<8x8x32xf32>
    %191 = arith.mulf %190, %185 : vector<8x8x32xf32>
    %192 = arith.addf %185, %191 : vector<8x8x32xf32>
    %cst_46 = arith.constant 0.797884583 : f32
    %193 = vector.broadcast %cst_46 : f32 to vector<8x8x32xf32>
    %194 = arith.mulf %193, %192 : vector<8x8x32xf32>
    %195 = math.tanh %194 : vector<8x8x32xf32>
    %cst_47 = arith.constant 1.000000e+00 : f32
    %196 = vector.broadcast %cst_47 : f32 to vector<8x8x32xf32>
    %197 = arith.addf %196, %195 : vector<8x8x32xf32>
    %198 = arith.mulf %187, %197 : vector<8x8x32xf32>
    %c1_48 = arith.constant 1 : index
    %c1_49 = arith.constant 1 : index
    %c0_50 = arith.constant 0 : index
    %199 = vector.load %arg11[%c1_48, %c1_49, %c0_50] : memref<10x10x32xf32, #tpu.memory_space<vmem>>, vector<8x8x32xf32>
    tpu.vector_store %arg11[%c1_48, %c1_49, %c0_50], %198 {strides = array<i32>} : memref<10x10x32xf32, #tpu.memory_space<vmem>>, vector<8x8x32xf32>,
    %c0_51 = arith.constant 0 : index
    %c0_52 = arith.constant 0 : index
    %c0_53 = arith.constant 0 : index
    %c0_54 = arith.constant 0 : index
    %200 = vector.load %arg8[%c0_51, %c0_52, %c0_53, %c0_54] : memref<3x3x32x32xf32, #tpu.memory_space<vmem>>, vector<3x3x32x32xf32>
    %c0_55 = arith.constant 0 : index
    %c0_56 = arith.constant 0 : index
    %201 = vector.load %arg9[%c0_55, %c0_56] : memref<1x32xf32, #tpu.memory_space<vmem>>, vector<1x32xf32>
    %c0_i32_57 = arith.constant 0 : i32
    %c8_i32_58 = arith.constant 8 : i32
    %202 = arith.addi %c0_i32_57, %c8_i32_58 : i32
    %c1_i32_59 = arith.constant 1 : i32
    scf.for %arg13 = %c0_i32_57 to %202 step %c1_i32_59  : i32 {
      %cst_61 = arith.constant 0.000000e+00 : f32
      %203 = vector.broadcast %cst_61 : f32 to vector<8x32xf32>
      %204 = vector.broadcast %201 : vector<1x32xf32> to vector<8x32xf32>
      %205 = arith.addf %203, %204 : vector<8x32xf32>
      %c0_i32_62 = arith.constant 0 : i32
      %206 = arith.addi %arg13, %c0_i32_62 : i32
      %207 = arith.index_cast %206 : i32 to index
      %c0_63 = arith.constant 0 : index
      %c0_64 = arith.constant 0 : index
      %208 = vector.load %arg11[%207, %c0_63, %c0_64] : memref<10x10x32xf32, #tpu.memory_space<vmem>>, vector<1x10x32xf32>
      %209 = vector.shape_cast %208 : vector<1x10x32xf32> to vector<10x32xf32>
      %210 = vector.extract_strided_slice %209 {offsets = [0, 0], sizes = [8, 32], strides = [1, 1]} : vector<10x32xf32> to vector<8x32xf32>
      %211 = vector.extract_strided_slice %200 {offsets = [0, 0, 0, 0], sizes = [1, 1, 32, 32], strides = [1, 1, 1, 1]} : vector<3x3x32x32xf32> to vector<1x1x32x32xf32>
      %212 = vector.shape_cast %211 : vector<1x1x32x32xf32> to vector<32x32xf32>
      %cst_65 = arith.constant dense<0.000000e+00> : vector<8x32xf32>
      %213 = tpu.matmul %210, %212, %cst_65 {dimension_numbers = #tpu.dot_dimension_numbers<[1], [0], [0], [1], [0, 0, 1, 1], [], []>} : vector<8x32xf32>, vector<32x32xf32>, vector<8x32xf32> -> vector<8x32xf32>
      %214 = arith.addf %205, %213 : vector<8x32xf32>
      %215 = vector.extract_strided_slice %209 {offsets = [1, 0], sizes = [8, 32], strides = [1, 1]} : vector<10x32xf32> to vector<8x32xf32>
      %216 = vector.extract_strided_slice %200 {offsets = [0, 1, 0, 0], sizes = [1, 1, 32, 32], strides = [1, 1, 1, 1]} : vector<3x3x32x32xf32> to vector<1x1x32x32xf32>
      %217 = vector.shape_cast %216 : vector<1x1x32x32xf32> to vector<32x32xf32>
      %cst_66 = arith.constant dense<0.000000e+00> : vector<8x32xf32>
      %218 = tpu.matmul %215, %217, %cst_66 {dimension_numbers = #tpu.dot_dimension_numbers<[1], [0], [0], [1], [0, 0, 1, 1], [], []>} : vector<8x32xf32>, vector<32x32xf32>, vector<8x32xf32> -> vector<8x32xf32>
      %219 = arith.addf %214, %218 : vector<8x32xf32>
      %220 = vector.extract_strided_slice %209 {offsets = [2, 0], sizes = [8, 32], strides = [1, 1]} : vector<10x32xf32> to vector<8x32xf32>
      %221 = vector.extract_strided_slice %200 {offsets = [0, 2, 0, 0], sizes = [1, 1, 32, 32], strides = [1, 1, 1, 1]} : vector<3x3x32x32xf32> to vector<1x1x32x32xf32>
      %222 = vector.shape_cast %221 : vector<1x1x32x32xf32> to vector<32x32xf32>
      %cst_67 = arith.constant dense<0.000000e+00> : vector<8x32xf32>
      %223 = tpu.matmul %220, %222, %cst_67 {dimension_numbers = #tpu.dot_dimension_numbers<[1], [0], [0], [1], [0, 0, 1, 1], [], []>} : vector<8x32xf32>, vector<32x32xf32>, vector<8x32xf32> -> vector<8x32xf32>
      %224 = arith.addf %219, %223 : vector<8x32xf32>
      %c1_i32_68 = arith.constant 1 : i32
      %225 = arith.addi %arg13, %c1_i32_68 : i32
      %226 = arith.index_cast %225 : i32 to index
      %c0_69 = arith.constant 0 : index
      %c0_70 = arith.constant 0 : index
      %227 = vector.load %arg11[%226, %c0_69, %c0_70] : memref<10x10x32xf32, #tpu.memory_space<vmem>>, vector<1x10x32xf32>
      %228 = vector.shape_cast %227 : vector<1x10x32xf32> to vector<10x32xf32>
      %229 = vector.extract_strided_slice %228 {offsets = [0, 0], sizes = [8, 32], strides = [1, 1]} : vector<10x32xf32> to vector<8x32xf32>
      %230 = vector.extract_strided_slice %200 {offsets = [1, 0, 0, 0], sizes = [1, 1, 32, 32], strides = [1, 1, 1, 1]} : vector<3x3x32x32xf32> to vector<1x1x32x32xf32>
      %231 = vector.shape_cast %230 : vector<1x1x32x32xf32> to vector<32x32xf32>
      %cst_71 = arith.constant dense<0.000000e+00> : vector<8x32xf32>
      %232 = tpu.matmul %229, %231, %cst_71 {dimension_numbers = #tpu.dot_dimension_numbers<[1], [0], [0], [1], [0, 0, 1, 1], [], []>} : vector<8x32xf32>, vector<32x32xf32>, vector<8x32xf32> -> vector<8x32xf32>
      %233 = arith.addf %224, %232 : vector<8x32xf32>
      %234 = vector.extract_strided_slice %228 {offsets = [1, 0], sizes = [8, 32], strides = [1, 1]} : vector<10x32xf32> to vector<8x32xf32>
      %235 = vector.extract_strided_slice %200 {offsets = [1, 1, 0, 0], sizes = [1, 1, 32, 32], strides = [1, 1, 1, 1]} : vector<3x3x32x32xf32> to vector<1x1x32x32xf32>
      %236 = vector.shape_cast %235 : vector<1x1x32x32xf32> to vector<32x32xf32>
      %cst_72 = arith.constant dense<0.000000e+00> : vector<8x32xf32>
      %237 = tpu.matmul %234, %236, %cst_72 {dimension_numbers = #tpu.dot_dimension_numbers<[1], [0], [0], [1], [0, 0, 1, 1], [], []>} : vector<8x32xf32>, vector<32x32xf32>, vector<8x32xf32> -> vector<8x32xf32>
      %238 = arith.addf %233, %237 : vector<8x32xf32>
      %239 = vector.extract_strided_slice %228 {offsets = [2, 0], sizes = [8, 32], strides = [1, 1]} : vector<10x32xf32> to vector<8x32xf32>
      %240 = vector.extract_strided_slice %200 {offsets = [1, 2, 0, 0], sizes = [1, 1, 32, 32], strides = [1, 1, 1, 1]} : vector<3x3x32x32xf32> to vector<1x1x32x32xf32>
      %241 = vector.shape_cast %240 : vector<1x1x32x32xf32> to vector<32x32xf32>
      %cst_73 = arith.constant dense<0.000000e+00> : vector<8x32xf32>
      %242 = tpu.matmul %239, %241, %cst_73 {dimension_numbers = #tpu.dot_dimension_numbers<[1], [0], [0], [1], [0, 0, 1, 1], [], []>} : vector<8x32xf32>, vector<32x32xf32>, vector<8x32xf32> -> vector<8x32xf32>
      %243 = arith.addf %238, %242 : vector<8x32xf32>
      %c2_i32 = arith.constant 2 : i32
      %244 = arith.addi %arg13, %c2_i32 : i32
      %245 = arith.index_cast %244 : i32 to index
      %c0_74 = arith.constant 0 : index
      %c0_75 = arith.constant 0 : index
      %246 = vector.load %arg11[%245, %c0_74, %c0_75] : memref<10x10x32xf32, #tpu.memory_space<vmem>>, vector<1x10x32xf32>
      %247 = vector.shape_cast %246 : vector<1x10x32xf32> to vector<10x32xf32>
      %248 = vector.extract_strided_slice %247 {offsets = [0, 0], sizes = [8, 32], strides = [1, 1]} : vector<10x32xf32> to vector<8x32xf32>
      %249 = vector.extract_strided_slice %200 {offsets = [2, 0, 0, 0], sizes = [1, 1, 32, 32], strides = [1, 1, 1, 1]} : vector<3x3x32x32xf32> to vector<1x1x32x32xf32>
      %250 = vector.shape_cast %249 : vector<1x1x32x32xf32> to vector<32x32xf32>
      %cst_76 = arith.constant dense<0.000000e+00> : vector<8x32xf32>
      %251 = tpu.matmul %248, %250, %cst_76 {dimension_numbers = #tpu.dot_dimension_numbers<[1], [0], [0], [1], [0, 0, 1, 1], [], []>} : vector<8x32xf32>, vector<32x32xf32>, vector<8x32xf32> -> vector<8x32xf32>
      %252 = arith.addf %243, %251 : vector<8x32xf32>
      %253 = vector.extract_strided_slice %247 {offsets = [1, 0], sizes = [8, 32], strides = [1, 1]} : vector<10x32xf32> to vector<8x32xf32>
      %254 = vector.extract_strided_slice %200 {offsets = [2, 1, 0, 0], sizes = [1, 1, 32, 32], strides = [1, 1, 1, 1]} : vector<3x3x32x32xf32> to vector<1x1x32x32xf32>
      %255 = vector.shape_cast %254 : vector<1x1x32x32xf32> to vector<32x32xf32>
      %cst_77 = arith.constant dense<0.000000e+00> : vector<8x32xf32>
      %256 = tpu.matmul %253, %255, %cst_77 {dimension_numbers = #tpu.dot_dimension_numbers<[1], [0], [0], [1], [0, 0, 1, 1], [], []>} : vector<8x32xf32>, vector<32x32xf32>, vector<8x32xf32> -> vector<8x32xf32>
      %257 = arith.addf %252, %256 : vector<8x32xf32>
      %258 = vector.extract_strided_slice %247 {offsets = [2, 0], sizes = [8, 32], strides = [1, 1]} : vector<10x32xf32> to vector<8x32xf32>
      %259 = vector.extract_strided_slice %200 {offsets = [2, 2, 0, 0], sizes = [1, 1, 32, 32], strides = [1, 1, 1, 1]} : vector<3x3x32x32xf32> to vector<1x1x32x32xf32>
      %260 = vector.shape_cast %259 : vector<1x1x32x32xf32> to vector<32x32xf32>
      %cst_78 = arith.constant dense<0.000000e+00> : vector<8x32xf32>
      %261 = tpu.matmul %258, %260, %cst_78 {dimension_numbers = #tpu.dot_dimension_numbers<[1], [0], [0], [1], [0, 0, 1, 1], [], []>} : vector<8x32xf32>, vector<32x32xf32>, vector<8x32xf32> -> vector<8x32xf32>
      %262 = arith.addf %257, %261 : vector<8x32xf32>
      %c0_79 = arith.constant 0 : index
      %263 = arith.index_cast %arg13 : i32 to index
      %c0_80 = arith.constant 0 : index
      %c0_81 = arith.constant 0 : index
      %264 = vector.load %arg1[%c0_79, %263, %c0_80, %c0_81] : memref<1x8x8x32xf32, #tpu.memory_space<vmem>>, vector<1x1x8x32xf32>
      %265 = vector.shape_cast %264 : vector<1x1x8x32xf32> to vector<8x32xf32>
      %266 = arith.addf %262, %265 : vector<8x32xf32>
      %c0_82 = arith.constant 0 : index
      %267 = arith.index_cast %arg13 : i32 to index
      %c0_83 = arith.constant 0 : index
      %c0_84 = arith.constant 0 : index
      %268 = vector.load %arg10[%c0_82, %267, %c0_83, %c0_84] : memref<1x8x8x32xf32, #tpu.memory_space<vmem>>, vector<1x1x8x32xf32>
      %269 = vector.shape_cast %268 : vector<1x1x8x32xf32> to vector<8x32xf32>
      %270 = vector.shape_cast %266 : vector<8x32xf32> to vector<1x1x8x32xf32>
      tpu.vector_store %arg10[%c0_82, %267, %c0_83, %c0_84], %270 {strides = array<i32>} : memref<1x8x8x32xf32, #tpu.memory_space<vmem>>, vector<1x1x8x32xf32>,
    }
    %c8_i32_60 = arith.constant 8 : i32
    return
  }
  func.func @transform_0(%arg0: i32) -> (i32, i32, i32, i32) {
    %c0_i32 = arith.constant 0 : i32
    %c0_i32_0 = arith.constant 0 : i32
    %c0_i32_1 = arith.constant 0 : i32
    %c0_i32_2 = arith.constant 0 : i32
    return %arg0, %c0_i32, %c0_i32_0, %c0_i32_1 : i32, i32, i32, i32
  }
  func.func @transform_1(%arg0: i32) -> (i32, i32, i32) {
    %c0_i32 = arith.constant 0 : i32
    %c0_i32_0 = arith.constant 0 : i32
    %c0_i32_1 = arith.constant 0 : i32
    %c0_i32_2 = arith.constant 0 : i32
    return %c0_i32, %c0_i32_0, %c0_i32_1 : i32, i32, i32
  }
  func.func @transform_2(%arg0: i32) -> (i32, i32, i32) {
    %c0_i32 = arith.constant 0 : i32
    %c0_i32_0 = arith.constant 0 : i32
    %c0_i32_1 = arith.constant 0 : i32
    %c0_i32_2 = arith.constant 0 : i32
    return %c0_i32, %c0_i32_0, %c0_i32_1 : i32, i32, i32
  }
  func.func @transform_3(%arg0: i32) -> (i32, i32, i32, i32) {
    %c0_i32 = arith.constant 0 : i32
    %c0_i32_0 = arith.constant 0 : i32
    %c0_i32_1 = arith.constant 0 : i32
    %c0_i32_2 = arith.constant 0 : i32
    %c0_i32_3 = arith.constant 0 : i32
    return %c0_i32, %c0_i32_0, %c0_i32_1, %c0_i32_2 : i32, i32, i32, i32
  }
  func.func @transform_4(%arg0: i32) -> (i32, i32) {
    %c0_i32 = arith.constant 0 : i32
    %c0_i32_0 = arith.constant 0 : i32
    %c0_i32_1 = arith.constant 0 : i32
    return %c0_i32, %c0_i32_0 : i32, i32
  }
  func.func @transform_5(%arg0: i32) -> (i32, i32, i32) {
    %c0_i32 = arith.constant 0 : i32
    %c0_i32_0 = arith.constant 0 : i32
    %c0_i32_1 = arith.constant 0 : i32
    %c0_i32_2 = arith.constant 0 : i32
    return %c0_i32, %c0_i32_0, %c0_i32_1 : i32, i32, i32
  }
  func.func @transform_6(%arg0: i32) -> (i32, i32, i32) {
    %c0_i32 = arith.constant 0 : i32
    %c0_i32_0 = arith.constant 0 : i32
    %c0_i32_1 = arith.constant 0 : i32
    %c0_i32_2 = arith.constant 0 : i32
    return %c0_i32, %c0_i32_0, %c0_i32_1 : i32, i32, i32
  }
  func.func @transform_7(%arg0: i32) -> (i32, i32, i32, i32) {
    %c0_i32 = arith.constant 0 : i32
    %c0_i32_0 = arith.constant 0 : i32
    %c0_i32_1 = arith.constant 0 : i32
    %c0_i32_2 = arith.constant 0 : i32
    %c0_i32_3 = arith.constant 0 : i32
    return %c0_i32, %c0_i32_0, %c0_i32_1, %c0_i32_2 : i32, i32, i32, i32
  }
  func.func @transform_8(%arg0: i32) -> (i32, i32) {
    %c0_i32 = arith.constant 0 : i32
    %c0_i32_0 = arith.constant 0 : i32
    %c0_i32_1 = arith.constant 0 : i32
    return %c0_i32, %c0_i32_0 : i32, i32
  }
  func.func @transform_9(%arg0: i32) -> (i32, i32, i32, i32) {
    %c0_i32 = arith.constant 0 : i32
    %c0_i32_0 = arith.constant 0 : i32
    %c0_i32_1 = arith.constant 0 : i32
    %c0_i32_2 = arith.constant 0 : i32
    return %arg0, %c0_i32, %c0_i32_0, %c0_i32_1 : i32, i32, i32, i32
  }
}

module attributes {stable_mosaic.version = 11 : i64} {
  func.func @_matmul_kernel(%arg0: i32, %arg1: i32, %arg2: memref<16x256xf32, #tpu.memory_space<vmem>>, %arg3: memref<256x128xf32, #tpu.memory_space<vmem>>, %arg4: memref<1x128xf32, #tpu.memory_space<vmem>>, %arg5: memref<16x128xf32, #tpu.memory_space<vmem>>) attributes {dimension_semantics = [#tpu.dimension_semantics<parallel>, #tpu.dimension_semantics<parallel>], iteration_bounds = array<i64: 1, 1>, scalar_prefetch = 0 : i64, scratch_operands = 0 : i64, tpu.core_type = #tpu.core_type<tc>, window_params = [{transform_indices = @transform_0, window_bounds = array<i64: 16, 256>}, {transform_indices = @transform_1, window_bounds = array<i64: 256, 128>}, {transform_indices = @transform_2, window_bounds = array<i64: 1, 128>}, {transform_indices = @transform_3, window_bounds = array<i64: 16, 128>}]} {
    %c0 = arith.constant 0 : index
    %c0_0 = arith.constant 0 : index
    %0 = vector.load %arg2[%c0, %c0_0] : memref<16x256xf32, #tpu.memory_space<vmem>>, vector<16x256xf32>
    %c0_1 = arith.constant 0 : index
    %c0_2 = arith.constant 0 : index
    %1 = vector.load %arg3[%c0_1, %c0_2] : memref<256x128xf32, #tpu.memory_space<vmem>>, vector<256x128xf32>
    %cst = arith.constant dense<0.000000e+00> : vector<16x128xf32>
    %2 = tpu.matmul %0, %1, %cst {dimension_numbers = #tpu.dot_dimension_numbers<[1], [0], [0], [1], [0, 0, 1, 1], [], []>} : vector<16x256xf32>, vector<256x128xf32>, vector<16x128xf32> -> vector<16x128xf32>
    %c0_3 = arith.constant 0 : index
    %c0_4 = arith.constant 0 : index
    %3 = vector.load %arg4[%c0_3, %c0_4] : memref<1x128xf32, #tpu.memory_space<vmem>>, vector<1x128xf32>
    %4 = vector.broadcast %3 : vector<1x128xf32> to vector<16x128xf32>
    %5 = arith.addf %2, %4 : vector<16x128xf32>
    %c0_5 = arith.constant 0 : index
    %c0_6 = arith.constant 0 : index
    %6 = vector.load %arg5[%c0_5, %c0_6] : memref<16x128xf32, #tpu.memory_space<vmem>>, vector<16x128xf32>
    tpu.vector_store %arg5[%c0_5, %c0_6], %5 {strides = array<i32>} : memref<16x128xf32, #tpu.memory_space<vmem>>, vector<16x128xf32>,
    return
  }
  func.func @transform_0(%arg0: i32, %arg1: i32) -> (i32, i32) {
    %c0_i32 = arith.constant 0 : i32
    %c0_i32_0 = arith.constant 0 : i32
    return %arg0, %c0_i32 : i32, i32
  }
  func.func @transform_1(%arg0: i32, %arg1: i32) -> (i32, i32) {
    %c0_i32 = arith.constant 0 : i32
    %c0_i32_0 = arith.constant 0 : i32
    return %c0_i32, %arg1 : i32, i32
  }
  func.func @transform_2(%arg0: i32, %arg1: i32) -> (i32, i32) {
    %c0_i32 = arith.constant 0 : i32
    %c0_i32_0 = arith.constant 0 : i32
    return %c0_i32, %arg1 : i32, i32
  }
  func.func @transform_3(%arg0: i32, %arg1: i32) -> (i32, i32) {
    %c0_i32 = arith.constant 0 : i32
    return %arg0, %arg1 : i32, i32
  }
}

module attributes {stable_mosaic.version = 11 : i64} {
  func.func @_ln_gelu_matmul_kernel(%arg0: i32, %arg1: i32, %arg2: memref<64x32xf32, #tpu.memory_space<vmem>>, %arg3: memref<1x32xf32, #tpu.memory_space<vmem>>, %arg4: memref<1x32xf32, #tpu.memory_space<vmem>>, %arg5: memref<32x256xf32, #tpu.memory_space<vmem>>, %arg6: memref<1x256xf32, #tpu.memory_space<vmem>>, %arg7: memref<64x256xf32, #tpu.memory_space<vmem>>) attributes {dimension_semantics = [#tpu.dimension_semantics<parallel>, #tpu.dimension_semantics<parallel>], iteration_bounds = array<i64: 1, 1>, scalar_prefetch = 0 : i64, scratch_operands = 0 : i64, tpu.core_type = #tpu.core_type<tc>, window_params = [{transform_indices = @transform_0, window_bounds = array<i64: 64, 32>}, {pipeline_mode = #tpu.pipeline_mode<synchronous>, transform_indices = @transform_1, window_bounds = array<i64: 1, 32>}, {pipeline_mode = #tpu.pipeline_mode<synchronous>, transform_indices = @transform_2, window_bounds = array<i64: 1, 32>}, {transform_indices = @transform_3, window_bounds = array<i64: 32, 256>}, {transform_indices = @transform_4, window_bounds = array<i64: 1, 256>}, {transform_indices = @transform_5, window_bounds = array<i64: 64, 256>}]} {
    %c0 = arith.constant 0 : index
    %c0_0 = arith.constant 0 : index
    %0 = vector.load %arg2[%c0, %c0_0] : memref<64x32xf32, #tpu.memory_space<vmem>>, vector<64x32xf32>
    %cst = arith.constant dense<0.000000e+00> : vector<64xf32>
    %1 = vector.multi_reduction <add>, %0, %cst [1] : vector<64x32xf32> to vector<64xf32>
    %2 = vector.shape_cast %1 : vector<64xf32> to vector<64x1xf32>
    %cst_1 = arith.constant 3.200000e+01 : f32
    %3 = vector.broadcast %cst_1 : f32 to vector<64x1xf32>
    %4 = arith.divf %2, %3 : vector<64x1xf32>
    %5 = vector.broadcast %4 : vector<64x1xf32> to vector<64x32xf32>
    %6 = arith.subf %0, %5 : vector<64x32xf32>
    %7 = vector.broadcast %4 : vector<64x1xf32> to vector<64x32xf32>
    %8 = arith.subf %0, %7 : vector<64x32xf32>
    %9 = arith.mulf %6, %8 : vector<64x32xf32>
    %cst_2 = arith.constant dense<0.000000e+00> : vector<64xf32>
    %10 = vector.multi_reduction <add>, %9, %cst_2 [1] : vector<64x32xf32> to vector<64xf32>
    %11 = vector.shape_cast %10 : vector<64xf32> to vector<64x1xf32>
    %cst_3 = arith.constant 3.200000e+01 : f32
    %12 = vector.broadcast %cst_3 : f32 to vector<64x1xf32>
    %13 = arith.divf %11, %12 : vector<64x1xf32>
    %14 = vector.broadcast %4 : vector<64x1xf32> to vector<64x32xf32>
    %15 = arith.subf %0, %14 : vector<64x32xf32>
    %cst_4 = arith.constant 9.99999974E-6 : f32
    %16 = vector.broadcast %cst_4 : f32 to vector<64x1xf32>
    %17 = arith.addf %13, %16 : vector<64x1xf32>
    %18 = math.rsqrt %17 : vector<64x1xf32>
    %19 = vector.broadcast %18 : vector<64x1xf32> to vector<64x32xf32>
    %20 = arith.mulf %15, %19 : vector<64x32xf32>
    %c0_5 = arith.constant 0 : index
    %c0_6 = arith.constant 0 : index
    %21 = vector.load %arg3[%c0_5, %c0_6] : memref<1x32xf32, #tpu.memory_space<vmem>>, vector<1x32xf32>
    %22 = vector.broadcast %21 : vector<1x32xf32> to vector<64x32xf32>
    %23 = arith.mulf %20, %22 : vector<64x32xf32>
    %c0_7 = arith.constant 0 : index
    %c0_8 = arith.constant 0 : index
    %24 = vector.load %arg4[%c0_7, %c0_8] : memref<1x32xf32, #tpu.memory_space<vmem>>, vector<1x32xf32>
    %25 = vector.broadcast %24 : vector<1x32xf32> to vector<64x32xf32>
    %26 = arith.addf %23, %25 : vector<64x32xf32>
    %cst_9 = arith.constant 5.000000e-01 : f32
    %27 = vector.broadcast %cst_9 : f32 to vector<64x32xf32>
    %28 = arith.mulf %27, %26 : vector<64x32xf32>
    %cst_10 = arith.constant 4.471500e-02 : f32
    %29 = vector.broadcast %cst_10 : f32 to vector<64x32xf32>
    %30 = arith.mulf %29, %26 : vector<64x32xf32>
    %31 = arith.mulf %30, %26 : vector<64x32xf32>
    %32 = arith.mulf %31, %26 : vector<64x32xf32>
    %33 = arith.addf %26, %32 : vector<64x32xf32>
    %cst_11 = arith.constant 0.797884583 : f32
    %34 = vector.broadcast %cst_11 : f32 to vector<64x32xf32>
    %35 = arith.mulf %34, %33 : vector<64x32xf32>
    %36 = math.tanh %35 : vector<64x32xf32>
    %cst_12 = arith.constant 1.000000e+00 : f32
    %37 = vector.broadcast %cst_12 : f32 to vector<64x32xf32>
    %38 = arith.addf %37, %36 : vector<64x32xf32>
    %39 = arith.mulf %28, %38 : vector<64x32xf32>
    %c0_13 = arith.constant 0 : index
    %c0_14 = arith.constant 0 : index
    %40 = vector.load %arg5[%c0_13, %c0_14] : memref<32x256xf32, #tpu.memory_space<vmem>>, vector<32x256xf32>
    %cst_15 = arith.constant dense<0.000000e+00> : vector<64x256xf32>
    %41 = tpu.matmul %39, %40, %cst_15 {dimension_numbers = #tpu.dot_dimension_numbers<[1], [0], [0], [1], [0, 0, 1, 1], [], []>} : vector<64x32xf32>, vector<32x256xf32>, vector<64x256xf32> -> vector<64x256xf32>
    %c0_16 = arith.constant 0 : index
    %c0_17 = arith.constant 0 : index
    %42 = vector.load %arg6[%c0_16, %c0_17] : memref<1x256xf32, #tpu.memory_space<vmem>>, vector<1x256xf32>
    %43 = vector.broadcast %42 : vector<1x256xf32> to vector<64x256xf32>
    %44 = arith.addf %41, %43 : vector<64x256xf32>
    %c0_18 = arith.constant 0 : index
    %c0_19 = arith.constant 0 : index
    %45 = vector.load %arg7[%c0_18, %c0_19] : memref<64x256xf32, #tpu.memory_space<vmem>>, vector<64x256xf32>
    tpu.vector_store %arg7[%c0_18, %c0_19], %44 {strides = array<i32>} : memref<64x256xf32, #tpu.memory_space<vmem>>, vector<64x256xf32>,
    return
  }
  func.func @transform_0(%arg0: i32, %arg1: i32) -> (i32, i32) {
    %c0_i32 = arith.constant 0 : i32
    %c0_i32_0 = arith.constant 0 : i32
    return %arg0, %c0_i32 : i32, i32
  }
  func.func @transform_1(%arg0: i32, %arg1: i32) -> (i32, i32) {
    %c0_i32 = arith.constant 0 : i32
    %c0_i32_0 = arith.constant 0 : i32
    %c0_i32_1 = arith.constant 0 : i32
    return %c0_i32, %c0_i32_0 : i32, i32
  }
  func.func @transform_2(%arg0: i32, %arg1: i32) -> (i32, i32) {
    %c0_i32 = arith.constant 0 : i32
    %c0_i32_0 = arith.constant 0 : i32
    %c0_i32_1 = arith.constant 0 : i32
    return %c0_i32, %c0_i32_0 : i32, i32
  }
  func.func @transform_3(%arg0: i32, %arg1: i32) -> (i32, i32) {
    %c0_i32 = arith.constant 0 : i32
    %c0_i32_0 = arith.constant 0 : i32
    return %c0_i32, %arg1 : i32, i32
  }
  func.func @transform_4(%arg0: i32, %arg1: i32) -> (i32, i32) {
    %c0_i32 = arith.constant 0 : i32
    %c0_i32_0 = arith.constant 0 : i32
    return %c0_i32, %arg1 : i32, i32
  }
  func.func @transform_5(%arg0: i32, %arg1: i32) -> (i32, i32) {
    %c0_i32 = arith.constant 0 : i32
    return %arg0, %arg1 : i32, i32
  }
}

module attributes {stable_mosaic.version = 11 : i64} {
  func.func @_bigru_kernel(%arg0: i32, %arg1: i32, %arg2: memref<8x8x1x3x32xf32, #tpu.memory_space<vmem>>, %arg3: memref<1x3x32x32xf32, #tpu.memory_space<vmem>>, %arg4: memref<1x3x1x32xf32, #tpu.memory_space<vmem>>, %arg5: memref<1x8x8x32xf32, #tpu.memory_space<vmem>>, %arg6: memref<8x32xf32, #tpu.memory_space<vmem>>) attributes {dimension_semantics = [#tpu.dimension_semantics<parallel>, #tpu.dimension_semantics<arbitrary>], iteration_bounds = array<i64: 2, 1>, scalar_prefetch = 0 : i64, scratch_operands = 1 : i64, tpu.core_type = #tpu.core_type<tc>, window_params = [{transform_indices = @transform_0, window_bounds = array<i64: 8, 8, 1, 3, 32>}, {transform_indices = @transform_1, window_bounds = array<i64: 1, 3, 32, 32>}, {transform_indices = @transform_2, window_bounds = array<i64: 1, 3, 1, 32>}, {transform_indices = @transform_3, window_bounds = array<i64: 1, 8, 8, 32>}]} {
    %c0_i32 = arith.constant 0 : i32
    %0 = arith.cmpi eq, %arg1, %c0_i32 : i32
    %1 = arith.extui %0 : i1 to i32
    %c0_i32_0 = arith.constant 0 : i32
    %2 = arith.cmpi ne, %1, %c0_i32_0 : i32
    scf.if %2 {
      %cst = arith.constant 0.000000e+00 : f32
      %20 = vector.broadcast %cst : f32 to vector<8x32xf32>
      %c0_25 = arith.constant 0 : index
      %c0_26 = arith.constant 0 : index
      %21 = vector.load %arg6[%c0_25, %c0_26] : memref<8x32xf32, #tpu.memory_space<vmem>>, vector<8x32xf32>
      tpu.vector_store %arg6[%c0_25, %c0_26], %20 {strides = array<i32>} : memref<8x32xf32, #tpu.memory_space<vmem>>, vector<8x32xf32>,
    } else {
    }
    %c0 = arith.constant 0 : index
    %c0_1 = arith.constant 0 : index
    %c0_2 = arith.constant 0 : index
    %c0_3 = arith.constant 0 : index
    %3 = vector.load %arg3[%c0, %c0_1, %c0_2, %c0_3] : memref<1x3x32x32xf32, #tpu.memory_space<vmem>>, vector<1x1x32x32xf32>
    %4 = vector.shape_cast %3 : vector<1x1x32x32xf32> to vector<32x32xf32>
    %c0_4 = arith.constant 0 : index
    %c1 = arith.constant 1 : index
    %c0_5 = arith.constant 0 : index
    %c0_6 = arith.constant 0 : index
    %5 = vector.load %arg3[%c0_4, %c1, %c0_5, %c0_6] : memref<1x3x32x32xf32, #tpu.memory_space<vmem>>, vector<1x1x32x32xf32>
    %6 = vector.shape_cast %5 : vector<1x1x32x32xf32> to vector<32x32xf32>
    %c0_7 = arith.constant 0 : index
    %c2 = arith.constant 2 : index
    %c0_8 = arith.constant 0 : index
    %c0_9 = arith.constant 0 : index
    %7 = vector.load %arg3[%c0_7, %c2, %c0_8, %c0_9] : memref<1x3x32x32xf32, #tpu.memory_space<vmem>>, vector<1x1x32x32xf32>
    %8 = vector.shape_cast %7 : vector<1x1x32x32xf32> to vector<32x32xf32>
    %c0_10 = arith.constant 0 : index
    %c0_11 = arith.constant 0 : index
    %c0_12 = arith.constant 0 : index
    %c0_13 = arith.constant 0 : index
    %9 = vector.load %arg4[%c0_10, %c0_11, %c0_12, %c0_13] : memref<1x3x1x32xf32, #tpu.memory_space<vmem>>, vector<1x1x1x32xf32>
    %10 = vector.shape_cast %9 : vector<1x1x1x32xf32> to vector<1x32xf32>
    %c0_14 = arith.constant 0 : index
    %c1_15 = arith.constant 1 : index
    %c0_16 = arith.constant 0 : index
    %c0_17 = arith.constant 0 : index
    %11 = vector.load %arg4[%c0_14, %c1_15, %c0_16, %c0_17] : memref<1x3x1x32xf32, #tpu.memory_space<vmem>>, vector<1x1x1x32xf32>
    %12 = vector.shape_cast %11 : vector<1x1x1x32xf32> to vector<1x32xf32>
    %c0_18 = arith.constant 0 : index
    %c2_19 = arith.constant 2 : index
    %c0_20 = arith.constant 0 : index
    %c0_21 = arith.constant 0 : index
    %13 = vector.load %arg4[%c0_18, %c2_19, %c0_20, %c0_21] : memref<1x3x1x32xf32, #tpu.memory_space<vmem>>, vector<1x1x1x32xf32>
    %14 = vector.shape_cast %13 : vector<1x1x1x32xf32> to vector<1x32xf32>
    %c2_i32 = arith.constant 2 : i32
    %15 = arith.muli %c2_i32, %arg1 : i32
    %c0_i32_22 = arith.constant 0 : i32
    %16 = arith.subi %c0_i32_22, %15 : i32
    %17 = arith.muli %arg0, %16 : i32
    %18 = arith.addi %17, %arg1 : i32
    %c0_i32_23 = arith.constant 0 : i32
    %c8_i32 = arith.constant 8 : i32
    %19 = arith.addi %c0_i32_23, %c8_i32 : i32
    %c1_i32 = arith.constant 1 : i32
    scf.for %arg7 = %c0_i32_23 to %19 step %c1_i32  : i32 {
      %c2_i32_25 = arith.constant 2 : i32
      %20 = arith.muli %c2_i32_25, %arg7 : i32
      %c7_i32 = arith.constant 7 : i32
      %21 = arith.subi %c7_i32, %20 : i32
      %22 = arith.muli %arg0, %21 : i32
      %23 = arith.addi %arg7, %22 : i32
      %c8_i32_26 = arith.constant 8 : i32
      %24 = arith.muli %18, %c8_i32_26 : i32
      %25 = arith.addi %24, %23 : i32
      %26 = arith.index_cast %23 : i32 to index
      %c0_27 = arith.constant 0 : index
      %c0_28 = arith.constant 0 : index
      %c0_29 = arith.constant 0 : index
      %c0_30 = arith.constant 0 : index
      %27 = vector.load %arg2[%26, %c0_27, %c0_28, %c0_29, %c0_30] : memref<8x8x1x3x32xf32, #tpu.memory_space<vmem>>, vector<1x8x1x3x32xf32>
      %28 = vector.shape_cast %27 : vector<1x8x1x3x32xf32> to vector<8x3x32xf32>
      %c0_31 = arith.constant 0 : index
      %c0_32 = arith.constant 0 : index
      %29 = vector.load %arg6[%c0_31, %c0_32] : memref<8x32xf32, #tpu.memory_space<vmem>>, vector<8x32xf32>
      %cst = arith.constant dense<0.000000e+00> : vector<8x32xf32>
      %30 = tpu.matmul %29, %4, %cst {dimension_numbers = #tpu.dot_dimension_numbers<[1], [0], [0], [1], [0, 0, 1, 1], [], []>} : vector<8x32xf32>, vector<32x32xf32>, vector<8x32xf32> -> vector<8x32xf32>
      %31 = vector.broadcast %10 : vector<1x32xf32> to vector<8x32xf32>
      %32 = arith.addf %30, %31 : vector<8x32xf32>
      %cst_33 = arith.constant dense<0.000000e+00> : vector<8x32xf32>
      %33 = tpu.matmul %29, %6, %cst_33 {dimension_numbers = #tpu.dot_dimension_numbers<[1], [0], [0], [1], [0, 0, 1, 1], [], []>} : vector<8x32xf32>, vector<32x32xf32>, vector<8x32xf32> -> vector<8x32xf32>
      %34 = vector.broadcast %12 : vector<1x32xf32> to vector<8x32xf32>
      %35 = arith.addf %33, %34 : vector<8x32xf32>
      %cst_34 = arith.constant dense<0.000000e+00> : vector<8x32xf32>
      %36 = tpu.matmul %29, %8, %cst_34 {dimension_numbers = #tpu.dot_dimension_numbers<[1], [0], [0], [1], [0, 0, 1, 1], [], []>} : vector<8x32xf32>, vector<32x32xf32>, vector<8x32xf32> -> vector<8x32xf32>
      %37 = vector.broadcast %14 : vector<1x32xf32> to vector<8x32xf32>
      %38 = arith.addf %36, %37 : vector<8x32xf32>
      %39 = vector.extract_strided_slice %28 {offsets = [0, 0, 0], sizes = [8, 1, 32], strides = [1, 1, 1]} : vector<8x3x32xf32> to vector<8x1x32xf32>
      %40 = vector.shape_cast %39 : vector<8x1x32xf32> to vector<8x32xf32>
      %41 = arith.addf %40, %32 : vector<8x32xf32>
      %42 = arith.negf %41 : vector<8x32xf32>
      %43 = math.exp %42 : vector<8x32xf32>
      %cst_35 = arith.constant 1.000000e+00 : f32
      %44 = vector.broadcast %cst_35 : f32 to vector<8x32xf32>
      %45 = arith.addf %44, %43 : vector<8x32xf32>
      %46 = arith.divf %44, %45 : vector<8x32xf32>
      %47 = vector.extract_strided_slice %28 {offsets = [0, 1, 0], sizes = [8, 1, 32], strides = [1, 1, 1]} : vector<8x3x32xf32> to vector<8x1x32xf32>
      %48 = vector.shape_cast %47 : vector<8x1x32xf32> to vector<8x32xf32>
      %49 = arith.addf %48, %35 : vector<8x32xf32>
      %50 = arith.negf %49 : vector<8x32xf32>
      %51 = math.exp %50 : vector<8x32xf32>
      %cst_36 = arith.constant 1.000000e+00 : f32
      %52 = vector.broadcast %cst_36 : f32 to vector<8x32xf32>
      %53 = arith.addf %52, %51 : vector<8x32xf32>
      %54 = arith.divf %52, %53 : vector<8x32xf32>
      %55 = vector.extract_strided_slice %28 {offsets = [0, 2, 0], sizes = [8, 1, 32], strides = [1, 1, 1]} : vector<8x3x32xf32> to vector<8x1x32xf32>
      %56 = vector.shape_cast %55 : vector<8x1x32xf32> to vector<8x32xf32>
      %57 = arith.mulf %46, %38 : vector<8x32xf32>
      %58 = arith.addf %56, %57 : vector<8x32xf32>
      %59 = math.tanh %58 : vector<8x32xf32>
      %cst_37 = arith.constant 1.000000e+00 : f32
      %60 = vector.broadcast %cst_37 : f32 to vector<8x32xf32>
      %61 = arith.subf %60, %54 : vector<8x32xf32>
      %62 = arith.mulf %61, %59 : vector<8x32xf32>
      %63 = arith.mulf %54, %29 : vector<8x32xf32>
      %64 = arith.addf %62, %63 : vector<8x32xf32>
      %c8_i32_38 = arith.constant 8 : i32
      %65 = arith.cmpi slt, %25, %c8_i32_38 : i32
      %66 = arith.select %65, %64, %29 : vector<8x32xf32>
      %c0_39 = arith.constant 0 : index
      %c0_40 = arith.constant 0 : index
      %67 = vector.load %arg6[%c0_39, %c0_40] : memref<8x32xf32, #tpu.memory_space<vmem>>, vector<8x32xf32>
      tpu.vector_store %arg6[%c0_39, %c0_40], %66 {strides = array<i32>} : memref<8x32xf32, #tpu.memory_space<vmem>>, vector<8x32xf32>,
      %c0_41 = arith.constant 0 : index
      %68 = arith.index_cast %23 : i32 to index
      %c0_42 = arith.constant 0 : index
      %c0_43 = arith.constant 0 : index
      %69 = vector.load %arg5[%c0_41, %68, %c0_42, %c0_43] : memref<1x8x8x32xf32, #tpu.memory_space<vmem>>, vector<1x1x8x32xf32>
      %70 = vector.shape_cast %69 : vector<1x1x8x32xf32> to vector<8x32xf32>
      %71 = vector.shape_cast %66 : vector<8x32xf32> to vector<1x1x8x32xf32>
      tpu.vector_store %arg5[%c0_41, %68, %c0_42, %c0_43], %71 {strides = array<i32>} : memref<1x8x8x32xf32, #tpu.memory_space<vmem>>, vector<1x1x8x32xf32>,
    }
    %c8_i32_24 = arith.constant 8 : i32
    return
  }
  func.func @transform_0(%arg0: i32, %arg1: i32) -> (i32, i32, i32, i32, i32) {
    %c2_i32 = arith.constant 2 : i32
    %0 = arith.muli %c2_i32, %arg1 : i32
    %c0_i32 = arith.constant 0 : i32
    %1 = arith.subi %c0_i32, %0 : i32
    %2 = arith.muli %arg0, %1 : i32
    %3 = arith.addi %2, %arg1 : i32
    %c0_i32_0 = arith.constant 0 : i32
    %c0_i32_1 = arith.constant 0 : i32
    %c0_i32_2 = arith.constant 0 : i32
    %c0_i32_3 = arith.constant 0 : i32
    return %3, %c0_i32_0, %arg0, %c0_i32_1, %c0_i32_2 : i32, i32, i32, i32, i32
  }
  func.func @transform_1(%arg0: i32, %arg1: i32) -> (i32, i32, i32, i32) {
    %c0_i32 = arith.constant 0 : i32
    %c0_i32_0 = arith.constant 0 : i32
    %c0_i32_1 = arith.constant 0 : i32
    %c0_i32_2 = arith.constant 0 : i32
    return %arg0, %c0_i32, %c0_i32_0, %c0_i32_1 : i32, i32, i32, i32
  }
  func.func @transform_2(%arg0: i32, %arg1: i32) -> (i32, i32, i32, i32) {
    %c0_i32 = arith.constant 0 : i32
    %c0_i32_0 = arith.constant 0 : i32
    %c0_i32_1 = arith.constant 0 : i32
    %c0_i32_2 = arith.constant 0 : i32
    return %arg0, %c0_i32, %c0_i32_0, %c0_i32_1 : i32, i32, i32, i32
  }
  func.func @transform_3(%arg0: i32, %arg1: i32) -> (i32, i32, i32, i32) {
    %c2_i32 = arith.constant 2 : i32
    %0 = arith.muli %c2_i32, %arg1 : i32
    %c0_i32 = arith.constant 0 : i32
    %1 = arith.subi %c0_i32, %0 : i32
    %2 = arith.muli %arg0, %1 : i32
    %3 = arith.addi %2, %arg1 : i32
    %c0_i32_0 = arith.constant 0 : i32
    %c0_i32_1 = arith.constant 0 : i32
    %c0_i32_2 = arith.constant 0 : i32
    return %arg0, %3, %c0_i32_0, %c0_i32_1 : i32, i32, i32, i32
  }
}

module attributes {stable_mosaic.version = 11 : i64} {
  func.func @_ln_gelu_matmul_kernel(%arg0: i32, %arg1: i32, %arg2: memref<16x64xf32, #tpu.memory_space<vmem>>, %arg3: memref<1x64xf32, #tpu.memory_space<vmem>>, %arg4: memref<1x64xf32, #tpu.memory_space<vmem>>, %arg5: memref<64x256xf32, #tpu.memory_space<vmem>>, %arg6: memref<1x256xf32, #tpu.memory_space<vmem>>, %arg7: memref<16x256xf32, #tpu.memory_space<vmem>>) attributes {dimension_semantics = [#tpu.dimension_semantics<parallel>, #tpu.dimension_semantics<parallel>], iteration_bounds = array<i64: 1, 1>, scalar_prefetch = 0 : i64, scratch_operands = 0 : i64, tpu.core_type = #tpu.core_type<tc>, window_params = [{transform_indices = @transform_0, window_bounds = array<i64: 16, 64>}, {pipeline_mode = #tpu.pipeline_mode<synchronous>, transform_indices = @transform_1, window_bounds = array<i64: 1, 64>}, {pipeline_mode = #tpu.pipeline_mode<synchronous>, transform_indices = @transform_2, window_bounds = array<i64: 1, 64>}, {transform_indices = @transform_3, window_bounds = array<i64: 64, 256>}, {transform_indices = @transform_4, window_bounds = array<i64: 1, 256>}, {transform_indices = @transform_5, window_bounds = array<i64: 16, 256>}]} {
    %c0 = arith.constant 0 : index
    %c0_0 = arith.constant 0 : index
    %0 = vector.load %arg2[%c0, %c0_0] : memref<16x64xf32, #tpu.memory_space<vmem>>, vector<16x64xf32>
    %cst = arith.constant dense<0.000000e+00> : vector<16xf32>
    %1 = vector.multi_reduction <add>, %0, %cst [1] : vector<16x64xf32> to vector<16xf32>
    %2 = vector.shape_cast %1 : vector<16xf32> to vector<16x1xf32>
    %cst_1 = arith.constant 6.400000e+01 : f32
    %3 = vector.broadcast %cst_1 : f32 to vector<16x1xf32>
    %4 = arith.divf %2, %3 : vector<16x1xf32>
    %5 = vector.broadcast %4 : vector<16x1xf32> to vector<16x64xf32>
    %6 = arith.subf %0, %5 : vector<16x64xf32>
    %7 = vector.broadcast %4 : vector<16x1xf32> to vector<16x64xf32>
    %8 = arith.subf %0, %7 : vector<16x64xf32>
    %9 = arith.mulf %6, %8 : vector<16x64xf32>
    %cst_2 = arith.constant dense<0.000000e+00> : vector<16xf32>
    %10 = vector.multi_reduction <add>, %9, %cst_2 [1] : vector<16x64xf32> to vector<16xf32>
    %11 = vector.shape_cast %10 : vector<16xf32> to vector<16x1xf32>
    %cst_3 = arith.constant 6.400000e+01 : f32
    %12 = vector.broadcast %cst_3 : f32 to vector<16x1xf32>
    %13 = arith.divf %11, %12 : vector<16x1xf32>
    %14 = vector.broadcast %4 : vector<16x1xf32> to vector<16x64xf32>
    %15 = arith.subf %0, %14 : vector<16x64xf32>
    %cst_4 = arith.constant 9.99999974E-6 : f32
    %16 = vector.broadcast %cst_4 : f32 to vector<16x1xf32>
    %17 = arith.addf %13, %16 : vector<16x1xf32>
    %18 = math.rsqrt %17 : vector<16x1xf32>
    %19 = vector.broadcast %18 : vector<16x1xf32> to vector<16x64xf32>
    %20 = arith.mulf %15, %19 : vector<16x64xf32>
    %c0_5 = arith.constant 0 : index
    %c0_6 = arith.constant 0 : index
    %21 = vector.load %arg3[%c0_5, %c0_6] : memref<1x64xf32, #tpu.memory_space<vmem>>, vector<1x64xf32>
    %22 = vector.broadcast %21 : vector<1x64xf32> to vector<16x64xf32>
    %23 = arith.mulf %20, %22 : vector<16x64xf32>
    %c0_7 = arith.constant 0 : index
    %c0_8 = arith.constant 0 : index
    %24 = vector.load %arg4[%c0_7, %c0_8] : memref<1x64xf32, #tpu.memory_space<vmem>>, vector<1x64xf32>
    %25 = vector.broadcast %24 : vector<1x64xf32> to vector<16x64xf32>
    %26 = arith.addf %23, %25 : vector<16x64xf32>
    %cst_9 = arith.constant 5.000000e-01 : f32
    %27 = vector.broadcast %cst_9 : f32 to vector<16x64xf32>
    %28 = arith.mulf %27, %26 : vector<16x64xf32>
    %cst_10 = arith.constant 4.471500e-02 : f32
    %29 = vector.broadcast %cst_10 : f32 to vector<16x64xf32>
    %30 = arith.mulf %29, %26 : vector<16x64xf32>
    %31 = arith.mulf %30, %26 : vector<16x64xf32>
    %32 = arith.mulf %31, %26 : vector<16x64xf32>
    %33 = arith.addf %26, %32 : vector<16x64xf32>
    %cst_11 = arith.constant 0.797884583 : f32
    %34 = vector.broadcast %cst_11 : f32 to vector<16x64xf32>
    %35 = arith.mulf %34, %33 : vector<16x64xf32>
    %36 = math.tanh %35 : vector<16x64xf32>
    %cst_12 = arith.constant 1.000000e+00 : f32
    %37 = vector.broadcast %cst_12 : f32 to vector<16x64xf32>
    %38 = arith.addf %37, %36 : vector<16x64xf32>
    %39 = arith.mulf %28, %38 : vector<16x64xf32>
    %c0_13 = arith.constant 0 : index
    %c0_14 = arith.constant 0 : index
    %40 = vector.load %arg5[%c0_13, %c0_14] : memref<64x256xf32, #tpu.memory_space<vmem>>, vector<64x256xf32>
    %cst_15 = arith.constant dense<0.000000e+00> : vector<16x256xf32>
    %41 = tpu.matmul %39, %40, %cst_15 {dimension_numbers = #tpu.dot_dimension_numbers<[1], [0], [0], [1], [0, 0, 1, 1], [], []>} : vector<16x64xf32>, vector<64x256xf32>, vector<16x256xf32> -> vector<16x256xf32>
    %c0_16 = arith.constant 0 : index
    %c0_17 = arith.constant 0 : index
    %42 = vector.load %arg6[%c0_16, %c0_17] : memref<1x256xf32, #tpu.memory_space<vmem>>, vector<1x256xf32>
    %43 = vector.broadcast %42 : vector<1x256xf32> to vector<16x256xf32>
    %44 = arith.addf %41, %43 : vector<16x256xf32>
    %c0_18 = arith.constant 0 : index
    %c0_19 = arith.constant 0 : index
    %45 = vector.load %arg7[%c0_18, %c0_19] : memref<16x256xf32, #tpu.memory_space<vmem>>, vector<16x256xf32>
    tpu.vector_store %arg7[%c0_18, %c0_19], %44 {strides = array<i32>} : memref<16x256xf32, #tpu.memory_space<vmem>>, vector<16x256xf32>,
    return
  }
  func.func @transform_0(%arg0: i32, %arg1: i32) -> (i32, i32) {
    %c0_i32 = arith.constant 0 : i32
    %c0_i32_0 = arith.constant 0 : i32
    return %arg0, %c0_i32 : i32, i32
  }
  func.func @transform_1(%arg0: i32, %arg1: i32) -> (i32, i32) {
    %c0_i32 = arith.constant 0 : i32
    %c0_i32_0 = arith.constant 0 : i32
    %c0_i32_1 = arith.constant 0 : i32
    return %c0_i32, %c0_i32_0 : i32, i32
  }
  func.func @transform_2(%arg0: i32, %arg1: i32) -> (i32, i32) {
    %c0_i32 = arith.constant 0 : i32
    %c0_i32_0 = arith.constant 0 : i32
    %c0_i32_1 = arith.constant 0 : i32
    return %c0_i32, %c0_i32_0 : i32, i32
  }
  func.func @transform_3(%arg0: i32, %arg1: i32) -> (i32, i32) {
    %c0_i32 = arith.constant 0 : i32
    %c0_i32_0 = arith.constant 0 : i32
    return %c0_i32, %arg1 : i32, i32
  }
  func.func @transform_4(%arg0: i32, %arg1: i32) -> (i32, i32) {
    %c0_i32 = arith.constant 0 : i32
    %c0_i32_0 = arith.constant 0 : i32
    return %c0_i32, %arg1 : i32, i32
  }
  func.func @transform_5(%arg0: i32, %arg1: i32) -> (i32, i32) {
    %c0_i32 = arith.constant 0 : i32
    return %arg0, %arg1 : i32, i32
  }
}

module attributes {stable_mosaic.version = 11 : i64} {
  func.func @_bigru_kernel(%arg0: i32, %arg1: i32, %arg2: memref<2x8x1x3x32xf32, #tpu.memory_space<vmem>>, %arg3: memref<1x3x32x32xf32, #tpu.memory_space<vmem>>, %arg4: memref<1x3x1x32xf32, #tpu.memory_space<vmem>>, %arg5: memref<1x2x8x32xf32, #tpu.memory_space<vmem>>, %arg6: memref<8x32xf32, #tpu.memory_space<vmem>>) attributes {dimension_semantics = [#tpu.dimension_semantics<parallel>, #tpu.dimension_semantics<arbitrary>], iteration_bounds = array<i64: 2, 1>, scalar_prefetch = 0 : i64, scratch_operands = 1 : i64, tpu.core_type = #tpu.core_type<tc>, window_params = [{transform_indices = @transform_0, window_bounds = array<i64: 2, 8, 1, 3, 32>}, {transform_indices = @transform_1, window_bounds = array<i64: 1, 3, 32, 32>}, {transform_indices = @transform_2, window_bounds = array<i64: 1, 3, 1, 32>}, {transform_indices = @transform_3, window_bounds = array<i64: 1, 2, 8, 32>}]} {
    %c0_i32 = arith.constant 0 : i32
    %0 = arith.cmpi eq, %arg1, %c0_i32 : i32
    %1 = arith.extui %0 : i1 to i32
    %c0_i32_0 = arith.constant 0 : i32
    %2 = arith.cmpi ne, %1, %c0_i32_0 : i32
    scf.if %2 {
      %cst = arith.constant 0.000000e+00 : f32
      %20 = vector.broadcast %cst : f32 to vector<8x32xf32>
      %c0_26 = arith.constant 0 : index
      %c0_27 = arith.constant 0 : index
      %21 = vector.load %arg6[%c0_26, %c0_27] : memref<8x32xf32, #tpu.memory_space<vmem>>, vector<8x32xf32>
      tpu.vector_store %arg6[%c0_26, %c0_27], %20 {strides = array<i32>} : memref<8x32xf32, #tpu.memory_space<vmem>>, vector<8x32xf32>,
    } else {
    }
    %c0 = arith.constant 0 : index
    %c0_1 = arith.constant 0 : index
    %c0_2 = arith.constant 0 : index
    %c0_3 = arith.constant 0 : index
    %3 = vector.load %arg3[%c0, %c0_1, %c0_2, %c0_3] : memref<1x3x32x32xf32, #tpu.memory_space<vmem>>, vector<1x1x32x32xf32>
    %4 = vector.shape_cast %3 : vector<1x1x32x32xf32> to vector<32x32xf32>
    %c0_4 = arith.constant 0 : index
    %c1 = arith.constant 1 : index
    %c0_5 = arith.constant 0 : index
    %c0_6 = arith.constant 0 : index
    %5 = vector.load %arg3[%c0_4, %c1, %c0_5, %c0_6] : memref<1x3x32x32xf32, #tpu.memory_space<vmem>>, vector<1x1x32x32xf32>
    %6 = vector.shape_cast %5 : vector<1x1x32x32xf32> to vector<32x32xf32>
    %c0_7 = arith.constant 0 : index
    %c2 = arith.constant 2 : index
    %c0_8 = arith.constant 0 : index
    %c0_9 = arith.constant 0 : index
    %7 = vector.load %arg3[%c0_7, %c2, %c0_8, %c0_9] : memref<1x3x32x32xf32, #tpu.memory_space<vmem>>, vector<1x1x32x32xf32>
    %8 = vector.shape_cast %7 : vector<1x1x32x32xf32> to vector<32x32xf32>
    %c0_10 = arith.constant 0 : index
    %c0_11 = arith.constant 0 : index
    %c0_12 = arith.constant 0 : index
    %c0_13 = arith.constant 0 : index
    %9 = vector.load %arg4[%c0_10, %c0_11, %c0_12, %c0_13] : memref<1x3x1x32xf32, #tpu.memory_space<vmem>>, vector<1x1x1x32xf32>
    %10 = vector.shape_cast %9 : vector<1x1x1x32xf32> to vector<1x32xf32>
    %c0_14 = arith.constant 0 : index
    %c1_15 = arith.constant 1 : index
    %c0_16 = arith.constant 0 : index
    %c0_17 = arith.constant 0 : index
    %11 = vector.load %arg4[%c0_14, %c1_15, %c0_16, %c0_17] : memref<1x3x1x32xf32, #tpu.memory_space<vmem>>, vector<1x1x1x32xf32>
    %12 = vector.shape_cast %11 : vector<1x1x1x32xf32> to vector<1x32xf32>
    %c0_18 = arith.constant 0 : index
    %c2_19 = arith.constant 2 : index
    %c0_20 = arith.constant 0 : index
    %c0_21 = arith.constant 0 : index
    %13 = vector.load %arg4[%c0_18, %c2_19, %c0_20, %c0_21] : memref<1x3x1x32xf32, #tpu.memory_space<vmem>>, vector<1x1x1x32xf32>
    %14 = vector.shape_cast %13 : vector<1x1x1x32xf32> to vector<1x32xf32>
    %c2_i32 = arith.constant 2 : i32
    %15 = arith.muli %c2_i32, %arg1 : i32
    %c0_i32_22 = arith.constant 0 : i32
    %16 = arith.subi %c0_i32_22, %15 : i32
    %17 = arith.muli %arg0, %16 : i32
    %18 = arith.addi %17, %arg1 : i32
    %c0_i32_23 = arith.constant 0 : i32
    %c2_i32_24 = arith.constant 2 : i32
    %19 = arith.addi %c0_i32_23, %c2_i32_24 : i32
    %c1_i32 = arith.constant 1 : i32
    scf.for %arg7 = %c0_i32_23 to %19 step %c1_i32  : i32 {
      %c2_i32_26 = arith.constant 2 : i32
      %20 = arith.muli %c2_i32_26, %arg7 : i32
      %c1_i32_27 = arith.constant 1 : i32
      %21 = arith.subi %c1_i32_27, %20 : i32
      %22 = arith.muli %arg0, %21 : i32
      %23 = arith.addi %arg7, %22 : i32
      %c2_i32_28 = arith.constant 2 : i32
      %24 = arith.muli %18, %c2_i32_28 : i32
      %25 = arith.addi %24, %23 : i32
      %26 = arith.index_cast %23 : i32 to index
      %c0_29 = arith.constant 0 : index
      %c0_30 = arith.constant 0 : index
      %c0_31 = arith.constant 0 : index
      %c0_32 = arith.constant 0 : index
      %27 = vector.load %arg2[%26, %c0_29, %c0_30, %c0_31, %c0_32] : memref<2x8x1x3x32xf32, #tpu.memory_space<vmem>>, vector<1x8x1x3x32xf32>
      %28 = vector.shape_cast %27 : vector<1x8x1x3x32xf32> to vector<8x3x32xf32>
      %c0_33 = arith.constant 0 : index
      %c0_34 = arith.constant 0 : index
      %29 = vector.load %arg6[%c0_33, %c0_34] : memref<8x32xf32, #tpu.memory_space<vmem>>, vector<8x32xf32>
      %cst = arith.constant dense<0.000000e+00> : vector<8x32xf32>
      %30 = tpu.matmul %29, %4, %cst {dimension_numbers = #tpu.dot_dimension_numbers<[1], [0], [0], [1], [0, 0, 1, 1], [], []>} : vector<8x32xf32>, vector<32x32xf32>, vector<8x32xf32> -> vector<8x32xf32>
      %31 = vector.broadcast %10 : vector<1x32xf32> to vector<8x32xf32>
      %32 = arith.addf %30, %31 : vector<8x32xf32>
      %cst_35 = arith.constant dense<0.000000e+00> : vector<8x32xf32>
      %33 = tpu.matmul %29, %6, %cst_35 {dimension_numbers = #tpu.dot_dimension_numbers<[1], [0], [0], [1], [0, 0, 1, 1], [], []>} : vector<8x32xf32>, vector<32x32xf32>, vector<8x32xf32> -> vector<8x32xf32>
      %34 = vector.broadcast %12 : vector<1x32xf32> to vector<8x32xf32>
      %35 = arith.addf %33, %34 : vector<8x32xf32>
      %cst_36 = arith.constant dense<0.000000e+00> : vector<8x32xf32>
      %36 = tpu.matmul %29, %8, %cst_36 {dimension_numbers = #tpu.dot_dimension_numbers<[1], [0], [0], [1], [0, 0, 1, 1], [], []>} : vector<8x32xf32>, vector<32x32xf32>, vector<8x32xf32> -> vector<8x32xf32>
      %37 = vector.broadcast %14 : vector<1x32xf32> to vector<8x32xf32>
      %38 = arith.addf %36, %37 : vector<8x32xf32>
      %39 = vector.extract_strided_slice %28 {offsets = [0, 0, 0], sizes = [8, 1, 32], strides = [1, 1, 1]} : vector<8x3x32xf32> to vector<8x1x32xf32>
      %40 = vector.shape_cast %39 : vector<8x1x32xf32> to vector<8x32xf32>
      %41 = arith.addf %40, %32 : vector<8x32xf32>
      %42 = arith.negf %41 : vector<8x32xf32>
      %43 = math.exp %42 : vector<8x32xf32>
      %cst_37 = arith.constant 1.000000e+00 : f32
      %44 = vector.broadcast %cst_37 : f32 to vector<8x32xf32>
      %45 = arith.addf %44, %43 : vector<8x32xf32>
      %46 = arith.divf %44, %45 : vector<8x32xf32>
      %47 = vector.extract_strided_slice %28 {offsets = [0, 1, 0], sizes = [8, 1, 32], strides = [1, 1, 1]} : vector<8x3x32xf32> to vector<8x1x32xf32>
      %48 = vector.shape_cast %47 : vector<8x1x32xf32> to vector<8x32xf32>
      %49 = arith.addf %48, %35 : vector<8x32xf32>
      %50 = arith.negf %49 : vector<8x32xf32>
      %51 = math.exp %50 : vector<8x32xf32>
      %cst_38 = arith.constant 1.000000e+00 : f32
      %52 = vector.broadcast %cst_38 : f32 to vector<8x32xf32>
      %53 = arith.addf %52, %51 : vector<8x32xf32>
      %54 = arith.divf %52, %53 : vector<8x32xf32>
      %55 = vector.extract_strided_slice %28 {offsets = [0, 2, 0], sizes = [8, 1, 32], strides = [1, 1, 1]} : vector<8x3x32xf32> to vector<8x1x32xf32>
      %56 = vector.shape_cast %55 : vector<8x1x32xf32> to vector<8x32xf32>
      %57 = arith.mulf %46, %38 : vector<8x32xf32>
      %58 = arith.addf %56, %57 : vector<8x32xf32>
      %59 = math.tanh %58 : vector<8x32xf32>
      %cst_39 = arith.constant 1.000000e+00 : f32
      %60 = vector.broadcast %cst_39 : f32 to vector<8x32xf32>
      %61 = arith.subf %60, %54 : vector<8x32xf32>
      %62 = arith.mulf %61, %59 : vector<8x32xf32>
      %63 = arith.mulf %54, %29 : vector<8x32xf32>
      %64 = arith.addf %62, %63 : vector<8x32xf32>
      %c2_i32_40 = arith.constant 2 : i32
      %65 = arith.cmpi slt, %25, %c2_i32_40 : i32
      %66 = arith.select %65, %64, %29 : vector<8x32xf32>
      %c0_41 = arith.constant 0 : index
      %c0_42 = arith.constant 0 : index
      %67 = vector.load %arg6[%c0_41, %c0_42] : memref<8x32xf32, #tpu.memory_space<vmem>>, vector<8x32xf32>
      tpu.vector_store %arg6[%c0_41, %c0_42], %66 {strides = array<i32>} : memref<8x32xf32, #tpu.memory_space<vmem>>, vector<8x32xf32>,
      %c0_43 = arith.constant 0 : index
      %68 = arith.index_cast %23 : i32 to index
      %c0_44 = arith.constant 0 : index
      %c0_45 = arith.constant 0 : index
      %69 = vector.load %arg5[%c0_43, %68, %c0_44, %c0_45] : memref<1x2x8x32xf32, #tpu.memory_space<vmem>>, vector<1x1x8x32xf32>
      %70 = vector.shape_cast %69 : vector<1x1x8x32xf32> to vector<8x32xf32>
      %71 = vector.shape_cast %66 : vector<8x32xf32> to vector<1x1x8x32xf32>
      tpu.vector_store %arg5[%c0_43, %68, %c0_44, %c0_45], %71 {strides = array<i32>} : memref<1x2x8x32xf32, #tpu.memory_space<vmem>>, vector<1x1x8x32xf32>,
    }
    %c2_i32_25 = arith.constant 2 : i32
    return
  }
  func.func @transform_0(%arg0: i32, %arg1: i32) -> (i32, i32, i32, i32, i32) {
    %c2_i32 = arith.constant 2 : i32
    %0 = arith.muli %c2_i32, %arg1 : i32
    %c0_i32 = arith.constant 0 : i32
    %1 = arith.subi %c0_i32, %0 : i32
    %2 = arith.muli %arg0, %1 : i32
    %3 = arith.addi %2, %arg1 : i32
    %c0_i32_0 = arith.constant 0 : i32
    %c0_i32_1 = arith.constant 0 : i32
    %c0_i32_2 = arith.constant 0 : i32
    %c0_i32_3 = arith.constant 0 : i32
    return %3, %c0_i32_0, %arg0, %c0_i32_1, %c0_i32_2 : i32, i32, i32, i32, i32
  }
  func.func @transform_1(%arg0: i32, %arg1: i32) -> (i32, i32, i32, i32) {
    %c0_i32 = arith.constant 0 : i32
    %c0_i32_0 = arith.constant 0 : i32
    %c0_i32_1 = arith.constant 0 : i32
    %c0_i32_2 = arith.constant 0 : i32
    return %arg0, %c0_i32, %c0_i32_0, %c0_i32_1 : i32, i32, i32, i32
  }
  func.func @transform_2(%arg0: i32, %arg1: i32) -> (i32, i32, i32, i32) {
    %c0_i32 = arith.constant 0 : i32
    %c0_i32_0 = arith.constant 0 : i32
    %c0_i32_1 = arith.constant 0 : i32
    %c0_i32_2 = arith.constant 0 : i32
    return %arg0, %c0_i32, %c0_i32_0, %c0_i32_1 : i32, i32, i32, i32
  }
  func.func @transform_3(%arg0: i32, %arg1: i32) -> (i32, i32, i32, i32) {
    %c2_i32 = arith.constant 2 : i32
    %0 = arith.muli %c2_i32, %arg1 : i32
    %c0_i32 = arith.constant 0 : i32
    %1 = arith.subi %c0_i32, %0 : i32
    %2 = arith.muli %arg0, %1 : i32
    %3 = arith.addi %2, %arg1 : i32
    %c0_i32_0 = arith.constant 0 : i32
    %c0_i32_1 = arith.constant 0 : i32
    %c0_i32_2 = arith.constant 0 : i32
    return %arg0, %3, %c0_i32_0, %c0_i32_1 : i32, i32, i32, i32
  }
}

module attributes {stable_mosaic.version = 11 : i64} {
  func.func @_classifier_kernel(%arg0: i32, %arg1: memref<16x64xf32, #tpu.memory_space<vmem>>, %arg2: memref<64x32xf32, #tpu.memory_space<vmem>>, %arg3: memref<1x32xf32, #tpu.memory_space<vmem>>, %arg4: memref<32x128xf32, #tpu.memory_space<vmem>>, %arg5: memref<1x128xf32, #tpu.memory_space<vmem>>, %arg6: memref<16x128xf32, #tpu.memory_space<vmem>>) attributes {dimension_semantics = [#tpu.dimension_semantics<parallel>], iteration_bounds = array<i64: 1>, scalar_prefetch = 0 : i64, scratch_operands = 0 : i64, tpu.core_type = #tpu.core_type<tc>, window_params = [{transform_indices = @transform_0, window_bounds = array<i64: 16, 64>}, {pipeline_mode = #tpu.pipeline_mode<synchronous>, transform_indices = @transform_1, window_bounds = array<i64: 64, 32>}, {pipeline_mode = #tpu.pipeline_mode<synchronous>, transform_indices = @transform_2, window_bounds = array<i64: 1, 32>}, {pipeline_mode = #tpu.pipeline_mode<synchronous>, transform_indices = @transform_3, window_bounds = array<i64: 32, 128>}, {pipeline_mode = #tpu.pipeline_mode<synchronous>, transform_indices = @transform_4, window_bounds = array<i64: 1, 128>}, {transform_indices = @transform_5, window_bounds = array<i64: 16, 128>}]} {
    %c0 = arith.constant 0 : index
    %c0_0 = arith.constant 0 : index
    %0 = vector.load %arg1[%c0, %c0_0] : memref<16x64xf32, #tpu.memory_space<vmem>>, vector<16x64xf32>
    %c0_1 = arith.constant 0 : index
    %c0_2 = arith.constant 0 : index
    %1 = vector.load %arg2[%c0_1, %c0_2] : memref<64x32xf32, #tpu.memory_space<vmem>>, vector<64x32xf32>
    %cst = arith.constant dense<0.000000e+00> : vector<16x32xf32>
    %2 = tpu.matmul %0, %1, %cst {dimension_numbers = #tpu.dot_dimension_numbers<[1], [0], [0], [1], [0, 0, 1, 1], [], []>} : vector<16x64xf32>, vector<64x32xf32>, vector<16x32xf32> -> vector<16x32xf32>
    %c0_3 = arith.constant 0 : index
    %c0_4 = arith.constant 0 : index
    %3 = vector.load %arg3[%c0_3, %c0_4] : memref<1x32xf32, #tpu.memory_space<vmem>>, vector<1x32xf32>
    %4 = vector.broadcast %3 : vector<1x32xf32> to vector<16x32xf32>
    %5 = arith.addf %2, %4 : vector<16x32xf32>
    %cst_5 = arith.constant 5.000000e-01 : f32
    %6 = vector.broadcast %cst_5 : f32 to vector<16x32xf32>
    %7 = arith.mulf %6, %5 : vector<16x32xf32>
    %cst_6 = arith.constant 4.471500e-02 : f32
    %8 = vector.broadcast %cst_6 : f32 to vector<16x32xf32>
    %9 = arith.mulf %8, %5 : vector<16x32xf32>
    %10 = arith.mulf %9, %5 : vector<16x32xf32>
    %11 = arith.mulf %10, %5 : vector<16x32xf32>
    %12 = arith.addf %5, %11 : vector<16x32xf32>
    %cst_7 = arith.constant 0.797884583 : f32
    %13 = vector.broadcast %cst_7 : f32 to vector<16x32xf32>
    %14 = arith.mulf %13, %12 : vector<16x32xf32>
    %15 = math.tanh %14 : vector<16x32xf32>
    %cst_8 = arith.constant 1.000000e+00 : f32
    %16 = vector.broadcast %cst_8 : f32 to vector<16x32xf32>
    %17 = arith.addf %16, %15 : vector<16x32xf32>
    %18 = arith.mulf %7, %17 : vector<16x32xf32>
    %c0_9 = arith.constant 0 : index
    %c0_10 = arith.constant 0 : index
    %19 = vector.load %arg4[%c0_9, %c0_10] : memref<32x128xf32, #tpu.memory_space<vmem>>, vector<32x128xf32>
    %cst_11 = arith.constant dense<0.000000e+00> : vector<16x128xf32>
    %20 = tpu.matmul %18, %19, %cst_11 {dimension_numbers = #tpu.dot_dimension_numbers<[1], [0], [0], [1], [0, 0, 1, 1], [], []>} : vector<16x32xf32>, vector<32x128xf32>, vector<16x128xf32> -> vector<16x128xf32>
    %c0_12 = arith.constant 0 : index
    %c0_13 = arith.constant 0 : index
    %21 = vector.load %arg5[%c0_12, %c0_13] : memref<1x128xf32, #tpu.memory_space<vmem>>, vector<1x128xf32>
    %22 = vector.broadcast %21 : vector<1x128xf32> to vector<16x128xf32>
    %23 = arith.addf %20, %22 : vector<16x128xf32>
    %c0_14 = arith.constant 0 : index
    %c0_15 = arith.constant 0 : index
    %24 = vector.load %arg6[%c0_14, %c0_15] : memref<16x128xf32, #tpu.memory_space<vmem>>, vector<16x128xf32>
    tpu.vector_store %arg6[%c0_14, %c0_15], %23 {strides = array<i32>} : memref<16x128xf32, #tpu.memory_space<vmem>>, vector<16x128xf32>,
    return
  }
  func.func @transform_0(%arg0: i32) -> (i32, i32) {
    %c0_i32 = arith.constant 0 : i32
    %c0_i32_0 = arith.constant 0 : i32
    return %arg0, %c0_i32 : i32, i32
  }
  func.func @transform_1(%arg0: i32) -> (i32, i32) {
    %c0_i32 = arith.constant 0 : i32
    %c0_i32_0 = arith.constant 0 : i32
    %c0_i32_1 = arith.constant 0 : i32
    return %c0_i32, %c0_i32_0 : i32, i32
  }
  func.func @transform_2(%arg0: i32) -> (i32, i32) {
    %c0_i32 = arith.constant 0 : i32
    %c0_i32_0 = arith.constant 0 : i32
    %c0_i32_1 = arith.constant 0 : i32
    return %c0_i32, %c0_i32_0 : i32, i32
  }
  func.func @transform_3(%arg0: i32) -> (i32, i32) {
    %c0_i32 = arith.constant 0 : i32
    %c0_i32_0 = arith.constant 0 : i32
    %c0_i32_1 = arith.constant 0 : i32
    return %c0_i32, %c0_i32_0 : i32, i32
  }
  func.func @transform_4(%arg0: i32) -> (i32, i32) {
    %c0_i32 = arith.constant 0 : i32
    %c0_i32_0 = arith.constant 0 : i32
    %c0_i32_1 = arith.constant 0 : i32
    return %c0_i32, %c0_i32_0 : i32, i32
  }
  func.func @transform_5(%arg0: i32) -> (i32, i32) {
    %c0_i32 = arith.constant 0 : i32
    %c0_i32_0 = arith.constant 0 : i32
    return %arg0, %c0_i32 : i32, i32
  }
}

</mosaic_0001>

<bundles_post_ra>
// kernel: _lambda_.8
= control target key start
LH: loop header
LB: loop body
LE: loop exit
PB: predicated region body
PF: predicated region fallthrough
CT: control target
= control target key end

     0   :  { %vm85_vm0 = vcmask 1040384   ;;  %vm36_vm1 = vcmask 72704   ;;  %s339_s1 = inlined_call_operand.vmem [shape: f32[9,128], index: 1, kind: input, shape index: {}]   ;;  %s340_s0 = inlined_call_operand.vmem [shape: f32[128,9], index: 0, kind: input, shape index: {}]   ;;  %s341_s2 = inlined_call_operand.vmem [shape: f32[1,128], index: 2, kind: input, shape index: {}]   ;;  %s342_s3 = inlined_call_operand.vmem [shape: f32[128,128], index: 3, kind: output, shape index: {}]  }
   0x1   :  { %v31_v0 = vld [vmem:[%s339_s1 + $0x8] sm:$0x1]  ;;  %v30_v1 = vld [vmem:[%s339_s1] sm:$0xff]  ;;  %v24_v10 = vld [vmem:[%s340_s0 + $0x50] sm:$0xff] }
   0x2   :  { %192 = vmatpush.msk.msra.mxu2 %vm85_vm0, %v31_v0  ;;  %193 = vmatpush.msk.msra.mxu3 %vm85_vm0, %v31_v0  ;;  %v22_v2 = vld [vmem:[%s340_s0 + $0x40] sm:$0xff]  ;;  %v23_v6 = vld [vmem:[%s340_s0 + $0x48] sm:$0xff]  ;;  %v28_v11 = vld [vmem:[%s340_s0 + $0x70] sm:$0xff] }
   0x3   :  { %v26_v3 = vld [vmem:[%s340_s0 + $0x60] sm:$0xff]  ;;  %174 = vmatpush.msk.msra.mxu0 %vm85_vm0, %v31_v0  ;;  %191 = vmatpush.msk.msra.mxu1 %vm85_vm0, %v31_v0  ;;  %v27_v7 = vld [vmem:[%s340_s0 + $0x68] sm:$0xff]  ;;  %v16_v12 = vld [vmem:[%s340_s0 + $0x10] sm:$0xff] }
   0x4   :  { %195 = vmatpush.msra.mxu2 %v30_v1  ;;  %196 = vmatpush.msra.mxu3 %v30_v1  ;;  %v14_v4 = vld [vmem:[%s340_s0] sm:$0xff]  ;;  %v15_v8 = vld [vmem:[%s340_s0 + $0x8] sm:$0xff]  ;;  %v20_v13 = vld [vmem:[%s340_s0 + $0x30] sm:$0xff] }
   0x5   :  { %v18_v5 = vld [vmem:[%s340_s0 + $0x20] sm:$0xff]  ;;  %183 = vmatmul.msk.f32.vlgmr.msra.gmra.mxu2 %vm36_vm1, %v22_v2  ;;  %187 = vmatmul.msk.f32.vlgmr.msra.gmra.mxu3 %vm36_vm1, %v26_v3  ;;  %v19_v9 = vld [vmem:[%s340_s0 + $0x28] sm:$0xff]  ;;  %v25_v14 = vld [vmem:[%s340_s0 + $0x58] sm:$0xff] }
   0x6   :  { %104 = vmatpush.msra.mxu0 %v30_v1  ;;  %194 = vmatpush.msra.mxu1 %v30_v1  ;;  %v29_v15 = vld [vmem:[%s340_s0 + $0x78] sm:$0xff]  ;;  %v197_v18 = vld [vmem:[%s341_s2] ss:$0 sm:$0xff] }
   0x7   :  { %175 = vmatmul.msk.f32.vlgmr.msra.gmra.mxu0 %vm36_vm1, %v14_v4  ;;  %179 = vmatmul.msk.f32.vlgmr.msra.gmra.mxu1 %vm36_vm1, %v18_v5  ;;  %v17_v16 = vld [vmem:[%s340_s0 + $0x18] sm:$0xff] }
   0x8   :  { %v21_v17 = vld [vmem:[%s340_s0 + $0x38] sm:$0xff] }
   0xd   :  { %184 = vmatmul.msk.f32.gmra.mxu2 %vm36_vm1, %v23_v6  ;;  %188 = vmatmul.msk.f32.gmra.mxu3 %vm36_vm1, %v27_v7 }
   0xf   :  { %176 = vmatmul.msk.f32.gmra.mxu0 %vm36_vm1, %v15_v8  ;;  %180 = vmatmul.msk.f32.gmra.mxu1 %vm36_vm1, %v19_v9 }
  0x15   :  { %185 = vmatmul.msk.f32.gmra.mxu2 %vm36_vm1, %v24_v10  ;;  %189 = vmatmul.msk.f32.gmra.mxu3 %vm36_vm1, %v28_v11 }
  0x17   :  { %177 = vmatmul.msk.f32.gmra.mxu0 %vm36_vm1, %v16_v12  ;;  %181 = vmatmul.msk.f32.gmra.mxu1 %vm36_vm1, %v20_v13 }
  0x1d   :  { %186 = vmatmul.msk.f32.gmra.mxu2 %vm36_vm1, %v25_v14  ;;  %190 = vmatmul.msk.f32.gmra.mxu3 %vm36_vm1, %v29_v15 }
  0x1f   :  { %178 = vmatmul.msk.f32.gmra.mxu0 %vm36_vm1, %v17_v16  ;;  %182 = vmatmul.msk.f32.gmra.mxu1 %vm36_vm1, %v21_v17 }
  0x84   :  { %v106_v19 = vpop.f32.mrf.mxu0  ;;  %v118_v20 = vpop.f32.mrf.mxu1 }
  0x85   :  { %v107_v21 = vadd.f32 %v197_v18, %v106_v19  ;;  %v119_v22 = vadd.f32 %v197_v18, %v118_v20 }
  0x87   :  { %154 = vst [vmem:[%s342_s3] sm:$0xff] %v107_v21 }
  0x88   :  { %158 = vst [vmem:[%s342_s3 + $0x20] sm:$0xff] %v119_v22  ;;  %v130_v23 = vpop.f32.mrf.mxu2  ;;  %v142_v24 = vpop.f32.mrf.mxu3 }
  0x89   :  { %v131_v25 = vadd.f32 %v197_v18, %v130_v23  ;;  %v143_v26 = vadd.f32 %v197_v18, %v142_v24 }
  0x8b   :  { %162 = vst [vmem:[%s342_s3 + $0x40] sm:$0xff] %v131_v25 }
  0x8c   :  { %166 = vst [vmem:[%s342_s3 + $0x60] sm:$0xff] %v143_v26  ;;  %v109_v27 = vpop.f32.mrf.mxu0  ;;  %v121_v28 = vpop.f32.mrf.mxu1 }
  0x8d   :  { %v110_v29 = vadd.f32 %v197_v18, %v109_v27  ;;  %v122_v30 = vadd.f32 %v197_v18, %v121_v28 }
  0x8f   :  { %155 = vst [vmem:[%s342_s3 + $0x8] sm:$0xff] %v110_v29 }
  0x90   :  { %159 = vst [vmem:[%s342_s3 + $0x28] sm:$0xff] %v122_v30  ;;  %v133_v31 = vpop.f32.mrf.mxu2  ;;  %v145_v32 = vpop.f32.mrf.mxu3 }
  0x91   :  { %v134_v33 = vadd.f32 %v197_v18, %v133_v31  ;;  %v146_v34 = vadd.f32 %v197_v18, %v145_v32 }
  0x93   :  { %163 = vst [vmem:[%s342_s3 + $0x48] sm:$0xff] %v134_v33 }
  0x94   :  { %167 = vst [vmem:[%s342_s3 + $0x68] sm:$0xff] %v146_v34  ;;  %v112_v35 = vpop.f32.mrf.mxu0  ;;  %v124_v36 = vpop.f32.mrf.mxu1 }
  0x95   :  { %v113_v37 = vadd.f32 %v197_v18, %v112_v35  ;;  %v125_v38 = vadd.f32 %v197_v18, %v124_v36 }
  0x97   :  { %156 = vst [vmem:[%s342_s3 + $0x10] sm:$0xff] %v113_v37 }
  0x98   :  { %160 = vst [vmem:[%s342_s3 + $0x30] sm:$0xff] %v125_v38  ;;  %v136_v39 = vpop.f32.mrf.mxu2  ;;  %v148_v40 = vpop.f32.mrf.mxu3 }
  0x99   :  { %v137_v41 = vadd.f32 %v197_v18, %v136_v39  ;;  %v149_v42 = vadd.f32 %v197_v18, %v148_v40 }
  0x9b   :  { %164 = vst [vmem:[%s342_s3 + $0x50] sm:$0xff] %v137_v41 }
  0x9c   :  { %168 = vst [vmem:[%s342_s3 + $0x70] sm:$0xff] %v149_v42  ;;  %v115_v43 = vpop.f32.mrf.mxu0  ;;  %v127_v44 = vpop.f32.mrf.mxu1 }
  0x9d   :  { %v116_v45 = vadd.f32 %v197_v18, %v115_v43  ;;  %v128_v46 = vadd.f32 %v197_v18, %v127_v44 }
  0x9f   :  { %157 = vst [vmem:[%s342_s3 + $0x18] sm:$0xff] %v116_v45 }
  0xa0   :  { %161 = vst [vmem:[%s342_s3 + $0x38] sm:$0xff] %v128_v46  ;;  %v139_v47 = vpop.f32.mrf.mxu2  ;;  %v151_v48 = vpop.f32.mrf.mxu3 }
  0xa1   :  { %v140_v49 = vadd.f32 %v197_v18, %v139_v47  ;;  %v152_v50 = vadd.f32 %v197_v18, %v151_v48 }
  0xa3   :  { %165 = vst [vmem:[%s342_s3 + $0x58] sm:$0xff] %v140_v49 }
  0xa4   :  { %169 = vst [vmem:[%s342_s3 + $0x78] sm:$0xff] %v152_v50 }

// kernel: _lambda_.10
= control target key start
LH: loop header
LB: loop body
LE: loop exit
PB: predicated region body
PF: predicated region fallthrough
CT: control target
= control target key end

     0   :  { %s276_s1 = inlined_call_operand.vmem [shape: f32[256,128], index: 1, kind: input, shape index: {}]   ;;  %s277_s2 = inlined_call_operand.vmem [shape: f32[1,128], index: 2, kind: input, shape index: {}]   ;;  %s278_s0 = inlined_call_operand.vmem [shape: f32[16,256], index: 0, kind: input, shape index: {}]   ;;  %s279_s3 = inlined_call_operand.vmem [shape: f32[16,128], index: 3, kind: output, shape index: {}]  }
   0x1   :  { %v33_v0 = vld [vmem:[%s276_s1 + $0x78] sm:$0xff]  ;;  %v32_v1 = vld [vmem:[%s276_s1 + $0x70] sm:$0xff]  ;;  %v31_v4 = vld [vmem:[%s276_s1 + $0x68] sm:$0xff] }
   0x2   :  { %v49_v2 = vld [vmem:[%s276_s1 + $0xf8] sm:$0xff]  ;;  %106 = vmatpush.msra.mxu2 %v33_v0  ;;  %v48_v3 = vld [vmem:[%s276_s1 + $0xf0] sm:$0xff]  ;;  %54 = vmatpush.msra.mxu0 %v33_v0  ;;  %v47_v5 = vld [vmem:[%s276_s1 + $0xe8] sm:$0xff] }
   0x3   :  { %122 = vmatpush.msra.mxu3 %v49_v2  ;;  %77 = vmatpush.msra.mxu1 %v49_v2  ;;  %v30_v6 = vld [vmem:[%s276_s1 + $0x60] sm:$0xff]  ;;  %v29_v8 = vld [vmem:[%s276_s1 + $0x58] sm:$0xff]  ;;  %v28_v10 = vld [vmem:[%s276_s1 + $0x50] sm:$0xff] }
   0x4   :  { %107 = vmatpush.msra.mxu2 %v32_v1  ;;  %55 = vmatpush.msra.mxu0 %v32_v1  ;;  %v46_v7 = vld [vmem:[%s276_s1 + $0xe0] sm:$0xff]  ;;  %v45_v9 = vld [vmem:[%s276_s1 + $0xd8] sm:$0xff]  ;;  %v44_v11 = vld [vmem:[%s276_s1 + $0xd0] sm:$0xff] }
   0x5   :  { %123 = vmatpush.msra.mxu3 %v48_v3  ;;  %78 = vmatpush.msra.mxu1 %v48_v3  ;;  %v27_v12 = vld [vmem:[%s276_s1 + $0x48] sm:$0xff]  ;;  %v26_v14 = vld [vmem:[%s276_s1 + $0x40] sm:$0xff]  ;;  %v25_v16 = vld [vmem:[%s276_s1 + $0x38] sm:$0xff] }
   0x6   :  { %108 = vmatpush.msra.mxu2 %v31_v4  ;;  %56 = vmatpush.msra.mxu0 %v31_v4  ;;  %v43_v13 = vld [vmem:[%s276_s1 + $0xc8] sm:$0xff]  ;;  %v42_v15 = vld [vmem:[%s276_s1 + $0xc0] sm:$0xff]  ;;  %v41_v17 = vld [vmem:[%s276_s1 + $0xb8] sm:$0xff] }
   0x7   :  { %124 = vmatpush.msra.mxu3 %v47_v5  ;;  %79 = vmatpush.msra.mxu1 %v47_v5  ;;  %v24_v18 = vld [vmem:[%s276_s1 + $0x30] sm:$0xff]  ;;  %v23_v20 = vld [vmem:[%s276_s1 + $0x28] sm:$0xff]  ;;  %v22_v22 = vld [vmem:[%s276_s1 + $0x20] sm:$0xff] }
   0x8   :  { %109 = vmatpush.msra.mxu2 %v30_v6  ;;  %57 = vmatpush.msra.mxu0 %v30_v6  ;;  %v40_v19 = vld [vmem:[%s276_s1 + $0xb0] sm:$0xff]  ;;  %v39_v21 = vld [vmem:[%s276_s1 + $0xa8] sm:$0xff]  ;;  %v38_v23 = vld [vmem:[%s276_s1 + $0xa0] sm:$0xff] }
   0x9   :  { %125 = vmatpush.msra.mxu3 %v46_v7  ;;  %80 = vmatpush.msra.mxu1 %v46_v7  ;;  %v21_v24 = vld [vmem:[%s276_s1 + $0x18] sm:$0xff]  ;;  %v20_v26 = vld [vmem:[%s276_s1 + $0x10] sm:$0xff]  ;;  %v19_v28 = vld [vmem:[%s276_s1 + $0x8] sm:$0xff] }
   0xa   :  { %110 = vmatpush.msra.mxu2 %v29_v8  ;;  %58 = vmatpush.msra.mxu0 %v29_v8  ;;  %v37_v25 = vld [vmem:[%s276_s1 + $0x98] sm:$0xff]  ;;  %v36_v27 = vld [vmem:[%s276_s1 + $0x90] sm:$0xff]  ;;  %v35_v29 = vld [vmem:[%s276_s1 + $0x88] sm:$0xff] }
   0xb   :  { %126 = vmatpush.msra.mxu3 %v45_v9  ;;  %81 = vmatpush.msra.mxu1 %v45_v9  ;;  %v18_v30 = vld [vmem:[%s276_s1] sm:$0xff]  ;;  %v16_v32 = vld [vmem:[%s278_s0 + $0x10] sm:$0xff]  ;;  %v17_v33 = vld [vmem:[%s278_s0 + $0x18] sm:$0xff] }
   0xc   :  { %111 = vmatpush.msra.mxu2 %v28_v10  ;;  %59 = vmatpush.msra.mxu0 %v28_v10  ;;  %v34_v31 = vld [vmem:[%s276_s1 + $0x80] sm:$0xff]  ;;  %v15_v35 = vld [vmem:[%s278_s0 + $0x8] sm:$0xff] }
   0xd   :  { %127 = vmatpush.msra.mxu3 %v44_v11  ;;  %82 = vmatpush.msra.mxu1 %v44_v11  ;;  %v14_v34 = vld [vmem:[%s278_s0] sm:$0xff] }
   0xe   :  { %112 = vmatpush.msra.mxu2 %v27_v12  ;;  %60 = vmatpush.msra.mxu0 %v27_v12  ;;  %v138_v36 = vld [vmem:[%s277_s2] ss:$0 sm:$0xff] }
   0xf   :  { %128 = vmatpush.msra.mxu3 %v43_v13  ;;  %83 = vmatpush.msra.mxu1 %v43_v13 }
  0x10   :  { %113 = vmatpush.msra.mxu2 %v26_v14  ;;  %61 = vmatpush.msra.mxu0 %v26_v14 }
  0x11   :  { %129 = vmatpush.msra.mxu3 %v42_v15  ;;  %84 = vmatpush.msra.mxu1 %v42_v15 }
  0x12   :  { %114 = vmatpush.msra.mxu2 %v25_v16  ;;  %62 = vmatpush.msra.mxu0 %v25_v16 }
  0x13   :  { %130 = vmatpush.msra.mxu3 %v41_v17  ;;  %85 = vmatpush.msra.mxu1 %v41_v17 }
  0x14   :  { %115 = vmatpush.msra.mxu2 %v24_v18  ;;  %63 = vmatpush.msra.mxu0 %v24_v18 }
  0x15   :  { %131 = vmatpush.msra.mxu3 %v40_v19  ;;  %86 = vmatpush.msra.mxu1 %v40_v19 }
  0x16   :  { %116 = vmatpush.msra.mxu2 %v23_v20  ;;  %64 = vmatpush.msra.mxu0 %v23_v20 }
  0x17   :  { %132 = vmatpush.msra.mxu3 %v39_v21  ;;  %87 = vmatpush.msra.mxu1 %v39_v21 }
  0x18   :  { %117 = vmatpush.msra.mxu2 %v22_v22  ;;  %65 = vmatpush.msra.mxu0 %v22_v22 }
  0x19   :  { %133 = vmatpush.msra.mxu3 %v38_v23  ;;  %88 = vmatpush.msra.mxu1 %v38_v23 }
  0x1a   :  { %118 = vmatpush.msra.mxu2 %v21_v24  ;;  %66 = vmatpush.msra.mxu0 %v21_v24 }
  0x1b   :  { %134 = vmatpush.msra.mxu3 %v37_v25  ;;  %89 = vmatpush.msra.mxu1 %v37_v25 }
  0x1c   :  { %119 = vmatpush.msra.mxu2 %v20_v26  ;;  %67 = vmatpush.msra.mxu0 %v20_v26 }
  0x1d   :  { %135 = vmatpush.msra.mxu3 %v36_v27  ;;  %90 = vmatpush.msra.mxu1 %v36_v27 }
  0x1e   :  { %120 = vmatpush.msra.mxu2 %v19_v28  ;;  %68 = vmatpush.msra.mxu0 %v19_v28 }
  0x1f   :  { %136 = vmatpush.msra.mxu3 %v35_v29  ;;  %91 = vmatpush.msra.mxu1 %v35_v29 }
  0x20   :  { %121 = vmatpush.msra.mxu2 %v18_v30  ;;  %69 = vmatpush.msra.mxu0 %v18_v30 }
  0x21   :  { %137 = vmatpush.msra.mxu3 %v34_v31  ;;  %73 = vmatmul.f32.vlgmr.msra.gmra.mxu2 %v16_v32 }
  0x22   :  { %96 = vmatmul.f32.vlgmr.msra.gmra.mxu3 %v17_v33  ;;  %92 = vmatpush.msra.mxu1 %v34_v31 }
  0x23   :  { %70 = vmatmul.f32.vlgmr.msra.gmra.mxu0 %v14_v34  ;;  %93 = vmatmul.f32.vlgmr.msra.gmra.mxu1 %v15_v35 }
  0xa0   :  { %v71_v37 = vpop.f32.mrf.mxu0  ;;  %v94_v38 = vpop.f32.mrf.mxu1 }
  0xa1   :  { %v72_v39 = vadd.f32 %v138_v36, %v71_v37 }
  0xa3   :  { %v95_v40 = vadd.f32 %v94_v38, %v72_v39 }
  0xa4   :  { %v74_v41 = vpop.f32.mrf.mxu2 }
  0xa5   :  { %v97_v42 = vpop.f32.mrf.mxu3  ;;  %v75_v43 = vadd.f32 %v138_v36, %v74_v41  ;;  %100 = vst [vmem:[%s279_s3] sm:$0xff] %v95_v40 }
  0xa7   :  { %v98_v44 = vadd.f32 %v97_v42, %v75_v43 }
  0xa9   :  { %101 = vst [vmem:[%s279_s3 + $0x8] sm:$0xff] %v98_v44 }

// kernel: _lambda_.9
= control target key start
LH: loop header
LB: loop body
LE: loop exit
PB: predicated region body
PF: predicated region fallthrough
CT: control target
= control target key end

     0   :  { %s1817_s30 = smov 0   ;;  %s2690_s0 = inlined_call_operand.vmem [shape: f32[2,8,8,32], index: 0, kind: input, shape index: {}]   ;;  %s2691_s1 = inlined_call_operand.vmem [shape: f32[8,1,1], index: 1, kind: input, shape index: {}, may-alias: {1,5}]   ;;  %s2692_s2 = inlined_call_operand.vmem [shape: f32[8,1,1], index: 2, kind: input, shape index: {}, may-alias: {2,6}]   ;;  %s2693_s3 = inlined_call_operand.vmem [shape: f32[3,3,32,32], index: 3, kind: input, shape index: {}]   ;;  %s2694_s4 = inlined_call_operand.vmem [shape: f32[1,32], index: 4, kind: input, shape index: {}]   ;;  %s2695_s5 = inlined_call_operand.vmem [shape: f32[8,1,1], index: 5, kind: input, shape index: {}, may-alias: {1,5}]   ;;  %s2696_s6 = inlined_call_operand.vmem [shape: f32[8,1,1], index: 6, kind: input, shape index: {}, may-alias: {2,6}]   ;;  %s2697_s7 = inlined_call_operand.vmem [shape: f32[3,3,32,32], index: 7, kind: input, shape index: {}]   ;;  %s2698_s8 = inlined_call_operand.vmem [shape: f32[1,32], index: 8, kind: input, shape index: {}]   ;;  %s2699_s9 = inlined_call_operand.vmem [shape: f32[2,8,8,32], index: 9, kind: output, shape index: {}]  }
   0x1 LB: > { %s1594_s10 = sadd.s32 4294967295, %s1755_s30   ;;  %p1598_p0 = scmp.ge.s32.totalorder %s1755_s30, 1  ;;  %s1755_s30 = sphi %s1817_s30, %s19_s30  }
   0x2   : > { %p287_p1 = scmp.lt.s32.totalorder %s1755_s30, 3 }
   0x4   : > { %p288_p2 = pnand %p1598_p0, %p287_p1 }
   0x5   : > { %p323_p3 = scmp.lt.s32.totalorder (!%p288_p2), %s1594_s10, 1  ;;  %s2208_s13 = smov (!%p288_p2), 0  }
   0x6   : > { %291 = sbr.rel (%p288_p2) target bundleno = 615 (0x267), region = 56 }
   0xb   : > { %v1670_v0 = vld [vmem:[%s2691_s1 + $0x4] ss:$0 sm:$0xff]  ;;  %v1765_v1 = vmov 0   ;;  %v1671_v2 = vld [vmem:[%s2691_s1 + $0x2] ss:$0 sm:$0xff]  ;;  %s2701_s10 = smov (!%p323_p3, %s1594_s10), 1 }
   0xc   : > { %1669 = vset.pattern.permute.xlu2 %v1765_v1  ;;  %1668 = vset.pattern.permute.xlu1 %v1765_v1  ;;  %v1672_v3 = vld [vmem:[%s2691_s1] ss:$0 sm:$0xff]  ;;  %v1673_v4 = vld [vmem:[%s2691_s1 + $0x5] ss:$0 sm:$0xff]  ;;  %v1674_v5 = vld [vmem:[%s2691_s1 + $0x3] ss:$0 sm:$0xff] }
   0xd   : > { %1667 = vset.pattern.permute.xlu0 %v1765_v1  ;;  %463 = vperm.xlu2 %1669, %v1670_v0   ;;  %v1675_v6 = vld [vmem:[%s2691_s1 + $0x1] ss:$0 sm:$0xff]  ;;  %v1676_v7 = vld [vmem:[%s2692_s2] ss:$0 sm:$0xff]  ;;  %v1677_v8 = vld [vmem:[%s2691_s1 + $0x7] ss:$0 sm:$0xff] }
   0xe   : > { %455 = vperm.xlu1 %1668, %v1671_v2   ;;  %447 = vperm.xlu0 %1667, %v1672_v3   ;;  %v1678_v9 = vld [vmem:[%s2691_s1 + $0x6] ss:$0 sm:$0xff]  ;;  %v1679_v10 = vld [vmem:[%s2692_s2 + $0x3] ss:$0 sm:$0xff]  ;;  %s1639_s12 = sshll.u32 %s2701_s10, 6  ;;  %vm341_vm0 = vcmask 261120  }
   0xf   : > { %v1680_v11 = vld [vmem:[%s2692_s2 + $0x2] ss:$0 sm:$0xff]  ;;  %s1864_s17 = scalar_lea.vmem %s2699_s9, %s1639_s12  ;;  %v1681_v12 = vld [vmem:[%s2692_s2 + $0x1] ss:$0 sm:$0xff]  ;;  %s1872_s22 = scalar_lea.vmem %s2690_s0, %s1639_s12  ;;  %v1682_v16 = vld [vmem:[%s2692_s2 + $0x6] ss:$0 sm:$0xff] }
  0x10   : > { %v333_v13 = vld [vmem:[%s1872_s22] sm:$0xff]  ;;  %v334_v14 = vld [vmem:[%s1872_s22 + $0x8] sm:$0xff]  ;;  %v335_v17 = vld [vmem:[%s1872_s22 + $0x10] sm:$0xff]  ;;  %v1766_v58 = vmov 0.0   ;;  %vm343_vm1 = vcmask 254976  }
  0x11   : > { %v379_v15 = vadd.f32 %v334_v14, %v333_v13  ;;  %v1683_v18 = vld [vmem:[%s2692_s2 + $0x5] ss:$0 sm:$0xff]  ;;  %v1684_v20 = vld [vmem:[%s2692_s2 + $0x4] ss:$0 sm:$0xff]  ;;  %v336_v21 = vld [vmem:[%s1872_s22 + $0x18] sm:$0xff]  ;;  %342 = vst.msk [vmem:[#allocation2] sm:$0xff] %vm341_vm0, %v1766_v58 }
  0x12   : > { %v337_v23 = vld [vmem:[%s1872_s22 + $0x20] sm:$0xff]  ;;  %v338_v25 = vld [vmem:[%s1872_s22 + $0x28] sm:$0xff]  ;;  %v339_v27 = vld [vmem:[%s1872_s22 + $0x30] sm:$0xff]  ;;  %344 = vst.msk [vmem:[#allocation2 + $0x8] sm:$0x3] %vm343_vm1, %v1766_v58 }
  0x13   : > { %v380_v19 = vadd.f32 %v379_v15, %v335_v17  ;;  %v1685_v29 = vld [vmem:[%s2692_s2 + $0x7] ss:$0 sm:$0xff]  ;;  %v340_v30 = vld [vmem:[%s1872_s22 + $0x38] sm:$0xff]  ;;  %345 = vst.msk [vmem:[#allocation2 + $0x10] sm:$0xff] %vm341_vm0, %v1766_v58 }
  0x14   : > { %346 = vst.msk [vmem:[#allocation2 + $0x18] sm:$0x3] %vm343_vm1, %v1766_v58 }
  0x15   : > { %467 = vperm.xlu2 %1669, %v1673_v4   ;;  %v381_v22 = vadd.f32 %v380_v19, %v336_v21  ;;  %361 = vst.msk [vmem:[#allocation2 + $0x90] sm:$0xff] %vm341_vm0, %v1766_v58 }
  0x16   : > { %459 = vperm.xlu1 %1668, %v1674_v5   ;;  %451 = vperm.xlu0 %1667, %v1675_v6   ;;  %362 = vst.msk [vmem:[#allocation2 + $0x98] sm:$0x3] %vm343_vm1, %v1766_v58 }
  0x17   : > { %v382_v24 = vadd.f32 %v381_v22, %v337_v23  ;;  %347 = vst.msk [vmem:[#allocation2 + $0x20] sm:$0xff] %vm341_vm0, %v1766_v58 }
  0x18   : > { %348 = vst.msk [vmem:[#allocation2 + $0x28] sm:$0x3] %vm343_vm1, %v1766_v58 }
  0x19   : > { %v383_v26 = vadd.f32 %v382_v24, %v338_v25  ;;  %349 = vst.msk [vmem:[#allocation2 + $0x30] sm:$0xff] %vm341_vm0, %v1766_v58 }
  0x1a   : > { %350 = vst.msk [vmem:[#allocation2 + $0x38] sm:$0x3] %vm343_vm1, %v1766_v58 }
  0x1b   : > { %v384_v28 = vadd.f32 %v383_v26, %v339_v27  ;;  %351 = vst.msk [vmem:[#allocation2 + $0x40] sm:$0xff] %vm341_vm0, %v1766_v58 }
  0x1c   : > { %352 = vst.msk [vmem:[#allocation2 + $0x48] sm:$0x3] %vm343_vm1, %v1766_v58 }
  0x1d   : > { %503 = vperm.xlu2 %1669, %v1676_v7   ;;  %v385_v31 = vadd.f32 %v384_v28, %v340_v30  ;;  %353 = vst.msk [vmem:[#allocation2 + $0x50] sm:$0xff] %vm341_vm0, %v1766_v58 }
  0x1e   : > { %475 = vperm.xlu1 %1668, %v1677_v8   ;;  %471 = vperm.xlu0 %1667, %v1678_v9   ;;  %354 = vst.msk [vmem:[#allocation2 + $0x58] sm:$0x3] %vm343_vm1, %v1766_v58 }
  0x1f   : > { %v386_v32 = vmul.f32 0.125, %v385_v31  ;;  %355 = vst.msk [vmem:[#allocation2 + $0x60] sm:$0xff] %vm341_vm0, %v1766_v58 }
  0x20   : > { %356 = vst.msk [vmem:[#allocation2 + $0x68] sm:$0x3] %vm343_vm1, %v1766_v58 }
  0x21   : > { %v387_v33 = vsub.f32 %v333_v13, %v386_v32  ;;  %v1894_v34 = vsub.f32 %v334_v14, %v386_v32  ;;  %v1898_v37 = vsub.f32 %v335_v17, %v386_v32  ;;  %v395_v40 = vsub.f32 %v336_v21, %v386_v32  ;;  %357 = vst.msk [vmem:[#allocation2 + $0x70] sm:$0xff] %vm341_vm0, %v1766_v58 }
  0x22   : > { %v1902_v43 = vsub.f32 %v337_v23, %v386_v32  ;;  %v1906_v46 = vsub.f32 %v338_v25, %v386_v32  ;;  %v1910_v49 = vsub.f32 %v339_v27, %v386_v32  ;;  %v1914_v52 = vsub.f32 %v340_v30, %v386_v32  ;;  %358 = vst.msk [vmem:[#allocation2 + $0x78] sm:$0x3] %vm343_vm1, %v1766_v58 }
  0x23   : > { %v388_v35 = vmul.f32 %v387_v33, %v387_v33  ;;  %v390_v36 = vmul.f32 %v1894_v34, %v1894_v34  ;;  %v393_v39 = vmul.f32 %v1898_v37, %v1898_v37  ;;  %v396_v42 = vmul.f32 %v395_v40, %v395_v40  ;;  %359 = vst.msk [vmem:[#allocation2 + $0x80] sm:$0xff] %vm341_vm0, %v1766_v58 }
  0x24   : > { %v399_v45 = vmul.f32 %v1902_v43, %v1902_v43  ;;  %v402_v48 = vmul.f32 %v1906_v46, %v1906_v46  ;;  %v405_v51 = vmul.f32 %v1910_v49, %v1910_v49  ;;  %v408_v54 = vmul.f32 %v1914_v52, %v1914_v52  ;;  %360 = vst.msk [vmem:[#allocation2 + $0x88] sm:$0x3] %vm343_vm1, %v1766_v58 }
  0x25   : > { %515 = vperm.xlu2 %1669, %v1679_v10   ;;  %v391_v38 = vadd.f32 %v390_v36, %v388_v35 }
  0x26   : > { %511 = vperm.xlu1 %1668, %v1680_v11   ;;  %507 = vperm.xlu0 %1667, %v1681_v12  }
  0x27   : > { %v394_v41 = vadd.f32 %v393_v39, %v391_v38 }
  0x29   : > { %v397_v44 = vadd.f32 %v396_v42, %v394_v41 }
  0x2b   : > { %v400_v47 = vadd.f32 %v399_v45, %v397_v44 }
  0x2d   : > { %527 = vperm.xlu2 %1669, %v1682_v16   ;;  %v403_v50 = vadd.f32 %v402_v48, %v400_v47 }
  0x2e   : > { %523 = vperm.xlu1 %1668, %v1683_v18   ;;  %519 = vperm.xlu0 %1667, %v1684_v20  }
  0x2f   : > { %v406_v53 = vadd.f32 %v405_v51, %v403_v50 }
  0x31   : > { %v409_v55 = vadd.f32 %v408_v54, %v406_v53 }
  0x33   : > { %v410_v56 = vmul.f32 0.125, %v409_v55 }
  0x35   : > { %v411_v57 = vadd.f32 1e-05, %v410_v56 }
  0x36   : > { %531 = vperm.xlu0 %1667, %v1685_v29  }
  0x37   : > { %1686 = vrsqrt.f32 %v411_v57  ;;  %vm418_vm2 = vweird.f32 %v411_v57 }
  0x3d   : > { %v1687_v59 = vpop.eup %1686 }
  0x3e   : > { %v413_v60 = vmul.f32 %v1687_v59, %v411_v57  ;;  %vm419_vm3 = vweird.f32 %v1687_v59 }
  0x3f   : > { %vm420_vm4 = vmor %vm418_vm2, %vm419_vm3 }
  0x40   : > { %v414_v62 = vmul.f32 %v1687_v59, %v413_v60 }
  0x42   : > { %v415_v63 = vmul.f32 0.5, %v414_v62 }
  0x44   : > { %v416_v0 = vsub.f32 1.5, %v415_v63 }
  0x46   : > { %v417_v3 = vmul.f32 %v1687_v59, %v416_v0 }
  0x48   : > { %v1960_v4 = vsel %vm420_vm4, %v1687_v59, %v417_v3 }
  0x49   : > { %v422_v5 = vmul.f32 %v1960_v4, %v387_v33  ;;  %v425_v11 = vmul.f32 %v1960_v4, %v395_v40  ;;  %v428_v23 = vmul.f32 %v1960_v4, %v1910_v49  ;;  %v424_v29 = vmul.f32 %v1960_v4, %v1898_v37 }
  0x4a   : > { %v423_v32 = vmul.f32 %v1960_v4, %v1894_v34  ;;  %v427_v50 = vmul.f32 %v1960_v4, %v1906_v46  ;;  %v426_v53 = vmul.f32 %v1960_v4, %v1902_v43 }
  0x67   : > { %v1936_v61 = vpop.permute.xlu2 %463 }
  0x68   : > { %v482_v3 = vmul.f32 %v1936_v61, %v426_v53  ;;  %v2010_v61 = vld [vmem:[%s2693_s3 + $0x10] sm:$0xff] }
  0x6f   : > { %v468_v2 = vpop.permute.xlu2 %467 }
  0x70   : > { %v483_v46 = vmul.f32 %v468_v2, %v427_v50  ;;  %v2005_v2 = vld [vmem:[%s2693_s3 + $0x8] sm:$0xff]  ;;  %v2125_v50 = vld [vmem:[%s2693_s3 + $0xb0] sm:$0xff] }
  0x77   : > { %v504_v6 = vpop.permute.xlu2 %503 }
  0x7f   : > { %v516_v15 = vpop.permute.xlu2 %515 }
  0x80   : > { %v456_v7 = vpop.permute.xlu1 %455  ;;  %v448_v8 = vpop.permute.xlu0 %447 }
  0x81   : > { %v478_v9 = vmul.f32 %v448_v8, %v422_v5  ;;  %v480_v39 = vmul.f32 %v456_v7, %v424_v29  ;;  %v2070_v29 = vld [vmem:[%s2693_s3 + $0x60] sm:$0xff] }
  0x83   : > { %v534_v10 = vadd.f32 %v504_v6, %v478_v9 }
  0x85   : > { %v550_v12 = vmul.f32 0.044715, %v534_v10  ;;  %v542_v40 = vmul.f32 0.5, %v534_v10 }
  0x87   : > { %v558_v13 = vmul.f32 %v550_v12, %v534_v10  ;;  %v528_v30 = vpop.permute.xlu2 %527 }
  0x88   : > { %v460_v14 = vpop.permute.xlu1 %459  ;;  %v452_v17 = vpop.permute.xlu0 %451 }
  0x89   : > { %v481_v16 = vmul.f32 %v460_v14, %v425_v11  ;;  %v566_v18 = vmul.f32 %v558_v13, %v534_v10  ;;  %v479_v42 = vmul.f32 %v452_v17, %v423_v32  ;;  %v2019_v13 = vld [vmem:[%s2693_s3 + $0x18] sm:$0xff]  ;;  %v2024_v14 = vld [vmem:[%s2693_s3 + $0x20] sm:$0xff] }
  0x8b   : > { %v537_v19 = vadd.f32 %v516_v15, %v481_v16  ;;  %v574_v20 = vadd.f32 %v566_v18, %v534_v10  ;;  %v2000_v10 = vld [vmem:[%s2693_s3] sm:$0xff]  ;;  %v2029_v15 = vld [vmem:[%s2693_s3 + $0x28] sm:$0xff]  ;;  %v2035_v18 = vld [vmem:[%s2693_s3 + $0x30] sm:$0xff] }
  0x8d   : > { %v553_v21 = vmul.f32 0.044715, %v537_v19  ;;  %v582_v22 = vmul.f32 0.7978846, %v574_v20  ;;  %v545_v59 = vmul.f32 0.5, %v537_v19 }
  0x8f   : > { %v561_v24 = vmul.f32 %v553_v21, %v537_v19  ;;  %1688 = vtanh.f32 %v582_v22  ;;  %v2043_v22 = vld [vmem:[%s2693_s3 + $0x38] sm:$0xff] }
  0x90   : > { %v1966_v25 = vpop.permute.xlu1 %475  ;;  %v472_v27 = vpop.permute.xlu0 %471 }
  0x91   : > { %v569_v26 = vmul.f32 %v561_v24, %v537_v19  ;;  %v484_v28 = vmul.f32 %v472_v27, %v428_v23  ;;  %v2049_v24 = vld [vmem:[%s2693_s3 + $0x40] sm:$0xff] }
  0x93   : > { %v577_v31 = vadd.f32 %v569_v26, %v537_v19  ;;  %v1972_v33 = vadd.f32 %v528_v30, %v484_v28  ;;  %v429_v19 = vmul.f32 %v1960_v4, %v1914_v52  ;;  %v2054_v52 = vld [vmem:[%s2693_s3 + $0x48] sm:$0xff]  ;;  %v2059_v4 = vld [vmem:[%s2693_s3 + $0x50] sm:$0xff]  ;;  %v2065_v28 = vld [vmem:[%s2693_s3 + $0x58] sm:$0xff] }
  0x94   : > { %v2075_v30 = vld [vmem:[%s2693_s3 + $0x68] sm:$0xff] }
  0x95   : > { %v585_v35 = vmul.f32 0.7978846, %v577_v31  ;;  %v1689_v36 = vpop.eup %1688  ;;  %v556_v38 = vmul.f32 0.044715, %v1972_v33  ;;  %v548_v31 = vmul.f32 0.5, %v1972_v33 }
  0x96   : > { %v598_v41 = vadd.f32 1.0, %v1689_v36  ;;  %v2082_v36 = vld [vmem:[%s2693_s3 + $0x70] sm:$0xff] }
  0x97   : > { %1690 = vtanh.f32 %v585_v35  ;;  %v564_v44 = vmul.f32 %v556_v38, %v1972_v33  ;;  %v2087_v38 = vld [vmem:[%s2693_s3 + $0x78] sm:$0xff] }
  0x98   : > { %v512_v45 = vpop.permute.xlu1 %511  ;;  %v606_v37 = vmul.f32 %v598_v41, %v542_v40  ;;  %v508_v48 = vpop.permute.xlu0 %507  ;;  %v2099_v41 = vld [vmem:[%s2693_s3 + $0x88] sm:$0xff] }
  0x99   : > { %v1976_v47 = vadd.f32 %v512_v45, %v480_v39  ;;  %v572_v34 = vmul.f32 %v564_v44, %v1972_v33  ;;  %v1979_v49 = vadd.f32 %v508_v48, %v479_v42  ;;  %v2092_v39 = vld [vmem:[%s2693_s3 + $0x80] sm:$0xff]  ;;  %v2104_v42 = vld [vmem:[%s2693_s3 + $0x90] sm:$0xff]  ;;  %v2109_v44 = vld [vmem:[%s2693_s3 + $0x98] sm:$0xff] }
  0x9a   : > { %615 = vst.msk [vmem:[#allocation2 + $0x11] sm:$0xff] %vm341_vm0, %v606_v37  ;;  %v2115_v48 = vld [vmem:[%s2693_s3 + $0xa0] sm:$0xff] }
  0x9b   : > { %v552_v51 = vmul.f32 0.044715, %v1976_v47  ;;  %v580_v54 = vadd.f32 %v572_v34, %v1972_v33  ;;  %v551_v55 = vmul.f32 0.044715, %v1979_v49  ;;  %v485_v33 = vmul.f32 %v1966_v25, %v429_v19  ;;  %v2120_v34 = vld [vmem:[%s2693_s3 + $0xa8] sm:$0xff] }
  0x9c   : > { %v2184_v19 = vld [vmem:[%s2693_s3 + $0x108] sm:$0xff] }
  0x9d   : > { %v1691_v56 = vpop.eup %1690  ;;  %v560_v57 = vmul.f32 %v552_v51, %v1976_v47  ;;  %v588_v62 = vmul.f32 0.7978846, %v580_v54  ;;  %v559_v63 = vmul.f32 %v551_v55, %v1979_v49  ;;  %v2131_v54 = vld [vmem:[%s2693_s3 + $0xb8] sm:$0xff]  ;;  %v2136_v55 = vld [vmem:[%s2693_s3 + $0xc0] sm:$0xff] }
  0x9e   : > { %v601_v60 = vadd.f32 1.0, %v1691_v56  ;;  %v2141_v56 = vld [vmem:[%s2693_s3 + $0xc8] sm:$0xff] }
  0x9f   : > { %v568_v0 = vmul.f32 %v560_v57, %v1976_v47  ;;  %1692 = vtanh.f32 %v588_v62  ;;  %v567_v43 = vmul.f32 %v559_v63, %v1979_v49  ;;  %v2152_v62 = vld [vmem:[%s2693_s3 + $0xd8] sm:$0xff]  ;;  %v2157_v63 = vld [vmem:[%s2693_s3 + $0xe0] sm:$0xff] }
  0xa0   : > { %v609_v5 = vmul.f32 %v601_v60, %v545_v59  ;;  %v524_v6 = vpop.permute.xlu1 %523  ;;  %v520_v9 = vpop.permute.xlu0 %519  ;;  %v2147_v60 = vld [vmem:[%s2693_s3 + $0xd0] sm:$0xff] }
  0xa1   : > { %v576_v7 = vadd.f32 %v568_v0, %v1976_v47  ;;  %v1995_v8 = vadd.f32 %v524_v6, %v483_v46  ;;  %v575_v11 = vadd.f32 %v567_v43, %v1979_v49  ;;  %v2014_v12 = vadd.f32 %v520_v9, %v482_v3  ;;  %v2164_v9 = vld [vmem:[%s2693_s3 + $0xe8] sm:$0xff] }
  0xa2   : > { %618 = vst.msk [vmem:[#allocation2 + $0x41] sm:$0xff] %vm341_vm0, %v609_v5  ;;  %v544_v0 = vmul.f32 0.5, %v1976_v47  ;;  %v543_v6 = vmul.f32 0.5, %v1979_v49  ;;  %v2174_v47 = vld [vmem:[%s2693_s3 + $0xf8] sm:$0xff] }
  0xa3   : > { %v584_v16 = vmul.f32 0.7978846, %v576_v7  ;;  %v555_v17 = vmul.f32 0.044715, %v1995_v8  ;;  %v583_v20 = vmul.f32 0.7978846, %v575_v11 }
  0xa4   : > { %v554_v21 = vmul.f32 0.044715, %v2014_v12  ;;  %v2169_v11 = vld [vmem:[%s2693_s3 + $0xf0] sm:$0xff] }
  0xa5   : > { %1694 = vtanh.f32 %v584_v16  ;;  %v563_v23 = vmul.f32 %v555_v17, %v1995_v8  ;;  %v1693_v26 = vpop.eup %1692  ;;  %v2179_v17 = vld [vmem:[%s2693_s3 + $0x100] sm:$0xff] }
  0xa6   : > { %1696 = vtanh.f32 %v583_v20  ;;  %v562_v27 = vmul.f32 %v554_v21, %v2014_v12  ;;  %v604_v32 = vadd.f32 1.0, %v1693_v26  ;;  %v2189_v20 = vld [vmem:[%s2693_s3 + $0x110] sm:$0xff]  ;;  %v2199_v26 = vld [vmem:[%s2694_s4] sm:$0x1] }
  0xa7   : > { %v571_v35 = vmul.f32 %v563_v23, %v1995_v8  ;;  %v2194_v23 = vld [vmem:[%s2693_s3 + $0x118] sm:$0xff] }
  0xa8   : > { %v570_v40 = vmul.f32 %v562_v27, %v2014_v12  ;;  %v612_v45 = vmul.f32 %v604_v32, %v548_v31  ;;  %v532_v37 = vpop.permute.xlu0 %531 }
  0xa9   : > { %v579_v25 = vadd.f32 %v571_v35, %v1995_v8  ;;  %v541_v53 = vadd.f32 %v532_v37, %v485_v33  ;;  %v547_v33 = vmul.f32 0.5, %v1995_v8 }
  0xaa   : > { %v578_v51 = vadd.f32 %v570_v40, %v2014_v12  ;;  %621 = vst.msk [vmem:[#allocation2 + $0x71] sm:$0xff] %vm341_vm0, %v612_v45 }
  0xab   : > { %v1695_v57 = vpop.eup %1694  ;;  %v587_v59 = vmul.f32 0.7978846, %v579_v25  ;;  %v557_v43 = vmul.f32 0.044715, %v541_v53  ;;  %v546_v25 = vmul.f32 0.5, %v2014_v12 }
  0xac   : > { %v1697_v46 = vpop.eup %1696  ;;  %v600_v3 = vadd.f32 1.0, %v1695_v57  ;;  %v586_v5 = vmul.f32 0.7978846, %v578_v51 }
  0xad   : > { %v599_v7 = vadd.f32 1.0, %v1697_v46  ;;  %1698 = vtanh.f32 %v587_v59  ;;  %v565_v49 = vmul.f32 %v557_v43, %v541_v53  ;;  %v549_v46 = vmul.f32 0.5, %v541_v53 }
  0xae   : > { %v608_v16 = vmul.f32 %v600_v3, %v544_v0  ;;  %1700 = vtanh.f32 %v586_v5 }
  0xaf   : > { %v607_v21 = vmul.f32 %v599_v7, %v543_v6  ;;  %v573_v27 = vmul.f32 %v565_v49, %v541_v53 }
  0xb0   : > { %617 = vst.msk [vmem:[#allocation2 + $0x31] sm:$0xff] %vm341_vm0, %v608_v16 }
  0xb1   : > { %616 = vst.msk [vmem:[#allocation2 + $0x21] sm:$0xff] %vm341_vm0, %v607_v21  ;;  %v581_v31 = vadd.f32 %v573_v27, %v541_v53 }
  0xb3   : > { %v1699_v32 = vpop.eup %1698  ;;  %v589_v45 = vmul.f32 0.7978846, %v581_v31 }
  0xb4   : > { %v1701_v35 = vpop.eup %1700  ;;  %v603_v40 = vadd.f32 1.0, %v1699_v32 }
  0xb5   : > { %v602_v37 = vadd.f32 1.0, %v1701_v35  ;;  %1702 = vtanh.f32 %v589_v45 }
  0xb6   : > { %v611_v51 = vmul.f32 %v603_v40, %v547_v33 }
  0xb7   : > { %v610_v57 = vmul.f32 %v602_v37, %v546_v25 }
  0xb8   : > { %620 = vst.msk [vmem:[#allocation2 + $0x61] sm:$0xff] %vm341_vm0, %v611_v51 }
  0xb9   : > { %619 = vst.msk [vmem:[#allocation2 + $0x51] sm:$0xff] %vm341_vm0, %v610_v57 }
  0xbb   : > { %v1703_v59 = vpop.eup %1702 }
  0xbc   : > { %v605_v0 = vadd.f32 1.0, %v1703_v59 }
  0xbe   : > { %v613_v3 = vmul.f32 %v605_v0, %v549_v46 }
  0xc0   : > { %622 = vst.msk [vmem:[#allocation2 + $0x81] sm:$0xff] %vm341_vm0, %v613_v3 }
  0xc1 LB: >> { %744 = vmatpush.msra.mxu2 %v2065_v28  ;;  %689 = vmatpush.msra.mxu0 %v2019_v13  ;;  %s1603_s14 = sshll.u32 %s1759_s13, 4  ;;  %vm726_vm5 = vcmask 1045504   ;;  %vm699_vm6 = vcmask 1046528   ;;  %v667_v3 = vperm.slane %v2199_v26, 0  ;;  %s1619_s16 = sshll.u32 %s1759_s13, 3  ;;  %s1759_s13 = sphi %s2208_s13, %s665_s13  }
  0xc2   : >> { %773 = vmatpush.msra.mxu3 %v2087_v38  ;;  %717 = vmatpush.msra.mxu1 %v2043_v22  ;;  %s671_s15 = scalar_lea.vmem [#allocation2], %s1603_s14  ;;  %s918_s18 = scalar_lea.vmem [#allocation3], %s1619_s16 }
  0xc3   : >> { %745 = vmatpush.msra.mxu2 %v2059_v4  ;;  %690 = vmatpush.msra.mxu0 %v2010_v61  ;;  %s665_s13 = sadd.s32 1, %s1759_s13  }
  0xc4   : >> { %774 = vmatpush.msra.mxu3 %v2082_v36  ;;  %718 = vmatpush.msra.mxu1 %v2035_v18  ;;  %p662_p4 = scmp.ge.s32.totalorder %s665_s13, 8  }
  0xc5   : >> { %746 = vmatpush.msra.mxu2 %v2054_v52  ;;  %691 = vmatpush.msra.mxu0 %v2005_v2  ;;  %v1711_v2 = vld [vmem:[%s2695_s5 + $0x3] ss:$0 sm:$0xff] (%p662_p4)  ;;  %v1713_v61 = vld [vmem:[%s2696_s6] ss:$0 sm:$0xff] (%p662_p4)  ;;  %v1714_v13 = vld [vmem:[%s2695_s5 + $0x7] ss:$0 sm:$0xff] (%p662_p4) }
  0xc6   : >> { %775 = vmatpush.msra.mxu3 %v2075_v30  ;;  %719 = vmatpush.msra.mxu1 %v2029_v15  ;;  %v1716_v15 = vld [vmem:[%s2696_s6 + $0x3] ss:$0 sm:$0xff] (%p662_p4)  ;;  %v1717_v18 = vld [vmem:[%s2696_s6 + $0x2] ss:$0 sm:$0xff] (%p662_p4)  ;;  %v1718_v22 = vld [vmem:[%s2696_s6 + $0x1] ss:$0 sm:$0xff] (%p662_p4) }
  0xc7   : >> { %v672_v8 = vld [vmem:[%s671_s15] sm:$0xff]  ;;  %v673_v12 = vld [vmem:[%s671_s15 + $0x8] sm:$0x3]  ;;  %747 = vmatpush.msra.mxu2 %v2049_v24  ;;  %692 = vmatpush.msra.mxu0 %v2000_v10  ;;  %v1608_v43 = vld [vmem:[%s671_s15 + $0x10] sm:$0xff]  ;;  %s2622_s16 = smov (%p662_p4), 0  }
  0xc8   : >> { %v727_v53 = vrot.slane %v672_v8, 2  ;;  %v728_v5 = vrot.slane %v673_v12, 2  ;;  %v700_v6 = vrot.slane %v672_v8, 1  ;;  %v701_v7 = vrot.slane %v673_v12, 1  ;;  %776 = vmatpush.msra.mxu3 %v2070_v29  ;;  %1604 = vmatmul.msk.f32.vlgmr.msra.gmra.mxu0 %vm341_vm0, %v672_v8  ;;  %v1614_v49 = vld [vmem:[%s671_s15 + $0x20] sm:$0xff] }
  0xc9   : >> { %855 = vmatpush.msrb.mxu2 %v2152_v62  ;;  %v1609_v21 = vld [vmem:[%s671_s15 + $0x18] sm:$0x3]  ;;  %v1615_v27 = vld [vmem:[%s671_s15 + $0x28] sm:$0x3]  ;;  %1610 = vmatmul.msk.f32.vlgmr.msra.gmra.mxu3 %vm341_vm0, %v1608_v43  ;;  %v783_v32 = vrot.slane %v1608_v43, 1  ;;  %v865_v35 = vrot.slane %v1614_v49, 1 }
  0xca   : >> { %v729_v16 = vsel %vm726_vm5, %v727_v53, %v728_v5  ;;  %800 = vmatpush.msrb.mxu0 %v2109_v44  ;;  %v702_v31 = vsel %vm699_vm6, %v700_v6, %v701_v7  ;;  %882 = vmatpush.msrb.mxu3 %v2174_v47  ;;  %v784_v33 = vrot.slane %v1609_v21, 1  ;;  %v866_v40 = vrot.slane %v1615_v27, 1  ;;  %v1710_v10 = vld [vmem:[%s2695_s5 + $0x5] ss:$0 sm:$0xff] (%p662_p4)  ;;  %922 = vst.msk [vmem:[#allocation2 + $0x10] sm:$0xff] (%p662_p4), %vm341_vm0, %v1766_v58 }
  0xcb   : >> { %1606 = vmatmul.msk.f32.vlgmr.msra.gmra.mxu2 %vm341_vm0, %v729_v16  ;;  %720 = vmatpush.msra.mxu1 %v2024_v14  ;;  %v809_v45 = vrot.slane %v1608_v43, 2  ;;  %v810_v25 = vrot.slane %v1609_v21, 2  ;;  %v891_v59 = vrot.slane %v1614_v49, 2  ;;  %v892_v46 = vrot.slane %v1615_v27, 2  ;;  %923 = vst.msk [vmem:[#allocation2 + $0x18] sm:$0x3] (%p662_p4), %vm343_vm1, %v1766_v58 }
  0xcc   : >> { %856 = vmatpush.msrb.mxu2 %v2147_v60  ;;  %801 = vmatpush.msrb.mxu0 %v2104_v42  ;;  %v785_v37 = vsel %vm699_vm6, %v783_v32, %v784_v33  ;;  %v867_v51 = vsel %vm699_vm6, %v865_v35, %v866_v40  ;;  %928 = vst.msk [vmem:[#allocation2 + $0x40] sm:$0xff] (%p662_p4), %vm341_vm0, %v1766_v58  ;;  %v1715_v14 = vld [vmem:[%s2695_s5 + $0x6] ss:$0 sm:$0xff] (%p662_p4)  ;;  %v1720_v36 = vld [vmem:[%s2696_s6 + $0x5] ss:$0 sm:$0xff] (%p662_p4) }
  0xcd   : >> { %1605 = vmatmul.msk.f32.vlgmr.msra.gmra.mxu1 %vm341_vm0, %v702_v31  ;;  %883 = vmatpush.msrb.mxu3 %v2169_v11  ;;  %v811_v57 = vsel %vm726_vm5, %v809_v45, %v810_v25  ;;  %v893_v0 = vsel %vm726_vm5, %v891_v59, %v892_v46  ;;  %929 = vst.msk [vmem:[#allocation2 + $0x48] sm:$0x3] (%p662_p4), %vm343_vm1, %v1766_v58  ;;  %v1719_v29 = vld [vmem:[%s2696_s6 + $0x6] ss:$0 sm:$0xff] (%p662_p4)  ;;  %v1721_v38 = vld [vmem:[%s2696_s6 + $0x4] ss:$0 sm:$0xff] (%p662_p4) }
  0xce   : >> { %857 = vmatpush.msrb.mxu2 %v2141_v56  ;;  %826 = vmatpush.msrb.mxu1 %v2131_v54  ;;  %934 = vst.msk [vmem:[#allocation2 + $0x70] sm:$0xff] (%p662_p4), %vm341_vm0, %v1766_v58  ;;  %v1722_v54 = vld [vmem:[%s2696_s6 + $0x7] ss:$0 sm:$0xff] (%p662_p4) }
  0xcf   : >> { %802 = vmatpush.msrb.mxu0 %v2099_v41  ;;  %884 = vmatpush.msrb.mxu3 %v2164_v9  ;;  %935 = vst.msk [vmem:[#allocation2 + $0x78] sm:$0x3] (%p662_p4), %vm343_vm1, %v1766_v58 }
  0xd0   : >> { %858 = vmatpush.msrb.mxu2 %v2136_v55  ;;  %827 = vmatpush.msrb.mxu1 %v2125_v50  ;;  %926 = vst.msk [vmem:[#allocation2 + $0x30] sm:$0xff] (%p662_p4), %vm341_vm0, %v1766_v58 }
  0xd1   : >> { %803 = vmatpush.msrb.mxu0 %v2092_v39  ;;  %885 = vmatpush.msrb.mxu3 %v2157_v63  ;;  %927 = vst.msk [vmem:[#allocation2 + $0x38] sm:$0x3] (%p662_p4), %vm343_vm1, %v1766_v58 }
  0xd2   : >> { %828 = vmatpush.msrb.mxu1 %v2120_v34  ;;  %1611 = vmatmul.msk.f32.vlgmr.msrb.gmra.mxu0 %vm341_vm0, %v785_v37  ;;  %v1707_v37 = vld [vmem:[%s2695_s5 + $0x4] ss:$0 sm:$0xff] (%p662_p4)  ;;  %924 = vst.msk [vmem:[#allocation2 + $0x20] sm:$0xff] (%p662_p4), %vm341_vm0, %v1766_v58 }
  0xd3   : >> { %1616 = vmatmul.msk.f32.vlgmr.msrb.gmra.mxu2 %vm341_vm0, %v1614_v49  ;;  %1617 = vmatmul.msk.f32.vlgmr.msrb.gmra.mxu3 %vm341_vm0, %v867_v51  ;;  %v1708_v51 = vld [vmem:[%s2695_s5 + $0x2] ss:$0 sm:$0xff] (%p662_p4)  ;;  %925 = vst.msk [vmem:[#allocation2 + $0x28] sm:$0x3] (%p662_p4), %vm343_vm1, %v1766_v58 }
  0xd4   : >> { %829 = vmatpush.msrb.mxu1 %v2115_v48  ;;  %908 = vmatpush.msra.mxu0 %v2194_v23  ;;  %932 = vst.msk [vmem:[#allocation2 + $0x60] sm:$0xff] (%p662_p4), %vm341_vm0, %v1766_v58 }
  0xd5   : >> { %1612 = vmatmul.msk.f32.vlgmr.msrb.gmra.mxu1 %vm341_vm0, %v811_v57  ;;  %1706 = vset.pattern.permute.xlu2 (%p662_p4), %v1765_v1  ;;  %v1709_v57 = vld [vmem:[%s2695_s5] ss:$0 sm:$0xff] (%p662_p4)  ;;  %933 = vst.msk [vmem:[#allocation2 + $0x68] sm:$0x3] (%p662_p4), %vm343_vm1, %v1766_v58 }
  0xd6   : >> { %909 = vmatpush.msra.mxu0 %v2189_v20  ;;  %1705 = vset.pattern.permute.xlu1 (%p662_p4), %v1765_v1  ;;  %930 = vst.msk [vmem:[#allocation2 + $0x50] sm:$0xff] (%p662_p4), %vm341_vm0, %v1766_v58 }
  0xd7   : > { %1704 = vset.pattern.permute.xlu0 (%p662_p4), %v1765_v1  ;;  %1048 = vperm.xlu2 (%p662_p4), %1706, %v1707_v37   ;;  %v1712_v1 = vld [vmem:[%s2695_s5 + $0x1] ss:$0 sm:$0xff] (%p662_p4)  ;;  %931 = vst.msk [vmem:[#allocation2 + $0x58] sm:$0x3] (%p662_p4), %vm343_vm1, %v1766_v58 }
  0xd8   : >> { %910 = vmatpush.msra.mxu0 %v2184_v19  ;;  %1040 = vperm.xlu1 (%p662_p4), %1705, %v1708_v51   ;;  %936 = vst.msk [vmem:[#allocation2 + $0x80] sm:$0xff] (%p662_p4), %vm341_vm0, %v1766_v58 }
  0xd9   : > { %1032 = vperm.xlu0 (%p662_p4), %1704, %v1709_v57   ;;  %937 = vst.msk [vmem:[#allocation2 + $0x88] sm:$0x3] (%p662_p4), %vm343_vm1, %v1766_v58 }
  0xda   : >> { %911 = vmatpush.msra.mxu0 %v2179_v17  ;;  %920 = vst.msk [vmem:[#allocation2] sm:$0xff] (%p662_p4), %vm341_vm0, %v1766_v58 }
  0xdb   : >> { %1618 = vmatmul.msk.f32.vlgmr.msra.gmra.mxu0 %vm341_vm0, %v893_v0  ;;  %921 = vst.msk [vmem:[#allocation2 + $0x8] sm:$0x3] (%p662_p4), %vm343_vm1, %v1766_v58 }
  0xdc   : > { %938 = vst.msk [vmem:[#allocation2 + $0x90] sm:$0xff] (%p662_p4), %vm341_vm0, %v1766_v58 }
  0xdd   : > { %939 = vst.msk [vmem:[#allocation2 + $0x98] sm:$0x3] (%p662_p4), %vm343_vm1, %v1766_v58 }
  0xdf   : > { %1052 = vperm.xlu2 (%p662_p4), %1706, %v1710_v10  }
  0xe0   : > { %1044 = vperm.xlu1 (%p662_p4), %1705, %v1711_v2  }
  0xe1   : > { %1036 = vperm.xlu0 (%p662_p4), %1704, %v1712_v1  }
  0xe7   : > { %1088 = vperm.xlu2 (%p662_p4), %1706, %v1713_v61  }
  0xe8   : > { %1060 = vperm.xlu1 (%p662_p4), %1705, %v1714_v13  }
  0xe9   : > { %1056 = vperm.xlu0 (%p662_p4), %1704, %v1715_v14  }
  0xef   : > { %1100 = vperm.xlu2 (%p662_p4), %1706, %v1716_v15  }
  0xf0   : > { %1096 = vperm.xlu1 (%p662_p4), %1705, %v1717_v18  }
  0xf1   : > { %1092 = vperm.xlu0 (%p662_p4), %1704, %v1718_v22  }
  0xf7   : > { %1112 = vperm.xlu2 (%p662_p4), %1706, %v1719_v29  }
  0xf8   : > { %1108 = vperm.xlu1 (%p662_p4), %1705, %v1720_v36  }
  0xf9   : > { %1104 = vperm.xlu0 (%p662_p4), %1704, %v1721_v38  }
 0x101   : > { %1116 = vperm.xlu0 (%p662_p4), %1704, %v1722_v54  }
 0x145   : >> { %v694_v8 = vpop.f32.mrf.mxu0 }
 0x146   : >> { %v697_v12 = vadd.f32 %v694_v8, %v667_v3 }
 0x14a   : >> { %v722_v53 = vpop.f32.mrf.mxu1  ;;  %v1041_v2 = vpop.permute.xlu1 (%p662_p4), %1040 }
 0x14b   : >> { %v725_v5 = vadd.f32 %v722_v53, %v697_v12  ;;  %v1033_v1 = vpop.permute.xlu0 (%p662_p4), %1032 }
 0x14c   : >> { %v778_v7 = vpop.f32.mrf.mxu3 }
 0x14e   : >> { %v749_v43 = vpop.f32.mrf.mxu2 }
 0x14f   : >> { %v752_v6 = vadd.f32 %v749_v43, %v725_v5  ;;  %v805_v49 = vpop.f32.mrf.mxu0 }
 0x151   : >> { %v781_v16 = vadd.f32 %v778_v7, %v752_v6 }
 0x152   : >> { %v831_v27 = vpop.f32.mrf.mxu1 }
 0x153   : >> { %v808_v21 = vadd.f32 %v805_v49, %v781_v16 }
 0x155   : >> { %v834_v31 = vadd.f32 %v831_v27, %v808_v21 }
 0x156   : >> { %v860_v32 = vpop.f32.mrf.mxu2  ;;  %v887_v33 = vpop.f32.mrf.mxu3 }
 0x157   : >> { %v863_v35 = vadd.f32 %v860_v32, %v834_v31 }
 0x158   : >> { %v913_v45 = vpop.f32.mrf.mxu0 }
 0x159   : >> { %v890_v40 = vadd.f32 %v887_v33, %v863_v35  ;;  %664 = sbr.rel (!%p662_p4) target bundleno = 193 (0xc1), region = 110  ;;  %v2378_v35 = vpop.permute.xlu2 (%p662_p4), %1048 }
 0x15b   : >> { %v916_v25 = vadd.f32 %v913_v45, %v890_v40 }
 0x15d   : >> { %919 = vst.msk [vmem:[%s918_s18] sm:$0xff] %vm341_vm0, %v916_v25 }
 0x161   : > { %v2380_v25 = vpop.permute.xlu2 %1052 }
 0x164   : > { %v940_v24 = vld [vmem:[#allocation3] sm:$0xff]  ;;  %v941_v52 = vld [vmem:[#allocation3 + $0x8] sm:$0xff]  ;;  %v942_v28 = vld [vmem:[#allocation3 + $0x10] sm:$0xff] }
 0x165   : > { %v964_v4 = vadd.f32 %v941_v52, %v940_v24  ;;  %v943_v39 = vld [vmem:[#allocation3 + $0x18] sm:$0xff]  ;;  %v944_v42 = vld [vmem:[#allocation3 + $0x20] sm:$0xff]  ;;  %v945_v58 = vld [vmem:[#allocation3 + $0x28] sm:$0xff] }
 0x166   : > { %v946_v34 = vld [vmem:[#allocation3 + $0x30] sm:$0xff]  ;;  %v947_v55 = vld [vmem:[#allocation3 + $0x38] sm:$0xff] }
 0x167   : > { %v965_v30 = vadd.f32 %v964_v4, %v942_v28 }
 0x169   : > { %v966_v41 = vadd.f32 %v965_v30, %v943_v39  ;;  %v1089_v57 = vpop.permute.xlu2 %1088 }
 0x16b   : > { %v967_v44 = vadd.f32 %v966_v41, %v944_v42 }
 0x16d   : > { %v968_v48 = vadd.f32 %v967_v44, %v945_v58 }
 0x16f   : > { %v969_v50 = vadd.f32 %v968_v48, %v946_v34 }
 0x171   : > { %v970_v56 = vadd.f32 %v969_v50, %v947_v55  ;;  %v1101_v18 = vpop.permute.xlu2 %1100 }
 0x173   : > { %v971_v60 = vmul.f32 0.125, %v970_v56 }
 0x175   : > { %v972_v62 = vsub.f32 %v940_v24, %v971_v60  ;;  %v2362_v63 = vsub.f32 %v941_v52, %v971_v60  ;;  %v977_v47 = vsub.f32 %v942_v28, %v971_v60  ;;  %v980_v20 = vsub.f32 %v943_v39, %v971_v60  ;;  %v1045_v24 = vpop.permute.xlu1 %1044  ;;  %v1037_v52 = vpop.permute.xlu0 %1036 }
 0x176   : > { %v2366_v59 = vsub.f32 %v944_v42, %v971_v60  ;;  %v2370_v3 = vsub.f32 %v945_v58, %v971_v60  ;;  %v989_v53 = vsub.f32 %v946_v34, %v971_v60  ;;  %v2374_v6 = vsub.f32 %v947_v55, %v971_v60 }
 0x177   : > { %v973_v9 = vmul.f32 %v972_v62, %v972_v62  ;;  %v975_v11 = vmul.f32 %v2362_v63, %v2362_v63  ;;  %v978_v19 = vmul.f32 %v977_v47, %v977_v47  ;;  %v981_v26 = vmul.f32 %v980_v20, %v980_v20 }
 0x178   : > { %v984_v0 = vmul.f32 %v2366_v59, %v2366_v59  ;;  %v987_v12 = vmul.f32 %v2370_v3, %v2370_v3  ;;  %v990_v43 = vmul.f32 %v989_v53, %v989_v53  ;;  %v993_v16 = vmul.f32 %v2374_v6, %v2374_v6 }
 0x179   : > { %v976_v17 = vadd.f32 %v975_v11, %v973_v9  ;;  %v1113_v34 = vpop.permute.xlu2 %1112 }
 0x17b   : > { %v979_v23 = vadd.f32 %v978_v19, %v976_v17 }
 0x17d   : > { %v982_v46 = vadd.f32 %v981_v26, %v979_v23  ;;  %v2387_v42 = vpop.permute.xlu1 %1060  ;;  %v1057_v44 = vpop.permute.xlu0 %1056 }
 0x17f   : > { %v985_v8 = vadd.f32 %v984_v0, %v982_v46 }
 0x181   : > { %v988_v5 = vadd.f32 %v987_v12, %v985_v8 }
 0x183   : > { %v991_v7 = vadd.f32 %v990_v43, %v988_v5 }
 0x185   : > { %v994_v49 = vadd.f32 %v993_v16, %v991_v7  ;;  %v1097_v46 = vpop.permute.xlu1 %1096  ;;  %v1093_v0 = vpop.permute.xlu0 %1092 }
 0x187   : > { %v995_v21 = vmul.f32 0.125, %v994_v49 }
 0x189   : > { %v996_v27 = vadd.f32 1e-05, %v995_v21 }
 0x18b   : > { %1723 = vrsqrt.f32 %v996_v27  ;;  %vm1003_vm7 = vweird.f32 %v996_v27 }
 0x191   : > { %v1724_v31 = vpop.eup %1723 }
 0x192   : > { %v998_v32 = vmul.f32 %v1724_v31, %v996_v27  ;;  %vm1004_vm8 = vweird.f32 %v1724_v31 }
 0x193   : > { %vm1005_vm9 = vmor %vm1003_vm7, %vm1004_vm8 }
 0x194   : > { %v999_v33 = vmul.f32 %v1724_v31, %v998_v32 }
 0x196   : > { %v1000_v40 = vmul.f32 0.5, %v999_v33 }
 0x198   : > { %v1001_v45 = vsub.f32 1.5, %v1000_v40 }
 0x19a   : > { %v1002_v37 = vmul.f32 %v1724_v31, %v1001_v45 }
 0x19c   : > { %v2382_v51 = vsel %vm1005_vm9, %v1724_v31, %v1002_v37  ;;  %v1109_v37 = vpop.permute.xlu1 %1108 }
 0x19d   : > { %v1007_v10 = vmul.f32 %v2382_v51, %v972_v62  ;;  %v1010_v15 = vmul.f32 %v2382_v51, %v980_v20  ;;  %v1013_v39 = vmul.f32 %v2382_v51, %v989_v53  ;;  %v1009_v50 = vmul.f32 %v2382_v51, %v977_v47 }
 0x19e   : > { %v1008_v55 = vmul.f32 %v2382_v51, %v2362_v63  ;;  %v1011_v63 = vmul.f32 %v2382_v51, %v2366_v59  ;;  %v1012_v53 = vmul.f32 %v2382_v51, %v2370_v3 }
 0x19f   : > { %v1063_v61 = vmul.f32 %v1033_v1, %v1007_v10  ;;  %v1066_v28 = vmul.f32 %v1045_v24, %v1010_v15  ;;  %v1069_v48 = vmul.f32 %v1057_v44, %v1013_v39  ;;  %v1065_v19 = vmul.f32 %v1041_v2, %v1009_v50  ;;  %v2412_v10 = vld [vmem:[%s2697_s7] sm:$0xff]  ;;  %v2417_v2 = vld [vmem:[%s2697_s7 + $0x8] sm:$0xff]  ;;  %v2454_v24 = vld [vmem:[%s2697_s7 + $0x38] sm:$0xff] }
 0x1a0   : > { %v1064_v20 = vmul.f32 %v1037_v52, %v1008_v55  ;;  %v1067_v33 = vmul.f32 %v2378_v35, %v1011_v63  ;;  %v1068_v59 = vmul.f32 %v2380_v25, %v1012_v53  ;;  %v2422_v35 = vld [vmem:[%s2697_s7 + $0x10] sm:$0xff]  ;;  %v2442_v15 = vld [vmem:[%s2697_s7 + $0x28] sm:$0xff]  ;;  %v2459_v52 = vld [vmem:[%s2697_s7 + $0x40] sm:$0xff] }
 0x1a1   : > { %v1119_v13 = vadd.f32 %v1089_v57, %v1063_v61  ;;  %v1122_v30 = vadd.f32 %v1101_v18, %v1066_v28  ;;  %v1125_v56 = vadd.f32 %v1113_v34, %v1069_v48  ;;  %v2392_v12 = vadd.f32 %v1097_v46, %v1065_v19  ;;  %v1105_v57 = vpop.permute.xlu0 %1104  ;;  %v2473_v39 = vld [vmem:[%s2697_s7 + $0x50] sm:$0xff]  ;;  %v2484_v44 = vld [vmem:[%s2697_s7 + $0x60] sm:$0xff]  ;;  %v2500_v55 = vld [vmem:[%s2697_s7 + $0x78] sm:$0xff] }
 0x1a2   : > { %v2394_v47 = vadd.f32 %v1093_v0, %v1064_v20  ;;  %v2425_v1 = vadd.f32 %v1109_v37, %v1068_v59  ;;  %v2427_v61 = vadd.f32 %v1105_v57, %v1067_v33  ;;  %v2538_v46 = vld [vmem:[%s2697_s7 + $0xb0] sm:$0xff]  ;;  %v2544_v63 = vld [vmem:[%s2697_s7 + $0xb8] sm:$0xff]  ;;  %v2549_v53 = vld [vmem:[%s2697_s7 + $0xc0] sm:$0xff] }
 0x1a3   : > { %v1135_v14 = vmul.f32 0.044715, %v1119_v13  ;;  %v1138_v38 = vmul.f32 0.044715, %v1122_v30  ;;  %v1141_v9 = vmul.f32 0.044715, %v1125_v56 }
 0x1a4   : > { %v1127_v11 = vmul.f32 0.5, %v1119_v13  ;;  %v1137_v43 = vmul.f32 0.044715, %v2392_v12  ;;  %v1136_v7 = vmul.f32 0.044715, %v2394_v47  ;;  %v1130_v27 = vmul.f32 0.5, %v1122_v30 }
 0x1a5   : > { %v1143_v22 = vmul.f32 %v1135_v14, %v1119_v13  ;;  %v1146_v41 = vmul.f32 %v1138_v38, %v1122_v30  ;;  %v1149_v23 = vmul.f32 %v1141_v9, %v1125_v56  ;;  %v2437_v14 = vld [vmem:[%s2697_s7 + $0x20] sm:$0xff]  ;;  %v2468_v38 = vld [vmem:[%s2697_s7 + $0x48] sm:$0xff]  ;;  %v1133_v48 = vmul.f32 0.5, %v1125_v56  ;;  %v2587_v37 = vld [vmem:[%s2697_s7 + $0xf8] sm:$0xff] }
 0x1a6   : > { %v1145_v21 = vmul.f32 %v1137_v43, %v2392_v12  ;;  %v1144_v32 = vmul.f32 %v1136_v7, %v2394_v47  ;;  %v2512_v9 = vld [vmem:[%s2697_s7 + $0x88] sm:$0xff]  ;;  %v2561_v7 = vld [vmem:[%s2697_s7 + $0xd0] sm:$0xff]  ;;  %v1128_v57 = vmul.f32 0.5, %v2394_v47 }
 0x1a7   : > { %v1151_v4 = vmul.f32 %v1143_v22, %v1119_v13  ;;  %v1154_v58 = vmul.f32 %v1146_v41, %v1122_v30  ;;  %v1157_v8 = vmul.f32 %v1149_v23, %v1125_v56  ;;  %v2449_v22 = vld [vmem:[%s2697_s7 + $0x30] sm:$0xff]  ;;  %v2528_v23 = vld [vmem:[%s2697_s7 + $0xa0] sm:$0xff]  ;;  %v2577_v33 = vld [vmem:[%s2697_s7 + $0xe8] sm:$0xff] }
 0x1a8   : > { %v1153_v3 = vmul.f32 %v1145_v21, %v2392_v12  ;;  %v1152_v45 = vmul.f32 %v1144_v32, %v2394_v47 }
 0x1a9   : > { %v1159_v29 = vadd.f32 %v1151_v4, %v1119_v13  ;;  %v1162_v54 = vadd.f32 %v1154_v58, %v1122_v30  ;;  %v1165_v5 = vadd.f32 %v1157_v8, %v1125_v56  ;;  %v2432_v13 = vld [vmem:[%s2697_s7 + $0x18] sm:$0xff]  ;;  %v1014_v4 = vmul.f32 %v2382_v51, %v2374_v6  ;;  %v2489_v58 = vld [vmem:[%s2697_s7 + $0x68] sm:$0xff]  ;;  %v1117_v20 = vpop.permute.xlu0 %1116 }
 0x1aa   : > { %v1161_v25 = vadd.f32 %v1153_v3, %v2392_v12  ;;  %v1160_v18 = vadd.f32 %v1152_v45, %v2394_v47  ;;  %v2479_v51 = vld [vmem:[%s2697_s7 + $0x58] sm:$0xff]  ;;  %v2582_v45 = vld [vmem:[%s2697_s7 + $0xf0] sm:$0xff]  ;;  %v2613_v47 = vld [vmem:[%s2698_s8] sm:$0x1] }
 0x1ab   : > { %v1167_v36 = vmul.f32 0.7978846, %v1159_v29  ;;  %v1170_v62 = vmul.f32 0.7978846, %v1162_v54  ;;  %v1173_v49 = vmul.f32 0.7978846, %v1165_v5  ;;  %v1070_v56 = vmul.f32 %v2387_v42, %v1014_v4 }
 0x1ac   : > { %v1169_v28 = vmul.f32 0.7978846, %v1161_v25  ;;  %v1140_v29 = vmul.f32 0.044715, %v2425_v1  ;;  %v1168_v30 = vmul.f32 0.7978846, %v1160_v18 }
 0x1ad   : > { %1725 = vtanh.f32 %v1167_v36  ;;  %v1139_v36 = vmul.f32 0.044715, %v2427_v61  ;;  %v2495_v54 = vld [vmem:[%s2697_s7 + $0x70] sm:$0xff]  ;;  %v1126_v8 = vadd.f32 %v1117_v20, %v1070_v56  ;;  %v2554_v5 = vld [vmem:[%s2697_s7 + $0xc8] sm:$0xff]  ;;  %v1132_v56 = vmul.f32 0.5, %v2425_v1 }
 0x1ae   : > { %1727 = vtanh.f32 %v1170_v62  ;;  %v1148_v6 = vmul.f32 %v1140_v29, %v2425_v1  ;;  %v2598_v4 = vld [vmem:[%s2697_s7 + $0x108] sm:$0xff]  ;;  %v2608_v29 = vld [vmem:[%s2697_s7 + $0x118] sm:$0xff] }
 0x1af   : > { %1729 = vtanh.f32 %v1173_v49  ;;  %v1147_v50 = vmul.f32 %v1139_v36, %v2427_v61  ;;  %v2571_v49 = vld [vmem:[%s2697_s7 + $0xe0] sm:$0xff]  ;;  %v1142_v32 = vmul.f32 0.044715, %v1126_v8 }
 0x1b0   : > { %1731 = vtanh.f32 %v1169_v28  ;;  %v1156_v62 = vmul.f32 %v1148_v6, %v2425_v1  ;;  %v2603_v28 = vld [vmem:[%s2697_s7 + $0x110] sm:$0xff] }
 0x1b1   : > { %1733 = vtanh.f32 %v1168_v30  ;;  %v1155_v42 = vmul.f32 %v1147_v50, %v2427_v61  ;;  %v1150_v18 = vmul.f32 %v1142_v32, %v1126_v8 }
 0x1b2   : > { %v1164_v0 = vadd.f32 %v1156_v62, %v2425_v1 }
 0x1b3   : > { %v1726_v60 = vpop.eup %1725  ;;  %v1163_v43 = vadd.f32 %v1155_v42, %v2427_v61 }
 0x1b4   : > { %v1183_v17 = vadd.f32 1.0, %v1726_v60  ;;  %v1728_v16 = vpop.eup %1727  ;;  %v2505_v60 = vld [vmem:[%s2697_s7 + $0x80] sm:$0xff] }
 0x1b5   : > { %v1186_v31 = vadd.f32 1.0, %v1728_v16  ;;  %v1730_v41 = vpop.eup %1729  ;;  %v2566_v16 = vld [vmem:[%s2697_s7 + $0xd8] sm:$0xff] }
 0x1b6   : > { %v1191_v26 = vmul.f32 %v1183_v17, %v1127_v11  ;;  %v1189_v34 = vadd.f32 1.0, %v1730_v41  ;;  %v2517_v11 = vld [vmem:[%s2697_s7 + $0x90] sm:$0xff]  ;;  %v2522_v17 = vld [vmem:[%s2697_s7 + $0x98] sm:$0xff]  ;;  %v1732_v21 = vpop.eup %1731  ;;  %v1158_v41 = vmul.f32 %v1150_v18, %v1126_v8 }
 0x1b7   : > { %v1194_v40 = vmul.f32 %v1186_v31, %v1130_v27  ;;  %v1129_v27 = vmul.f32 0.5, %v2392_v12  ;;  %v1172_v31 = vmul.f32 0.7978846, %v1164_v0  ;;  %v1734_v59 = vpop.eup %1733  ;;  %v1185_v3 = vadd.f32 1.0, %v1732_v21  ;;  %v2592_v12 = vld [vmem:[%s2697_s7 + $0x100] sm:$0xff] }
 0x1b8   : > { %1199 = vst.msk [vmem:[#allocation2 + $0x11] sm:$0xff] %vm341_vm0, %v1191_v26  ;;  %v1197_v19 = vmul.f32 %v1189_v34, %v1133_v48  ;;  %v2533_v26 = vld [vmem:[%s2697_s7 + $0xa8] sm:$0xff]  ;;  %v1184_v25 = vadd.f32 1.0, %v1734_v59  ;;  %v1166_v6 = vadd.f32 %v1158_v41, %v1126_v8  ;;  %v1134_v21 = vmul.f32 0.5, %v1126_v8 }
 0x1b9   : > { %1202 = vst.msk [vmem:[#allocation2 + $0x41] sm:$0xff] %vm341_vm0, %v1194_v40  ;;  %v1171_v40 = vmul.f32 0.7978846, %v1163_v43  ;;  %1735 = vtanh.f32 %v1172_v31  ;;  %v1193_v30 = vmul.f32 %v1185_v3, %v1129_v27 }
 0x1ba   : > { %1205 = vst.msk [vmem:[#allocation2 + $0x71] sm:$0xff] %vm341_vm0, %v1197_v19  ;;  %v1192_v36 = vmul.f32 %v1184_v25, %v1128_v57  ;;  %v1174_v34 = vmul.f32 0.7978846, %v1166_v6  ;;  %v1131_v19 = vmul.f32 0.5, %v2427_v61 }
 0x1bb   : > { %1737 = vtanh.f32 %v1171_v40  ;;  %1201 = vst.msk [vmem:[#allocation2 + $0x31] sm:$0xff] %vm341_vm0, %v1193_v30 }
 0x1bc   : > { %1200 = vst.msk [vmem:[#allocation2 + $0x21] sm:$0xff] %vm341_vm0, %v1192_v36  ;;  %1739 = vtanh.f32 %v1174_v34 }
 0x1bf   : > { %v1736_v48 = vpop.eup %1735 }
 0x1c0   : > { %v1188_v62 = vadd.f32 1.0, %v1736_v48 }
 0x1c1   : > { %v1738_v50 = vpop.eup %1737 }
 0x1c2   : > { %v1187_v42 = vadd.f32 1.0, %v1738_v50  ;;  %v1196_v20 = vmul.f32 %v1188_v62, %v1132_v56  ;;  %v1740_v43 = vpop.eup %1739 }
 0x1c3   : > { %v1190_v27 = vadd.f32 1.0, %v1740_v43 }
 0x1c4   : > { %v1195_v0 = vmul.f32 %v1187_v42, %v1131_v19  ;;  %1204 = vst.msk [vmem:[#allocation2 + $0x61] sm:$0xff] %vm341_vm0, %v1196_v20 }
 0x1c5   : > { %v1198_v31 = vmul.f32 %v1190_v27, %v1134_v21 }
 0x1c6   : > { %1203 = vst.msk [vmem:[#allocation2 + $0x51] sm:$0xff] %vm341_vm0, %v1195_v0 }
 0x1c7   : > { %1206 = vst.msk [vmem:[#allocation2 + $0x81] sm:$0xff] %vm341_vm0, %v1198_v31 }
 0x1c8 LB: >> { %1328 = vmatpush.msra.mxu2 %v2479_v51  ;;  %1273 = vmatpush.msra.mxu0 %v2432_v13  ;;  %s1620_s18 = sshll.u32 %s1763_s16, 4  ;;  %v1251_v21 = vperm.slane %v2613_v47, 0  ;;  %s1636_s20 = sshll.u32 %s1763_s16, 3  ;;  %s1763_s16 = sphi %s2622_s16, %s1249_s16  }
 0x1c9   : >> { %1357 = vmatpush.msra.mxu3 %v2500_v55  ;;  %1301 = vmatpush.msra.mxu1 %v2454_v24  ;;  %s1255_s19 = scalar_lea.vmem [#allocation2], %s1620_s18  ;;  %s1502_s21 = scalar_lea.vmem %s1872_s22, %s1636_s20 }
 0x1ca   : >> { %1329 = vmatpush.msra.mxu2 %v2473_v39  ;;  %1274 = vmatpush.msra.mxu0 %v2422_v35  ;;  %s1505_s10 = scalar_lea.vmem %s1864_s17, %s1636_s20  ;;  %s1249_s16 = sadd.s32 1, %s1763_s16  }
 0x1cb   : >> { %1358 = vmatpush.msra.mxu3 %v2495_v54  ;;  %1302 = vmatpush.msra.mxu1 %v2449_v22  ;;  %p1246_p5 = scmp.ge.s32.totalorder %s1249_s16, 8  }
 0x1cc   : >> { %1330 = vmatpush.msra.mxu2 %v2468_v38  ;;  %1275 = vmatpush.msra.mxu0 %v2417_v2 }
 0x1cd   : >> { %1359 = vmatpush.msra.mxu3 %v2489_v58  ;;  %1303 = vmatpush.msra.mxu1 %v2442_v15 }
 0x1ce   : >> { %v1256_v1 = vld [vmem:[%s1255_s19] sm:$0xff]  ;;  %v1257_v61 = vld [vmem:[%s1255_s19 + $0x8] sm:$0x3]  ;;  %1331 = vmatpush.msra.mxu2 %v2459_v52  ;;  %1276 = vmatpush.msra.mxu0 %v2412_v10  ;;  %v1625_v40 = vld [vmem:[%s1255_s19 + $0x10] sm:$0xff] }
 0x1cf   : >> { %v1311_v8 = vrot.slane %v1256_v1, 2  ;;  %v1312_v32 = vrot.slane %v1257_v61, 2  ;;  %v1284_v59 = vrot.slane %v1256_v1, 1  ;;  %v1285_v3 = vrot.slane %v1257_v61, 1  ;;  %1360 = vmatpush.msra.mxu3 %v2484_v44  ;;  %1621 = vmatmul.msk.f32.vlgmr.msra.gmra.mxu0 %vm341_vm0, %v1256_v1  ;;  %v1631_v25 = vld [vmem:[%s1255_s19 + $0x20] sm:$0xff] }
 0x1d0   : >> { %1439 = vmatpush.msrb.mxu2 %v2566_v16  ;;  %v1626_v18 = vld [vmem:[%s1255_s19 + $0x18] sm:$0x3]  ;;  %v1632_v30 = vld [vmem:[%s1255_s19 + $0x28] sm:$0x3]  ;;  %1627 = vmatmul.msk.f32.vlgmr.msra.gmra.mxu3 %vm341_vm0, %v1625_v40  ;;  %v1367_v41 = vrot.slane %v1625_v40, 1  ;;  %v1449_v48 = vrot.slane %v1631_v25, 1 }
 0x1d1   : >> { %v1313_v57 = vsel %vm726_vm5, %v1311_v8, %v1312_v32  ;;  %1384 = vmatpush.msrb.mxu0 %v2522_v17  ;;  %v1286_v36 = vsel %vm699_vm6, %v1284_v59, %v1285_v3  ;;  %1466 = vmatpush.msrb.mxu3 %v2587_v37  ;;  %v1368_v6 = vrot.slane %v1626_v18, 1  ;;  %v1450_v34 = vrot.slane %v1632_v30, 1 }
 0x1d2   : >> { %1623 = vmatmul.msk.f32.vlgmr.msra.gmra.mxu2 %vm341_vm0, %v1313_v57  ;;  %1304 = vmatpush.msra.mxu1 %v2437_v14  ;;  %v1393_v50 = vrot.slane %v1625_v40, 2  ;;  %v1394_v56 = vrot.slane %v1626_v18, 2  ;;  %v1475_v20 = vrot.slane %v1631_v25, 2  ;;  %v1476_v0 = vrot.slane %v1632_v30, 2 }
 0x1d3   : >> { %1440 = vmatpush.msrb.mxu2 %v2561_v7  ;;  %1385 = vmatpush.msrb.mxu0 %v2517_v11  ;;  %v1369_v62 = vsel %vm699_vm6, %v1367_v41, %v1368_v6  ;;  %v1451_v19 = vsel %vm699_vm6, %v1449_v48, %v1450_v34  ;;  %v1503_v34 = vld [vmem:[%s1502_s21] sm:$0xff] }
 0x1d4   : >> { %1622 = vmatmul.msk.f32.vlgmr.msra.gmra.mxu1 %vm341_vm0, %v1286_v36  ;;  %1467 = vmatpush.msrb.mxu3 %v2582_v45  ;;  %v1395_v42 = vsel %vm726_vm5, %v1393_v50, %v1394_v56  ;;  %v1477_v43 = vsel %vm726_vm5, %v1475_v20, %v1476_v0 }
 0x1d5   : >> { %1441 = vmatpush.msrb.mxu2 %v2554_v5  ;;  %1410 = vmatpush.msrb.mxu1 %v2544_v63 }
 0x1d6   : >> { %1386 = vmatpush.msrb.mxu0 %v2512_v9  ;;  %1468 = vmatpush.msrb.mxu3 %v2577_v33 }
 0x1d7   : >> { %1442 = vmatpush.msrb.mxu2 %v2549_v53  ;;  %1411 = vmatpush.msrb.mxu1 %v2538_v46 }
 0x1d8   : >> { %1387 = vmatpush.msrb.mxu0 %v2505_v60  ;;  %1469 = vmatpush.msrb.mxu3 %v2571_v49 }
 0x1d9   : >> { %1412 = vmatpush.msrb.mxu1 %v2533_v26  ;;  %1628 = vmatmul.msk.f32.vlgmr.msrb.gmra.mxu0 %vm341_vm0, %v1369_v62 }
 0x1da   : >> { %1633 = vmatmul.msk.f32.vlgmr.msrb.gmra.mxu2 %vm341_vm0, %v1631_v25  ;;  %1634 = vmatmul.msk.f32.vlgmr.msrb.gmra.mxu3 %vm341_vm0, %v1451_v19 }
 0x1db   : >> { %1413 = vmatpush.msrb.mxu1 %v2528_v23  ;;  %1492 = vmatpush.msra.mxu0 %v2608_v29 }
 0x1dc   : >> { %1629 = vmatmul.msk.f32.vlgmr.msrb.gmra.mxu1 %vm341_vm0, %v1395_v42 }
 0x1dd   : >> { %1493 = vmatpush.msra.mxu0 %v2603_v28 }
 0x1df   : >> { %1494 = vmatpush.msra.mxu0 %v2598_v4 }
 0x1e1   : >> { %1495 = vmatpush.msra.mxu0 %v2592_v12 }
 0x1e2   : >> { %1635 = vmatmul.msk.f32.vlgmr.msra.gmra.mxu0 %vm341_vm0, %v1477_v43 }
 0x24c   : >> { %v1278_v27 = vpop.f32.mrf.mxu0 }
 0x24d   : >> { %v1281_v31 = vadd.f32 %v1278_v27, %v1251_v21 }
 0x251   : >> { %v1306_v1 = vpop.f32.mrf.mxu1 }
 0x252   : >> { %v1309_v61 = vadd.f32 %v1306_v1, %v1281_v31 }
 0x253   : >> { %v1362_v59 = vpop.f32.mrf.mxu3 }
 0x255   : >> { %v1333_v8 = vpop.f32.mrf.mxu2 }
 0x256   : >> { %v1336_v32 = vadd.f32 %v1333_v8, %v1309_v61  ;;  %v1389_v40 = vpop.f32.mrf.mxu0 }
 0x258   : >> { %v1365_v3 = vadd.f32 %v1362_v59, %v1336_v32 }
 0x259   : >> { %v1415_v25 = vpop.f32.mrf.mxu1 }
 0x25a   : >> { %v1392_v57 = vadd.f32 %v1389_v40, %v1365_v3 }
 0x25c   : >> { %v1418_v18 = vadd.f32 %v1415_v25, %v1392_v57 }
 0x25d   : >> { %v1444_v30 = vpop.f32.mrf.mxu2  ;;  %v1471_v41 = vpop.f32.mrf.mxu3 }
 0x25e   : >> { %v1447_v36 = vadd.f32 %v1444_v30, %v1418_v18 }
 0x25f   : >> { %v1497_v48 = vpop.f32.mrf.mxu0 }
 0x260   : >> { %v1474_v6 = vadd.f32 %v1471_v41, %v1447_v36 }
 0x262   : >> { %v1500_v50 = vadd.f32 %v1497_v48, %v1474_v6  ;;  %1248 = sbr.rel (!%p1246_p5) target bundleno = 456 (0x1c8), region = 121 }
 0x264   : >> { %v1504_v56 = vadd.f32 %v1503_v34, %v1500_v50 }
 0x266   : >> { %1506 = vst.msk [vmem:[%s1505_s10] sm:$0xff] %vm341_vm0, %v1504_v56 }
 0x267 PF: > { %s19_s30 = sadd.s32 1, %s1755_s30  }
 0x268   : > { %p16_p6 = scmp.ge.s32.totalorder %s19_s30, 4  }
 0x26a   :  { %18 = sbr.rel (!%p16_p6) target bundleno = 1 (0x1), region = 132 }

// kernel: _lambda_.11
= control target key start
LH: loop header
LB: loop body
LE: loop exit
PB: predicated region body
PF: predicated region fallthrough
CT: control target
= control target key end

     0   :  { %vm28_vm0 = vcmask 261120   ;;  %v509_v16 = vmov 32.0   ;;  %s884_s0 = inlined_call_operand.vmem [shape: f32[64,32], index: 0, kind: input, shape index: {}]   ;;  %s885_s1 = inlined_call_operand.vmem [shape: f32[1,32], index: 1, kind: input, shape index: {}]   ;;  %s886_s2 = inlined_call_operand.vmem [shape: f32[1,32], index: 2, kind: input, shape index: {}]   ;;  %s887_s3 = inlined_call_operand.vmem [shape: f32[32,256], index: 3, kind: input, shape index: {}]   ;;  %s888_s4 = inlined_call_operand.vmem [shape: f32[1,256], index: 4, kind: input, shape index: {}]   ;;  %s889_s5 = inlined_call_operand.vmem [shape: f32[64,256], index: 5, kind: output, shape index: {}]  }
   0x1   :  { %v26_v0 = vld [vmem:[%s884_s0 + $0x30] sm:$0xff]  ;;  %v25_v1 = vld [vmem:[%s884_s0 + $0x28] sm:$0xff]  ;;  %v24_v2 = vld [vmem:[%s884_s0 + $0x20] sm:$0xff]  ;;  %475 = vrcp.f32 %v509_v16 }
   0x2   :  { %v47_v3 = vsel %vm28_vm0, %v26_v0, 0.0  ;;  %v44_v4 = vsel %vm28_vm0, %v25_v1, 0.0  ;;  %v41_v5 = vsel %vm28_vm0, %v24_v2, 0.0  ;;  %v22_v6 = vld [vmem:[%s884_s0 + $0x10] sm:$0xff]  ;;  %v21_v7 = vld [vmem:[%s884_s0 + $0x8] sm:$0xff]  ;;  %v20_v8 = vld [vmem:[%s884_s0] sm:$0xff] }
   0x3   :  { %48 = vadd.xlane.f32.xlu2 %v47_v3  ;;  %45 = vadd.xlane.f32.xlu1 %v44_v4  ;;  %v35_v9 = vsel %vm28_vm0, %v22_v6, 0.0  ;;  %v32_v10 = vsel %vm28_vm0, %v21_v7, 0.0  ;;  %v29_v11 = vsel %vm28_vm0, %v20_v8, 0.0  ;;  %v23_v12 = vld [vmem:[%s884_s0 + $0x18] sm:$0xff] }
   0x4   :  { %42 = vadd.xlane.f32.xlu0 %v41_v5  ;;  %v27_v13 = vld [vmem:[%s884_s0 + $0x38] sm:$0xff]  ;;  %v38_v14 = vsel %vm28_vm0, %v23_v12, 0.0 }
   0x5   :  { %v50_v15 = vsel %vm28_vm0, %v27_v13, 0.0 }
   0x7   :  { %v476_v17 = vpop.eup %475 }
   0x8   :  { %v54_v18 = vmul.f32 32.0, %v476_v17  ;;  %vm58_vm1 = vweird.f32 %v476_v17 }
   0xa   :  { %v55_v19 = vsub.f32 1.0, %v54_v18 }
   0xb   :  { %36 = vadd.xlane.f32.xlu2 %v35_v9  ;;  %33 = vadd.xlane.f32.xlu1 %v32_v10 }
   0xc   :  { %30 = vadd.xlane.f32.xlu0 %v29_v11  ;;  %v56_v20 = vmul.f32 %v476_v17, %v55_v19 }
   0xe   :  { %v57_v21 = vadd.f32 %v476_v17, %v56_v20  ;;  %v314_v20 = vld [vmem:[%s887_s3 + $0x30] sm:$0xff] }
   0xf   :  { %464 = vmatpush.msra.mxu2 %v314_v20  ;;  %358 = vmatpush.msra.mxu0 %v314_v20 }
  0x10   :  { %v572_v22 = vsel %vm58_vm1, %v476_v17, %v57_v21  ;;  %v315_v21 = vld [vmem:[%s887_s3 + $0x38] sm:$0xff] }
  0x11   :  { %468 = vmatpush.msra.mxu3 %v315_v21  ;;  %399 = vmatpush.msra.mxu1 %v315_v21 }
  0x13   :  { %39 = vadd.xlane.f32.xlu1 %v38_v14 }
  0x14   :  { %51 = vadd.xlane.f32.xlu0 %v50_v15 }
  0x76   :  { %v49_v23 = vpop.xlane.xlu2 %48  ;;  %v46_v24 = vpop.xlane.xlu1 %45 }
  0x77   :  { %v65_v25 = vmul.f32 %v572_v22, %v46_v24  ;;  %v43_v26 = vpop.xlane.xlu0 %42  ;;  %v66_v39 = vmul.f32 %v572_v22, %v49_v23 }
  0x78   :  { %v64_v27 = vmul.f32 %v572_v22, %v43_v26 }
  0x79   :  { %v576_v28 = vsub.f32 %v25_v1, %v65_v25  ;;  %v600_v46 = vsub.f32 %v26_v0, %v66_v39  ;;  %v677_v39 = vld [vmem:[%s885_s1] ss:$0 sm:$0xff] }
  0x7a   :  { %v578_v29 = vsub.f32 %v24_v2, %v64_v27  ;;  %v312_v27 = vld [vmem:[%s887_s3 + $0x20] sm:$0xff] }
  0x7b   :  { %v81_v30 = vmul.f32 %v576_v28, %v576_v28  ;;  %v82_v55 = vmul.f32 %v600_v46, %v600_v46  ;;  %465 = vmatpush.msra.mxu2 %v312_v27  ;;  %359 = vmatpush.msra.mxu0 %v312_v27 }
  0x7c   :  { %v80_v31 = vmul.f32 %v578_v29, %v578_v29 }
  0x7d   :  { %v99_v32 = vsel %vm28_vm0, %v81_v30, 0.0  ;;  %v102_v58 = vsel %vm28_vm0, %v82_v55, 0.0  ;;  %v313_v30 = vld [vmem:[%s887_s3 + $0x28] sm:$0xff] }
  0x7e   :  { %v96_v33 = vsel %vm28_vm0, %v80_v31, 0.0  ;;  %v37_v34 = vpop.xlane.xlu2 %36  ;;  %100 = vadd.xlane.f32.xlu1 %v99_v32  ;;  %v34_v35 = vpop.xlane.xlu1 %33  ;;  %469 = vmatpush.msra.mxu3 %v313_v30 }
  0x7f   :  { %97 = vadd.xlane.f32.xlu2 %v96_v33  ;;  %v62_v36 = vmul.f32 %v572_v22, %v37_v34  ;;  %v61_v37 = vmul.f32 %v572_v22, %v34_v35  ;;  %v31_v38 = vpop.xlane.xlu0 %30  ;;  %400 = vmatpush.msra.mxu1 %v313_v30 }
  0x80   :  { %v60_v40 = vmul.f32 %v572_v22, %v31_v38 }
  0x81   :  { %v590_v41 = vsub.f32 %v22_v6, %v62_v36  ;;  %v592_v42 = vsub.f32 %v21_v7, %v61_v37  ;;  %v310_v36 = vld [vmem:[%s887_s3 + $0x10] sm:$0xff]  ;;  %v311_v37 = vld [vmem:[%s887_s3 + $0x18] sm:$0xff] }
  0x82   :  { %v594_v43 = vsub.f32 %v20_v8, %v60_v40  ;;  %466 = vmatpush.msra.mxu2 %v310_v36  ;;  %470 = vmatpush.msra.mxu3 %v311_v37 }
  0x83   :  { %v78_v44 = vmul.f32 %v590_v41, %v590_v41  ;;  %v77_v45 = vmul.f32 %v592_v42, %v592_v42  ;;  %360 = vmatpush.msra.mxu0 %v310_v36  ;;  %401 = vmatpush.msra.mxu1 %v311_v37 }
  0x84   :  { %v76_v47 = vmul.f32 %v594_v43, %v594_v43 }
  0x85   :  { %v90_v48 = vsel %vm28_vm0, %v78_v44, 0.0  ;;  %v87_v49 = vsel %vm28_vm0, %v77_v45, 0.0 }
  0x86   :  { %91 = vadd.xlane.f32.xlu1 %v90_v48  ;;  %v84_v50 = vsel %vm28_vm0, %v76_v47, 0.0  ;;  %v40_v51 = vpop.xlane.xlu1 %39 }
  0x87   :  { %88 = vadd.xlane.f32.xlu2 %v87_v49  ;;  %85 = vadd.xlane.f32.xlu0 %v84_v50  ;;  %v52_v52 = vpop.xlane.xlu0 %51  ;;  %v63_v54 = vmul.f32 %v572_v22, %v40_v51 }
  0x88   :  { %v67_v53 = vmul.f32 %v572_v22, %v52_v52  ;;  %v308_v52 = vld [vmem:[%s887_s3] sm:$0xff] }
  0x89   :  { %v613_v57 = vsub.f32 %v23_v12, %v63_v54  ;;  %467 = vmatpush.msra.mxu2 %v308_v52  ;;  %361 = vmatpush.msra.mxu0 %v308_v52 }
  0x8a   :  { %v611_v56 = vsub.f32 %v27_v13, %v67_v53  ;;  %v309_v53 = vld [vmem:[%s887_s3 + $0x8] sm:$0xff] }
  0x8b   :  { %v79_v61 = vmul.f32 %v613_v57, %v613_v57  ;;  %471 = vmatpush.msra.mxu3 %v309_v53  ;;  %402 = vmatpush.msra.mxu1 %v309_v53 }
  0x8c   :  { %v83_v59 = vmul.f32 %v611_v56, %v611_v56 }
  0x8d   :  { %v93_v62 = vsel %vm28_vm0, %v79_v61, 0.0 }
  0x8e   :  { %v105_v60 = vsel %vm28_vm0, %v83_v59, 0.0  ;;  %v717_v59 = vld [vmem:[%s886_s2] ss:$0 sm:$0xff] }
  0x8f   :  { %103 = vadd.xlane.f32.xlu0 %v102_v58  ;;  %106 = vadd.xlane.f32.xlu2 %v105_v60 }
  0x97   :  { %94 = vadd.xlane.f32.xlu0 %v93_v62 }
  0xf1   :  { %v101_v63 = vpop.xlane.xlu1 %100 }
  0xf2   :  { %v98_v0 = vpop.xlane.xlu2 %97  ;;  %v113_v1 = vmul.f32 %v101_v63, %v572_v22 }
  0xf3   :  { %v112_v2 = vmul.f32 %v98_v0, %v572_v22 }
  0xf4   :  { %v121_v3 = vadd.f32 1e-05, %v113_v1 }
  0xf5   :  { %v624_v4 = vadd.f32 1e-05, %v112_v2 }
  0xf6   :  { %477 = vrsqrt.f32 %v121_v3  ;;  %vm180_vm2 = vweird.f32 %v121_v3 }
  0xf7   :  { %479 = vrsqrt.f32 %v624_v4  ;;  %vm170_vm5 = vweird.f32 %v624_v4 }
  0xf9   :  { %v92_v5 = vpop.xlane.xlu1 %91 }
  0xfa   :  { %v89_v6 = vpop.xlane.xlu2 %88  ;;  %v110_v7 = vmul.f32 %v92_v5, %v572_v22  ;;  %v86_v8 = vpop.xlane.xlu0 %85 }
  0xfb   :  { %v109_v9 = vmul.f32 %v89_v6, %v572_v22  ;;  %v108_v10 = vmul.f32 %v86_v8, %v572_v22 }
  0xfc   :  { %v630_v11 = vpop.eup %477  ;;  %v632_v12 = vadd.f32 1e-05, %v110_v7 }
  0xfd   :  { %v634_v13 = vpop.eup %479  ;;  %v175_v14 = vmul.f32 %v630_v11, %v121_v3  ;;  %v637_v15 = vadd.f32 1e-05, %v109_v9  ;;  %v639_v16 = vadd.f32 1e-05, %v108_v10  ;;  %vm181_vm3 = vweird.f32 %v630_v11 }
  0xfe   :  { %v165_v17 = vmul.f32 %v634_v13, %v624_v4  ;;  %481 = vrsqrt.f32 %v632_v12  ;;  %vm171_vm4 = vweird.f32 %v634_v13  ;;  %vm691_vm6 = vmor %vm180_vm2, %vm181_vm3  ;;  %vm150_vm8 = vweird.f32 %v632_v12 }
  0xff   :  { %v176_v18 = vmul.f32 %v630_v11, %v175_v14  ;;  %483 = vrsqrt.f32 %v637_v15  ;;  %vm172_vm7 = vmor %vm170_vm5, %vm171_vm4  ;;  %vm140_vm10 = vweird.f32 %v637_v15  ;;  %vm130_vm14 = vweird.f32 %v639_v16 }
 0x100   :  { %v166_v19 = vmul.f32 %v634_v13, %v165_v17  ;;  %485 = vrsqrt.f32 %v639_v16 }
 0x101   :  { %v177_v23 = vmul.f32 0.5, %v176_v18 }
 0x102   :  { %v167_v24 = vmul.f32 0.5, %v166_v19  ;;  %v107_v25 = vpop.xlane.xlu2 %106  ;;  %v104_v26 = vpop.xlane.xlu0 %103 }
 0x103   :  { %v178_v31 = vsub.f32 1.5, %v177_v23  ;;  %v115_v32 = vmul.f32 %v107_v25, %v572_v22  ;;  %v114_v33 = vmul.f32 %v104_v26, %v572_v22 }
 0x104   :  { %v663_v34 = vpop.eup %481  ;;  %v168_v35 = vsub.f32 1.5, %v167_v24 }
 0x105   :  { %v672_v38 = vpop.eup %483  ;;  %v179_v40 = vmul.f32 %v630_v11, %v178_v31  ;;  %v145_v44 = vmul.f32 %v663_v34, %v632_v12  ;;  %v682_v45 = vadd.f32 1e-05, %v115_v32  ;;  %v697_v51 = vadd.f32 1e-05, %v114_v33 }
 0x106   :  { %v684_v47 = vpop.eup %485  ;;  %v169_v48 = vmul.f32 %v634_v13, %v168_v35  ;;  %v135_v50 = vmul.f32 %v672_v38, %v637_v15  ;;  %vm151_vm9 = vweird.f32 %v663_v34  ;;  %vm141_vm11 = vweird.f32 %v672_v38 }
 0x107   :  { %v183_v54 = vsel %vm691_vm6, %v630_v11, %v179_v40  ;;  %v146_v55 = vmul.f32 %v663_v34, %v145_v44  ;;  %v125_v58 = vmul.f32 %v684_v47, %v639_v16  ;;  %487 = vrsqrt.f32 %v682_v45  ;;  %vm152_vm12 = vmor %vm150_vm8, %vm151_vm9 }
 0x108   :  { %v173_v60 = vsel %vm172_vm7, %v634_v13, %v169_v48  ;;  %v209_v61 = vmul.f32 %v183_v54, %v576_v28  ;;  %v136_v62 = vmul.f32 %v672_v38, %v135_v50  ;;  %489 = vrsqrt.f32 %v697_v51  ;;  %vm142_vm15 = vmor %vm140_vm10, %vm141_vm11 }
 0x109   :  { %v208_v63 = vmul.f32 %v173_v60, %v578_v29  ;;  %v147_v0 = vmul.f32 0.5, %v146_v55  ;;  %v126_v1 = vmul.f32 %v684_v47, %v125_v58  ;;  %vm131_vm13 = vweird.f32 %v684_v47 }
 0x10a   :  { %v221_v2 = vmul.f32 %v677_v39, %v209_v61  ;;  %v137_v3 = vmul.f32 0.5, %v136_v62  ;;  %v95_v4 = vpop.xlane.xlu0 %94  ;;  %vm132_vm1 = vmor %vm130_vm14, %vm131_vm13  ;;  %vm200_vm2 = vweird.f32 %v682_v45  ;;  %vm190_vm6 = vweird.f32 %v697_v51 }
 0x10b   :  { %v220_v28 = vmul.f32 %v677_v39, %v208_v63  ;;  %v148_v5 = vsub.f32 1.5, %v147_v0  ;;  %v127_v6 = vmul.f32 0.5, %v126_v1  ;;  %v111_v7 = vmul.f32 %v95_v4, %v572_v22 }
 0x10c   :  { %v731_v8 = vadd.f32 %v717_v59, %v221_v2  ;;  %v138_v29 = vsub.f32 1.5, %v137_v3 }
 0x10d   :  { %v149_v9 = vmul.f32 %v663_v34, %v148_v5  ;;  %v128_v10 = vsub.f32 1.5, %v127_v6  ;;  %v739_v11 = vadd.f32 1e-05, %v111_v7  ;;  %v488_v13 = vpop.eup %487  ;;  %v744_v14 = vadd.f32 %v717_v59, %v220_v28 }
 0x10e   :  { %v139_v22 = vmul.f32 %v672_v38, %v138_v29  ;;  %v195_v17 = vmul.f32 %v488_v13, %v682_v45  ;;  %v490_v18 = vpop.eup %489  ;;  %v249_v16 = vmul.f32 0.044715, %v731_v8  ;;  %vm201_vm3 = vweird.f32 %v488_v13 }
 0x10f   :  { %v153_v15 = vsel %vm152_vm12, %v663_v34, %v149_v9  ;;  %v129_v12 = vmul.f32 %v684_v47, %v128_v10  ;;  %491 = vrsqrt.f32 %v739_v11  ;;  %v185_v25 = vmul.f32 %v490_v18, %v697_v51  ;;  %vm202_vm5 = vmor %vm200_vm2, %vm201_vm3 }
 0x110   :  { %v143_v19 = vsel %vm142_vm15, %v672_v38, %v139_v22  ;;  %v206_v20 = vmul.f32 %v153_v15, %v590_v41  ;;  %v196_v24 = vmul.f32 %v488_v13, %v195_v17  ;;  %v248_v32 = vmul.f32 0.044715, %v744_v14 }
 0x111   :  { %v205_v21 = vmul.f32 %v143_v19, %v592_v42  ;;  %v133_v23 = vsel %vm132_vm1, %v684_v47, %v129_v12  ;;  %v186_v41 = vmul.f32 %v490_v18, %v185_v25  ;;  %v257_v34 = vmul.f32 %v249_v16, %v731_v8 }
 0x112   :  { %v218_v26 = vmul.f32 %v677_v39, %v206_v20  ;;  %v204_v27 = vmul.f32 %v133_v23, %v594_v43  ;;  %v197_v31 = vmul.f32 0.5, %v196_v24  ;;  %v256_v43 = vmul.f32 %v248_v32, %v744_v14 }
 0x113   :  { %v217_v30 = vmul.f32 %v677_v39, %v205_v21  ;;  %v187_v36 = vmul.f32 0.5, %v186_v41  ;;  %vm191_vm4 = vweird.f32 %v490_v18  ;;  %v265_v40 = vmul.f32 %v257_v34, %v731_v8 }
 0x114   :  { %v761_v33 = vadd.f32 %v717_v59, %v218_v26  ;;  %v216_v42 = vmul.f32 %v677_v39, %v204_v27  ;;  %v198_v35 = vsub.f32 1.5, %v197_v31  ;;  %v264_v49 = vmul.f32 %v256_v43, %v744_v14  ;;  %vm192_vm7 = vmor %vm190_vm6, %vm191_vm4 }
 0x115   :  { %v492_v37 = vpop.eup %491  ;;  %v772_v44 = vadd.f32 %v717_v59, %v217_v30  ;;  %v188_v48 = vsub.f32 1.5, %v187_v36  ;;  %v273_v58 = vadd.f32 %v265_v40, %v731_v8  ;;  %vm160_vm8 = vweird.f32 %v739_v11 }
 0x116   :  { %v768_v38 = vadd.f32 %v717_v59, %v216_v42  ;;  %v199_v47 = vmul.f32 %v488_v13, %v198_v35  ;;  %v155_v45 = vmul.f32 %v492_v37, %v739_v11  ;;  %v246_v52 = vmul.f32 0.044715, %v761_v33 }
 0x117   :  { %v189_v54 = vmul.f32 %v490_v18, %v188_v48  ;;  %v272_v61 = vadd.f32 %v264_v49, %v744_v14  ;;  %vm161_vm9 = vweird.f32 %v492_v37  ;;  %v245_v0 = vmul.f32 0.044715, %v772_v44 }
 0x118   :  { %v244_v50 = vmul.f32 0.044715, %v768_v38  ;;  %v203_v53 = vsel %vm202_vm5, %v488_v13, %v199_v47  ;;  %v156_v55 = vmul.f32 %v492_v37, %v155_v45  ;;  %v281_v28 = vmul.f32 0.7978846, %v273_v58  ;;  %vm162_vm10 = vmor %vm160_vm8, %vm161_vm9 }
 0x119   :  { %v211_v60 = vmul.f32 %v203_v53, %v611_v56  ;;  %v193_v62 = vsel %vm192_vm7, %v490_v18, %v189_v54  ;;  %v280_v3 = vmul.f32 0.7978846, %v272_v61  ;;  %v253_v5 = vmul.f32 %v245_v0, %v772_v44 }
 0x11a   :  { %v252_v51 = vmul.f32 %v244_v50, %v768_v38  ;;  %v157_v63 = vmul.f32 0.5, %v156_v55  ;;  %v210_v2 = vmul.f32 %v193_v62, %v600_v46  ;;  %v254_v6 = vmul.f32 %v246_v52, %v761_v33 }
 0x11b   :  { %v223_v1 = vmul.f32 %v677_v39, %v211_v60  ;;  %493 = vtanh.f32 %v280_v3  ;;  %v261_v46 = vmul.f32 %v253_v5, %v772_v44  ;;  %v240_v25 = vmul.f32 0.5, %v744_v14 }
 0x11c   :  { %v260_v56 = vmul.f32 %v252_v51, %v768_v38  ;;  %v158_v4 = vsub.f32 1.5, %v157_v63  ;;  %v222_v29 = vmul.f32 %v677_v39, %v210_v2  ;;  %495 = vtanh.f32 %v281_v28 }
 0x11d   :  { %v792_v7 = vadd.f32 %v717_v59, %v223_v1  ;;  %v269_v17 = vadd.f32 %v261_v46, %v772_v44  ;;  %v262_v18 = vmul.f32 %v254_v6, %v761_v33  ;;  %v241_v49 = vmul.f32 0.5, %v731_v8 }
 0x11e   :  { %v268_v9 = vadd.f32 %v260_v56, %v768_v38  ;;  %v159_v10 = vmul.f32 %v492_v37, %v158_v4  ;;  %v234_v13 = vadd.f32 %v717_v59, %v222_v29  ;;  %v237_v54 = vmul.f32 0.5, %v772_v44 }
 0x11f   :  { %v251_v15 = vmul.f32 0.044715, %v792_v7  ;;  %v277_v16 = vmul.f32 0.7978846, %v269_v17  ;;  %v270_v27 = vadd.f32 %v262_v18, %v761_v33  ;;  %v238_v44 = vmul.f32 0.5, %v761_v33 }
 0x120   :  { %v276_v22 = vmul.f32 0.7978846, %v268_v9  ;;  %v163_v12 = vsel %vm162_vm10, %v492_v37, %v159_v10  ;;  %v250_v20 = vmul.f32 0.044715, %v234_v13  ;;  %v242_v61 = vmul.f32 0.5, %v234_v13 }
 0x121   :  { %v207_v19 = vmul.f32 %v163_v12, %v613_v57  ;;  %v259_v21 = vmul.f32 %v251_v15, %v792_v7  ;;  %v494_v23 = vpop.eup %493  ;;  %v278_v43 = vmul.f32 0.7978846, %v270_v27  ;;  %v243_v56 = vmul.f32 0.5, %v792_v7  ;;  %v316_v33 = vld [vmem:[%s888_s4] sm:$0x3] }
 0x122   :  { %497 = vtanh.f32 %v276_v22  ;;  %v258_v24 = vmul.f32 %v250_v20, %v234_v13  ;;  %v296_v26 = vadd.f32 1.0, %v494_v23  ;;  %v496_v41 = vpop.eup %495  ;;  %v318_v29 = vperm.slane %v316_v33, 0 }
 0x123   :  { %v219_v11 = vmul.f32 %v677_v39, %v207_v19  ;;  %499 = vtanh.f32 %v277_v16  ;;  %v267_v57 = vmul.f32 %v259_v21, %v792_v7  ;;  %v236_v39 = vmul.f32 0.5, %v768_v38 }
 0x124   :  { %v266_v31 = vmul.f32 %v258_v24, %v234_v13  ;;  %v304_v32 = vmul.f32 %v296_v26, %v240_v25  ;;  %v297_v47 = vadd.f32 1.0, %v496_v41 }
 0x125   :  { %v231_v30 = vadd.f32 %v717_v59, %v219_v11  ;;  %v275_v59 = vadd.f32 %v267_v57, %v792_v7  ;;  %v319_v7 = vperm.slane %v316_v33, 1 }
 0x126   :  { %v274_v34 = vadd.f32 %v266_v31, %v234_v13  ;;  %452 = vmatmul.msk.f32.vlgmr.msra.gmra.mxu2 %vm28_vm0, %v304_v32  ;;  %460 = vmatmul.msk.f32.vlgmr.msra.gmra.mxu3 %vm28_vm0, %v304_v32  ;;  %v305_v52 = vmul.f32 %v297_v47, %v241_v49 }
 0x127   :  { %v247_v35 = vmul.f32 0.044715, %v231_v30  ;;  %v283_v50 = vmul.f32 0.7978846, %v275_v59  ;;  %v239_v5 = vmul.f32 0.5, %v231_v30 }
 0x128   :  { %v498_v42 = vpop.eup %497  ;;  %v282_v36 = vmul.f32 0.7978846, %v274_v34 }
 0x129   :  { %v292_v14 = vadd.f32 1.0, %v498_v42  ;;  %v255_v37 = vmul.f32 %v247_v35, %v231_v30  ;;  %v500_v48 = vpop.eup %499 }
 0x12a   :  { %501 = vtanh.f32 %v282_v36  ;;  %v293_v53 = vadd.f32 1.0, %v500_v48 }
 0x12b   :  { %v300_v40 = vmul.f32 %v292_v14, %v236_v39  ;;  %v263_v45 = vmul.f32 %v255_v37, %v231_v30  ;;  %503 = vtanh.f32 %v278_v43 }
 0x12c   :  { %505 = vtanh.f32 %v283_v50  ;;  %v301_v60 = vmul.f32 %v293_v53, %v237_v54 }
 0x12d   :  { %448 = vmatmul.msk.f32.vlgmr.msra.gmra.mxu0 %vm28_vm0, %v300_v40  ;;  %456 = vmatmul.msk.f32.vlgmr.msra.gmra.mxu1 %vm28_vm0, %v300_v40  ;;  %v271_v38 = vadd.f32 %v263_v45, %v231_v30 }
 0x12e   :  { %453 = vmatmul.msk.f32.gmra.mxu2 %vm28_vm0, %v305_v52  ;;  %461 = vmatmul.msk.f32.gmra.mxu3 %vm28_vm0, %v305_v52 }
 0x12f   :  { %v279_v58 = vmul.f32 0.7978846, %v271_v38 }
 0x130   :  { %v502_v55 = vpop.eup %501 }
 0x131   :  { %v298_v51 = vadd.f32 1.0, %v502_v55  ;;  %v504_v8 = vpop.eup %503  ;;  %507 = vtanh.f32 %v279_v58 }
 0x132   :  { %v294_v63 = vadd.f32 1.0, %v504_v8  ;;  %v506_v0 = vpop.eup %505 }
 0x133   :  { %v306_v62 = vmul.f32 %v298_v51, %v242_v61  ;;  %v299_v2 = vadd.f32 1.0, %v506_v0 }
 0x134   :  { %v302_v1 = vmul.f32 %v294_v63, %v238_v44 }
 0x135   :  { %449 = vmatmul.msk.f32.gmra.mxu0 %vm28_vm0, %v301_v60  ;;  %457 = vmatmul.msk.f32.gmra.mxu1 %vm28_vm0, %v301_v60  ;;  %v307_v4 = vmul.f32 %v299_v2, %v243_v56 }
 0x136   :  { %454 = vmatmul.msk.f32.gmra.mxu2 %vm28_vm0, %v306_v62  ;;  %462 = vmatmul.msk.f32.gmra.mxu3 %vm28_vm0, %v306_v62 }
 0x137   :  { %v508_v3 = vpop.eup %507 }
 0x138   :  { %v295_v28 = vadd.f32 1.0, %v508_v3 }
 0x13a   :  { %v303_v6 = vmul.f32 %v295_v28, %v239_v5 }
 0x13d   :  { %450 = vmatmul.msk.f32.gmra.mxu0 %vm28_vm0, %v302_v1  ;;  %458 = vmatmul.msk.f32.gmra.mxu1 %vm28_vm0, %v302_v1 }
 0x13e   :  { %455 = vmatmul.msk.f32.gmra.mxu2 %vm28_vm0, %v307_v4  ;;  %463 = vmatmul.msk.f32.gmra.mxu3 %vm28_vm0, %v307_v4 }
 0x145   :  { %451 = vmatmul.msk.f32.gmra.mxu0 %vm28_vm0, %v303_v6  ;;  %459 = vmatmul.msk.f32.gmra.mxu1 %vm28_vm0, %v303_v6 }
 0x1a9   :  { %v375_v22 = vpop.f32.mrf.mxu2  ;;  %v416_v15 = vpop.f32.mrf.mxu3 }
 0x1aa   :  { %v363_v9 = vpop.f32.mrf.mxu0  ;;  %v404_v10 = vpop.f32.mrf.mxu1  ;;  %v376_v12 = vadd.f32 %v375_v22, %v318_v29  ;;  %v417_v17 = vadd.f32 %v416_v15, %v319_v7 }
 0x1ab   :  { %v364_v46 = vadd.f32 %v363_v9, %v318_v29  ;;  %v405_v13 = vadd.f32 %v404_v10, %v319_v7 }
 0x1ac   :  { %436 = vst [vmem:[%s889_s5 + $0x40] sm:$0xff] %v376_v12 }
 0x1ad   :  { %428 = vst [vmem:[%s889_s5] sm:$0xff] %v364_v46 }
 0x1ae   :  { %429 = vst [vmem:[%s889_s5 + $0x8] sm:$0xff] %v405_v13 }
 0x1af   :  { %437 = vst [vmem:[%s889_s5 + $0x48] sm:$0xff] %v417_v17 }
 0x1b1   :  { %v378_v21 = vpop.f32.mrf.mxu2  ;;  %v419_v23 = vpop.f32.mrf.mxu3 }
 0x1b2   :  { %v366_v18 = vpop.f32.mrf.mxu0  ;;  %v407_v19 = vpop.f32.mrf.mxu1  ;;  %v379_v11 = vadd.f32 %v378_v21, %v318_v29  ;;  %v420_v24 = vadd.f32 %v419_v23, %v319_v7 }
 0x1b3   :  { %v367_v20 = vadd.f32 %v366_v18, %v318_v29  ;;  %v408_v16 = vadd.f32 %v407_v19, %v319_v7 }
 0x1b4   :  { %438 = vst [vmem:[%s889_s5 + $0x50] sm:$0xff] %v379_v11 }
 0x1b5   :  { %430 = vst [vmem:[%s889_s5 + $0x10] sm:$0xff] %v367_v20 }
 0x1b6   :  { %431 = vst [vmem:[%s889_s5 + $0x18] sm:$0xff] %v408_v16 }
 0x1b7   :  { %439 = vst [vmem:[%s889_s5 + $0x58] sm:$0xff] %v420_v24 }
 0x1b9   :  { %v381_v31 = vpop.f32.mrf.mxu2  ;;  %v422_v57 = vpop.f32.mrf.mxu3 }
 0x1ba   :  { %v369_v25 = vpop.f32.mrf.mxu0  ;;  %v410_v26 = vpop.f32.mrf.mxu1  ;;  %v382_v41 = vadd.f32 %v381_v31, %v318_v29  ;;  %v423_v32 = vadd.f32 %v422_v57, %v319_v7 }
 0x1bb   :  { %v370_v27 = vadd.f32 %v369_v25, %v318_v29  ;;  %v411_v30 = vadd.f32 %v410_v26, %v319_v7 }
 0x1bc   :  { %440 = vst [vmem:[%s889_s5 + $0x60] sm:$0xff] %v382_v41 }
 0x1bd   :  { %432 = vst [vmem:[%s889_s5 + $0x20] sm:$0xff] %v370_v27 }
 0x1be   :  { %433 = vst [vmem:[%s889_s5 + $0x28] sm:$0xff] %v411_v30 }
 0x1bf   :  { %441 = vst [vmem:[%s889_s5 + $0x68] sm:$0xff] %v423_v32 }
 0x1c1   :  { %v384_v14 = vpop.f32.mrf.mxu2  ;;  %v425_v36 = vpop.f32.mrf.mxu3 }
 0x1c2   :  { %v372_v42 = vpop.f32.mrf.mxu0  ;;  %v413_v34 = vpop.f32.mrf.mxu1  ;;  %v385_v43 = vadd.f32 %v384_v14, %v318_v29  ;;  %v426_v59 = vadd.f32 %v425_v36, %v319_v7 }
 0x1c3   :  { %v373_v35 = vadd.f32 %v372_v42, %v318_v29  ;;  %v414_v39 = vadd.f32 %v413_v34, %v319_v7 }
 0x1c4   :  { %442 = vst [vmem:[%s889_s5 + $0x70] sm:$0xff] %v385_v43 }
 0x1c5   :  { %434 = vst [vmem:[%s889_s5 + $0x30] sm:$0xff] %v373_v35 }
 0x1c6   :  { %435 = vst [vmem:[%s889_s5 + $0x38] sm:$0xff] %v414_v39 }
 0x1c7   :  { %443 = vst [vmem:[%s889_s5 + $0x78] sm:$0xff] %v426_v59 }

// kernel: _lambda_.12
= control target key start
LH: loop header
LB: loop body
LE: loop exit
PB: predicated region body
PF: predicated region fallthrough
CT: control target
= control target key end

     0   :  { %s1612_s12 = smov 0   ;;  %s1614_s13 = smov 0   ;;  %s2471_s0 = inlined_call_operand.vmem [shape: f32[8,8,2,3,32], index: 0, kind: input, shape index: {}]   ;;  %s2472_s1 = inlined_call_operand.vmem [shape: f32[2,3,32,32], index: 1, kind: input, shape index: {}]   ;;  %s2473_s2 = inlined_call_operand.vmem [shape: f32[2,3,1,32], index: 2, kind: input, shape index: {}]   ;;  %s2474_s3 = inlined_call_operand.vmem [shape: f32[2,8,8,32], index: 3, kind: output, shape index: {}]  }
   0x1   :  { %s1616_s14 = smov 0   ;;  %s1618_s15 = smov 0  }
   0x2   :  { %s1620_s16 = smov 0  }
   0x3 LB: > { %s25_s17 = sadd.s32 1, %s1581_s15  ;;  %p49_p1 = scmp.ne.s32.totalorder %s1573_s13, %s1569_s12  ;;  %s1585_s16 = sphi %s1620_s16, %s13_s16   ;;  %s1581_s15 = sphi %s1618_s15, %s2549_s15   ;;  %s1577_s14 = sphi %s1616_s14, %s2548_s14   ;;  %s1573_s13 = sphi %s1614_s13, %s2547_s13   ;;  %s1569_s12 = sphi %s1612_s12, %s2546_s12  }
   0x4   : > { %p27_p0 = scmp.ge.s32.totalorder %s25_s17, 2  ;;  %p50_p2 = scmp.eq.s32.totalorder %s1585_s16, 0 }
   0x5   : > { %s42_s19 = sadd.s32 1, %s1573_s13  ;;  %p1369_p5 = scmp.ge.s32.totalorder %s1585_s16, 2 }
   0x6   : > { %s2551_s17 = smov (%p27_p0, %s25_s17), 0  ;;  %p51_p3 = por %p50_p2, %p49_p1 }
   0x7   : > { %s38_s18 = ssub.s32 %s1581_s15, %s2551_s17  ;;  %163 = sbr.rel (%p1369_p5) target bundleno = 80 (0x50), region = 16 }
   0x8   : > { %p40_p4 = scmp.eq.s32.totalorder %s38_s18, 0 }
   0xa   : > { %s1647_s20 = scalar_select %p40_p4, %s1573_s13, %s42_s19  }
   0xc   : > { %166 = sbr.rel (!%p51_p3) target bundleno = 80 (0x50), region = 20  ;;  %s168_s21 = sand.u32 (%p51_p3), 1, %s1573_s13  }
   0xd   : > { %s1371_s22 = sshll.u32 (%p51_p3), %s1581_s15, 2  ;;  %s1370_s23 = sshll.u32 (%p51_p3), %s168_s21, 8 }
   0xe   : > { %s1655_s26 = scalar_lea.vmem (%p51_p3), %s2471_s0, %s1371_s22  ;;  %s1659_s27 = scalar_lea.vmem (%p51_p3), [#allocation3], %s1370_s23 }
   0xf   : > { %v196_v0 = vld [vmem:[%s1655_s26] sm:$0xf] (%p51_p3)  ;;  %v198_v1 = vld [vmem:[%s1655_s26 + $0x8] sm:$0xf] (%p51_p3)  ;;  %v200_v2 = vld [vmem:[%s1655_s26 + $0x10] sm:$0xf] (%p51_p3) }
  0x10   : > { %197 = vst [vmem:[%s1659_s27] sm:$0xf] (%p51_p3), %v196_v0  ;;  %v202_v3 = vld [vmem:[%s1655_s26 + $0x18] sm:$0xf] (%p51_p3)  ;;  %v204_v4 = vld [vmem:[%s1655_s26 + $0x20] sm:$0xf] (%p51_p3) }
  0x11   : > { %199 = vst [vmem:[%s1659_s27 + $0x4] sm:$0xf] %v198_v1  ;;  %v206_v5 = vld [vmem:[%s1655_s26 + $0x28] sm:$0xf]  ;;  %v208_v6 = vld [vmem:[%s1655_s26 + $0x30] sm:$0xf] }
  0x12   : > { %201 = vst [vmem:[%s1659_s27 + $0x8] sm:$0xf] %v200_v2  ;;  %v210_v7 = vld [vmem:[%s1655_s26 + $0x38] sm:$0xf]  ;;  %v212_v8 = vld [vmem:[%s1655_s26 + $0x40] sm:$0xf] }
  0x13   : > { %203 = vst [vmem:[%s1659_s27 + $0xc] sm:$0xf] %v202_v3  ;;  %v214_v9 = vld [vmem:[%s1655_s26 + $0x48] sm:$0xf]  ;;  %v216_v10 = vld [vmem:[%s1655_s26 + $0x50] sm:$0xf] }
  0x14   : > { %205 = vst [vmem:[%s1659_s27 + $0x10] sm:$0xf] %v204_v4  ;;  %v218_v11 = vld [vmem:[%s1655_s26 + $0x58] sm:$0xf]  ;;  %v220_v12 = vld [vmem:[%s1655_s26 + $0x60] sm:$0xf] }
  0x15   : > { %207 = vst [vmem:[%s1659_s27 + $0x14] sm:$0xf] %v206_v5  ;;  %v222_v13 = vld [vmem:[%s1655_s26 + $0x68] sm:$0xf]  ;;  %v224_v14 = vld [vmem:[%s1655_s26 + $0x70] sm:$0xf] }
  0x16   : > { %209 = vst [vmem:[%s1659_s27 + $0x18] sm:$0xf] %v208_v6  ;;  %v226_v15 = vld [vmem:[%s1655_s26 + $0x78] sm:$0xf]  ;;  %v228_v16 = vld [vmem:[%s1655_s26 + $0x80] sm:$0xf] }
  0x17   : > { %211 = vst [vmem:[%s1659_s27 + $0x1c] sm:$0xf] %v210_v7  ;;  %v230_v17 = vld [vmem:[%s1655_s26 + $0x88] sm:$0xf]  ;;  %v232_v18 = vld [vmem:[%s1655_s26 + $0x90] sm:$0xf] }
  0x18   : > { %213 = vst [vmem:[%s1659_s27 + $0x20] sm:$0xf] %v212_v8  ;;  %v234_v19 = vld [vmem:[%s1655_s26 + $0x98] sm:$0xf]  ;;  %v236_v20 = vld [vmem:[%s1655_s26 + $0xa0] sm:$0xf] }
  0x19   : > { %215 = vst [vmem:[%s1659_s27 + $0x24] sm:$0xf] %v214_v9  ;;  %v238_v21 = vld [vmem:[%s1655_s26 + $0xa8] sm:$0xf]  ;;  %v240_v22 = vld [vmem:[%s1655_s26 + $0xb0] sm:$0xf] }
  0x1a   : > { %217 = vst [vmem:[%s1659_s27 + $0x28] sm:$0xf] %v216_v10  ;;  %v242_v23 = vld [vmem:[%s1655_s26 + $0xb8] sm:$0xf]  ;;  %v244_v24 = vld [vmem:[%s1655_s26 + $0xc0] sm:$0xf] }
  0x1b   : > { %219 = vst [vmem:[%s1659_s27 + $0x2c] sm:$0xf] %v218_v11  ;;  %v246_v25 = vld [vmem:[%s1655_s26 + $0xc8] sm:$0xf]  ;;  %v248_v26 = vld [vmem:[%s1655_s26 + $0xd0] sm:$0xf] }
  0x1c   : > { %221 = vst [vmem:[%s1659_s27 + $0x30] sm:$0xf] %v220_v12  ;;  %v250_v27 = vld [vmem:[%s1655_s26 + $0xd8] sm:$0xf]  ;;  %v252_v28 = vld [vmem:[%s1655_s26 + $0xe0] sm:$0xf] }
  0x1d   : > { %223 = vst [vmem:[%s1659_s27 + $0x34] sm:$0xf] %v222_v13  ;;  %v254_v29 = vld [vmem:[%s1655_s26 + $0xe8] sm:$0xf]  ;;  %v256_v30 = vld [vmem:[%s1655_s26 + $0xf0] sm:$0xf] }
  0x1e   : > { %225 = vst [vmem:[%s1659_s27 + $0x38] sm:$0xf] %v224_v14  ;;  %v258_v31 = vld [vmem:[%s1655_s26 + $0xf8] sm:$0xf]  ;;  %v260_v32 = vld [vmem:[%s1655_s26 + $0x100] sm:$0xf] }
  0x1f   : > { %227 = vst [vmem:[%s1659_s27 + $0x3c] sm:$0xf] %v226_v15  ;;  %v262_v33 = vld [vmem:[%s1655_s26 + $0x108] sm:$0xf]  ;;  %v264_v34 = vld [vmem:[%s1655_s26 + $0x110] sm:$0xf] }
  0x20   : > { %229 = vst [vmem:[%s1659_s27 + $0x40] sm:$0xf] %v228_v16  ;;  %v266_v35 = vld [vmem:[%s1655_s26 + $0x118] sm:$0xf]  ;;  %v268_v36 = vld [vmem:[%s1655_s26 + $0x120] sm:$0xf] }
  0x21   : > { %231 = vst [vmem:[%s1659_s27 + $0x44] sm:$0xf] %v230_v17  ;;  %v270_v37 = vld [vmem:[%s1655_s26 + $0x128] sm:$0xf]  ;;  %v272_v38 = vld [vmem:[%s1655_s26 + $0x130] sm:$0xf] }
  0x22   : > { %233 = vst [vmem:[%s1659_s27 + $0x48] sm:$0xf] %v232_v18  ;;  %v274_v39 = vld [vmem:[%s1655_s26 + $0x138] sm:$0xf]  ;;  %v276_v40 = vld [vmem:[%s1655_s26 + $0x140] sm:$0xf] }
  0x23   : > { %235 = vst [vmem:[%s1659_s27 + $0x4c] sm:$0xf] %v234_v19  ;;  %v278_v41 = vld [vmem:[%s1655_s26 + $0x148] sm:$0xf]  ;;  %v280_v42 = vld [vmem:[%s1655_s26 + $0x150] sm:$0xf] }
  0x24   : > { %237 = vst [vmem:[%s1659_s27 + $0x50] sm:$0xf] %v236_v20  ;;  %v282_v43 = vld [vmem:[%s1655_s26 + $0x158] sm:$0xf]  ;;  %v284_v44 = vld [vmem:[%s1655_s26 + $0x160] sm:$0xf] }
  0x25   : > { %239 = vst [vmem:[%s1659_s27 + $0x54] sm:$0xf] %v238_v21  ;;  %v286_v45 = vld [vmem:[%s1655_s26 + $0x168] sm:$0xf]  ;;  %v288_v46 = vld [vmem:[%s1655_s26 + $0x170] sm:$0xf] }
  0x26   : > { %241 = vst [vmem:[%s1659_s27 + $0x58] sm:$0xf] %v240_v22  ;;  %v290_v47 = vld [vmem:[%s1655_s26 + $0x178] sm:$0xf]  ;;  %v292_v48 = vld [vmem:[%s1655_s26 + $0x180] sm:$0xf] }
  0x27   : > { %243 = vst [vmem:[%s1659_s27 + $0x5c] sm:$0xf] %v242_v23  ;;  %v294_v49 = vld [vmem:[%s1655_s26 + $0x188] sm:$0xf]  ;;  %v296_v50 = vld [vmem:[%s1655_s26 + $0x190] sm:$0xf] }
  0x28   : > { %245 = vst [vmem:[%s1659_s27 + $0x60] sm:$0xf] %v244_v24  ;;  %v298_v51 = vld [vmem:[%s1655_s26 + $0x198] sm:$0xf]  ;;  %v300_v52 = vld [vmem:[%s1655_s26 + $0x1a0] sm:$0xf] }
  0x29   : > { %247 = vst [vmem:[%s1659_s27 + $0x64] sm:$0xf] %v246_v25  ;;  %v302_v53 = vld [vmem:[%s1655_s26 + $0x1a8] sm:$0xf]  ;;  %v304_v54 = vld [vmem:[%s1655_s26 + $0x1b0] sm:$0xf] }
  0x2a   : > { %249 = vst [vmem:[%s1659_s27 + $0x68] sm:$0xf] %v248_v26  ;;  %v306_v55 = vld [vmem:[%s1655_s26 + $0x1b8] sm:$0xf]  ;;  %v308_v56 = vld [vmem:[%s1655_s26 + $0x1c0] sm:$0xf] }
  0x2b   : > { %251 = vst [vmem:[%s1659_s27 + $0x6c] sm:$0xf] %v250_v27  ;;  %v310_v57 = vld [vmem:[%s1655_s26 + $0x1c8] sm:$0xf]  ;;  %v312_v58 = vld [vmem:[%s1655_s26 + $0x1d0] sm:$0xf] }
  0x2c   : > { %253 = vst [vmem:[%s1659_s27 + $0x70] sm:$0xf] %v252_v28  ;;  %v314_v59 = vld [vmem:[%s1655_s26 + $0x1d8] sm:$0xf]  ;;  %v316_v60 = vld [vmem:[%s1655_s26 + $0x1e0] sm:$0xf] }
  0x2d   : > { %255 = vst [vmem:[%s1659_s27 + $0x74] sm:$0xf] %v254_v29  ;;  %v318_v61 = vld [vmem:[%s1655_s26 + $0x1e8] sm:$0xf]  ;;  %v320_v62 = vld [vmem:[%s1655_s26 + $0x1f0] sm:$0xf] }
  0x2e   : > { %257 = vst [vmem:[%s1659_s27 + $0x78] sm:$0xf] %v256_v30  ;;  %v322_v63 = vld [vmem:[%s1655_s26 + $0x1f8] sm:$0xf] }
  0x2f   : > { %259 = vst [vmem:[%s1659_s27 + $0x7c] sm:$0xf] %v258_v31 }
  0x30   : > { %261 = vst [vmem:[%s1659_s27 + $0x80] sm:$0xf] %v260_v32 }
  0x31   : > { %263 = vst [vmem:[%s1659_s27 + $0x84] sm:$0xf] %v262_v33 }
  0x32   : > { %265 = vst [vmem:[%s1659_s27 + $0x88] sm:$0xf] %v264_v34 }
  0x33   : > { %267 = vst [vmem:[%s1659_s27 + $0x8c] sm:$0xf] %v266_v35 }
  0x34   : > { %269 = vst [vmem:[%s1659_s27 + $0x90] sm:$0xf] %v268_v36 }
  0x35   : > { %271 = vst [vmem:[%s1659_s27 + $0x94] sm:$0xf] %v270_v37 }
  0x36   : > { %273 = vst [vmem:[%s1659_s27 + $0x98] sm:$0xf] %v272_v38 }
  0x37   : > { %275 = vst [vmem:[%s1659_s27 + $0x9c] sm:$0xf] %v274_v39 }
  0x38   : > { %277 = vst [vmem:[%s1659_s27 + $0xa0] sm:$0xf] %v276_v40 }
  0x39   : > { %279 = vst [vmem:[%s1659_s27 + $0xa4] sm:$0xf] %v278_v41 }
  0x3a   : > { %281 = vst [vmem:[%s1659_s27 + $0xa8] sm:$0xf] %v280_v42 }
  0x3b   : > { %283 = vst [vmem:[%s1659_s27 + $0xac] sm:$0xf] %v282_v43 }
  0x3c   : > { %285 = vst [vmem:[%s1659_s27 + $0xb0] sm:$0xf] %v284_v44 }
  0x3d   : > { %287 = vst [vmem:[%s1659_s27 + $0xb4] sm:$0xf] %v286_v45 }
  0x3e   : > { %289 = vst [vmem:[%s1659_s27 + $0xb8] sm:$0xf] %v288_v46 }
  0x3f   : > { %291 = vst [vmem:[%s1659_s27 + $0xbc] sm:$0xf] %v290_v47 }
  0x40   : > { %293 = vst [vmem:[%s1659_s27 + $0xc0] sm:$0xf] %v292_v48 }
  0x41   : > { %295 = vst [vmem:[%s1659_s27 + $0xc4] sm:$0xf] %v294_v49 }
  0x42   : > { %297 = vst [vmem:[%s1659_s27 + $0xc8] sm:$0xf] %v296_v50 }
  0x43   : > { %299 = vst [vmem:[%s1659_s27 + $0xcc] sm:$0xf] %v298_v51 }
  0x44   : > { %301 = vst [vmem:[%s1659_s27 + $0xd0] sm:$0xf] %v300_v52 }
  0x45   : > { %303 = vst [vmem:[%s1659_s27 + $0xd4] sm:$0xf] %v302_v53 }
  0x46   : > { %305 = vst [vmem:[%s1659_s27 + $0xd8] sm:$0xf] %v304_v54 }
  0x47   : > { %307 = vst [vmem:[%s1659_s27 + $0xdc] sm:$0xf] %v306_v55 }
  0x48   : > { %309 = vst [vmem:[%s1659_s27 + $0xe0] sm:$0xf] %v308_v56 }
  0x49   : > { %311 = vst [vmem:[%s1659_s27 + $0xe4] sm:$0xf] %v310_v57 }
  0x4a   : > { %313 = vst [vmem:[%s1659_s27 + $0xe8] sm:$0xf] %v312_v58 }
  0x4b   : > { %315 = vst [vmem:[%s1659_s27 + $0xec] sm:$0xf] %v314_v59 }
  0x4c   : > { %317 = vst [vmem:[%s1659_s27 + $0xf0] sm:$0xf] %v316_v60 }
  0x4d   : > { %319 = vst [vmem:[%s1659_s27 + $0xf4] sm:$0xf] %v318_v61 }
  0x4e   : > { %321 = vst [vmem:[%s1659_s27 + $0xf8] sm:$0xf] %v320_v62 }
  0x4f   : > { %323 = vst [vmem:[%s1659_s27 + $0xfc] sm:$0xf] %v322_v63 }
  0x50 PF: > { %p1372_p6 = scmp.ge.s32.totalorder %s1585_s16, 1  ;;  %p489_p7 = scmp.lt.s32.totalorder %s1585_s16, 3 }
  0x52   : > { %p490_p8 = pnand %p1372_p6, %p489_p7 }
  0x53   : > { %s496_s28 = sand.u32 (!%p490_p8), 1, %s1569_s12   ;;  %p541_p9 = scmp.lt.s32.totalorder (!%p490_p8), %s1577_s14, 1 }
  0x54   : > { %493 = sbr.rel (%p490_p8) target bundleno = 354 (0x162), region = 69  ;;  %s1791_s29 = sshll.u32 (!%p490_p8), %s496_s28, 8 }
  0x55   : > { %s498_s22 = scalar_lea.vmem (!%p490_p8), [#allocation3], %s1791_s29  ;;  %s1837_s23 = smov (!%p490_p8), 0  }
  0x59   : > { %vm572_vm0 = vcmask 261120   ;;  %v1591_v0 = vmov 0.0   ;;  %s542_s30 = scalar_select %p541_p9, %s1577_s14, 1 }
  0x5a   : > { %573 = vst.msk [vmem:[#allocation2] sm:$0xff] %vm572_vm0, %v1591_v0 }
  0x5b   : > { %s1412_s4 = smul.u32 96, %s542_s30  ;;  %s1411_s5 = sshll.u32 %s542_s30, 6 }
  0x5c   : > { %s1413_s6 = smul.u32 3, %s542_s30  ;;  %s1798_s9 = scalar_lea.vmem %s2474_s3, %s1411_s5 }
  0x5d   : > { %s545_s12 = scalar_lea.vmem %s2472_s1, %s1412_s4 }
  0x5e   : > { %v1803_v1 = vld [vmem:[%s545_s12] sm:$0xff]  ;;  %v1805_v2 = vld [vmem:[%s545_s12 + $0x8] sm:$0xff]  ;;  %v1807_v3 = vld [vmem:[%s545_s12 + $0x10] sm:$0xff]  ;;  %s549_s21 = scalar_lea.vmem %s2473_s2, %s1413_s6 }
  0x5f   : > { %2475 = vst [vmem:[#allocation4_spill] sm:$0xff] %v1803_v1  ;;  %v1812_v4 = vld [vmem:[%s545_s12 + $0x18] sm:$0xff]  ;;  %v1814_v5 = vld [vmem:[%s545_s12 + $0x20] sm:$0xff]  ;;  %v1816_v6 = vld [vmem:[%s545_s12 + $0x28] sm:$0xff] }
  0x60   : > { %2476 = vst [vmem:[#allocation5_spill] sm:$0xff] %v1805_v2  ;;  %v1818_v7 = vld [vmem:[%s545_s12 + $0x30] sm:$0xff]  ;;  %v1820_v8 = vld [vmem:[%s545_s12 + $0x38] sm:$0xff]  ;;  %v1822_v9 = vld [vmem:[%s545_s12 + $0x40] sm:$0xff] }
  0x61   : > { %2477 = vst [vmem:[#allocation6_spill] sm:$0xff] %v1807_v3  ;;  %v1824_v10 = vld [vmem:[%s545_s12 + $0x48] sm:$0xff]  ;;  %v1826_v11 = vld [vmem:[%s545_s12 + $0x50] sm:$0xff]  ;;  %v1828_v12 = vld [vmem:[%s545_s12 + $0x58] sm:$0xff] }
  0x62   : > { %2478 = vst [vmem:[#allocation7_spill] sm:$0xff] %v1812_v4  ;;  %v1830_v13 = vld [vmem:[%s549_s21] sm:$0x1]  ;;  %v1832_v14 = vld [vmem:[%s549_s21 + $0x1] sm:$0x1] }
  0x63   : > { %2479 = vst [vmem:[#allocation8_spill] sm:$0xff] %v1814_v5  ;;  %v1834_v15 = vld [vmem:[%s549_s21 + $0x2] sm:$0x1] }
  0x64   : > { %2480 = vst [vmem:[#allocation9_spill] sm:$0xff] %v1816_v6 }
  0x65   : > { %2481 = vst [vmem:[#allocation10_spill] sm:$0xff] %v1818_v7 }
  0x66   : > { %2482 = vst [vmem:[#allocation11_spill] sm:$0xff] %v1820_v8 }
  0x67   : > { %2483 = vst [vmem:[#allocation12_spill] sm:$0xff] %v1822_v9 }
  0x68   : > { %2484 = vst [vmem:[#allocation13_spill] sm:$0xff] %v1824_v10 }
  0x69 LB: >> { %v2485_v4 = vld [vmem:[#allocation7_spill] sm:$0xff]  ;;  %685 = vmatpush.msra.mxu2 %v1828_v12  ;;  %v2487_v3 = vld [vmem:[#allocation6_spill] sm:$0xff]  ;;  %v2489_v2 = vld [vmem:[#allocation5_spill] sm:$0xff]  ;;  %s1387_s24 = sshll.u32 %s1589_s23, 1  ;;  %v621_v17 = vperm.slane %v1830_v13, 0  ;;  %v648_v18 = vperm.slane %v1832_v14, 0  ;;  %s1589_s23 = sphi %s1837_s23, %s602_s23  }
  0x6a   : >> { %639 = vmatpush.msra.mxu0 %v2485_v4  ;;  %v1850_v16 = vld [vmem:[#allocation2] sm:$0xff]  ;;  %v2492_v1 = vld [vmem:[#allocation4_spill] sm:$0xff]  ;;  %s604_s25 = ssub.s32 7, %s1387_s24 }
  0x6b   : >> { %686 = vmatpush.msra.mxu2 %v1826_v11  ;;  %v2490_v6 = vld [vmem:[#allocation9_spill] sm:$0xff]  ;;  %v2493_v5 = vld [vmem:[#allocation8_spill] sm:$0xff]  ;;  %s605_s26 = smul.u32 %s1577_s14, %s604_s25 }
  0x6c   : >> { %640 = vmatpush.msra.mxu0 %v2487_v3  ;;  %v2488_v7 = vld [vmem:[#allocation10_spill] sm:$0xff] }
  0x6d   : >> { %v2486_v8 = vld [vmem:[#allocation11_spill] sm:$0xff]  ;;  %s1865_s27 = sadd.s32 %s1589_s23, %s605_s26  ;;  %s602_s23 = sadd.s32 1, %s1589_s23  }
  0x6e   : >> { %662 = vmatpush.msra.mxu1 %v2486_v8  ;;  %641 = vmatpush.msra.mxu0 %v2489_v2  ;;  %v2494_v9 = vld [vmem:[#allocation12_spill] sm:$0xff]  ;;  %s1388_s28 = sshll.u32 %s1865_s27, 5  ;;  %p1180_p10 = scmp.lt.s32.totalorder %s1865_s27, 8 }
  0x6f   : >> { %v2491_v10 = vld [vmem:[#allocation13_spill] sm:$0xff]  ;;  %s610_s30 = scalar_lea.vmem %s498_s22, %s1388_s28 [#allocation3]  ;;  %s1408_s5 = sshll.u32 %s1865_s27, 3 }
  0x70   : >> { %663 = vmatpush.msra.mxu1 %v2488_v7  ;;  %687 = vmatpush.msra.mxu2 %v2491_v10  ;;  %v1872_v21 = vld [vmem:[%s610_s30] sm:$0x7]  ;;  %v1874_v22 = vld [vmem:[%s610_s30 + $0x4] sm:$0x7]  ;;  %v1876_v23 = vld [vmem:[%s610_s30 + $0x8] sm:$0x7]  ;;  %s1226_s6 = scalar_lea.vmem %s1798_s9, %s1408_s5 }
  0x71   : >> { %642 = vmatpush.msra.mxu0 %v2492_v1  ;;  %v1878_v25 = vld [vmem:[%s610_s30 + $0xc] sm:$0x7]  ;;  %v1880_v26 = vld [vmem:[%s610_s30 + $0x10] sm:$0x7]  ;;  %v1882_v27 = vld [vmem:[%s610_s30 + $0x14] sm:$0x7] }
  0x72   : >> { %664 = vmatpush.msra.mxu1 %v2490_v6  ;;  %1389 = vmatmul.msk.f32.vlgmr.msra.gmra.mxu0 %vm572_vm0, %v1850_v16  ;;  %v1884_v29 = vld [vmem:[%s610_s30 + $0x18] sm:$0x7]  ;;  %v1886_v34 = vld [vmem:[%s610_s30 + $0x1c] sm:$0x7]  ;;  %s1899_s4 = scalar_select %p1180_p10, 1, 0 }
  0x73   : >> { %688 = vmatpush.msra.mxu2 %v2494_v9  ;;  %p599_p11 = scmp.ge.s32.totalorder %s602_s23, 8  }
  0x74   : >> { %665 = vmatpush.msra.mxu1 %v2493_v5  ;;  %1391 = vmatmul.msk.f32.vlgmr.msra.gmra.mxu2 %vm572_vm0, %v1850_v16 }
  0x75   : >> { %1390 = vmatmul.msk.f32.vlgmr.msra.gmra.mxu1 %vm572_vm0, %v1850_v16 }
  0xef   : >> { %v644_v19 = vpop.f32.mrf.mxu0 }
  0xf0   : >> { %v645_v24 = vadd.f32 %v644_v19, %v621_v17 }
  0xf2   : >> { %v667_v20 = vpop.f32.mrf.mxu1  ;;  %v694_v30 = vrot.slane %v645_v24, 1  ;;  %v695_v31 = vrot.slane %v645_v24, 2  ;;  %v696_v32 = vrot.slane %v645_v24, 3  ;;  %v697_v33 = vrot.slane %v645_v24, 4 }
  0xf3   : >> { %v668_v28 = vadd.f32 %v667_v20, %v648_v18  ;;  %v698_v35 = vrot.slane %v645_v24, 5  ;;  %v699_v36 = vrot.slane %v645_v24, 6  ;;  %v700_v37 = vrot.slane %v645_v24, 7 }
  0xf4   : >> { %v709_v38 = vadd.f32 %v645_v24, %v1872_v21  ;;  %v710_v39 = vadd.f32 %v694_v30, %v1874_v22  ;;  %v711_v40 = vadd.f32 %v695_v31, %v1876_v23  ;;  %v712_v41 = vadd.f32 %v696_v32, %v1878_v25 }
  0xf5   : >> { %v713_v42 = vadd.f32 %v697_v33, %v1880_v26  ;;  %v714_v43 = vadd.f32 %v698_v35, %v1882_v27  ;;  %v715_v44 = vadd.f32 %v699_v36, %v1884_v29  ;;  %v716_v46 = vadd.f32 %v700_v37, %v1886_v34 }
  0xf6   : >> { %v1392_v45 = vmul.f32 -1.442695, %v709_v38  ;;  %v1393_v47 = vmul.f32 -1.442695, %v710_v39  ;;  %v1394_v48 = vmul.f32 -1.442695, %v711_v40  ;;  %v886_v62 = vadd.f32 %v668_v28, %v1874_v22 }
  0xf7   : >> { %v1395_v49 = vmul.f32 -1.442695, %v712_v41  ;;  %v1396_v50 = vmul.f32 -1.442695, %v713_v42  ;;  %v1397_v51 = vmul.f32 -1.442695, %v714_v43 }
  0xf8   : >> { %1463 = vpow2.f32 %v1392_v45  ;;  %v870_v52 = vrot.slane %v668_v28, 7  ;;  %v1398_v53 = vmul.f32 -1.442695, %v715_v44  ;;  %v871_v54 = vrot.slane %v668_v28, 1 }
  0xf9   : >> { %1465 = vpow2.f32 %v1393_v47  ;;  %v872_v55 = vrot.slane %v668_v28, 2  ;;  %v1399_v56 = vmul.f32 -1.442695, %v716_v46  ;;  %v873_v57 = vrot.slane %v668_v28, 3 }
  0xfa   : >> { %1467 = vpow2.f32 %v1394_v48  ;;  %v885_v58 = vadd.f32 %v870_v52, %v1872_v21  ;;  %v874_v59 = vrot.slane %v668_v28, 4  ;;  %v875_v60 = vrot.slane %v668_v28, 5 }
  0xfb   : >> { %1469 = vpow2.f32 %v1395_v49  ;;  %v876_v61 = vrot.slane %v668_v28, 6  ;;  %v887_v0 = vadd.f32 %v871_v54, %v1876_v23  ;;  %v888_v17 = vadd.f32 %v872_v55, %v1878_v25 }
  0xfc   : >> { %1471 = vpow2.f32 %v1396_v50  ;;  %v1400_v18 = vmul.f32 -1.442695, %v885_v58  ;;  %v889_v30 = vadd.f32 %v873_v57, %v1880_v26  ;;  %v890_v33 = vadd.f32 %v874_v59, %v1882_v27 }
  0xfd   : >> { %1473 = vpow2.f32 %v1397_v51  ;;  %v891_v28 = vadd.f32 %v875_v60, %v1884_v29  ;;  %v892_v37 = vadd.f32 %v876_v61, %v1886_v34  ;;  %v1401_v38 = vmul.f32 -1.442695, %v886_v62  ;;  %v690_v51 = vpop.f32.mrf.mxu2 }
  0xfe   : >> { %v1464_v63 = vpop.eup %1463  ;;  %1475 = vpow2.f32 %v1398_v53  ;;  %v1402_v41 = vmul.f32 -1.442695, %v887_v0  ;;  %v1403_v42 = vmul.f32 -1.442695, %v888_v17  ;;  %v671_v45 = vperm.slane %v1834_v15, 0 }
  0xff   : >> { %v1466_v19 = vpop.eup %1465  ;;  %1477 = vpow2.f32 %v1399_v56  ;;  %v1905_v20 = vadd.f32 1.0, %v1464_v63  ;;  %v1404_v49 = vmul.f32 -1.442695, %v889_v30  ;;  %v1405_v50 = vmul.f32 -1.442695, %v890_v33 }
 0x100   : >> { %v1468_v31 = vpop.eup %1467  ;;  %v1909_v32 = vadd.f32 1.0, %v1466_v19  ;;  %1479 = vpow2.f32 %v1400_v18  ;;  %v1406_v54 = vmul.f32 -1.442695, %v891_v28  ;;  %v1407_v55 = vmul.f32 -1.442695, %v892_v37 }
 0x101   : >> { %v1470_v35 = vpop.eup %1469  ;;  %v1913_v36 = vadd.f32 1.0, %v1468_v31  ;;  %1481 = vrcp.f32 %v1905_v20  ;;  %v760_v46 = vand.u32 2147483648, %v1905_v20  ;;  %vm754_vm1 = vweird.f32 %v1905_v20 }
 0x102   : >> { %v1472_v39 = vpop.eup %1471  ;;  %v1917_v40 = vadd.f32 1.0, %v1470_v35  ;;  %1483 = vrcp.f32 %v1909_v32  ;;  %v758_v58 = vand.u32 2147483647, %v1905_v20  ;;  %v775_v59 = vand.u32 2147483648, %v1909_v32 }
 0x103   : >> { %v1474_v43 = vpop.eup %1473  ;;  %v1920_v44 = vadd.f32 1.0, %v1472_v39  ;;  %1485 = vrcp.f32 %v1913_v36  ;;  %v1940_v61 = vadd.f32 %v690_v51, %v671_v45  ;;  %v1942_v62 = vor.u32 1.1754944e-38, %v760_v46 }
 0x104   : >> { %v1476_v47 = vpop.eup %1475  ;;  %v1925_v48 = vadd.f32 1.0, %v1474_v43  ;;  %1487 = vrcp.f32 %v1917_v40  ;;  %vm769_vm2 = vweird.f32 %v1909_v32  ;;  %v773_v63 = vand.u32 2147483647, %v1909_v32 }
 0x105   : >> { %v1478_v52 = vpop.eup %1477  ;;  %v1928_v53 = vadd.f32 1.0, %v1476_v47  ;;  %1489 = vrcp.f32 %v1920_v44  ;;  %v788_v19 = vand.u32 2147483647, %v1913_v36  ;;  %v776_v33 = vor.u32 1.1754944e-38, %v775_v59 }
 0x106   : >> { %v1480_v56 = vpop.eup %1479  ;;  %v1931_v57 = vadd.f32 1.0, %v1478_v52  ;;  %1491 = vrcp.f32 %v1925_v48  ;;  %vm784_vm4 = vweird.f32 %v1913_v36  ;;  %vm1962_vm5 = vcmp.eq.f32.partialorder %v758_v58, 8.507059e+37 }
 0x107   : >> { %v1937_v60 = vpop.eup %1481  ;;  %1493 = vrcp.f32 %v1928_v53  ;;  %v1949_v17 = vadd.f32 1.0, %v1480_v56  ;;  %vm1971_vm7 = vcmp.eq.f32.partialorder %v773_v63, 8.507059e+37  ;;  %vm1981_vm8 = vcmp.eq.f32.partialorder %v788_v19, 8.507059e+37 }
 0x108   : >> { %v1946_v0 = vpop.eup %1483  ;;  %1495 = vrcp.f32 %v1931_v57  ;;  %v750_v18 = vmul.f32 %v1937_v60, %v1905_v20  ;;  %vm755_vm3 = vweird.f32 %v1937_v60  ;;  %vm799_vm10 = vweird.f32 %v1917_v40 }
 0x109   : >> { %v1954_v30 = vpop.eup %1485  ;;  %1497 = vpow2.f32 %v1401_v38  ;;  %v765_v31 = vmul.f32 %v1946_v0, %v1909_v32  ;;  %vm770_vm6 = vweird.f32 %v1946_v0  ;;  %vm1998_vm11 = vmor %vm754_vm1, %vm755_vm3  ;;  %v835_v1 = vand.u32 2147483648, %v1925_v48 }
 0x10a   : >> { %v1960_v28 = vpop.eup %1487  ;;  %1499 = vpow2.f32 %v1402_v41  ;;  %v751_v35 = vsub.f32 1.0, %v750_v18  ;;  %v780_v38 = vmul.f32 %v1954_v30, %v1913_v36  ;;  %v790_v41 = vand.u32 2147483648, %v1913_v36  ;;  %vm2014_vm12 = vmor %vm769_vm2, %vm770_vm6 }
 0x10b   : >> { %v1969_v39 = vpop.eup %1489  ;;  %1501 = vpow2.f32 %v1403_v42  ;;  %v766_v43 = vsub.f32 1.0, %v765_v31  ;;  %v795_v46 = vmul.f32 %v1960_v28, %v1917_v40  ;;  %vm785_vm9 = vweird.f32 %v1954_v30 }
 0x10c   : >> { %v1978_v47 = vpop.eup %1491  ;;  %1503 = vpow2.f32 %v1404_v49  ;;  %v752_v51 = vmul.f32 %v1937_v60, %v751_v35  ;;  %v781_v52 = vsub.f32 1.0, %v780_v38  ;;  %v791_v35 = vor.u32 1.1754944e-38, %v790_v41  ;;  %vm2034_vm14 = vmor %vm784_vm4, %vm785_vm9 }
 0x10d   : >> { %v1985_v42 = vpop.eup %1493  ;;  %1505 = vpow2.f32 %v1405_v50  ;;  %v767_v58 = vmul.f32 %v1946_v0, %v766_v43  ;;  %v796_v59 = vsub.f32 1.0, %v795_v46  ;;  %vm800_vm13 = vweird.f32 %v1960_v28 }
 0x10e   : >> { %v1989_v63 = vpop.eup %1495  ;;  %1507 = vpow2.f32 %v1406_v54  ;;  %v753_v49 = vadd.f32 %v1937_v60, %v752_v51  ;;  %v782_v18 = vmul.f32 %v1954_v30, %v781_v52  ;;  %vm2063_vm15 = vmor %vm799_vm10, %vm800_vm13  ;;  %vm814_vm2 = vweird.f32 %v1920_v44 }
 0x10f   : >> { %v1498_v19 = vpop.eup %1497  ;;  %1509 = vpow2.f32 %v1407_v55  ;;  %v768_v31 = vadd.f32 %v1946_v0, %v767_v58  ;;  %v797_v54 = vmul.f32 %v1960_v28, %v796_v59  ;;  %vm815_vm3 = vweird.f32 %v1969_v39 }
 0x110   : >> { %v1500_v38 = vpop.eup %1499  ;;  %v2004_v43 = vadd.f32 1.0, %v1498_v19  ;;  %1511 = vrcp.f32 %v1949_v17  ;;  %v757_v55 = vsel %vm1998_vm11, %v1937_v60, %v753_v49  ;;  %v783_v41 = vadd.f32 %v1954_v30, %v782_v18 }
 0x111   : >> { %v1502_v46 = vpop.eup %1501  ;;  %v2019_v51 = vadd.f32 1.0, %v1500_v38  ;;  %v772_v52 = vsel %vm2014_vm12, %v1946_v0, %v768_v31  ;;  %v798_v58 = vadd.f32 %v1960_v28, %v797_v54  ;;  %v803_v0 = vand.u32 2147483647, %v1917_v40 }
 0x112   : >> { %v1504_v60 = vpop.eup %1503  ;;  %v2026_v59 = vadd.f32 1.0, %v1502_v46  ;;  %1513 = vrcp.f32 %v2004_v43  ;;  %v951_v32 = vand.u32 2147483648, %v2004_v43  ;;  %v2045_v50 = vsel %vm1962_vm5, %v1942_v62, %v757_v55  ;;  %vm816_vm5 = vmor %vm814_vm2, %vm815_vm3 }
 0x113   : >> { %v1506_v18 = vpop.eup %1505  ;;  %v2039_v19 = vadd.f32 1.0, %v1504_v60  ;;  %1515 = vrcp.f32 %v2019_v51  ;;  %v787_v36 = vsel %vm2034_vm14, %v1954_v30, %v783_v41  ;;  %v2057_v20 = vsel %vm1971_vm7, %v776_v33, %v772_v52 }
 0x114   : >> { %v1508_v31 = vpop.eup %1507  ;;  %v2050_v54 = vadd.f32 1.0, %v1506_v18  ;;  %v2052_v38 = vor.u32 1.1754944e-38, %v951_v32  ;;  %1517 = vrcp.f32 %v2026_v59  ;;  %v2072_v55 = vsel %vm1981_vm8, %v791_v35, %v787_v36 }
 0x115   : >> { %v1510_v30 = vpop.eup %1509  ;;  %v2067_v37 = vadd.f32 1.0, %v1508_v31  ;;  %1519 = vrcp.f32 %v2039_v19  ;;  %v802_v33 = vsel %vm2063_vm15, %v1960_v28, %v798_v58  ;;  %v805_v46 = vand.u32 2147483648, %v1917_v40 }
 0x116   : >> { %v2077_v45 = vpop.eup %1511  ;;  %v2079_v41 = vadd.f32 1.0, %v1510_v30  ;;  %1521 = vrcp.f32 %v2050_v54  ;;  %v810_v52 = vmul.f32 %v1969_v39, %v1920_v44  ;;  %vm804_vm1 = vcmp.eq.f32.partialorder %v803_v0, 8.507059e+37 }
 0x117   : >> { %v2087_v56 = vmul.f32 %v2077_v45, %v1949_v17  ;;  %1523 = vrcp.f32 %v2067_v37  ;;  %v806_v35 = vor.u32 1.1754944e-38, %v805_v46  ;;  %v818_v40 = vand.u32 2147483647, %v1920_v44 }
 0x118   : >> { %v2091_v28 = vpop.eup %1513  ;;  %1525 = vrcp.f32 %v2079_v41  ;;  %v811_v58 = vsub.f32 1.0, %v810_v52  ;;  %v820_v49 = vand.u32 2147483648, %v1920_v44  ;;  %v825_v0 = vmul.f32 %v1978_v47, %v1925_v48 }
 0x119   : >> { %v2095_v60 = vpop.eup %1515  ;;  %v941_v32 = vmul.f32 %v2091_v28, %v2004_v43  ;;  %v927_v36 = vsub.f32 1.0, %v2087_v56  ;;  %v2108_v62 = vsel %vm804_vm1, %v806_v35, %v802_v33  ;;  %vm2115_vm4 = vcmp.eq.f32.partialorder %v818_v40, 8.507059e+37 }
 0x11a   : >> { %v2103_v18 = vpop.eup %1517  ;;  %v956_v31 = vmul.f32 %v2095_v60, %v2019_v51  ;;  %v812_v30 = vmul.f32 %v1969_v39, %v811_v58  ;;  %v826_v2 = vsub.f32 1.0, %v825_v0  ;;  %v821_v58 = vor.u32 1.1754944e-38, %v820_v49 }
 0x11b   : >> { %v2111_v46 = vpop.eup %1519  ;;  %v942_v52 = vsub.f32 1.0, %v941_v32  ;;  %v971_v24 = vmul.f32 %v2103_v18, %v2026_v59  ;;  %vm829_vm6 = vweird.f32 %v1925_v48  ;;  %vm945_vm7 = vweird.f32 %v2004_v43 }
 0x11c   : >> { %v2119_v3 = vpop.eup %1521  ;;  %v957_v56 = vsub.f32 1.0, %v956_v31  ;;  %v986_v33 = vmul.f32 %v2111_v46, %v2039_v19  ;;  %v813_v35 = vadd.f32 %v1969_v39, %v812_v30  ;;  %v827_v40 = vmul.f32 %v1978_v47, %v826_v2 }
 0x11d   : >> { %v2124_v4 = vpop.eup %1523  ;;  %v972_v32 = vsub.f32 1.0, %v971_v24  ;;  %v1001_v5 = vmul.f32 %v2119_v3, %v2050_v54  ;;  %v943_v31 = vmul.f32 %v2091_v28, %v942_v52  ;;  %vm830_vm8 = vweird.f32 %v1978_v47 }
 0x11e   : >> { %v2134_v0 = vpop.eup %1525  ;;  %v987_v49 = vsub.f32 1.0, %v986_v33  ;;  %v1016_v24 = vmul.f32 %v2124_v4, %v2067_v37  ;;  %v817_v30 = vsel %vm816_vm5, %v1969_v39, %v813_v35  ;;  %v958_v6 = vmul.f32 %v2095_v60, %v957_v56  ;;  %vm2158_vm9 = vmor %vm829_vm6, %vm830_vm8 }
 0x11f   : >> { %v2142_v7 = vmul.f32 %v2103_v18, %v972_v32  ;;  %v1002_v44 = vsub.f32 1.0, %v1001_v5  ;;  %v1031_v2 = vmul.f32 %v2134_v0, %v2079_v41  ;;  %v2149_v52 = vsel %vm2115_vm4, %v821_v58, %v817_v30 }
 0x120   : >> { %v1017_v8 = vsub.f32 1.0, %v1016_v24  ;;  %v828_v33 = vadd.f32 %v1978_v47, %v827_v40  ;;  %v2154_v39 = vmul.f32 %v2111_v46, %v987_v49  ;;  %v833_v35 = vand.u32 2147483647, %v1925_v48 }
 0x121   : >> { %v1032_v56 = vsub.f32 1.0, %v1031_v2  ;;  %v2165_v58 = vmul.f32 %v2119_v3, %v1002_v44  ;;  %v840_v49 = vmul.f32 %v1985_v42, %v1928_v53  ;;  %v836_v30 = vor.u32 1.1754944e-38, %v835_v1 }
 0x122   : >> { %v2168_v32 = vmul.f32 %v2124_v4, %v1017_v8  ;;  %v832_v40 = vsel %vm2158_vm9, %v1978_v47, %v828_v33  ;;  %vm834_vm10 = vcmp.eq.f32.partialorder %v833_v35, 8.507059e+37  ;;  %vm844_vm11 = vweird.f32 %v1928_v53 }
 0x123   : >> { %v2176_v24 = vmul.f32 %v2134_v0, %v1032_v56  ;;  %v841_v48 = vsub.f32 1.0, %v840_v49  ;;  %v848_v44 = vand.u32 2147483647, %v1928_v53  ;;  %v850_v8 = vand.u32 2147483648, %v1928_v53 }
 0x124   : >> { %v855_v2 = vmul.f32 %v1989_v63, %v1931_v57  ;;  %v2183_v5 = vsel %vm834_vm10, %v836_v30, %v832_v40  ;;  %vm845_vm12 = vweird.f32 %v1985_v42  ;;  %vm859_vm13 = vweird.f32 %v1931_v57 }
 0x125   : >> { %v863_v47 = vand.u32 2147483647, %v1931_v57  ;;  %v842_v33 = vmul.f32 %v1985_v42, %v841_v48  ;;  %vm2189_vm14 = vcmp.eq.f32.partialorder %v848_v44, 8.507059e+37  ;;  %vm860_vm15 = vweird.f32 %v1989_v63  ;;  %vm2200_vm2 = vmor %vm844_vm11, %vm845_vm12 }
 0x126   : >> { %v856_v35 = vsub.f32 1.0, %v855_v2  ;;  %v851_v1 = vor.u32 1.1754944e-38, %v850_v8  ;;  %v865_v49 = vand.u32 2147483648, %v1931_v57  ;;  %v928_v40 = vmul.f32 %v2077_v45, %v927_v36  ;;  %vm861_vm6 = vmor %vm859_vm13, %vm860_vm15 }
 0x127   : >> { %vm930_vm1 = vweird.f32 %v1949_v17  ;;  %v843_v30 = vadd.f32 %v1985_v42, %v842_v33  ;;  %vm931_vm3 = vweird.f32 %v2077_v45  ;;  %v934_v8 = vand.u32 2147483647, %v1949_v17 }
 0x128   : >> { %v857_v44 = vmul.f32 %v1989_v63, %v856_v35  ;;  %vm2207_vm4 = vcmp.eq.f32.partialorder %v863_v47, 8.507059e+37  ;;  %v929_v36 = vadd.f32 %v2077_v45, %v928_v40  ;;  %vm2212_vm5 = vmor %vm930_vm1, %vm931_vm3  ;;  %v936_v53 = vand.u32 2147483648, %v1949_v17 }
 0x129   : >> { %v944_v9 = vadd.f32 %v2091_v28, %v943_v31  ;;  %v847_v35 = vsel %vm2200_vm2, %v1985_v42, %v843_v30  ;;  %vm935_vm8 = vcmp.eq.f32.partialorder %v934_v8, 8.507059e+37  ;;  %vm946_vm9 = vweird.f32 %v2091_v28 }
 0x12a   : >> { %v858_v10 = vadd.f32 %v1989_v63, %v857_v44  ;;  %v866_v47 = vor.u32 1.1754944e-38, %v865_v49  ;;  %v933_v17 = vsel %vm2212_vm5, %v2077_v45, %v929_v36  ;;  %v937_v31 = vor.u32 1.1754944e-38, %v936_v53  ;;  %vm2232_vm10 = vmor %vm945_vm7, %vm946_vm9 }
 0x12b   : >> { %v949_v40 = vand.u32 2147483647, %v2004_v43  ;;  %v2239_v57 = vsel %vm2189_vm14, %v851_v1, %v847_v35  ;;  %v959_v49 = vadd.f32 %v2095_v60, %v958_v6  ;;  %vm960_vm11 = vweird.f32 %v2019_v51 }
 0x12c   : >> { %v862_v30 = vsel %vm861_vm6, %v1989_v63, %v858_v10  ;;  %v2248_v48 = vsel %vm935_vm8, %v937_v31, %v933_v17  ;;  %v948_v43 = vsel %vm2232_vm10, %v2091_v28, %v944_v9  ;;  %vm961_vm7 = vweird.f32 %v2095_v60 }
 0x12d   : >> { %v2246_v45 = vsel %vm2207_vm4, %v866_v47, %v862_v30  ;;  %vm2254_vm12 = vcmp.eq.f32.partialorder %v949_v40, 8.507059e+37  ;;  %vm2258_vm13 = vmor %vm960_vm11, %vm961_vm7  ;;  %v964_v10 = vand.u32 2147483647, %v2019_v51  ;;  %v966_v63 = vand.u32 2147483648, %v2019_v51 }
 0x12e   : >> { %v974_v1 = vadd.f32 %v2103_v18, %v2142_v7  ;;  %v963_v9 = vsel %vm2258_vm13, %v2095_v60, %v959_v49  ;;  %vm975_vm14 = vweird.f32 %v2026_v59  ;;  %vm976_vm15 = vweird.f32 %v2103_v18 }
 0x12f   : >> { %v979_v28 = vand.u32 2147483647, %v2026_v59  ;;  %vm965_vm1 = vcmp.eq.f32.partialorder %v964_v10, 8.507059e+37  ;;  %v967_v44 = vor.u32 1.1754944e-38, %v966_v63  ;;  %vm2272_vm2 = vmor %vm975_vm14, %vm976_vm15  ;;  %v981_v51 = vand.u32 2147483648, %v2026_v59 }
 0x130   : >> { %v989_v7 = vadd.f32 %v2111_v46, %v2154_v39  ;;  %v978_v60 = vsel %vm2272_vm2, %v2103_v18, %v974_v1  ;;  %vm990_vm4 = vweird.f32 %v2039_v19  ;;  %vm991_vm5 = vweird.f32 %v2111_v46 }
 0x131   : >> { %vm980_vm3 = vcmp.eq.f32.partialorder %v979_v28, 8.507059e+37  ;;  %v2287_v2 = vsel %vm2254_vm12, %v2052_v38, %v948_v43  ;;  %v982_v36 = vor.u32 1.1754944e-38, %v981_v51  ;;  %vm2289_vm6 = vmor %vm990_vm4, %vm991_vm5  ;;  %v994_v39 = vand.u32 2147483647, %v2039_v19 }
 0x132   : >> { %v996_v33 = vand.u32 2147483648, %v2039_v19  ;;  %v2295_v18 = vsel %vm965_vm1, %v967_v44, %v963_v9  ;;  %v1004_v53 = vadd.f32 %v2119_v3, %v2165_v58  ;;  %vm1005_vm8 = vweird.f32 %v2050_v54 }
 0x133   : >> { %vm1006_vm9 = vweird.f32 %v2119_v3  ;;  %v2301_v38 = vsel %vm980_vm3, %v982_v36, %v978_v60  ;;  %v993_v35 = vsel %vm2289_vm6, %v2111_v46, %v989_v7  ;;  %vm2306_vm10 = vcmp.eq.f32.partialorder %v994_v39, 8.507059e+37 }
 0x134   : >> { %vm2310_vm11 = vmor %vm1005_vm8, %vm1006_vm9  ;;  %v1009_v58 = vand.u32 2147483647, %v2050_v54  ;;  %v997_v17 = vor.u32 1.1754944e-38, %v996_v33  ;;  %v1011_v31 = vand.u32 2147483648, %v2050_v54  ;;  %v1019_v42 = vadd.f32 %v2124_v4, %v2168_v32 }
 0x135   : >> { %vm1020_vm7 = vweird.f32 %v2067_v37  ;;  %v1008_v46 = vsel %vm2310_vm11, %v2119_v3, %v1004_v53  ;;  %vm1021_vm13 = vweird.f32 %v2124_v4  ;;  %v1024_v30 = vand.u32 2147483647, %v2067_v37 }
 0x136   : >> { %vm2322_vm12 = vcmp.eq.f32.partialorder %v1009_v58, 8.507059e+37  ;;  %v1012_v49 = vor.u32 1.1754944e-38, %v1011_v31  ;;  %vm2328_vm14 = vmor %vm1020_vm7, %vm1021_vm13  ;;  %v1026_v32 = vand.u32 2147483648, %v2067_v37  ;;  %v1034_v43 = vadd.f32 %v2134_v0, %v2176_v24 }
 0x137   : >> { %vm1035_vm15 = vweird.f32 %v2079_v41  ;;  %v1023_v3 = vsel %vm2328_vm14, %v2124_v4, %v1019_v42  ;;  %vm1025_vm1 = vcmp.eq.f32.partialorder %v1024_v30, 8.507059e+37  ;;  %vm1036_vm2 = vweird.f32 %v2134_v0 }
 0x138   : >> { %v1039_v56 = vand.u32 2147483647, %v2079_v41  ;;  %v2343_v6 = vsel %vm2306_vm10, %v997_v17, %v993_v35  ;;  %v1027_v10 = vor.u32 1.1754944e-38, %v1026_v32  ;;  %vm2345_vm3 = vmor %vm1035_vm15, %vm1036_vm2  ;;  %v1041_v24 = vand.u32 2147483648, %v2079_v41 }
 0x139   : >> { %v1046_v63 = vrot.slane %v1940_v61, 1  ;;  %v2353_v4 = vsel %vm2322_vm12, %v1012_v49, %v1008_v46  ;;  %v1038_v1 = vsel %vm2345_vm3, %v2134_v0, %v1034_v43  ;;  %v1047_v9 = vrot.slane %v1940_v61, 2 }
 0x13a   : >> { %v1048_v28 = vrot.slane %v1940_v61, 3  ;;  %v2360_v44 = vsel %vm1025_vm1, %v1027_v10, %v1023_v3  ;;  %vm2362_vm4 = vcmp.eq.f32.partialorder %v1039_v56, 8.507059e+37  ;;  %v1049_v41 = vrot.slane %v1940_v61, 4 }
 0x13b   : >> { %v1050_v51 = vrot.slane %v1940_v61, 5  ;;  %v1051_v7 = vrot.slane %v1940_v61, 6  ;;  %v1052_v60 = vrot.slane %v1940_v61, 7  ;;  %v1061_v0 = vmul.f32 %v2045_v50, %v1940_v61 }
 0x13c   : >> { %v1062_v36 = vmul.f32 %v1046_v63, %v2057_v20  ;;  %v1042_v59 = vor.u32 1.1754944e-38, %v1041_v24  ;;  %v1063_v39 = vmul.f32 %v1047_v9, %v2072_v55  ;;  %v1064_v33 = vmul.f32 %v1048_v28, %v2108_v62 }
 0x13d   : >> { %v1065_v53 = vmul.f32 %v1049_v41, %v2149_v52  ;;  %v1066_v35 = vmul.f32 %v1050_v51, %v2183_v5  ;;  %v1067_v47 = vmul.f32 %v1051_v7, %v2239_v57  ;;  %v1068_v19 = vmul.f32 %v1052_v60, %v2246_v45 }
 0x13e   : >> { %v1077_v58 = vrot.slane %v1061_v0, 6  ;;  %v1078_v17 = vrot.slane %v1062_v36, 6  ;;  %v1079_v31 = vrot.slane %v1063_v39, 6  ;;  %v1080_v42 = vrot.slane %v1064_v33, 6 }
 0x13f   : >> { %v1081_v61 = vrot.slane %v1065_v53, 6  ;;  %v1082_v50 = vrot.slane %v1066_v35, 6  ;;  %v1083_v20 = vrot.slane %v1067_v47, 6  ;;  %v1084_v46 = vrot.slane %v1068_v19, 6 }
 0x140   : >> { %v1093_v55 = vadd.f32 %v1077_v58, %v1872_v21  ;;  %v2382_v62 = vsel %vm2362_vm4, %v1042_v59, %v1038_v1  ;;  %v1094_v52 = vadd.f32 %v1078_v17, %v1874_v22  ;;  %v1095_v5 = vadd.f32 %v1079_v31, %v1876_v23 }
 0x141   : >> { %v1096_v57 = vadd.f32 %v1080_v42, %v1878_v25  ;;  %v1097_v45 = vadd.f32 %v1081_v61, %v1880_v26  ;;  %v1098_v40 = vadd.f32 %v1082_v50, %v1882_v27  ;;  %v1099_v30 = vadd.f32 %v1083_v20, %v1884_v29 }
 0x142   : >> { %1527 = vtanh.f32 %v1093_v55  ;;  %v1100_v49 = vadd.f32 %v1084_v46, %v1886_v34  ;;  %v1109_v21 = vsub.f32 1.0, %v2248_v48  ;;  %v1110_v54 = vsub.f32 1.0, %v2287_v2 }
 0x143   : >> { %1529 = vtanh.f32 %v1094_v52  ;;  %v2543_v32 = vstv %s1899_s4  ;;  %v1111_v23 = vsub.f32 1.0, %v2295_v18  ;;  %v1112_v25 = vsub.f32 1.0, %v2301_v38 }
 0x144   : >> { %vm2395_vm5 = vcmp.eq.s32.totalorder %v2543_v32, 1  ;;  %1531 = vtanh.f32 %v1095_v5  ;;  %v1113_v26 = vsub.f32 1.0, %v2343_v6  ;;  %v1114_v27 = vsub.f32 1.0, %v2353_v4 }
 0x145   : >> { %1533 = vtanh.f32 %v1096_v57  ;;  %v1115_v29 = vsub.f32 1.0, %v2360_v44  ;;  %v1149_v34 = vrot.slane %v1850_v16, 7  ;;  %v1150_v43 = vrot.slane %v1850_v16, 1 }
 0x146   : >> { %1535 = vtanh.f32 %v1097_v45  ;;  %v1151_v3 = vrot.slane %v1850_v16, 2  ;;  %v1152_v56 = vrot.slane %v1850_v16, 3  ;;  %v1153_v10 = vrot.slane %v1850_v16, 4 }
 0x147   : >> { %1537 = vtanh.f32 %v1098_v40  ;;  %v1154_v37 = vrot.slane %v1850_v16, 5  ;;  %v1155_v24 = vrot.slane %v1850_v16, 6  ;;  %v1116_v1 = vsub.f32 1.0, %v2382_v62 }
 0x148   : >> { %v1528_v63 = vpop.eup %1527  ;;  %1539 = vtanh.f32 %v1099_v30  ;;  %v1164_v9 = vmul.f32 %v1149_v34, %v2248_v48  ;;  %v1165_v28 = vmul.f32 %v2287_v2, %v1850_v16  ;;  %v1166_v51 = vmul.f32 %v1150_v43, %v2295_v18 }
 0x149   : >> { %v1530_v8 = vpop.eup %1529  ;;  %1541 = vtanh.f32 %v1100_v49  ;;  %v1125_v41 = vrot.slane %v1528_v63, 1  ;;  %v1167_v7 = vmul.f32 %v1151_v3, %v2301_v38  ;;  %v1168_v36 = vmul.f32 %v1152_v56, %v2343_v6 }
 0x14a   : >> { %v1532_v60 = vpop.eup %1531  ;;  %v1126_v0 = vrot.slane %v1530_v8, 1  ;;  %v1169_v59 = vmul.f32 %v1153_v10, %v2353_v4  ;;  %v1170_v48 = vmul.f32 %v1154_v37, %v2360_v44  ;;  %v1171_v53 = vmul.f32 %v1155_v24, %v2382_v62 }
 0x14b   : >> { %v1534_v39 = vpop.eup %1533  ;;  %v1127_v33 = vrot.slane %v1532_v60, 1  ;;  %v1141_v2 = vmul.f32 %v1125_v41, %v1109_v21  ;;  %vm1201_vm6 = vcmask 1042434   ;;  %vm1204_vm8 = vcmask 1043459  }
 0x14c   : >> { %v1536_v18 = vpop.eup %1535  ;;  %v1128_v38 = vrot.slane %v1534_v39, 1  ;;  %v1142_v35 = vmul.f32 %v1126_v0, %v1110_v54  ;;  %vm1207_vm9 = vcmask 1044484   ;;  %vm1210_vm10 = vcmask 1045509  }
 0x14d   : >> { %v1538_v6 = vpop.eup %1537  ;;  %v1129_v47 = vrot.slane %v1536_v18, 1  ;;  %v1143_v4 = vmul.f32 %v1127_v33, %v1111_v23  ;;  %v1172_v19 = vadd.f32 %v1164_v9, %v1141_v2  ;;  %vm1213_vm11 = vcmask 1046534  }
 0x14e   : >> { %v1540_v58 = vpop.eup %1539  ;;  %v1130_v44 = vrot.slane %v1538_v6, 1  ;;  %v1144_v17 = vmul.f32 %v1128_v38, %v1112_v25  ;;  %v1173_v31 = vadd.f32 %v1165_v28, %v1142_v35  ;;  %vm1216_vm7 = vcmask 1047559  }
 0x14f   : >> { %v1542_v42 = vpop.eup %1541  ;;  %v1131_v61 = vrot.slane %v1540_v58, 1  ;;  %v1145_v50 = vmul.f32 %v1129_v47, %v1113_v26  ;;  %v1174_v20 = vadd.f32 %v1166_v51, %v1143_v4  ;;  %v1184_v46 = vsel %vm2395_vm5, %v1172_v19, %v1149_v34 }
 0x150   : >> { %v1132_v55 = vrot.slane %v1542_v42, 1  ;;  %v1146_v62 = vmul.f32 %v1130_v44, %v1114_v27  ;;  %v1175_v52 = vadd.f32 %v1167_v7, %v1144_v17  ;;  %v1185_v5 = vsel %vm2395_vm5, %v1173_v31, %v1850_v16 }
 0x151   : >> { %v1147_v57 = vmul.f32 %v1131_v61, %v1115_v29  ;;  %v1176_v45 = vadd.f32 %v1168_v36, %v1145_v50  ;;  %v1186_v40 = vsel %vm2395_vm5, %v1174_v20, %v1150_v43  ;;  %v1200_v30 = vrot.slane %v1185_v5, 7 }
 0x152   : >> { %v1148_v49 = vmul.f32 %v1132_v55, %v1116_v1  ;;  %v1177_v21 = vadd.f32 %v1169_v59, %v1146_v62  ;;  %v1187_v54 = vsel %vm2395_vm5, %v1175_v52, %v1151_v3  ;;  %v1203_v32 = vrot.slane %v1186_v40, 6 }
 0x153   : >> { %v1178_v23 = vadd.f32 %v1170_v48, %v1147_v57  ;;  %v1188_v25 = vsel %vm2395_vm5, %v1176_v45, %v1152_v56  ;;  %v1202_v26 = vsel %vm1201_vm6, %v1200_v30, %v1184_v46  ;;  %v1206_v27 = vrot.slane %v1187_v54, 5 }
 0x154   : >> { %v1179_v29 = vadd.f32 %v1171_v53, %v1148_v49  ;;  %v1189_v34 = vsel %vm2395_vm5, %v1177_v21, %v1153_v10  ;;  %v1205_v43 = vsel %vm1204_vm8, %v1203_v32, %v1202_v26  ;;  %v1209_v63 = vrot.slane %v1188_v25, 4 }
 0x155   : >> { %v1190_v3 = vsel %vm2395_vm5, %v1178_v23, %v1154_v37  ;;  %v1208_v1 = vsel %vm1207_vm9, %v1206_v27, %v1205_v43  ;;  %v1212_v9 = vrot.slane %v1189_v34, 3  ;;  %vm1221_vm12 = vcmask 261121  }
 0x156   : >> { %v1191_v56 = vsel %vm2395_vm5, %v1179_v29, %v1155_v24  ;;  %v1211_v10 = vsel %vm1210_vm10, %v1209_v63, %v1208_v1  ;;  %v1215_v28 = vrot.slane %v1190_v3, 2  ;;  %vm1223_vm13 = vcmask 253952  }
 0x157   : >> { %v1214_v8 = vsel %vm1213_vm11, %v1212_v9, %v1211_v10  ;;  %v1218_v41 = vrot.slane %v1191_v56, 1 }
 0x158   : >> { %v1217_v51 = vsel %vm1216_vm7, %v1215_v28, %v1214_v8 }
 0x159   : >> { %1222 = vst.msk [vmem:[#allocation2 - $0x1] sm:$0xfe] %vm1221_vm12, %v1217_v51 }
 0x15a   : >> { %1224 = vst.msk [vmem:[#allocation2 + $0x7] sm:$0x1] %vm1223_vm13, %v1218_v41 }
 0x15b   : >> { %1227 = vst.msk [vmem:[%s1226_s6 - $0x1] sm:$0xfe] %vm1221_vm12, %v1217_v51 }
 0x15c   : >> { %1228 = vst.msk [vmem:[%s1226_s6 + $0x7] sm:$0x1] %vm1223_vm13, %v1218_v41 }
 0x15d   : > { %601 = sbr.rel (!%p599_p11) target bundleno = 105 (0x69), region = 131 }
 0x162 PF: > { %s13_s16 = sadd.s32 1, %s1585_s16   ;;  %s2546_s12 = smov %s1573_s13 }
 0x163   : > { %p10_p12 = scmp.ge.s32.totalorder %s13_s16, 4   ;;  %s2547_s13 = smov %s1647_s20 }
 0x164   : > { %s2548_s14 = smov %s1581_s15  ;;  %s2549_s15 = smov %s2551_s17 }
 0x165   :  { %12 = sbr.rel (!%p10_p12) target bundleno = 3 (0x3), region = 142 }

// kernel: _lambda_.13
= control target key start
LH: loop header
LB: loop body
LE: loop exit
PB: predicated region body
PF: predicated region fallthrough
CT: control target
= control target key end

     0   :  { %vm22_vm0 = vcmask 523264   ;;  %v219_v4 = vmov 64.0   ;;  %s348_s0 = inlined_call_operand.vmem [shape: f32[16,64], index: 0, kind: input, shape index: {}]   ;;  %s349_s1 = inlined_call_operand.vmem [shape: f32[1,64], index: 1, kind: input, shape index: {}]   ;;  %s350_s2 = inlined_call_operand.vmem [shape: f32[1,64], index: 2, kind: input, shape index: {}]   ;;  %s351_s3 = inlined_call_operand.vmem [shape: f32[64,256], index: 3, kind: input, shape index: {}]   ;;  %s352_s4 = inlined_call_operand.vmem [shape: f32[1,256], index: 4, kind: input, shape index: {}]   ;;  %s353_s5 = inlined_call_operand.vmem [shape: f32[16,256], index: 5, kind: output, shape index: {}]  }
   0x1   :  { %v21_v0 = vld [vmem:[%s348_s0 + $0x8] sm:$0xff]  ;;  %v20_v2 = vld [vmem:[%s348_s0] sm:$0xff]  ;;  %209 = vrcp.f32 %v219_v4  ;;  %v118_v23 = vld [vmem:[%s351_s3 + $0x70] sm:$0xff] }
   0x2   :  { %v26_v1 = vsel %vm22_vm0, %v21_v0, 0.0  ;;  %v23_v3 = vsel %vm22_vm0, %v20_v2, 0.0  ;;  %v119_v24 = vld [vmem:[%s351_s3 + $0x78] sm:$0xff]  ;;  %190 = vmatpush.msra.mxu2 %v118_v23  ;;  %v116_v26 = vld [vmem:[%s351_s3 + $0x60] sm:$0xff]  ;;  %v117_v27 = vld [vmem:[%s351_s3 + $0x68] sm:$0xff]  ;;  %140 = vmatpush.msra.mxu0 %v118_v23 }
   0x3   :  { %27 = vadd.xlane.f32.xlu0 %v26_v1  ;;  %198 = vmatpush.msra.mxu3 %v119_v24  ;;  %v114_v28 = vld [vmem:[%s351_s3 + $0x50] sm:$0xff]  ;;  %v115_v29 = vld [vmem:[%s351_s3 + $0x58] sm:$0xff]  ;;  %v112_v30 = vld [vmem:[%s351_s3 + $0x40] sm:$0xff] }
   0x4   :  { %163 = vmatpush.msra.mxu1 %v119_v24  ;;  %191 = vmatpush.msra.mxu2 %v116_v26  ;;  %v113_v31 = vld [vmem:[%s351_s3 + $0x48] sm:$0xff]  ;;  %v110_v33 = vld [vmem:[%s351_s3 + $0x30] sm:$0xff]  ;;  %v111_v34 = vld [vmem:[%s351_s3 + $0x38] sm:$0xff] }
   0x5   :  { %199 = vmatpush.msra.mxu3 %v117_v27  ;;  %141 = vmatpush.msra.mxu0 %v116_v26  ;;  %v108_v36 = vld [vmem:[%s351_s3 + $0x20] sm:$0xff]  ;;  %v109_v37 = vld [vmem:[%s351_s3 + $0x28] sm:$0xff]  ;;  %v106_v41 = vld [vmem:[%s351_s3 + $0x10] sm:$0xff] }
   0x6   :  { %164 = vmatpush.msra.mxu1 %v117_v27  ;;  %192 = vmatpush.msra.mxu2 %v114_v28  ;;  %v107_v42 = vld [vmem:[%s351_s3 + $0x18] sm:$0xff]  ;;  %v104_v44 = vld [vmem:[%s351_s3] sm:$0xff]  ;;  %v105_v45 = vld [vmem:[%s351_s3 + $0x8] sm:$0xff] }
   0x7   :  { %v210_v5 = vpop.eup %209  ;;  %200 = vmatpush.msra.mxu3 %v115_v29  ;;  %142 = vmatpush.msra.mxu0 %v114_v28  ;;  %v207_v51 = vld [vmem:[%s349_s1] ss:$0 sm:$0xff] }
   0x8   :  { %v30_v6 = vmul.f32 64.0, %v210_v5  ;;  %vm34_vm1 = vweird.f32 %v210_v5  ;;  %165 = vmatpush.msra.mxu1 %v115_v29  ;;  %193 = vmatpush.msra.mxu2 %v112_v30  ;;  %v208_v54 = vld [vmem:[%s350_s2] ss:$0 sm:$0xff] }
   0x9   :  { %201 = vmatpush.msra.mxu3 %v113_v31  ;;  %143 = vmatpush.msra.mxu0 %v112_v30 }
   0xa   :  { %v31_v7 = vsub.f32 1.0, %v30_v6  ;;  %166 = vmatpush.msra.mxu1 %v113_v31  ;;  %194 = vmatpush.msra.mxu2 %v110_v33 }
   0xb   :  { %24 = vadd.xlane.f32.xlu0 %v23_v3  ;;  %202 = vmatpush.msra.mxu3 %v111_v34 }
   0xc   :  { %v32_v8 = vmul.f32 %v210_v5, %v31_v7  ;;  %144 = vmatpush.msra.mxu0 %v110_v33  ;;  %167 = vmatpush.msra.mxu1 %v111_v34 }
   0xd   :  { %195 = vmatpush.msra.mxu2 %v108_v36  ;;  %203 = vmatpush.msra.mxu3 %v109_v37 }
   0xe   :  { %v33_v9 = vadd.f32 %v210_v5, %v32_v8  ;;  %145 = vmatpush.msra.mxu0 %v108_v36  ;;  %168 = vmatpush.msra.mxu1 %v109_v37 }
   0xf   :  { %196 = vmatpush.msra.mxu2 %v106_v41  ;;  %204 = vmatpush.msra.mxu3 %v107_v42 }
  0x10   :  { %v35_v10 = vsel %vm34_vm1, %v210_v5, %v33_v9  ;;  %146 = vmatpush.msra.mxu0 %v106_v41  ;;  %169 = vmatpush.msra.mxu1 %v107_v42 }
  0x11   :  { %197 = vmatpush.msra.mxu2 %v104_v44  ;;  %205 = vmatpush.msra.mxu3 %v105_v45 }
  0x12   :  { %147 = vmatpush.msra.mxu0 %v104_v44  ;;  %170 = vmatpush.msra.mxu1 %v105_v45 }
  0x76   :  { %v28_v11 = vpop.xlane.xlu0 %27 }
  0x77   :  { %v37_v12 = vmul.f32 %v35_v10, %v28_v11 }
  0x79   :  { %v258_v13 = vsub.f32 %v21_v0, %v37_v12 }
  0x7b   :  { %v41_v14 = vmul.f32 %v258_v13, %v258_v13 }
  0x7d   :  { %v45_v15 = vsel %vm22_vm0, %v41_v14, 0.0 }
  0x7e   :  { %46 = vadd.xlane.f32.xlu1 %v45_v15  ;;  %v25_v16 = vpop.xlane.xlu0 %24 }
  0x7f   :  { %v36_v17 = vmul.f32 %v35_v10, %v25_v16 }
  0x81   :  { %v263_v18 = vsub.f32 %v20_v2, %v36_v17 }
  0x83   :  { %v40_v19 = vmul.f32 %v263_v18, %v263_v18 }
  0x85   :  { %v42_v20 = vsel %vm22_vm0, %v40_v19, 0.0  ;;  %v120_v19 = vld [vmem:[%s352_s4] sm:$0x3] }
  0x86   :  { %43 = vadd.xlane.f32.xlu1 %v42_v20  ;;  %v122_v20 = vperm.slane %v120_v19, 0 }
  0xf1   :  { %v47_v21 = vpop.xlane.xlu1 %46 }
  0xf2   :  { %v49_v22 = vmul.f32 %v47_v21, %v35_v10  ;;  %v123_v21 = vperm.slane %v120_v19, 1 }
  0xf4   :  { %v274_v25 = vadd.f32 1e-05, %v49_v22 }
  0xf6   :  { %211 = vrsqrt.f32 %v274_v25  ;;  %vm68_vm3 = vweird.f32 %v274_v25 }
  0xf9   :  { %v44_v32 = vpop.xlane.xlu1 %43 }
  0xfa   :  { %v48_v35 = vmul.f32 %v44_v32, %v35_v10 }
  0xfc   :  { %v212_v38 = vpop.eup %211  ;;  %v50_v39 = vadd.f32 1e-05, %v48_v35 }
  0xfd   :  { %v63_v40 = vmul.f32 %v212_v38, %v274_v25  ;;  %vm69_vm2 = vweird.f32 %v212_v38 }
  0xfe   :  { %213 = vrsqrt.f32 %v50_v39  ;;  %vm70_vm4 = vmor %vm68_vm3, %vm69_vm2  ;;  %vm58_vm6 = vweird.f32 %v50_v39 }
  0xff   :  { %v64_v43 = vmul.f32 %v212_v38, %v63_v40 }
 0x101   :  { %v65_v46 = vmul.f32 0.5, %v64_v43 }
 0x103   :  { %v66_v47 = vsub.f32 1.5, %v65_v46 }
 0x104   :  { %v214_v48 = vpop.eup %213 }
 0x105   :  { %v67_v49 = vmul.f32 %v212_v38, %v66_v47  ;;  %v53_v50 = vmul.f32 %v214_v48, %v50_v39  ;;  %vm59_vm5 = vweird.f32 %v214_v48 }
 0x106   :  { %vm60_vm7 = vmor %vm58_vm6, %vm59_vm5 }
 0x107   :  { %v71_v52 = vsel %vm70_vm4, %v212_v38, %v67_v49  ;;  %v54_v53 = vmul.f32 %v214_v48, %v53_v50 }
 0x108   :  { %v73_v55 = vmul.f32 %v71_v52, %v258_v13 }
 0x109   :  { %v55_v56 = vmul.f32 0.5, %v54_v53 }
 0x10a   :  { %v79_v57 = vmul.f32 %v207_v51, %v73_v55 }
 0x10b   :  { %v56_v58 = vsub.f32 1.5, %v55_v56 }
 0x10c   :  { %v85_v59 = vadd.f32 %v208_v54, %v79_v57 }
 0x10d   :  { %v57_v60 = vmul.f32 %v214_v48, %v56_v58 }
 0x10e   :  { %v89_v61 = vmul.f32 0.044715, %v85_v59  ;;  %v87_v12 = vmul.f32 0.5, %v85_v59 }
 0x10f   :  { %v61_v62 = vsel %vm60_vm7, %v214_v48, %v57_v60 }
 0x110   :  { %v72_v63 = vmul.f32 %v61_v62, %v263_v18  ;;  %v91_v0 = vmul.f32 %v89_v61, %v85_v59 }
 0x112   :  { %v78_v1 = vmul.f32 %v207_v51, %v72_v63  ;;  %v93_v2 = vmul.f32 %v91_v0, %v85_v59 }
 0x114   :  { %v84_v3 = vadd.f32 %v208_v54, %v78_v1  ;;  %v95_v4 = vadd.f32 %v93_v2, %v85_v59 }
 0x116   :  { %v97_v5 = vmul.f32 0.7978846, %v95_v4  ;;  %v88_v6 = vmul.f32 0.044715, %v84_v3  ;;  %v86_v16 = vmul.f32 0.5, %v84_v3 }
 0x118   :  { %215 = vtanh.f32 %v97_v5  ;;  %v90_v7 = vmul.f32 %v88_v6, %v84_v3 }
 0x11a   :  { %v92_v8 = vmul.f32 %v90_v7, %v84_v3 }
 0x11c   :  { %v94_v9 = vadd.f32 %v92_v8, %v84_v3 }
 0x11e   :  { %v216_v10 = vpop.eup %215  ;;  %v96_v11 = vmul.f32 0.7978846, %v94_v9 }
 0x11f   :  { %v101_v13 = vadd.f32 1.0, %v216_v10 }
 0x120   :  { %217 = vtanh.f32 %v96_v11 }
 0x121   :  { %v103_v14 = vmul.f32 %v101_v13, %v87_v12 }
 0x123   :  { %187 = vmatmul.msk.f32.vlgmr.msra.gmra.mxu2 %vm22_vm0, %v103_v14  ;;  %189 = vmatmul.msk.f32.vlgmr.msra.gmra.mxu3 %vm22_vm0, %v103_v14 }
 0x126   :  { %v218_v15 = vpop.eup %217 }
 0x127   :  { %v100_v17 = vadd.f32 1.0, %v218_v15 }
 0x129   :  { %v102_v18 = vmul.f32 %v100_v17, %v86_v16 }
 0x12b   :  { %186 = vmatmul.msk.f32.vlgmr.msra.gmra.mxu0 %vm22_vm0, %v102_v18  ;;  %188 = vmatmul.msk.f32.vlgmr.msra.gmra.mxu1 %vm22_vm0, %v102_v18 }
 0x1a6   :  { %v152_v22 = vpop.f32.mrf.mxu2  ;;  %v175_v23 = vpop.f32.mrf.mxu3 }
 0x1a7   :  { %v153_v24 = vadd.f32 %v152_v22, %v122_v20  ;;  %v176_v25 = vadd.f32 %v175_v23, %v123_v21 }
 0x1a8   :  { %v149_v26 = vpop.f32.mrf.mxu0  ;;  %v172_v27 = vpop.f32.mrf.mxu1 }
 0x1a9   :  { %180 = vst [vmem:[%s353_s5 + $0x10] sm:$0xff] %v153_v24  ;;  %v150_v28 = vadd.f32 %v149_v26, %v122_v20  ;;  %v173_v29 = vadd.f32 %v172_v27, %v123_v21 }
 0x1aa   :  { %181 = vst [vmem:[%s353_s5 + $0x18] sm:$0xff] %v176_v25 }
 0x1ab   :  { %178 = vst [vmem:[%s353_s5] sm:$0xff] %v150_v28 }
 0x1ac   :  { %179 = vst [vmem:[%s353_s5 + $0x8] sm:$0xff] %v173_v29 }

// kernel: _lambda_.15
= control target key start
LH: loop header
LB: loop body
LE: loop exit
PB: predicated region body
PF: predicated region fallthrough
CT: control target
= control target key end

     0   :  { %vm34_vm0 = vcmask 523264   ;;  %vm90_vm1 = vcmask 261120   ;;  %s228_s1 = inlined_call_operand.vmem [shape: f32[64,32], index: 1, kind: input, shape index: {}]   ;;  %s229_s2 = inlined_call_operand.vmem [shape: f32[1,32], index: 2, kind: input, shape index: {}]   ;;  %s230_s0 = inlined_call_operand.vmem [shape: f32[16,64], index: 0, kind: input, shape index: {}]   ;;  %s231_s4 = inlined_call_operand.vmem [shape: f32[1,128], index: 4, kind: input, shape index: {}]   ;;  %s232_s3 = inlined_call_operand.vmem [shape: f32[32,128], index: 3, kind: input, shape index: {}]   ;;  %s233_s5 = inlined_call_operand.vmem [shape: f32[16,128], index: 5, kind: output, shape index: {}]  }
   0x1   :  { %v29_v0 = vld [vmem:[%s228_s1 + $0x38] sm:$0xff]  ;;  %v28_v1 = vld [vmem:[%s228_s1 + $0x30] sm:$0xff]  ;;  %v27_v2 = vld [vmem:[%s228_s1 + $0x28] sm:$0xff] }
   0x2   :  { %49 = vmatpush.msra.mxu0 %v29_v0  ;;  %130 = vmatpush.msra.mxu2 %v29_v0  ;;  %v26_v3 = vld [vmem:[%s228_s1 + $0x20] sm:$0xff]  ;;  %v25_v4 = vld [vmem:[%s228_s1 + $0x18] sm:$0xff]  ;;  %v24_v5 = vld [vmem:[%s228_s1 + $0x10] sm:$0xff] }
   0x3   :  { %v23_v6 = vld [vmem:[%s228_s1 + $0x8] sm:$0xff]  ;;  %v22_v7 = vld [vmem:[%s228_s1] sm:$0xff]  ;;  %v85_v10 = vld [vmem:[%s232_s3 + $0x18] sm:$0xff] }
   0x4   :  { %50 = vmatpush.msra.mxu0 %v28_v1  ;;  %131 = vmatpush.msra.mxu2 %v28_v1  ;;  %v20_v8 = vld [vmem:[%s230_s0] sm:$0xff]  ;;  %v21_v9 = vld [vmem:[%s230_s0 + $0x8] sm:$0xff]  ;;  %v84_v11 = vld [vmem:[%s232_s3 + $0x10] sm:$0xff] }
   0x5   :  { %109 = vmatpush.msra.mxu1 %v85_v10  ;;  %v83_v12 = vld [vmem:[%s232_s3 + $0x8] sm:$0xff]  ;;  %v82_v13 = vld [vmem:[%s232_s3] sm:$0xff] }
   0x6   :  { %51 = vmatpush.msra.mxu0 %v27_v2  ;;  %132 = vmatpush.msra.mxu2 %v27_v2  ;;  %v138_v14 = vld [vmem:[%s229_s2] ss:$0 sm:$0xff] }
   0x7   :  { %110 = vmatpush.msra.mxu1 %v84_v11  ;;  %v139_v37 = vld [vmem:[%s231_s4] ss:$0 sm:$0xff] }
   0x8   :  { %52 = vmatpush.msra.mxu0 %v26_v3  ;;  %133 = vmatpush.msra.mxu2 %v26_v3 }
   0x9   :  { %111 = vmatpush.msra.mxu1 %v83_v12 }
   0xa   :  { %53 = vmatpush.msra.mxu0 %v25_v4  ;;  %134 = vmatpush.msra.mxu2 %v25_v4 }
   0xb   :  { %112 = vmatpush.msra.mxu1 %v82_v13 }
   0xc   :  { %54 = vmatpush.msra.mxu0 %v24_v5  ;;  %135 = vmatpush.msra.mxu2 %v24_v5 }
   0xe   :  { %55 = vmatpush.msra.mxu0 %v23_v6  ;;  %136 = vmatpush.msra.mxu2 %v23_v6 }
  0x10   :  { %56 = vmatpush.msra.mxu0 %v22_v7  ;;  %137 = vmatpush.msra.mxu2 %v22_v7 }
  0x11   :  { %126 = vmatmul.msk.f32.vlgmr.msra.gmra.mxu0 %vm34_vm0, %v20_v8  ;;  %127 = vmatmul.msk.f32.vlgmr.msra.gmra.mxu2 %vm34_vm0, %v21_v9 }
  0x8e   :  { %v58_v15 = vpop.f32.mrf.mxu0 }
  0x8f   :  { %v59_v16 = vadd.f32 %v138_v14, %v58_v15 }
  0x91   :  { %v66_v17 = vmul.f32 0.044715, %v59_v16  ;;  %v64_v30 = vmul.f32 0.5, %v59_v16 }
  0x93   :  { %v68_v18 = vmul.f32 %v66_v17, %v59_v16 }
  0x94   :  { %v61_v19 = vpop.f32.mrf.mxu2 }
  0x95   :  { %v62_v20 = vadd.f32 %v138_v14, %v61_v19  ;;  %v70_v21 = vmul.f32 %v68_v18, %v59_v16 }
  0x97   :  { %v67_v22 = vmul.f32 0.044715, %v62_v20  ;;  %v72_v23 = vadd.f32 %v70_v21, %v59_v16  ;;  %v65_v35 = vmul.f32 0.5, %v62_v20 }
  0x99   :  { %v74_v24 = vmul.f32 0.7978846, %v72_v23  ;;  %v69_v25 = vmul.f32 %v67_v22, %v62_v20 }
  0x9b   :  { %140 = vtanh.f32 %v74_v24  ;;  %v71_v26 = vmul.f32 %v69_v25, %v62_v20 }
  0x9d   :  { %v73_v27 = vadd.f32 %v71_v26, %v62_v20 }
  0x9f   :  { %v75_v28 = vmul.f32 0.7978846, %v73_v27 }
  0xa1   :  { %v141_v29 = vpop.eup %140  ;;  %142 = vtanh.f32 %v75_v28 }
  0xa2   :  { %v78_v31 = vadd.f32 1.0, %v141_v29 }
  0xa4   :  { %v80_v32 = vmul.f32 %v78_v31, %v64_v30 }
  0xa6   :  { %128 = vmatmul.msk.f32.vlgmr.msra.gmra.mxu1 %vm90_vm1, %v80_v32 }
  0xa7   :  { %v143_v33 = vpop.eup %142 }
  0xa8   :  { %v79_v34 = vadd.f32 1.0, %v143_v33 }
  0xaa   :  { %v81_v36 = vmul.f32 %v79_v34, %v65_v35 }
  0xae   :  { %129 = vmatmul.msk.f32.gmra.mxu1 %vm90_vm1, %v81_v36 }
 0x123   :  { %v114_v38 = vpop.f32.mrf.mxu1 }
 0x124   :  { %v115_v39 = vadd.f32 %v139_v37, %v114_v38 }
 0x126   :  { %120 = vst [vmem:[%s233_s5] sm:$0xff] %v115_v39 }
 0x12b   :  { %v117_v40 = vpop.f32.mrf.mxu1 }
 0x12c   :  { %v118_v41 = vadd.f32 %v139_v37, %v117_v40 }
 0x12e   :  { %121 = vst [vmem:[%s233_s5 + $0x8] sm:$0xff] %v118_v41 }

// kernel: _lambda_.14
= control target key start
LH: loop header
LB: loop body
LE: loop exit
PB: predicated region body
PF: predicated region fallthrough
CT: control target
= control target key end

     0   :  { %s1420_s12 = smov 0   ;;  %s1422_s13 = smov 0   ;;  %s2165_s0 = inlined_call_operand.vmem [shape: f32[2,8,2,3,32], index: 0, kind: input, shape index: {}]   ;;  %s2166_s1 = inlined_call_operand.vmem [shape: f32[2,3,32,32], index: 1, kind: input, shape index: {}]   ;;  %s2167_s2 = inlined_call_operand.vmem [shape: f32[2,3,1,32], index: 2, kind: input, shape index: {}]   ;;  %s2168_s3 = inlined_call_operand.vmem [shape: f32[2,2,8,32], index: 3, kind: output, shape index: {}]  }
   0x1   :  { %s1424_s14 = smov 0   ;;  %s1426_s15 = smov 0  }
   0x2   :  { %s1428_s16 = smov 0  }
   0x3 LB: > { %s25_s17 = sadd.s32 1, %s1389_s15  ;;  %p49_p1 = scmp.ne.s32.totalorder %s1381_s13, %s1377_s12  ;;  %s1393_s16 = sphi %s1428_s16, %s13_s16   ;;  %s1389_s15 = sphi %s1426_s15, %s2243_s15   ;;  %s1385_s14 = sphi %s1424_s14, %s2242_s14   ;;  %s1381_s13 = sphi %s1422_s13, %s2241_s13   ;;  %s1377_s12 = sphi %s1420_s12, %s2240_s12  }
   0x4   : > { %p27_p0 = scmp.ge.s32.totalorder %s25_s17, 2  ;;  %p50_p2 = scmp.eq.s32.totalorder %s1393_s16, 0 }
   0x5   : > { %s42_s19 = sadd.s32 1, %s1381_s13  ;;  %p1177_p5 = scmp.ge.s32.totalorder %s1393_s16, 2 }
   0x6   : > { %s2245_s17 = smov (%p27_p0, %s25_s17), 0  ;;  %p51_p3 = por %p50_p2, %p49_p1 }
   0x7   : > { %s38_s18 = ssub.s32 %s1389_s15, %s2245_s17  ;;  %163 = sbr.rel (%p1177_p5) target bundleno = 32 (0x20), region = 16 }
   0x8   : > { %p40_p4 = scmp.eq.s32.totalorder %s38_s18, 0 }
   0xa   : > { %s1455_s20 = scalar_select %p40_p4, %s1381_s13, %s42_s19  }
   0xc   : > { %166 = sbr.rel (!%p51_p3) target bundleno = 32 (0x20), region = 20  ;;  %s168_s21 = sand.u32 (%p51_p3), 1, %s1381_s13  }
   0xd   : > { %s1179_s22 = sshll.u32 (%p51_p3), %s1389_s15, 2  ;;  %s1178_s23 = sshll.u32 (%p51_p3), %s168_s21, 6 }
   0xe   : > { %s1463_s26 = scalar_lea.vmem (%p51_p3), %s2165_s0, %s1179_s22  ;;  %s170_s27 = scalar_lea.vmem (%p51_p3), [#allocation3], %s1178_s23 }
   0xf   : > { %v196_v0 = vld [vmem:[%s1463_s26] sm:$0xf] (%p51_p3)  ;;  %v198_v1 = vld [vmem:[%s1463_s26 + $0x8] sm:$0xf] (%p51_p3)  ;;  %v200_v2 = vld [vmem:[%s1463_s26 + $0x10] sm:$0xf] (%p51_p3) }
  0x10   : > { %197 = vst [vmem:[%s170_s27] sm:$0xf] (%p51_p3), %v196_v0  ;;  %v202_v3 = vld [vmem:[%s1463_s26 + $0x18] sm:$0xf] (%p51_p3)  ;;  %v204_v4 = vld [vmem:[%s1463_s26 + $0x20] sm:$0xf] (%p51_p3) }
  0x11   : > { %199 = vst [vmem:[%s170_s27 + $0x4] sm:$0xf] %v198_v1  ;;  %v206_v5 = vld [vmem:[%s1463_s26 + $0x28] sm:$0xf]  ;;  %v208_v6 = vld [vmem:[%s1463_s26 + $0x30] sm:$0xf] }
  0x12   : > { %201 = vst [vmem:[%s170_s27 + $0x8] sm:$0xf] %v200_v2  ;;  %v210_v7 = vld [vmem:[%s1463_s26 + $0x38] sm:$0xf]  ;;  %v212_v8 = vld [vmem:[%s1463_s26 + $0x40] sm:$0xf] }
  0x13   : > { %203 = vst [vmem:[%s170_s27 + $0xc] sm:$0xf] %v202_v3  ;;  %v214_v9 = vld [vmem:[%s1463_s26 + $0x48] sm:$0xf]  ;;  %v216_v10 = vld [vmem:[%s1463_s26 + $0x50] sm:$0xf] }
  0x14   : > { %205 = vst [vmem:[%s170_s27 + $0x10] sm:$0xf] %v204_v4  ;;  %v218_v11 = vld [vmem:[%s1463_s26 + $0x58] sm:$0xf]  ;;  %v220_v12 = vld [vmem:[%s1463_s26 + $0x60] sm:$0xf] }
  0x15   : > { %207 = vst [vmem:[%s170_s27 + $0x14] sm:$0xf] %v206_v5  ;;  %v222_v13 = vld [vmem:[%s1463_s26 + $0x68] sm:$0xf]  ;;  %v224_v14 = vld [vmem:[%s1463_s26 + $0x70] sm:$0xf] }
  0x16   : > { %209 = vst [vmem:[%s170_s27 + $0x18] sm:$0xf] %v208_v6  ;;  %v226_v15 = vld [vmem:[%s1463_s26 + $0x78] sm:$0xf] }
  0x17   : > { %211 = vst [vmem:[%s170_s27 + $0x1c] sm:$0xf] %v210_v7 }
  0x18   : > { %213 = vst [vmem:[%s170_s27 + $0x20] sm:$0xf] %v212_v8 }
  0x19   : > { %215 = vst [vmem:[%s170_s27 + $0x24] sm:$0xf] %v214_v9 }
  0x1a   : > { %217 = vst [vmem:[%s170_s27 + $0x28] sm:$0xf] %v216_v10 }
  0x1b   : > { %219 = vst [vmem:[%s170_s27 + $0x2c] sm:$0xf] %v218_v11 }
  0x1c   : > { %221 = vst [vmem:[%s170_s27 + $0x30] sm:$0xf] %v220_v12 }
  0x1d   : > { %223 = vst [vmem:[%s170_s27 + $0x34] sm:$0xf] %v222_v13 }
  0x1e   : > { %225 = vst [vmem:[%s170_s27 + $0x38] sm:$0xf] %v224_v14 }
  0x1f   : > { %227 = vst [vmem:[%s170_s27 + $0x3c] sm:$0xf] %v226_v15 }
  0x20 PF: > { %p1180_p6 = scmp.ge.s32.totalorder %s1393_s16, 1  ;;  %p297_p7 = scmp.lt.s32.totalorder %s1393_s16, 3 }
  0x22   : > { %p298_p8 = pnand %p1180_p6, %p297_p7 }
  0x23   : > { %s304_s28 = sand.u32 (!%p298_p8), 1, %s1377_s12   ;;  %p349_p9 = scmp.lt.s32.totalorder (!%p298_p8), %s1385_s14, 1 }
  0x24   : > { %301 = sbr.rel (%p298_p8) target bundleno = 306 (0x132), region = 69  ;;  %s1485_s29 = sshll.u32 (!%p298_p8), %s304_s28, 6 }
  0x25   : > { %s306_s22 = scalar_lea.vmem (!%p298_p8), [#allocation3], %s1485_s29  ;;  %s1531_s23 = smov (!%p298_p8), 0  }
  0x29   : > { %vm380_vm0 = vcmask 261120   ;;  %v1399_v16 = vmov 0.0   ;;  %s350_s30 = scalar_select %p349_p9, %s1385_s14, 1 }
  0x2a   : > { %381 = vst.msk [vmem:[#allocation2] sm:$0xff] %vm380_vm0, %v1399_v16 }
  0x2b   : > { %s1220_s4 = smul.u32 96, %s350_s30  ;;  %s1219_s5 = sshll.u32 %s350_s30, 4 }
  0x2c   : > { %s1221_s6 = smul.u32 3, %s350_s30  ;;  %s1492_s9 = scalar_lea.vmem %s2168_s3, %s1219_s5 }
  0x2d   : > { %s353_s12 = scalar_lea.vmem %s2166_s1, %s1220_s4 }
  0x2e   : > { %v1497_v17 = vld [vmem:[%s353_s12] sm:$0xff]  ;;  %v1499_v18 = vld [vmem:[%s353_s12 + $0x8] sm:$0xff]  ;;  %v1501_v19 = vld [vmem:[%s353_s12 + $0x10] sm:$0xff]  ;;  %s357_s21 = scalar_lea.vmem %s2167_s2, %s1221_s6 }
  0x2f   : > { %2169 = vst [vmem:[#allocation4_spill] sm:$0xff] %v1497_v17  ;;  %v1506_v20 = vld [vmem:[%s353_s12 + $0x18] sm:$0xff]  ;;  %v1508_v21 = vld [vmem:[%s353_s12 + $0x20] sm:$0xff]  ;;  %v1510_v22 = vld [vmem:[%s353_s12 + $0x28] sm:$0xff] }
  0x30   : > { %2170 = vst [vmem:[#allocation5_spill] sm:$0xff] %v1499_v18  ;;  %v1512_v23 = vld [vmem:[%s353_s12 + $0x30] sm:$0xff]  ;;  %v1514_v24 = vld [vmem:[%s353_s12 + $0x38] sm:$0xff]  ;;  %v1516_v25 = vld [vmem:[%s353_s12 + $0x40] sm:$0xff] }
  0x31   : > { %2171 = vst [vmem:[#allocation6_spill] sm:$0xff] %v1501_v19  ;;  %v1518_v26 = vld [vmem:[%s353_s12 + $0x48] sm:$0xff]  ;;  %v1520_v27 = vld [vmem:[%s353_s12 + $0x50] sm:$0xff]  ;;  %v1522_v28 = vld [vmem:[%s353_s12 + $0x58] sm:$0xff] }
  0x32   : > { %2172 = vst [vmem:[#allocation7_spill] sm:$0xff] %v1506_v20  ;;  %v1524_v29 = vld [vmem:[%s357_s21] sm:$0x1]  ;;  %v1526_v30 = vld [vmem:[%s357_s21 + $0x1] sm:$0x1] }
  0x33   : > { %2173 = vst [vmem:[#allocation8_spill] sm:$0xff] %v1508_v21  ;;  %v1528_v31 = vld [vmem:[%s357_s21 + $0x2] sm:$0x1] }
  0x34   : > { %2174 = vst [vmem:[#allocation9_spill] sm:$0xff] %v1510_v22 }
  0x35   : > { %2175 = vst [vmem:[#allocation10_spill] sm:$0xff] %v1512_v23 }
  0x36   : > { %2176 = vst [vmem:[#allocation11_spill] sm:$0xff] %v1514_v24 }
  0x37   : > { %2177 = vst [vmem:[#allocation12_spill] sm:$0xff] %v1516_v25 }
  0x38   : > { %2178 = vst [vmem:[#allocation13_spill] sm:$0xff] %v1518_v26 }
  0x39 LB: >> { %v2179_v20 = vld [vmem:[#allocation7_spill] sm:$0xff]  ;;  %493 = vmatpush.msra.mxu2 %v1522_v28  ;;  %v2181_v19 = vld [vmem:[#allocation6_spill] sm:$0xff]  ;;  %v2183_v18 = vld [vmem:[#allocation5_spill] sm:$0xff]  ;;  %s1195_s24 = sshll.u32 %s1397_s23, 1  ;;  %v429_v33 = vperm.slane %v1524_v29, 0  ;;  %v456_v34 = vperm.slane %v1526_v30, 0  ;;  %s1397_s23 = sphi %s1531_s23, %s410_s23  }
  0x3a   : >> { %447 = vmatpush.msra.mxu0 %v2179_v20  ;;  %v1544_v32 = vld [vmem:[#allocation2] sm:$0xff]  ;;  %v2186_v17 = vld [vmem:[#allocation4_spill] sm:$0xff]  ;;  %s412_s25 = ssub.s32 1, %s1195_s24 }
  0x3b   : >> { %494 = vmatpush.msra.mxu2 %v1520_v27  ;;  %v2184_v22 = vld [vmem:[#allocation9_spill] sm:$0xff]  ;;  %v2187_v21 = vld [vmem:[#allocation8_spill] sm:$0xff]  ;;  %s413_s26 = smul.u32 %s1385_s14, %s412_s25 }
  0x3c   : >> { %448 = vmatpush.msra.mxu0 %v2181_v19  ;;  %v2182_v23 = vld [vmem:[#allocation10_spill] sm:$0xff] }
  0x3d   : >> { %v2180_v24 = vld [vmem:[#allocation11_spill] sm:$0xff]  ;;  %s1559_s27 = sadd.s32 %s1397_s23, %s413_s26  ;;  %s410_s23 = sadd.s32 1, %s1397_s23  }
  0x3e   : >> { %470 = vmatpush.msra.mxu1 %v2180_v24  ;;  %449 = vmatpush.msra.mxu0 %v2183_v18  ;;  %v2188_v25 = vld [vmem:[#allocation12_spill] sm:$0xff]  ;;  %s1196_s28 = sshll.u32 %s1559_s27, 5  ;;  %p988_p10 = scmp.lt.s32.totalorder %s1559_s27, 2 }
  0x3f   : >> { %v2185_v26 = vld [vmem:[#allocation13_spill] sm:$0xff]  ;;  %s418_s30 = scalar_lea.vmem %s306_s22, %s1196_s28 [#allocation3]  ;;  %s1216_s5 = sshll.u32 %s1559_s27, 3 }
  0x40   : >> { %471 = vmatpush.msra.mxu1 %v2182_v23  ;;  %495 = vmatpush.msra.mxu2 %v2185_v26  ;;  %v1566_v37 = vld [vmem:[%s418_s30] sm:$0x7]  ;;  %v1568_v38 = vld [vmem:[%s418_s30 + $0x4] sm:$0x7]  ;;  %v1570_v39 = vld [vmem:[%s418_s30 + $0x8] sm:$0x7]  ;;  %s1034_s6 = scalar_lea.vmem %s1492_s9, %s1216_s5 }
  0x41   : >> { %450 = vmatpush.msra.mxu0 %v2186_v17  ;;  %v1572_v41 = vld [vmem:[%s418_s30 + $0xc] sm:$0x7]  ;;  %v1574_v42 = vld [vmem:[%s418_s30 + $0x10] sm:$0x7]  ;;  %v1576_v43 = vld [vmem:[%s418_s30 + $0x14] sm:$0x7] }
  0x42   : >> { %472 = vmatpush.msra.mxu1 %v2184_v22  ;;  %1197 = vmatmul.msk.f32.vlgmr.msra.gmra.mxu0 %vm380_vm0, %v1544_v32  ;;  %v1578_v45 = vld [vmem:[%s418_s30 + $0x18] sm:$0x7]  ;;  %v1580_v50 = vld [vmem:[%s418_s30 + $0x1c] sm:$0x7]  ;;  %s1593_s4 = scalar_select %p988_p10, 1, 0 }
  0x43   : >> { %496 = vmatpush.msra.mxu2 %v2188_v25  ;;  %p407_p11 = scmp.ge.s32.totalorder %s410_s23, 2  }
  0x44   : >> { %473 = vmatpush.msra.mxu1 %v2187_v21  ;;  %1199 = vmatmul.msk.f32.vlgmr.msra.gmra.mxu2 %vm380_vm0, %v1544_v32 }
  0x45   : >> { %1198 = vmatmul.msk.f32.vlgmr.msra.gmra.mxu1 %vm380_vm0, %v1544_v32 }
  0xbf   : >> { %v452_v35 = vpop.f32.mrf.mxu0 }
  0xc0   : >> { %v453_v40 = vadd.f32 %v452_v35, %v429_v33 }
  0xc2   : >> { %v475_v36 = vpop.f32.mrf.mxu1  ;;  %v502_v46 = vrot.slane %v453_v40, 1  ;;  %v503_v47 = vrot.slane %v453_v40, 2  ;;  %v504_v48 = vrot.slane %v453_v40, 3  ;;  %v505_v49 = vrot.slane %v453_v40, 4 }
  0xc3   : >> { %v476_v44 = vadd.f32 %v475_v36, %v456_v34  ;;  %v506_v51 = vrot.slane %v453_v40, 5  ;;  %v507_v52 = vrot.slane %v453_v40, 6  ;;  %v508_v53 = vrot.slane %v453_v40, 7 }
  0xc4   : >> { %v517_v54 = vadd.f32 %v453_v40, %v1566_v37  ;;  %v518_v55 = vadd.f32 %v502_v46, %v1568_v38  ;;  %v519_v56 = vadd.f32 %v503_v47, %v1570_v39  ;;  %v520_v57 = vadd.f32 %v504_v48, %v1572_v41 }
  0xc5   : >> { %v521_v58 = vadd.f32 %v505_v49, %v1574_v42  ;;  %v522_v59 = vadd.f32 %v506_v51, %v1576_v43  ;;  %v523_v60 = vadd.f32 %v507_v52, %v1578_v45  ;;  %v524_v62 = vadd.f32 %v508_v53, %v1580_v50 }
  0xc6   : >> { %v1200_v61 = vmul.f32 -1.442695, %v517_v54  ;;  %v1201_v63 = vmul.f32 -1.442695, %v518_v55  ;;  %v1202_v0 = vmul.f32 -1.442695, %v519_v56  ;;  %v694_v14 = vadd.f32 %v476_v44, %v1568_v38 }
  0xc7   : >> { %v1203_v1 = vmul.f32 -1.442695, %v520_v57  ;;  %v1204_v2 = vmul.f32 -1.442695, %v521_v58  ;;  %v1205_v3 = vmul.f32 -1.442695, %v522_v59 }
  0xc8   : >> { %1271 = vpow2.f32 %v1200_v61  ;;  %v678_v4 = vrot.slane %v476_v44, 7  ;;  %v1206_v5 = vmul.f32 -1.442695, %v523_v60  ;;  %v679_v6 = vrot.slane %v476_v44, 1 }
  0xc9   : >> { %1273 = vpow2.f32 %v1201_v63  ;;  %v680_v7 = vrot.slane %v476_v44, 2  ;;  %v1207_v8 = vmul.f32 -1.442695, %v524_v62  ;;  %v681_v9 = vrot.slane %v476_v44, 3 }
  0xca   : >> { %1275 = vpow2.f32 %v1202_v0  ;;  %v693_v10 = vadd.f32 %v678_v4, %v1566_v37  ;;  %v682_v11 = vrot.slane %v476_v44, 4  ;;  %v683_v12 = vrot.slane %v476_v44, 5 }
  0xcb   : >> { %1277 = vpow2.f32 %v1203_v1  ;;  %v684_v13 = vrot.slane %v476_v44, 6  ;;  %v695_v16 = vadd.f32 %v679_v6, %v1570_v39  ;;  %v696_v33 = vadd.f32 %v680_v7, %v1572_v41 }
  0xcc   : >> { %1279 = vpow2.f32 %v1204_v2  ;;  %v1208_v34 = vmul.f32 -1.442695, %v693_v10  ;;  %v697_v46 = vadd.f32 %v681_v9, %v1574_v42  ;;  %v698_v49 = vadd.f32 %v682_v11, %v1576_v43 }
  0xcd   : >> { %1281 = vpow2.f32 %v1205_v3  ;;  %v699_v44 = vadd.f32 %v683_v12, %v1578_v45  ;;  %v700_v53 = vadd.f32 %v684_v13, %v1580_v50  ;;  %v1209_v54 = vmul.f32 -1.442695, %v694_v14  ;;  %v498_v3 = vpop.f32.mrf.mxu2 }
  0xce   : >> { %v1272_v15 = vpop.eup %1271  ;;  %1283 = vpow2.f32 %v1206_v5  ;;  %v1210_v57 = vmul.f32 -1.442695, %v695_v16  ;;  %v1211_v58 = vmul.f32 -1.442695, %v696_v33  ;;  %v479_v61 = vperm.slane %v1528_v31, 0 }
  0xcf   : >> { %v1274_v35 = vpop.eup %1273  ;;  %1285 = vpow2.f32 %v1207_v8  ;;  %v1599_v36 = vadd.f32 1.0, %v1272_v15  ;;  %v1212_v1 = vmul.f32 -1.442695, %v697_v46  ;;  %v1213_v2 = vmul.f32 -1.442695, %v698_v49 }
  0xd0   : >> { %v1276_v47 = vpop.eup %1275  ;;  %v1603_v48 = vadd.f32 1.0, %v1274_v35  ;;  %1287 = vpow2.f32 %v1208_v34  ;;  %v1214_v6 = vmul.f32 -1.442695, %v699_v44  ;;  %v1215_v7 = vmul.f32 -1.442695, %v700_v53 }
  0xd1   : >> { %v1278_v51 = vpop.eup %1277  ;;  %v1607_v52 = vadd.f32 1.0, %v1276_v47  ;;  %1289 = vrcp.f32 %v1599_v36  ;;  %v568_v62 = vand.u32 2147483648, %v1599_v36  ;;  %vm562_vm1 = vweird.f32 %v1599_v36 }
  0xd2   : >> { %v1280_v55 = vpop.eup %1279  ;;  %v1611_v56 = vadd.f32 1.0, %v1278_v51  ;;  %1291 = vrcp.f32 %v1603_v48  ;;  %v566_v10 = vand.u32 2147483647, %v1599_v36  ;;  %v583_v11 = vand.u32 2147483648, %v1603_v48 }
  0xd3   : >> { %v1282_v59 = vpop.eup %1281  ;;  %v1614_v60 = vadd.f32 1.0, %v1280_v55  ;;  %1293 = vrcp.f32 %v1607_v52  ;;  %v1634_v13 = vadd.f32 %v498_v3, %v479_v61  ;;  %v1636_v14 = vor.u32 1.1754944e-38, %v568_v62 }
  0xd4   : >> { %v1284_v63 = vpop.eup %1283  ;;  %v1619_v0 = vadd.f32 1.0, %v1282_v59  ;;  %1295 = vrcp.f32 %v1611_v56  ;;  %vm577_vm2 = vweird.f32 %v1603_v48  ;;  %v581_v15 = vand.u32 2147483647, %v1603_v48 }
  0xd5   : >> { %v1286_v4 = vpop.eup %1285  ;;  %v1622_v5 = vadd.f32 1.0, %v1284_v63  ;;  %1297 = vrcp.f32 %v1614_v60  ;;  %v596_v35 = vand.u32 2147483647, %v1607_v52  ;;  %v584_v49 = vor.u32 1.1754944e-38, %v583_v11 }
  0xd6   : >> { %v1288_v8 = vpop.eup %1287  ;;  %v1625_v9 = vadd.f32 1.0, %v1286_v4  ;;  %1299 = vrcp.f32 %v1619_v0  ;;  %vm592_vm4 = vweird.f32 %v1607_v52  ;;  %vm1656_vm5 = vcmp.eq.f32.partialorder %v566_v10, 8.507059e+37 }
  0xd7   : >> { %v1631_v12 = vpop.eup %1289  ;;  %1301 = vrcp.f32 %v1622_v5  ;;  %v1643_v33 = vadd.f32 1.0, %v1288_v8  ;;  %vm1665_vm7 = vcmp.eq.f32.partialorder %v581_v15, 8.507059e+37  ;;  %vm1675_vm8 = vcmp.eq.f32.partialorder %v596_v35, 8.507059e+37 }
  0xd8   : >> { %v1640_v16 = vpop.eup %1291  ;;  %1303 = vrcp.f32 %v1625_v9  ;;  %v558_v34 = vmul.f32 %v1631_v12, %v1599_v36  ;;  %vm563_vm3 = vweird.f32 %v1631_v12  ;;  %vm607_vm10 = vweird.f32 %v1611_v56 }
  0xd9   : >> { %v1648_v46 = vpop.eup %1293  ;;  %1305 = vpow2.f32 %v1209_v54  ;;  %v573_v47 = vmul.f32 %v1640_v16, %v1603_v48  ;;  %vm578_vm6 = vweird.f32 %v1640_v16  ;;  %vm1692_vm11 = vmor %vm562_vm1, %vm563_vm3  ;;  %v643_v17 = vand.u32 2147483648, %v1619_v0 }
  0xda   : >> { %v1654_v44 = vpop.eup %1295  ;;  %1307 = vpow2.f32 %v1210_v57  ;;  %v559_v51 = vsub.f32 1.0, %v558_v34  ;;  %v588_v54 = vmul.f32 %v1648_v46, %v1607_v52  ;;  %v598_v57 = vand.u32 2147483648, %v1607_v52  ;;  %vm1708_vm12 = vmor %vm577_vm2, %vm578_vm6 }
  0xdb   : >> { %v1663_v55 = vpop.eup %1297  ;;  %1309 = vpow2.f32 %v1211_v58  ;;  %v574_v59 = vsub.f32 1.0, %v573_v47  ;;  %v603_v62 = vmul.f32 %v1654_v44, %v1611_v56  ;;  %vm593_vm9 = vweird.f32 %v1648_v46 }
  0xdc   : >> { %v1672_v63 = vpop.eup %1299  ;;  %1311 = vpow2.f32 %v1212_v1  ;;  %v560_v3 = vmul.f32 %v1631_v12, %v559_v51  ;;  %v589_v4 = vsub.f32 1.0, %v588_v54  ;;  %v599_v51 = vor.u32 1.1754944e-38, %v598_v57  ;;  %vm1728_vm14 = vmor %vm592_vm4, %vm593_vm9 }
  0xdd   : >> { %v1679_v58 = vpop.eup %1301  ;;  %1313 = vpow2.f32 %v1213_v2  ;;  %v575_v10 = vmul.f32 %v1640_v16, %v574_v59  ;;  %v604_v11 = vsub.f32 1.0, %v603_v62  ;;  %vm608_vm13 = vweird.f32 %v1654_v44 }
  0xde   : >> { %v1683_v15 = vpop.eup %1303  ;;  %1315 = vpow2.f32 %v1214_v6  ;;  %v561_v1 = vadd.f32 %v1631_v12, %v560_v3  ;;  %v590_v34 = vmul.f32 %v1648_v46, %v589_v4  ;;  %vm1757_vm15 = vmor %vm607_vm10, %vm608_vm13  ;;  %vm622_vm2 = vweird.f32 %v1614_v60 }
  0xdf   : >> { %v1306_v35 = vpop.eup %1305  ;;  %1317 = vpow2.f32 %v1215_v7  ;;  %v576_v47 = vadd.f32 %v1640_v16, %v575_v10  ;;  %v605_v6 = vmul.f32 %v1654_v44, %v604_v11  ;;  %vm623_vm3 = vweird.f32 %v1663_v55 }
  0xe0   : >> { %v1308_v54 = vpop.eup %1307  ;;  %v1698_v59 = vadd.f32 1.0, %v1306_v35  ;;  %1319 = vrcp.f32 %v1643_v33  ;;  %v565_v7 = vsel %vm1692_vm11, %v1631_v12, %v561_v1  ;;  %v591_v57 = vadd.f32 %v1648_v46, %v590_v34 }
  0xe1   : >> { %v1310_v62 = vpop.eup %1309  ;;  %v1713_v3 = vadd.f32 1.0, %v1308_v54  ;;  %v580_v4 = vsel %vm1708_vm12, %v1640_v16, %v576_v47  ;;  %v606_v10 = vadd.f32 %v1654_v44, %v605_v6  ;;  %v611_v16 = vand.u32 2147483647, %v1611_v56 }
  0xe2   : >> { %v1312_v12 = vpop.eup %1311  ;;  %v1720_v11 = vadd.f32 1.0, %v1310_v62  ;;  %1321 = vrcp.f32 %v1698_v59  ;;  %v759_v48 = vand.u32 2147483648, %v1698_v59  ;;  %v1739_v2 = vsel %vm1656_vm5, %v1636_v14, %v565_v7  ;;  %vm624_vm5 = vmor %vm622_vm2, %vm623_vm3 }
  0xe3   : >> { %v1314_v34 = vpop.eup %1313  ;;  %v1733_v35 = vadd.f32 1.0, %v1312_v12  ;;  %1323 = vrcp.f32 %v1713_v3  ;;  %v595_v52 = vsel %vm1728_vm14, %v1648_v46, %v591_v57  ;;  %v1751_v36 = vsel %vm1665_vm7, %v584_v49, %v580_v4 }
  0xe4   : >> { %v1316_v47 = vpop.eup %1315  ;;  %v1744_v6 = vadd.f32 1.0, %v1314_v34  ;;  %v1746_v54 = vor.u32 1.1754944e-38, %v759_v48  ;;  %1325 = vrcp.f32 %v1720_v11  ;;  %v1766_v7 = vsel %vm1675_vm8, %v599_v51, %v595_v52 }
  0xe5   : >> { %v1318_v46 = vpop.eup %1317  ;;  %v1761_v53 = vadd.f32 1.0, %v1316_v47  ;;  %1327 = vrcp.f32 %v1733_v35  ;;  %v610_v49 = vsel %vm1757_vm15, %v1654_v44, %v606_v10  ;;  %v613_v62 = vand.u32 2147483648, %v1611_v56 }
  0xe6   : >> { %v1771_v61 = vpop.eup %1319  ;;  %v1773_v57 = vadd.f32 1.0, %v1318_v46  ;;  %1329 = vrcp.f32 %v1744_v6  ;;  %v618_v4 = vmul.f32 %v1663_v55, %v1614_v60  ;;  %vm612_vm1 = vcmp.eq.f32.partialorder %v611_v16, 8.507059e+37 }
  0xe7   : >> { %v1781_v8 = vmul.f32 %v1771_v61, %v1643_v33  ;;  %1331 = vrcp.f32 %v1761_v53  ;;  %v614_v51 = vor.u32 1.1754944e-38, %v613_v62  ;;  %v626_v56 = vand.u32 2147483647, %v1614_v60 }
  0xe8   : >> { %v1785_v44 = vpop.eup %1321  ;;  %1333 = vrcp.f32 %v1773_v57  ;;  %v619_v10 = vsub.f32 1.0, %v618_v4  ;;  %v628_v1 = vand.u32 2147483648, %v1614_v60  ;;  %v633_v16 = vmul.f32 %v1672_v63, %v1619_v0 }
  0xe9   : >> { %v1789_v12 = vpop.eup %1323  ;;  %v749_v48 = vmul.f32 %v1785_v44, %v1698_v59  ;;  %v735_v52 = vsub.f32 1.0, %v1781_v8  ;;  %v1802_v14 = vsel %vm612_vm1, %v614_v51, %v610_v49  ;;  %vm1809_vm4 = vcmp.eq.f32.partialorder %v626_v56, 8.507059e+37 }
  0xea   : >> { %v1797_v34 = vpop.eup %1325  ;;  %v764_v47 = vmul.f32 %v1789_v12, %v1713_v3  ;;  %v620_v46 = vmul.f32 %v1663_v55, %v619_v10  ;;  %v634_v18 = vsub.f32 1.0, %v633_v16  ;;  %v629_v10 = vor.u32 1.1754944e-38, %v628_v1 }
  0xeb   : >> { %v1805_v62 = vpop.eup %1327  ;;  %v750_v4 = vsub.f32 1.0, %v749_v48  ;;  %v779_v40 = vmul.f32 %v1797_v34, %v1720_v11  ;;  %vm637_vm6 = vweird.f32 %v1619_v0  ;;  %vm753_vm7 = vweird.f32 %v1698_v59 }
  0xec   : >> { %v1813_v19 = vpop.eup %1329  ;;  %v765_v8 = vsub.f32 1.0, %v764_v47  ;;  %v794_v49 = vmul.f32 %v1805_v62, %v1733_v35  ;;  %v621_v51 = vadd.f32 %v1663_v55, %v620_v46  ;;  %v635_v56 = vmul.f32 %v1672_v63, %v634_v18 }
  0xed   : >> { %v1818_v20 = vpop.eup %1331  ;;  %v780_v48 = vsub.f32 1.0, %v779_v40  ;;  %v809_v21 = vmul.f32 %v1813_v19, %v1744_v6  ;;  %v751_v47 = vmul.f32 %v1785_v44, %v750_v4  ;;  %vm638_vm8 = vweird.f32 %v1672_v63 }
  0xee   : >> { %v1828_v16 = vpop.eup %1333  ;;  %v795_v1 = vsub.f32 1.0, %v794_v49  ;;  %v824_v40 = vmul.f32 %v1818_v20, %v1761_v53  ;;  %v625_v46 = vsel %vm624_vm5, %v1663_v55, %v621_v51  ;;  %v766_v22 = vmul.f32 %v1789_v12, %v765_v8  ;;  %vm1852_vm9 = vmor %vm637_vm6, %vm638_vm8 }
  0xef   : >> { %v1836_v23 = vmul.f32 %v1797_v34, %v780_v48  ;;  %v810_v60 = vsub.f32 1.0, %v809_v21  ;;  %v839_v18 = vmul.f32 %v1828_v16, %v1773_v57  ;;  %v1843_v4 = vsel %vm1809_vm4, %v629_v10, %v625_v46 }
  0xf0   : >> { %v825_v24 = vsub.f32 1.0, %v824_v40  ;;  %v636_v49 = vadd.f32 %v1672_v63, %v635_v56  ;;  %v1848_v55 = vmul.f32 %v1805_v62, %v795_v1  ;;  %v641_v51 = vand.u32 2147483647, %v1619_v0 }
  0xf1   : >> { %v840_v8 = vsub.f32 1.0, %v839_v18  ;;  %v1859_v10 = vmul.f32 %v1813_v19, %v810_v60  ;;  %v648_v1 = vmul.f32 %v1679_v58, %v1622_v5  ;;  %v644_v46 = vor.u32 1.1754944e-38, %v643_v17 }
  0xf2   : >> { %v1862_v48 = vmul.f32 %v1818_v20, %v825_v24  ;;  %v640_v56 = vsel %vm1852_vm9, %v1672_v63, %v636_v49  ;;  %vm642_vm10 = vcmp.eq.f32.partialorder %v641_v51, 8.507059e+37  ;;  %vm652_vm11 = vweird.f32 %v1622_v5 }
  0xf3   : >> { %v1870_v40 = vmul.f32 %v1828_v16, %v840_v8  ;;  %v649_v0 = vsub.f32 1.0, %v648_v1  ;;  %v656_v60 = vand.u32 2147483647, %v1622_v5  ;;  %v658_v24 = vand.u32 2147483648, %v1622_v5 }
  0xf4   : >> { %v663_v18 = vmul.f32 %v1683_v15, %v1625_v9  ;;  %v1877_v21 = vsel %vm642_vm10, %v644_v46, %v640_v56  ;;  %vm653_vm12 = vweird.f32 %v1679_v58  ;;  %vm667_vm13 = vweird.f32 %v1625_v9 }
  0xf5   : >> { %v671_v63 = vand.u32 2147483647, %v1625_v9  ;;  %v650_v49 = vmul.f32 %v1679_v58, %v649_v0  ;;  %vm1883_vm14 = vcmp.eq.f32.partialorder %v656_v60, 8.507059e+37  ;;  %vm668_vm15 = vweird.f32 %v1683_v15  ;;  %vm1894_vm2 = vmor %vm652_vm11, %vm653_vm12 }
  0xf6   : >> { %v664_v51 = vsub.f32 1.0, %v663_v18  ;;  %v659_v17 = vor.u32 1.1754944e-38, %v658_v24  ;;  %v673_v1 = vand.u32 2147483648, %v1625_v9  ;;  %v736_v56 = vmul.f32 %v1771_v61, %v735_v52  ;;  %vm669_vm6 = vmor %vm667_vm13, %vm668_vm15 }
  0xf7   : >> { %vm738_vm1 = vweird.f32 %v1643_v33  ;;  %v651_v46 = vadd.f32 %v1679_v58, %v650_v49  ;;  %vm739_vm3 = vweird.f32 %v1771_v61  ;;  %v742_v24 = vand.u32 2147483647, %v1643_v33 }
  0xf8   : >> { %v665_v60 = vmul.f32 %v1683_v15, %v664_v51  ;;  %vm1901_vm4 = vcmp.eq.f32.partialorder %v671_v63, 8.507059e+37  ;;  %v737_v52 = vadd.f32 %v1771_v61, %v736_v56  ;;  %vm1906_vm5 = vmor %vm738_vm1, %vm739_vm3  ;;  %v744_v5 = vand.u32 2147483648, %v1643_v33 }
  0xf9   : >> { %v752_v25 = vadd.f32 %v1785_v44, %v751_v47  ;;  %v655_v51 = vsel %vm1894_vm2, %v1679_v58, %v651_v46  ;;  %vm743_vm8 = vcmp.eq.f32.partialorder %v742_v24, 8.507059e+37  ;;  %vm754_vm9 = vweird.f32 %v1785_v44 }
  0xfa   : >> { %v666_v26 = vadd.f32 %v1683_v15, %v665_v60  ;;  %v674_v63 = vor.u32 1.1754944e-38, %v673_v1  ;;  %v741_v33 = vsel %vm1906_vm5, %v1771_v61, %v737_v52  ;;  %v745_v47 = vor.u32 1.1754944e-38, %v744_v5  ;;  %vm1926_vm10 = vmor %vm753_vm7, %vm754_vm9 }
  0xfb   : >> { %v757_v56 = vand.u32 2147483647, %v1698_v59  ;;  %v1933_v9 = vsel %vm1883_vm14, %v659_v17, %v655_v51  ;;  %v767_v1 = vadd.f32 %v1789_v12, %v766_v22  ;;  %vm768_vm11 = vweird.f32 %v1713_v3 }
  0xfc   : >> { %v670_v46 = vsel %vm669_vm6, %v1683_v15, %v666_v26  ;;  %v1942_v0 = vsel %vm743_vm8, %v745_v47, %v741_v33  ;;  %v756_v59 = vsel %vm1926_vm10, %v1785_v44, %v752_v25  ;;  %vm769_vm7 = vweird.f32 %v1789_v12 }
  0xfd   : >> { %v1940_v61 = vsel %vm1901_vm4, %v674_v63, %v670_v46  ;;  %vm1948_vm12 = vcmp.eq.f32.partialorder %v757_v56, 8.507059e+37  ;;  %vm1952_vm13 = vmor %vm768_vm11, %vm769_vm7  ;;  %v772_v26 = vand.u32 2147483647, %v1713_v3  ;;  %v774_v15 = vand.u32 2147483648, %v1713_v3 }
  0xfe   : >> { %v782_v17 = vadd.f32 %v1797_v34, %v1836_v23  ;;  %v771_v25 = vsel %vm1952_vm13, %v1789_v12, %v767_v1  ;;  %vm783_vm14 = vweird.f32 %v1720_v11  ;;  %vm784_vm15 = vweird.f32 %v1797_v34 }
  0xff   : >> { %v787_v44 = vand.u32 2147483647, %v1720_v11  ;;  %vm773_vm1 = vcmp.eq.f32.partialorder %v772_v26, 8.507059e+37  ;;  %v775_v60 = vor.u32 1.1754944e-38, %v774_v15  ;;  %vm1966_vm2 = vmor %vm783_vm14, %vm784_vm15  ;;  %v789_v3 = vand.u32 2147483648, %v1720_v11 }
 0x100   : >> { %v797_v23 = vadd.f32 %v1805_v62, %v1848_v55  ;;  %v786_v12 = vsel %vm1966_vm2, %v1797_v34, %v782_v17  ;;  %vm798_vm4 = vweird.f32 %v1733_v35  ;;  %vm799_vm5 = vweird.f32 %v1805_v62 }
 0x101   : >> { %vm788_vm3 = vcmp.eq.f32.partialorder %v787_v44, 8.507059e+37  ;;  %v1981_v18 = vsel %vm1948_vm12, %v1746_v54, %v756_v59  ;;  %v790_v52 = vor.u32 1.1754944e-38, %v789_v3  ;;  %vm1983_vm6 = vmor %vm798_vm4, %vm799_vm5  ;;  %v802_v55 = vand.u32 2147483647, %v1733_v35 }
 0x102   : >> { %v804_v49 = vand.u32 2147483648, %v1733_v35  ;;  %v1989_v34 = vsel %vm773_vm1, %v775_v60, %v771_v25  ;;  %v812_v5 = vadd.f32 %v1813_v19, %v1859_v10  ;;  %vm813_vm8 = vweird.f32 %v1744_v6 }
 0x103   : >> { %vm814_vm9 = vweird.f32 %v1813_v19  ;;  %v1995_v54 = vsel %vm788_vm3, %v790_v52, %v786_v12  ;;  %v801_v51 = vsel %vm1983_vm6, %v1805_v62, %v797_v23  ;;  %vm2000_vm10 = vcmp.eq.f32.partialorder %v802_v55, 8.507059e+37 }
 0x104   : >> { %vm2004_vm11 = vmor %vm813_vm8, %vm814_vm9  ;;  %v817_v10 = vand.u32 2147483647, %v1744_v6  ;;  %v805_v33 = vor.u32 1.1754944e-38, %v804_v49  ;;  %v819_v47 = vand.u32 2147483648, %v1744_v6  ;;  %v827_v58 = vadd.f32 %v1818_v20, %v1862_v48 }
 0x105   : >> { %vm828_vm7 = vweird.f32 %v1761_v53  ;;  %v816_v62 = vsel %vm2004_vm11, %v1813_v19, %v812_v5  ;;  %vm829_vm13 = vweird.f32 %v1818_v20  ;;  %v832_v46 = vand.u32 2147483647, %v1761_v53 }
 0x106   : >> { %vm2016_vm12 = vcmp.eq.f32.partialorder %v817_v10, 8.507059e+37  ;;  %v820_v1 = vor.u32 1.1754944e-38, %v819_v47  ;;  %vm2022_vm14 = vmor %vm828_vm7, %vm829_vm13  ;;  %v834_v48 = vand.u32 2147483648, %v1761_v53  ;;  %v842_v59 = vadd.f32 %v1828_v16, %v1870_v40 }
 0x107   : >> { %vm843_vm15 = vweird.f32 %v1773_v57  ;;  %v831_v19 = vsel %vm2022_vm14, %v1818_v20, %v827_v58  ;;  %vm833_vm1 = vcmp.eq.f32.partialorder %v832_v46, 8.507059e+37  ;;  %vm844_vm2 = vweird.f32 %v1828_v16 }
 0x108   : >> { %v847_v8 = vand.u32 2147483647, %v1773_v57  ;;  %v2037_v22 = vsel %vm2000_vm10, %v805_v33, %v801_v51  ;;  %v835_v26 = vor.u32 1.1754944e-38, %v834_v48  ;;  %vm2039_vm3 = vmor %vm843_vm15, %vm844_vm2  ;;  %v849_v40 = vand.u32 2147483648, %v1773_v57 }
 0x109   : >> { %v854_v15 = vrot.slane %v1634_v13, 1  ;;  %v2047_v20 = vsel %vm2016_vm12, %v820_v1, %v816_v62  ;;  %v846_v17 = vsel %vm2039_vm3, %v1828_v16, %v842_v59  ;;  %v855_v25 = vrot.slane %v1634_v13, 2 }
 0x10a   : >> { %v856_v44 = vrot.slane %v1634_v13, 3  ;;  %v2054_v60 = vsel %vm833_vm1, %v835_v26, %v831_v19  ;;  %vm2056_vm4 = vcmp.eq.f32.partialorder %v847_v8, 8.507059e+37  ;;  %v857_v57 = vrot.slane %v1634_v13, 4 }
 0x10b   : >> { %v858_v3 = vrot.slane %v1634_v13, 5  ;;  %v859_v23 = vrot.slane %v1634_v13, 6  ;;  %v860_v12 = vrot.slane %v1634_v13, 7  ;;  %v869_v16 = vmul.f32 %v1739_v2, %v1634_v13 }
 0x10c   : >> { %v870_v52 = vmul.f32 %v854_v15, %v1751_v36  ;;  %v850_v11 = vor.u32 1.1754944e-38, %v849_v40  ;;  %v871_v55 = vmul.f32 %v855_v25, %v1766_v7  ;;  %v872_v49 = vmul.f32 %v856_v44, %v1802_v14 }
 0x10d   : >> { %v873_v5 = vmul.f32 %v857_v57, %v1843_v4  ;;  %v874_v51 = vmul.f32 %v858_v3, %v1877_v21  ;;  %v875_v63 = vmul.f32 %v859_v23, %v1933_v9  ;;  %v876_v35 = vmul.f32 %v860_v12, %v1940_v61 }
 0x10e   : >> { %v885_v10 = vrot.slane %v869_v16, 6  ;;  %v886_v33 = vrot.slane %v870_v52, 6  ;;  %v887_v47 = vrot.slane %v871_v55, 6  ;;  %v888_v58 = vrot.slane %v872_v49, 6 }
 0x10f   : >> { %v889_v13 = vrot.slane %v873_v5, 6  ;;  %v890_v2 = vrot.slane %v874_v51, 6  ;;  %v891_v36 = vrot.slane %v875_v63, 6  ;;  %v892_v62 = vrot.slane %v876_v35, 6 }
 0x110   : >> { %v901_v7 = vadd.f32 %v885_v10, %v1566_v37  ;;  %v2076_v14 = vsel %vm2056_vm4, %v850_v11, %v846_v17  ;;  %v902_v4 = vadd.f32 %v886_v33, %v1568_v38  ;;  %v903_v21 = vadd.f32 %v887_v47, %v1570_v39 }
 0x111   : >> { %v904_v9 = vadd.f32 %v888_v58, %v1572_v41  ;;  %v905_v61 = vadd.f32 %v889_v13, %v1574_v42  ;;  %v906_v56 = vadd.f32 %v890_v2, %v1576_v43  ;;  %v907_v46 = vadd.f32 %v891_v36, %v1578_v45 }
 0x112   : >> { %1335 = vtanh.f32 %v901_v7  ;;  %v908_v1 = vadd.f32 %v892_v62, %v1580_v50  ;;  %v917_v37 = vsub.f32 1.0, %v1942_v0  ;;  %v918_v6 = vsub.f32 1.0, %v1981_v18 }
 0x113   : >> { %1337 = vtanh.f32 %v902_v4  ;;  %v2237_v48 = vstv %s1593_s4  ;;  %v919_v39 = vsub.f32 1.0, %v1989_v34  ;;  %v920_v41 = vsub.f32 1.0, %v1995_v54 }
 0x114   : >> { %vm2089_vm5 = vcmp.eq.s32.totalorder %v2237_v48, 1  ;;  %1339 = vtanh.f32 %v903_v21  ;;  %v921_v42 = vsub.f32 1.0, %v2037_v22  ;;  %v922_v43 = vsub.f32 1.0, %v2047_v20 }
 0x115   : >> { %1341 = vtanh.f32 %v904_v9  ;;  %v923_v45 = vsub.f32 1.0, %v2054_v60  ;;  %v957_v50 = vrot.slane %v1544_v32, 7  ;;  %v958_v59 = vrot.slane %v1544_v32, 1 }
 0x116   : >> { %1343 = vtanh.f32 %v905_v61  ;;  %v959_v19 = vrot.slane %v1544_v32, 2  ;;  %v960_v8 = vrot.slane %v1544_v32, 3  ;;  %v961_v26 = vrot.slane %v1544_v32, 4 }
 0x117   : >> { %1345 = vtanh.f32 %v906_v56  ;;  %v962_v53 = vrot.slane %v1544_v32, 5  ;;  %v963_v40 = vrot.slane %v1544_v32, 6  ;;  %v924_v17 = vsub.f32 1.0, %v2076_v14 }
 0x118   : >> { %v1336_v15 = vpop.eup %1335  ;;  %1347 = vtanh.f32 %v907_v46  ;;  %v972_v25 = vmul.f32 %v957_v50, %v1942_v0  ;;  %v973_v44 = vmul.f32 %v1981_v18, %v1544_v32  ;;  %v974_v3 = vmul.f32 %v958_v59, %v1989_v34 }
 0x119   : >> { %v1338_v24 = vpop.eup %1337  ;;  %1349 = vtanh.f32 %v908_v1  ;;  %v933_v57 = vrot.slane %v1336_v15, 1  ;;  %v975_v23 = vmul.f32 %v959_v19, %v1995_v54  ;;  %v976_v52 = vmul.f32 %v960_v8, %v2037_v22 }
 0x11a   : >> { %v1340_v12 = vpop.eup %1339  ;;  %v934_v16 = vrot.slane %v1338_v24, 1  ;;  %v977_v11 = vmul.f32 %v961_v26, %v2047_v20  ;;  %v978_v0 = vmul.f32 %v962_v53, %v2054_v60  ;;  %v979_v5 = vmul.f32 %v963_v40, %v2076_v14 }
 0x11b   : >> { %v1342_v55 = vpop.eup %1341  ;;  %v935_v49 = vrot.slane %v1340_v12, 1  ;;  %v949_v18 = vmul.f32 %v933_v57, %v917_v37  ;;  %vm1009_vm6 = vcmask 1042434   ;;  %vm1012_vm8 = vcmask 1043459  }
 0x11c   : >> { %v1344_v34 = vpop.eup %1343  ;;  %v936_v54 = vrot.slane %v1342_v55, 1  ;;  %v950_v51 = vmul.f32 %v934_v16, %v918_v6  ;;  %vm1015_vm9 = vcmask 1044484   ;;  %vm1018_vm10 = vcmask 1045509  }
 0x11d   : >> { %v1346_v22 = vpop.eup %1345  ;;  %v937_v63 = vrot.slane %v1344_v34, 1  ;;  %v951_v20 = vmul.f32 %v935_v49, %v919_v39  ;;  %v980_v35 = vadd.f32 %v972_v25, %v949_v18  ;;  %vm1021_vm11 = vcmask 1046534  }
 0x11e   : >> { %v1348_v10 = vpop.eup %1347  ;;  %v938_v60 = vrot.slane %v1346_v22, 1  ;;  %v952_v33 = vmul.f32 %v936_v54, %v920_v41  ;;  %v981_v47 = vadd.f32 %v973_v44, %v950_v51  ;;  %vm1024_vm7 = vcmask 1047559  }
 0x11f   : >> { %v1350_v58 = vpop.eup %1349  ;;  %v939_v13 = vrot.slane %v1348_v10, 1  ;;  %v953_v2 = vmul.f32 %v937_v63, %v921_v42  ;;  %v982_v36 = vadd.f32 %v974_v3, %v951_v20  ;;  %v992_v62 = vsel %vm2089_vm5, %v980_v35, %v957_v50 }
 0x120   : >> { %v940_v7 = vrot.slane %v1350_v58, 1  ;;  %v954_v14 = vmul.f32 %v938_v60, %v922_v43  ;;  %v983_v4 = vadd.f32 %v975_v23, %v952_v33  ;;  %v993_v21 = vsel %vm2089_vm5, %v981_v47, %v1544_v32 }
 0x121   : >> { %v955_v9 = vmul.f32 %v939_v13, %v923_v45  ;;  %v984_v61 = vadd.f32 %v976_v52, %v953_v2  ;;  %v994_v56 = vsel %vm2089_vm5, %v982_v36, %v958_v59  ;;  %v1008_v46 = vrot.slane %v993_v21, 7 }
 0x122   : >> { %v956_v1 = vmul.f32 %v940_v7, %v924_v17  ;;  %v985_v37 = vadd.f32 %v977_v11, %v954_v14  ;;  %v995_v6 = vsel %vm2089_vm5, %v983_v4, %v959_v19  ;;  %v1011_v48 = vrot.slane %v994_v56, 6 }
 0x123   : >> { %v986_v39 = vadd.f32 %v978_v0, %v955_v9  ;;  %v996_v41 = vsel %vm2089_vm5, %v984_v61, %v960_v8  ;;  %v1010_v42 = vsel %vm1009_vm6, %v1008_v46, %v992_v62  ;;  %v1014_v43 = vrot.slane %v995_v6, 5 }
 0x124   : >> { %v987_v45 = vadd.f32 %v979_v5, %v956_v1  ;;  %v997_v50 = vsel %vm2089_vm5, %v985_v37, %v961_v26  ;;  %v1013_v59 = vsel %vm1012_vm8, %v1011_v48, %v1010_v42  ;;  %v1017_v15 = vrot.slane %v996_v41, 4 }
 0x125   : >> { %v998_v19 = vsel %vm2089_vm5, %v986_v39, %v962_v53  ;;  %v1016_v17 = vsel %vm1015_vm9, %v1014_v43, %v1013_v59  ;;  %v1020_v25 = vrot.slane %v997_v50, 3  ;;  %vm1029_vm12 = vcmask 261121  }
 0x126   : >> { %v999_v8 = vsel %vm2089_vm5, %v987_v45, %v963_v40  ;;  %v1019_v26 = vsel %vm1018_vm10, %v1017_v15, %v1016_v17  ;;  %v1023_v44 = vrot.slane %v998_v19, 2  ;;  %vm1031_vm13 = vcmask 253952  }
 0x127   : >> { %v1022_v24 = vsel %vm1021_vm11, %v1020_v25, %v1019_v26  ;;  %v1026_v57 = vrot.slane %v999_v8, 1 }
 0x128   : >> { %v1025_v3 = vsel %vm1024_vm7, %v1023_v44, %v1022_v24 }
 0x129   : >> { %1030 = vst.msk [vmem:[#allocation2 - $0x1] sm:$0xfe] %vm1029_vm12, %v1025_v3 }
 0x12a   : >> { %1032 = vst.msk [vmem:[#allocation2 + $0x7] sm:$0x1] %vm1031_vm13, %v1026_v57 }
 0x12b   : >> { %1035 = vst.msk [vmem:[%s1034_s6 - $0x1] sm:$0xfe] %vm1029_vm12, %v1025_v3 }
 0x12c   : >> { %1036 = vst.msk [vmem:[%s1034_s6 + $0x7] sm:$0x1] %vm1031_vm13, %v1026_v57 }
 0x12d   : > { %409 = sbr.rel (!%p407_p11) target bundleno = 57 (0x39), region = 131 }
 0x132 PF: > { %s13_s16 = sadd.s32 1, %s1393_s16   ;;  %s2240_s12 = smov %s1381_s13 }
 0x133   : > { %p10_p12 = scmp.ge.s32.totalorder %s13_s16, 4   ;;  %s2241_s13 = smov %s1455_s20 }
 0x134   : > { %s2242_s14 = smov %s1389_s15  ;;  %s2243_s15 = smov %s2245_s17 }
 0x135   :  { %12 = sbr.rel (!%p10_p12) target bundleno = 3 (0x3), region = 142 }

</bundles_post_ra>
